<compile_context>
chip_gen: v7x
topology: tpu7x:2x2x1
jax: 0.10.0
libtpu: 0.0.40
codegen_flags: <defaults>
</compile_context>

<pallas_src>
from functools import partial

import jax
import jax.numpy as jnp
from jax.experimental import pallas as pl
from jax.experimental.pallas import tpu as pltpu


def classifier_kernel(x_ref, w1m_ref, w1a_ref, b1_ref, w2_ref, b2_ref,
                      w3_ref, b3_ref, out_ref, max_sc, sum_sc, *, inv_n):
    step = pl.program_id(0)
    n_steps = pl.num_programs(0)

    # ---- init running pooling accumulators ----
    @pl.when(step == 0)
    def _():
        max_sc[...] = jnp.full(max_sc.shape, -jnp.inf, max_sc.dtype)
        sum_sc[...] = jnp.zeros(sum_sc.shape, sum_sc.dtype)

    # ---- pooling hot path: fold this (B, C, TN) tile into (B, C, LW) ----
    lw = max_sc.shape[-1]                 # 128 (or TN for awkward N)
    nk = x_ref.shape[-1] // lw            # static chunk count
    for k in range(nk):                   # static, lane-aligned slices
        chunk = x_ref[:, :, k * lw:(k + 1) * lw]          # (B, C, LW) f32
        max_sc[...] = jnp.maximum(max_sc[...], chunk)
        sum_sc[...] = sum_sc[...] + chunk

    # ---- MLP head, once all point tiles have been folded in ----
    @pl.when(step == n_steps - 1)
    def _():
        x_max = jnp.max(max_sc[...], axis=-1)             # (B, 512) lane reduce
        x_avg = jnp.sum(sum_sc[...], axis=-1) * inv_n     # mean pool, f32

        # linear1 (bias-free, BN6 folded, concat replaced by two dots)
        h = (jnp.dot(x_max.astype(jnp.bfloat16), w1m_ref[...],
                     preferred_element_type=jnp.float32)
             + jnp.dot(x_avg.astype(jnp.bfloat16), w1a_ref[...],
                       preferred_element_type=jnp.float32)
             + b1_ref[...])                               # (B, 512) f32
        h = jnp.where(h > 0, h, 0.2 * h)                  # leaky_relu(0.2)
        # dp1: identity (eval)

        # linear2 (BN7 folded into weights/bias)
        h = jnp.dot(h.astype(jnp.bfloat16), w2_ref[...],
                    preferred_element_type=jnp.float32) + b2_ref[...]  # (B, 256)
        h = jnp.where(h > 0, h, 0.2 * h)
        # dp2: identity (eval)

        # linear3, output zero-padded to 128 lanes (unmasked stores)
        out_ref[...] = jnp.dot(h.astype(jnp.bfloat16), w3_ref[...],
                               preferred_element_type=jnp.float32) + b3_ref[...]


def _pick_tn(B, C, N, max_block_bytes=4 << 20):
    """Largest lane-tile (multiple of 128) that divides N while keeping one x
    block within `max_block_bytes` (double-buffered tiles + accumulators must
    fit VMEM on v5e/v6e/v7x)."""
    bytes_per_lane = B * C * 4
    tn = (max(max_block_bytes // bytes_per_lane, 128) // 128) * 128
    while tn >= 128:
        if N % tn == 0:
            return tn
        tn -= 128
    # TODO(synk): very large N with no multiple-of-128 divisor falls back to a
    #             single full-axis block; pad N to a multiple of 128 upstream.
    return N


def dgcnn_cls_classifier(x, params):
    B, C, N = x.shape
    assert C == 512, "module requires 512 input channels (linear1 in=1024)"
    w1m, w1a, b1, w2, b2, w3, b3 = params

    TN = _pick_tn(B, C, N)                 # point tile on the lane axis
    LW = 128 if TN % 128 == 0 else TN      # accumulator lane width
    grid = (N // TN,)

    in_specs = [
        pl.BlockSpec((B, C, TN), lambda i: (0, 0, i)),   # x tile (streamed)
        pl.BlockSpec((C, 512), lambda i: (0, 0)),        # w1_max (resident)
        pl.BlockSpec((C, 512), lambda i: (0, 0)),        # w1_avg
        pl.BlockSpec((1, 512), lambda i: (0, 0)),        # b1 (folded bn6 shift)
        pl.BlockSpec((512, 256), lambda i: (0, 0)),      # w2 (bn7 folded)
        pl.BlockSpec((1, 256), lambda i: (0, 0)),        # b2 (bn7 folded)
        pl.BlockSpec((256, 128), lambda i: (0, 0)),      # w3 (padded to 128)
        pl.BlockSpec((1, 128), lambda i: (0, 0)),        # b3 (padded to 128)
    ]

    # VMEM budget estimate -> raise the scoped limit only when actually needed.
    weight_bytes = (2 * C * 512 + 512 * 256 + 256 * 128) * 2     # bf16
    bias_bytes = (512 + 256 + 128) * 4
    est = (2 * B * C * TN * 4              # double-buffered x tiles
           + 2 * B * C * LW * 4            # max / sum accumulators
           + 2 * (weight_bytes + bias_bytes)
           + 2 * B * 128 * 4)              # output block
    vmem_limit = int(min(max(est + (4 << 20), 32 << 20), 56 << 20))

    out_padded = pl.pallas_call(
        partial(classifier_kernel, inv_n=1.0 / N),
        out_shape=jax.ShapeDtypeStruct((B, 128), jnp.float32),
        grid=grid,
        in_specs=in_specs,
        out_specs=pl.BlockSpec((B, 128), lambda i: (0, 0)),
        scratch_shapes=[
            pltpu.VMEM((B, C, LW), jnp.float32),         # running max
            pltpu.VMEM((B, C, LW), jnp.float32),         # running sum (f32)
        ],
        compiler_params=pltpu.CompilerParams(
            dimension_semantics=("arbitrary",),
            vmem_limit_bytes=vmem_limit),
    )(x, w1m, w1a, b1, w2, b2, w3, b3)

    return out_padded[:, :10]


def make_params(key):
    """Synthetic parameters matching the module, with eval-mode BatchNorm
    folded into the weights and bf16 weight storage."""
    ks = jax.random.split(key, 8)
    eps = 1e-5
    C = 512

    # linear1: Linear(1024, 512, bias=False); stored (in, out). BN6 folded.
    w1 = jax.random.normal(ks[0], (2 * C, C), jnp.float32) * 0.02
    g6 = 1.0 + 0.1 * jax.random.normal(ks[1], (C,), jnp.float32)
    b6 = 0.1 * jax.random.normal(ks[2], (C,), jnp.float32)
    # TODO(synk): folding assumes fresh running stats (mean=0, var=1); with
    #             trained stats use s = g/sqrt(var+eps), t = b - mean*s.
    s6 = g6 / jnp.sqrt(1.0 + eps)
    t6 = b6
    w1_folded = w1 * s6[None, :]
    w1m = w1_folded[:C, :].astype(jnp.bfloat16)              # max-pool half
    w1a = w1_folded[C:, :].astype(jnp.bfloat16)              # avg-pool half
    b1 = t6.reshape(1, C).astype(jnp.float32)

    # linear2: Linear(512, 256) with BN7 folded.
    w2 = jax.random.normal(ks[3], (C, 256), jnp.float32) * 0.02
    b2 = 0.1 * jax.random.normal(ks[4], (256,), jnp.float32)
    g7 = 1.0 + 0.1 * jax.random.normal(ks[5], (256,), jnp.float32)
    b7 = 0.1 * jax.random.normal(ks[6], (256,), jnp.float32)
    s7 = g7 / jnp.sqrt(1.0 + eps)
    t7 = b7
    w2f = (w2 * s7[None, :]).astype(jnp.bfloat16)
    b2f = (b2 * s7 + t7).reshape(1, 256).astype(jnp.float32)

    # linear3: Linear(256, 10), zero-padded to 128 output lanes.
    w3 = jax.random.normal(ks[7], (256, 10), jnp.float32) * 0.02
    b3 = jnp.zeros((10,), jnp.float32)
    w3p = jnp.zeros((256, 128), jnp.float32).at[:, :10].set(w3).astype(jnp.bfloat16)
    b3p = jnp.zeros((1, 128), jnp.float32).at[:, :10].set(b3)

    return (w1m, w1a, b1, w2f, b2f, w3p, b3p)


def reference(x, params, n_points):
    """Pure-JAX reference mirroring the kernel's numerics (native NCW layout)."""
    w1m, w1a, b1, w2, b2, w3, b3 = params
    x_max = jnp.max(x, axis=-1)                              # adaptive_max_pool1d
    x_avg = jnp.sum(x, axis=-1) * (1.0 / n_points)           # adaptive_avg_pool1d
    h = (jnp.dot(x_max.astype(jnp.bfloat16), w1m, preferred_element_type=jnp.float32)
         + jnp.dot(x_avg.astype(jnp.bfloat16), w1a, preferred_element_type=jnp.float32)
         + b1)
    h = jnp.where(h > 0, h, 0.2 * h)
    h = jnp.dot(h.astype(jnp.bfloat16), w2, preferred_element_type=jnp.float32) + b2
    h = jnp.where(h > 0, h, 0.2 * h)
    out = jnp.dot(h.astype(jnp.bfloat16), w3, preferred_element_type=jnp.float32) + b3
    return out[:, :10]


if __name__ == "__main__":
    key = jax.random.PRNGKey(0)
    k_x, k_p = jax.random.split(key)

    B, C, N = 2, 512, 1152        # channels fixed by the module; N -> 3 lane tiles
    x = jax.random.normal(k_x, (B, C, N), jnp.float32)
    params = make_params(k_p)

    out = jax.block_until_ready(dgcnn_cls_classifier(x, params))
    assert out.shape == (B, 10)

    ref = jax.block_until_ready(reference(x, params, N))
    assert jnp.allclose(out, ref, rtol=1e-2, atol=1e-2), (out, ref)

    print("KERNEL_OK")
</pallas_src>

<mosaic_0001>
module attributes {stable_mosaic.version = 11 : i64} {
  func.func @classifier_kernel(%arg0: i32, %arg1: memref<2x512x384xf32, #tpu.memory_space<vmem>>, %arg2: memref<512x512xbf16, #tpu.memory_space<vmem>>, %arg3: memref<512x512xbf16, #tpu.memory_space<vmem>>, %arg4: memref<1x512xf32, #tpu.memory_space<vmem>>, %arg5: memref<512x256xbf16, #tpu.memory_space<vmem>>, %arg6: memref<1x256xf32, #tpu.memory_space<vmem>>, %arg7: memref<256x128xbf16, #tpu.memory_space<vmem>>, %arg8: memref<1x128xf32, #tpu.memory_space<vmem>>, %arg9: memref<2x128xf32, #tpu.memory_space<vmem>>, %arg10: memref<2x512x128xf32, #tpu.memory_space<vmem>>, %arg11: memref<2x512x128xf32, #tpu.memory_space<vmem>>) attributes {dimension_semantics = [#tpu.dimension_semantics<arbitrary>], iteration_bounds = array<i64: 3>, scalar_prefetch = 0 : i64, scratch_operands = 2 : i64, tpu.core_type = #tpu.core_type<tc>, window_params = [{transform_indices = @transform_0, window_bounds = array<i64: 2, 512, 384>}, {pipeline_mode = #tpu.pipeline_mode<synchronous>, transform_indices = @transform_1, window_bounds = array<i64: 512, 512>}, {pipeline_mode = #tpu.pipeline_mode<synchronous>, transform_indices = @transform_2, window_bounds = array<i64: 512, 512>}, {pipeline_mode = #tpu.pipeline_mode<synchronous>, transform_indices = @transform_3, window_bounds = array<i64: 1, 512>}, {pipeline_mode = #tpu.pipeline_mode<synchronous>, transform_indices = @transform_4, window_bounds = array<i64: 512, 256>}, {pipeline_mode = #tpu.pipeline_mode<synchronous>, transform_indices = @transform_5, window_bounds = array<i64: 1, 256>}, {pipeline_mode = #tpu.pipeline_mode<synchronous>, transform_indices = @transform_6, window_bounds = array<i64: 256, 128>}, {pipeline_mode = #tpu.pipeline_mode<synchronous>, transform_indices = @transform_7, window_bounds = array<i64: 1, 128>}, {pipeline_mode = #tpu.pipeline_mode<synchronous>, transform_indices = @transform_8, window_bounds = array<i64: 2, 128>}]} {
    %c0_i32 = arith.constant 0 : i32
    %0 = arith.cmpi eq, %arg0, %c0_i32 : i32
    %1 = arith.extui %0 : i1 to i32
    %c0_i32_0 = arith.constant 0 : i32
    %2 = arith.cmpi ne, %1, %c0_i32_0 : i32
    scf.if %2 {
      %cst = arith.constant 0xFF800000 : f32
      %27 = vector.broadcast %cst : f32 to vector<2x512x128xf32>
      %c0_44 = arith.constant 0 : index
      %c0_45 = arith.constant 0 : index
      %c0_46 = arith.constant 0 : index
      %28 = vector.load %arg10[%c0_44, %c0_45, %c0_46] : memref<2x512x128xf32, #tpu.memory_space<vmem>>, vector<2x512x128xf32>
      tpu.vector_store %arg10[%c0_44, %c0_45, %c0_46], %27 {strides = array<i32>} : memref<2x512x128xf32, #tpu.memory_space<vmem>>, vector<2x512x128xf32>,
      %cst_47 = arith.constant 0.000000e+00 : f32
      %29 = vector.broadcast %cst_47 : f32 to vector<2x512x128xf32>
      %c0_48 = arith.constant 0 : index
      %c0_49 = arith.constant 0 : index
      %c0_50 = arith.constant 0 : index
      %30 = vector.load %arg11[%c0_48, %c0_49, %c0_50] : memref<2x512x128xf32, #tpu.memory_space<vmem>>, vector<2x512x128xf32>
      tpu.vector_store %arg11[%c0_48, %c0_49, %c0_50], %29 {strides = array<i32>} : memref<2x512x128xf32, #tpu.memory_space<vmem>>, vector<2x512x128xf32>,
    } else {
    }
    %c0 = arith.constant 0 : index
    %c0_1 = arith.constant 0 : index
    %c0_2 = arith.constant 0 : index
    %3 = vector.load %arg1[%c0, %c0_1, %c0_2] : memref<2x512x384xf32, #tpu.memory_space<vmem>>, vector<2x512x128xf32>
    %c0_3 = arith.constant 0 : index
    %c0_4 = arith.constant 0 : index
    %c0_5 = arith.constant 0 : index
    %4 = vector.load %arg10[%c0_3, %c0_4, %c0_5] : memref<2x512x128xf32, #tpu.memory_space<vmem>>, vector<2x512x128xf32>
    %5 = arith.maximumf %4, %3 : vector<2x512x128xf32>
    %c0_6 = arith.constant 0 : index
    %c0_7 = arith.constant 0 : index
    %c0_8 = arith.constant 0 : index
    %6 = vector.load %arg10[%c0_6, %c0_7, %c0_8] : memref<2x512x128xf32, #tpu.memory_space<vmem>>, vector<2x512x128xf32>
    tpu.vector_store %arg10[%c0_6, %c0_7, %c0_8], %5 {strides = array<i32>} : memref<2x512x128xf32, #tpu.memory_space<vmem>>, vector<2x512x128xf32>,
    %c0_9 = arith.constant 0 : index
    %c0_10 = arith.constant 0 : index
    %c0_11 = arith.constant 0 : index
    %7 = vector.load %arg11[%c0_9, %c0_10, %c0_11] : memref<2x512x128xf32, #tpu.memory_space<vmem>>, vector<2x512x128xf32>
    %8 = arith.addf %7, %3 : vector<2x512x128xf32>
    %c0_12 = arith.constant 0 : index
    %c0_13 = arith.constant 0 : index
    %c0_14 = arith.constant 0 : index
    %9 = vector.load %arg11[%c0_12, %c0_13, %c0_14] : memref<2x512x128xf32, #tpu.memory_space<vmem>>, vector<2x512x128xf32>
    tpu.vector_store %arg11[%c0_12, %c0_13, %c0_14], %8 {strides = array<i32>} : memref<2x512x128xf32, #tpu.memory_space<vmem>>, vector<2x512x128xf32>,
    %c0_15 = arith.constant 0 : index
    %c0_16 = arith.constant 0 : index
    %c128 = arith.constant 128 : index
    %10 = vector.load %arg1[%c0_15, %c0_16, %c128] : memref<2x512x384xf32, #tpu.memory_space<vmem>>, vector<2x512x128xf32>
    %c0_17 = arith.constant 0 : index
    %c0_18 = arith.constant 0 : index
    %c0_19 = arith.constant 0 : index
    %11 = vector.load %arg10[%c0_17, %c0_18, %c0_19] : memref<2x512x128xf32, #tpu.memory_space<vmem>>, vector<2x512x128xf32>
    %12 = arith.maximumf %11, %10 : vector<2x512x128xf32>
    %c0_20 = arith.constant 0 : index
    %c0_21 = arith.constant 0 : index
    %c0_22 = arith.constant 0 : index
    %13 = vector.load %arg10[%c0_20, %c0_21, %c0_22] : memref<2x512x128xf32, #tpu.memory_space<vmem>>, vector<2x512x128xf32>
    tpu.vector_store %arg10[%c0_20, %c0_21, %c0_22], %12 {strides = array<i32>} : memref<2x512x128xf32, #tpu.memory_space<vmem>>, vector<2x512x128xf32>,
    %c0_23 = arith.constant 0 : index
    %c0_24 = arith.constant 0 : index
    %c0_25 = arith.constant 0 : index
    %14 = vector.load %arg11[%c0_23, %c0_24, %c0_25] : memref<2x512x128xf32, #tpu.memory_space<vmem>>, vector<2x512x128xf32>
    %15 = arith.addf %14, %10 : vector<2x512x128xf32>
    %c0_26 = arith.constant 0 : index
    %c0_27 = arith.constant 0 : index
    %c0_28 = arith.constant 0 : index
    %16 = vector.load %arg11[%c0_26, %c0_27, %c0_28] : memref<2x512x128xf32, #tpu.memory_space<vmem>>, vector<2x512x128xf32>
    tpu.vector_store %arg11[%c0_26, %c0_27, %c0_28], %15 {strides = array<i32>} : memref<2x512x128xf32, #tpu.memory_space<vmem>>, vector<2x512x128xf32>,
    %c0_29 = arith.constant 0 : index
    %c0_30 = arith.constant 0 : index
    %c256 = arith.constant 256 : index
    %17 = vector.load %arg1[%c0_29, %c0_30, %c256] : memref<2x512x384xf32, #tpu.memory_space<vmem>>, vector<2x512x128xf32>
    %c0_31 = arith.constant 0 : index
    %c0_32 = arith.constant 0 : index
    %c0_33 = arith.constant 0 : index
    %18 = vector.load %arg10[%c0_31, %c0_32, %c0_33] : memref<2x512x128xf32, #tpu.memory_space<vmem>>, vector<2x512x128xf32>
    %19 = arith.maximumf %18, %17 : vector<2x512x128xf32>
    %c0_34 = arith.constant 0 : index
    %c0_35 = arith.constant 0 : index
    %c0_36 = arith.constant 0 : index
    %20 = vector.load %arg10[%c0_34, %c0_35, %c0_36] : memref<2x512x128xf32, #tpu.memory_space<vmem>>, vector<2x512x128xf32>
    tpu.vector_store %arg10[%c0_34, %c0_35, %c0_36], %19 {strides = array<i32>} : memref<2x512x128xf32, #tpu.memory_space<vmem>>, vector<2x512x128xf32>,
    %c0_37 = arith.constant 0 : index
    %c0_38 = arith.constant 0 : index
    %c0_39 = arith.constant 0 : index
    %21 = vector.load %arg11[%c0_37, %c0_38, %c0_39] : memref<2x512x128xf32, #tpu.memory_space<vmem>>, vector<2x512x128xf32>
    %22 = arith.addf %21, %17 : vector<2x512x128xf32>
    %c0_40 = arith.constant 0 : index
    %c0_41 = arith.constant 0 : index
    %c0_42 = arith.constant 0 : index
    %23 = vector.load %arg11[%c0_40, %c0_41, %c0_42] : memref<2x512x128xf32, #tpu.memory_space<vmem>>, vector<2x512x128xf32>
    tpu.vector_store %arg11[%c0_40, %c0_41, %c0_42], %22 {strides = array<i32>} : memref<2x512x128xf32, #tpu.memory_space<vmem>>, vector<2x512x128xf32>,
    %c2_i32 = arith.constant 2 : i32
    %24 = arith.cmpi eq, %arg0, %c2_i32 : i32
    %25 = arith.extui %24 : i1 to i32
    %c0_i32_43 = arith.constant 0 : i32
    %26 = arith.cmpi ne, %25, %c0_i32_43 : i32
    scf.if %26 {
      %c0_44 = arith.constant 0 : index
      %c0_45 = arith.constant 0 : index
      %c0_46 = arith.constant 0 : index
      %27 = vector.load %arg10[%c0_44, %c0_45, %c0_46] : memref<2x512x128xf32, #tpu.memory_space<vmem>>, vector<2x512x128xf32>
      %cst = arith.constant dense<0xFF800000> : vector<2x512xf32>
      %28 = vector.multi_reduction <maximumf>, %27, %cst [2] : vector<2x512x128xf32> to vector<2x512xf32>
      %c0_47 = arith.constant 0 : index
      %c0_48 = arith.constant 0 : index
      %c0_49 = arith.constant 0 : index
      %29 = vector.load %arg11[%c0_47, %c0_48, %c0_49] : memref<2x512x128xf32, #tpu.memory_space<vmem>>, vector<2x512x128xf32>
      %cst_50 = arith.constant dense<0.000000e+00> : vector<2x512xf32>
      %30 = vector.multi_reduction <add>, %29, %cst_50 [2] : vector<2x512x128xf32> to vector<2x512xf32>
      %cst_51 = arith.constant 8.68055562E-4 : f32
      %31 = vector.broadcast %cst_51 : f32 to vector<2x512xf32>
      %32 = arith.mulf %30, %31 : vector<2x512xf32>
      %33 = arith.truncf %28 : vector<2x512xf32> to vector<2x512xbf16>
      %c0_52 = arith.constant 0 : index
      %c0_53 = arith.constant 0 : index
      %34 = vector.load %arg2[%c0_52, %c0_53] : memref<512x512xbf16, #tpu.memory_space<vmem>>, vector<512x512xbf16>
      %cst_54 = arith.constant dense<0.000000e+00> : vector<2x512xf32>
      %35 = tpu.matmul %33, %34, %cst_54 {dimension_numbers = #tpu.dot_dimension_numbers<[1], [0], [0], [1], [0, 0, 1, 1], [], []>} : vector<2x512xbf16>, vector<512x512xbf16>, vector<2x512xf32> -> vector<2x512xf32>
      %36 = arith.truncf %32 : vector<2x512xf32> to vector<2x512xbf16>
      %c0_55 = arith.constant 0 : index
      %c0_56 = arith.constant 0 : index
      %37 = vector.load %arg3[%c0_55, %c0_56] : memref<512x512xbf16, #tpu.memory_space<vmem>>, vector<512x512xbf16>
      %cst_57 = arith.constant dense<0.000000e+00> : vector<2x512xf32>
      %38 = tpu.matmul %36, %37, %cst_57 {dimension_numbers = #tpu.dot_dimension_numbers<[1], [0], [0], [1], [0, 0, 1, 1], [], []>} : vector<2x512xbf16>, vector<512x512xbf16>, vector<2x512xf32> -> vector<2x512xf32>
      %39 = arith.addf %35, %38 : vector<2x512xf32>
      %c0_58 = arith.constant 0 : index
      %c0_59 = arith.constant 0 : index
      %40 = vector.load %arg4[%c0_58, %c0_59] : memref<1x512xf32, #tpu.memory_space<vmem>>, vector<1x512xf32>
      %41 = vector.broadcast %40 : vector<1x512xf32> to vector<2x512xf32>
      %42 = arith.addf %39, %41 : vector<2x512xf32>
      %cst_60 = arith.constant 0.000000e+00 : f32
      %43 = vector.broadcast %cst_60 : f32 to vector<2x512xf32>
      %44 = arith.cmpf ogt, %42, %43 : vector<2x512xf32>
      %cst_61 = arith.constant 2.000000e-01 : f32
      %45 = vector.broadcast %cst_61 : f32 to vector<2x512xf32>
      %46 = arith.mulf %45, %42 : vector<2x512xf32>
      %47 = arith.select %44, %42, %46 : vector<2x512xi1>, vector<2x512xf32>
      %48 = arith.truncf %47 : vector<2x512xf32> to vector<2x512xbf16>
      %c0_62 = arith.constant 0 : index
      %c0_63 = arith.constant 0 : index
      %49 = vector.load %arg5[%c0_62, %c0_63] : memref<512x256xbf16, #tpu.memory_space<vmem>>, vector<512x256xbf16>
      %cst_64 = arith.constant dense<0.000000e+00> : vector<2x256xf32>
      %50 = tpu.matmul %48, %49, %cst_64 {dimension_numbers = #tpu.dot_dimension_numbers<[1], [0], [0], [1], [0, 0, 1, 1], [], []>} : vector<2x512xbf16>, vector<512x256xbf16>, vector<2x256xf32> -> vector<2x256xf32>
      %c0_65 = arith.constant 0 : index
      %c0_66 = arith.constant 0 : index
      %51 = vector.load %arg6[%c0_65, %c0_66] : memref<1x256xf32, #tpu.memory_space<vmem>>, vector<1x256xf32>
      %52 = vector.broadcast %51 : vector<1x256xf32> to vector<2x256xf32>
      %53 = arith.addf %50, %52 : vector<2x256xf32>
      %cst_67 = arith.constant 0.000000e+00 : f32
      %54 = vector.broadcast %cst_67 : f32 to vector<2x256xf32>
      %55 = arith.cmpf ogt, %53, %54 : vector<2x256xf32>
      %cst_68 = arith.constant 2.000000e-01 : f32
      %56 = vector.broadcast %cst_68 : f32 to vector<2x256xf32>
      %57 = arith.mulf %56, %53 : vector<2x256xf32>
      %58 = arith.select %55, %53, %57 : vector<2x256xi1>, vector<2x256xf32>
      %59 = arith.truncf %58 : vector<2x256xf32> to vector<2x256xbf16>
      %c0_69 = arith.constant 0 : index
      %c0_70 = arith.constant 0 : index
      %60 = vector.load %arg7[%c0_69, %c0_70] : memref<256x128xbf16, #tpu.memory_space<vmem>>, vector<256x128xbf16>
      %cst_71 = arith.constant dense<0.000000e+00> : vector<2x128xf32>
      %61 = tpu.matmul %59, %60, %cst_71 {dimension_numbers = #tpu.dot_dimension_numbers<[1], [0], [0], [1], [0, 0, 1, 1], [], []>} : vector<2x256xbf16>, vector<256x128xbf16>, vector<2x128xf32> -> vector<2x128xf32>
      %c0_72 = arith.constant 0 : index
      %c0_73 = arith.constant 0 : index
      %62 = vector.load %arg8[%c0_72, %c0_73] : memref<1x128xf32, #tpu.memory_space<vmem>>, vector<1x128xf32>
      %63 = vector.broadcast %62 : vector<1x128xf32> to vector<2x128xf32>
      %64 = arith.addf %61, %63 : vector<2x128xf32>
      %c0_74 = arith.constant 0 : index
      %c0_75 = arith.constant 0 : index
      %65 = vector.load %arg9[%c0_74, %c0_75] : memref<2x128xf32, #tpu.memory_space<vmem>>, vector<2x128xf32>
      tpu.vector_store %arg9[%c0_74, %c0_75], %64 {strides = array<i32>} : memref<2x128xf32, #tpu.memory_space<vmem>>, vector<2x128xf32>,
    } else {
    }
    return
  }
  func.func @transform_0(%arg0: i32) -> (i32, i32, i32) {
    %c0_i32 = arith.constant 0 : i32
    %c0_i32_0 = arith.constant 0 : i32
    %c0_i32_1 = arith.constant 0 : i32
    return %c0_i32, %c0_i32_0, %arg0 : i32, i32, i32
  }
  func.func @transform_1(%arg0: i32) -> (i32, i32) {
    %c0_i32 = arith.constant 0 : i32
    %c0_i32_0 = arith.constant 0 : i32
    %c0_i32_1 = arith.constant 0 : i32
    return %c0_i32, %c0_i32_0 : i32, i32
  }
  func.func @transform_2(%arg0: i32) -> (i32, i32) {
    %c0_i32 = arith.constant 0 : i32
    %c0_i32_0 = arith.constant 0 : i32
    %c0_i32_1 = arith.constant 0 : i32
    return %c0_i32, %c0_i32_0 : i32, i32
  }
  func.func @transform_3(%arg0: i32) -> (i32, i32) {
    %c0_i32 = arith.constant 0 : i32
    %c0_i32_0 = arith.constant 0 : i32
    %c0_i32_1 = arith.constant 0 : i32
    return %c0_i32, %c0_i32_0 : i32, i32
  }
  func.func @transform_4(%arg0: i32) -> (i32, i32) {
    %c0_i32 = arith.constant 0 : i32
    %c0_i32_0 = arith.constant 0 : i32
    %c0_i32_1 = arith.constant 0 : i32
    return %c0_i32, %c0_i32_0 : i32, i32
  }
  func.func @transform_5(%arg0: i32) -> (i32, i32) {
    %c0_i32 = arith.constant 0 : i32
    %c0_i32_0 = arith.constant 0 : i32
    %c0_i32_1 = arith.constant 0 : i32
    return %c0_i32, %c0_i32_0 : i32, i32
  }
  func.func @transform_6(%arg0: i32) -> (i32, i32) {
    %c0_i32 = arith.constant 0 : i32
    %c0_i32_0 = arith.constant 0 : i32
    %c0_i32_1 = arith.constant 0 : i32
    return %c0_i32, %c0_i32_0 : i32, i32
  }
  func.func @transform_7(%arg0: i32) -> (i32, i32) {
    %c0_i32 = arith.constant 0 : i32
    %c0_i32_0 = arith.constant 0 : i32
    %c0_i32_1 = arith.constant 0 : i32
    return %c0_i32, %c0_i32_0 : i32, i32
  }
  func.func @transform_8(%arg0: i32) -> (i32, i32) {
    %c0_i32 = arith.constant 0 : i32
    %c0_i32_0 = arith.constant 0 : i32
    %c0_i32_1 = arith.constant 0 : i32
    return %c0_i32, %c0_i32_0 : i32, i32
  }
}

</mosaic_0001>

<bundles_post_ra>
// kernel: tpu_custom_call.1
= control target key start
LH: loop header
LB: loop body
LE: loop exit
PB: predicated region body
PF: predicated region fallthrough
CT: control target
= control target key end

     0   :  { %13 = vsyncpa [#allocation5], 0  ;;  %s13593_s0 = inlined_call_operand.hbm [shape: f32[2,512,1152], index: 0, kind: input, shape index: {}]   ;;  %s13594_s1 = inlined_call_operand.hbm [shape: bf16[512,512], index: 1, kind: input, shape index: {}]   ;;  %s13595_s2 = inlined_call_operand.hbm [shape: bf16[512,512], index: 2, kind: input, shape index: {}]   ;;  %s13596_s3 = inlined_call_operand.hbm [shape: f32[1,512], index: 3, kind: input, shape index: {}]   ;;  %s13597_s4 = inlined_call_operand.hbm [shape: bf16[512,256], index: 4, kind: input, shape index: {}]   ;;  %s13598_s5 = inlined_call_operand.hbm [shape: f32[1,256], index: 5, kind: input, shape index: {}]   ;;  %s13599_s6 = inlined_call_operand.hbm [shape: bf16[256,128], index: 6, kind: input, shape index: {}]   ;;  %s13600_s7 = inlined_call_operand.hbm [shape: f32[1,128], index: 7, kind: input, shape index: {}]   ;;  %s13601_s8 = inlined_call_operand.hbm [shape: f32[2,128], index: 8, kind: output, shape index: {}]  }
   0x1   :  { %15 = vsyncpa [#allocation5 + $0x1], 0 }
   0x2   :  { %16 = vsyncpa [#allocation8], 0 }
   0x3   :  { %17 = vsyncpa [#allocation11], 0 }
   0x4   :  { %18 = vsyncpa [#allocation14], 0 }
   0x5   :  { %19 = vsyncpa [#allocation17], 0 }
   0x6   :  { %20 = vsyncpa [#allocation6], 0  ;;  %s10184_s27 = smov 0   ;;  %s10186_s28 = smov 0  }
   0x7   :  { %s10188_s29 = smov 0   ;;  %s10190_s30 = smov 0  }
   0x8 LB: > { %s10119_s9 = smov [#allocation7]   ;;  %s10205_s11 = sadd.s32 4294967295, %s10117_s30   ;;  %s10117_s30 = sphi %s10190_s30, %s14345_s30   ;;  %s10113_s29 = sphi %s10188_s29, %s14344_s29   ;;  %s10109_s28 = sphi %s10186_s28, %s14343_s28   ;;  %s10105_s27 = sphi %s10184_s27, %s14342_s27  }
   0x9   : > { %s237_s10 = sshll.u32 %s10119_s9, 4  ;;  %p8784_p0 = scmp.ge.s32.totalorder %s10117_s30, 1  ;;  %s10211_s10 = int_to_ptr.vmem [resolvable:$true] %s237_s10 }
   0xa   : > { %p13603_p1 = scmp.eq.s32.totalorder %s10205_s11, 0  ;;  %p225_p2 = scmp.lt.s32.totalorder %s10117_s30, 4 }
   0xb   : > { %s10120_s13 = smov [#allocation10]   ;;  %s10121_s16 = smov [#allocation13]  }
   0xc   : > { %p10213_p4 = pnand %p8784_p0, %p225_p2  ;;  %s264_s14 = sshll.u32 %s10120_s13, 4  ;;  %s10225_s14 = int_to_ptr.vmem [resolvable:$true] %s264_s14 }
   0xd   : > { %s288_s17 = sshll.u32 %s10121_s16, 4  ;;  %s9811_s20 = scalar_lea.hbm %s13594_s1, 16384  ;;  %s10227_s17 = int_to_ptr.vmem [resolvable:$true] %s288_s17 }
   0xe   : > { %s13845_s12 = scalar_select %p10213_p4, 1, 0 }
   0xf   : > { %p9210_p5 = pneg %p10213_p4  ;;  %p9812_p7 = scmp.ne.s32.totalorder %s13594_s1, %s9811_s20 }
  0x10   : > { %p9818_p11 = scmp.lt.u32.totalorder %s9811_s20, %s13594_s1 }
  0x11   : > { %p10221_p6 = pnand %p9210_p5, %p13603_p1 }
  0x13   : > { %p10237_p8 = pneg %p10221_p6 }
  0x15   : > { %p9814_p9 = pnand %p10237_p8, %p9812_p7 }
  0x17   : > { %p9815_p10 = pneg %p9814_p9 }
  0x19   : > { %p9820_p12 = pnand %p9818_p11, %p9815_p10 }
  0x1b   : > { %9823 = shalt.err (!%p9820_p12)
}
  0x1c   : > { %s9824_s26 = scalar_lea.vmem %s10211_s10, 16384  ;;  %p9832_p5 = scmp.lt.s32.totalorder %s10211_s10, %s10211_s10 }
  0x1d   : > { %p9825_p13 = scmp.ne.s32.totalorder %s10211_s10, %s9824_s26  ;;  %p9833_p3 = scmp.lt.s32.totalorder %s9824_s26, %s9824_s26 }
  0x1f   : > { %p9827_p0 = pnand %p9825_p13, %p10237_p8  ;;  %p9834_p7 = por %p9833_p3, %p9832_p5 }
  0x21   : > { %p9828_p2 = pneg %p9827_p0 }
  0x23   : > { %p9835_p9 = pnand %p9834_p7, %p9828_p2 }
  0x25   : > { %9838 = shalt.err (!%p9835_p9)
}
  0x26   : > { %s13602_s9 = smov 256   ;;  %s10123_s13 = smov 16  }
  0x27   : > { %9213 = dma.hbm_to_vmem [thread:$0]  (!%p10221_p6), %s13594_s1, 16384, %s10211_s10, [#allocation8], %s13602_s9, %s13602_s9, %s10123_s13  }
  0x28   : > { %s9839_s21 = scalar_lea.hbm %s13596_s3, 64 }
  0x29   : > { %p9840_p3 = scmp.ne.s32.totalorder %s13596_s3, %s9839_s21  ;;  %p9846_p12 = scmp.lt.u32.totalorder %s9839_s21, %s13596_s3 }
  0x2b   : > { %p9842_p10 = pnand %p9840_p3, %p10237_p8 }
  0x2d   : > { %p9843_p11 = pneg %p9842_p10 }
  0x2f   : > { %p9848_p13 = pnand %p9846_p12, %p9843_p11 }
  0x31   : > { %9851 = shalt.err (!%p9848_p13)
}
  0x32   : > { %s9852_s10 = scalar_lea.vmem %s10225_s14, 64  ;;  %p9860_p7 = scmp.lt.s32.totalorder %s10225_s14, %s10225_s14 }
  0x33   : > { %p9853_p0 = scmp.ne.s32.totalorder %s10225_s14, %s9852_s10  ;;  %p9861_p9 = scmp.lt.s32.totalorder %s9852_s10, %s9852_s10 }
  0x35   : > { %p9855_p2 = pnand %p9853_p0, %p10237_p8  ;;  %p9862_p3 = por %p9861_p9, %p9860_p7 }
  0x37   : > { %p9856_p5 = pneg %p9855_p2 }
  0x39   : > { %p9863_p10 = pnand %p9862_p3, %p9856_p5 }
  0x3b   : > { %9866 = shalt.err (!%p9863_p10)
}
  0x3c   : > { %9219 = dma.hbm_to_vmem [thread:$0]  (!%p10221_p6), %s13596_s3, 64, %s10225_s14, [#allocation11]  }
  0x3d   : > { %s9867_s21 = scalar_lea.hbm %s13598_s5, 32 }
  0x3e   : > { %p9868_p11 = scmp.ne.s32.totalorder %s13598_s5, %s9867_s21  ;;  %p9874_p0 = scmp.lt.u32.totalorder %s9867_s21, %s13598_s5 }
  0x40   : > { %p9870_p12 = pnand %p9868_p11, %p10237_p8 }
  0x42   : > { %p9871_p13 = pneg %p9870_p12 }
  0x44   : > { %p9876_p2 = pnand %p9874_p0, %p9871_p13 }
  0x46   : > { %9879 = shalt.err (!%p9876_p2)
}
  0x47   : > { %s9880_s14 = scalar_lea.vmem %s10227_s17, 32  ;;  %p9888_p3 = scmp.lt.s32.totalorder %s10227_s17, %s10227_s17 }
  0x48   : > { %p9881_p5 = scmp.ne.s32.totalorder %s10227_s17, %s9880_s14  ;;  %p9889_p10 = scmp.lt.s32.totalorder %s9880_s14, %s9880_s14 }
  0x4a   : > { %p9883_p7 = pnand %p9881_p5, %p10237_p8  ;;  %p9890_p11 = por %p9889_p10, %p9888_p3 }
  0x4c   : > { %p9884_p9 = pneg %p9883_p7 }
  0x4e   : > { %p9891_p12 = pnand %p9890_p11, %p9884_p9 }
  0x50   : > { %9894 = shalt.err (!%p9891_p12)
}
  0x51   : > { %9225 = dma.hbm_to_vmem [thread:$0]  (!%p10221_p6), %s13598_s5, 32, %s10227_s17, [#allocation14]  }
  0x52   : > { %s10124_s18 = smov [#allocation9]   ;;  %s10125_s20 = smov [#allocation12]  }
  0x53   : > { %s250_s19 = sshll.u32 %s10124_s18, 4  ;;  %s274_s21 = sshll.u32 %s10125_s20, 4  ;;  %s251_s19 = int_to_ptr.vmem [resolvable:$true] %s250_s19  ;;  %s275_s21 = int_to_ptr.vmem [resolvable:$true] %s274_s21 }
  0x54   : > { %s9895_s25 = scalar_lea.hbm %s13595_s2, 16384 }
  0x55   : > { %p9896_p13 = scmp.ne.s32.totalorder %s13595_s2, %s9895_s25  ;;  %p9902_p5 = scmp.lt.u32.totalorder %s9895_s25, %s13595_s2 }
  0x57   : > { %p9898_p0 = pnand %p9896_p13, %p10237_p8 }
  0x59   : > { %p9899_p2 = pneg %p9898_p0 }
  0x5b   : > { %p9904_p7 = pnand %p9902_p5, %p9899_p2 }
  0x5d   : > { %9907 = shalt.err (!%p9904_p7)
}
  0x5e   : > { %s9908_s17 = scalar_lea.vmem %s251_s19, 16384  ;;  %p9916_p11 = scmp.lt.s32.totalorder %s251_s19, %s251_s19 }
  0x5f   : > { %p9909_p9 = scmp.ne.s32.totalorder %s251_s19, %s9908_s17  ;;  %p9917_p12 = scmp.lt.s32.totalorder %s9908_s17, %s9908_s17 }
  0x61   : > { %p9911_p3 = pnand %p9909_p9, %p10237_p8  ;;  %p9918_p1 = por %p9917_p12, %p9916_p11 }
  0x63   : > { %p9912_p10 = pneg %p9911_p3 }
  0x65   : > { %p9919_p4 = pnand %p9918_p1, %p9912_p10 }
  0x67   : > { %9922 = shalt.err (!%p9919_p4)
}
  0x68   : > { %s13848_s16 = smov 256   ;;  %s9923_s24 = scalar_lea.hbm %s13597_s4, 8192 }
  0x69   : > { %9216 = dma.hbm_to_vmem [thread:$0]  (!%p10221_p6), %s13595_s2, 16384, %s251_s19, [#allocation8], %s13848_s16, %s13848_s16, %s10123_s13  }
  0x6a   : > { %p9924_p1 = scmp.ne.s32.totalorder %s13597_s4, %s9923_s24  ;;  %p9930_p0 = scmp.lt.u32.totalorder %s9923_s24, %s13597_s4 }
  0x6c   : > { %p9926_p4 = pnand %p9924_p1, %p10237_p8 }
  0x6e   : > { %p9927_p13 = pneg %p9926_p4 }
  0x70   : > { %p9932_p2 = pnand %p9930_p0, %p9927_p13 }
  0x72   : > { %9935 = shalt.err (!%p9932_p2)
}
  0x73   : > { %s9936_s17 = scalar_lea.vmem %s275_s21, 8192  ;;  %p9944_p3 = scmp.lt.s32.totalorder %s275_s21, %s275_s21 }
  0x74   : > { %p9937_p5 = scmp.ne.s32.totalorder %s275_s21, %s9936_s17  ;;  %p9945_p10 = scmp.lt.s32.totalorder %s9936_s17, %s9936_s17 }
  0x76   : > { %p9939_p7 = pnand %p9937_p5, %p10237_p8  ;;  %p9946_p11 = por %p9945_p10, %p9944_p3 }
  0x78   : > { %p9940_p9 = pneg %p9939_p7 }
  0x7a   : > { %p9947_p12 = pnand %p9946_p11, %p9940_p9 }
  0x7c   : > { %9950 = shalt.err (!%p9947_p12)
}
  0x7d   : > { %s10126_s13 = smov 128   ;;  %s10127_s19 = smov 8  }
  0x7e   : > { %9222 = dma.hbm_to_vmem [thread:$0]  (!%p10221_p6), %s13597_s4, 8192, %s275_s21, [#allocation11], %s10126_s13, %s10126_s13, %s10127_s19  }
  0x7f   : > { %s10128_s18 = smov [#allocation15]   ;;  %s9951_s25 = scalar_lea.hbm %s13599_s6, 2048 }
  0x80   : > { %s298_s20 = sshll.u32 %s10128_s18, 4  ;;  %p9952_p1 = scmp.ne.s32.totalorder %s13599_s6, %s9951_s25  ;;  %s299_s20 = int_to_ptr.vmem [resolvable:$true] %s298_s20 }
  0x81   : > { %p9958_p0 = scmp.lt.u32.totalorder %s9951_s25, %s13599_s6 }
  0x82   : > { %p9954_p4 = pnand %p9952_p1, %p10237_p8 }
  0x84   : > { %p9955_p13 = pneg %p9954_p4 }
  0x86   : > { %p9960_p2 = pnand %p9958_p0, %p9955_p13 }
  0x88   : > { %9963 = shalt.err (!%p9960_p2)
}
  0x89   : > { %s9964_s21 = scalar_lea.vmem %s299_s20, 2048  ;;  %p9972_p3 = scmp.lt.s32.totalorder %s299_s20, %s299_s20 }
  0x8a   : > { %p9965_p5 = scmp.ne.s32.totalorder %s299_s20, %s9964_s21  ;;  %p9973_p10 = scmp.lt.s32.totalorder %s9964_s21, %s9964_s21 }
  0x8c   : > { %p9967_p7 = pnand %p9965_p5, %p10237_p8  ;;  %p9974_p11 = por %p9973_p10, %p9972_p3 }
  0x8e   : > { %p9968_p9 = pneg %p9967_p7 }
  0x90   : > { %p9975_p12 = pnand %p9974_p11, %p9968_p9 }
  0x92   : > { %9978 = shalt.err (!%p9975_p12)
}
  0x93   : > { %s10129_s13 = smov 64   ;;  %s10130_s19 = smov 4  }
  0x94   : > { %9228 = dma.hbm_to_vmem [thread:$0]  (!%p10221_p6), %s13599_s6, 2048, %s299_s20, [#allocation14], %s10129_s13, %s10129_s13, %s10130_s19  }
  0x95   : > { %s10131_s18 = smov [#allocation16]   ;;  %s9979_s26 = scalar_lea.hbm %s13600_s7, 16 }
  0x96   : > { %s312_s22 = sshll.u32 %s10131_s18, 4  ;;  %p9980_p1 = scmp.ne.s32.totalorder %s13600_s7, %s9979_s26  ;;  %s313_s22 = int_to_ptr.vmem [resolvable:$true] %s312_s22 }
  0x97   : > { %p9986_p0 = scmp.lt.u32.totalorder %s9979_s26, %s13600_s7 }
  0x98   : > { %p9982_p4 = pnand %p9980_p1, %p10237_p8 }
  0x9a   : > { %p9983_p13 = pneg %p9982_p4 }
  0x9c   : > { %p9988_p2 = pnand %p9986_p0, %p9983_p13 }
  0x9e   : > { %9991 = shalt.err (!%p9988_p2)
}
  0x9f   : > { %s9992_s20 = scalar_lea.vmem %s313_s22, 16  ;;  %s9999_s13 = scalar_lea.vmem %s313_s22, 32 }
  0xa0   : > { %p9993_p5 = scmp.ne.s32.totalorder %s313_s22, %s9992_s20  ;;  %p10000_p3 = scmp.lt.s32.totalorder %s313_s22, %s313_s22 }
  0xa1   : > { %p10001_p10 = scmp.lt.s32.totalorder %s9999_s13, %s9992_s20 }
  0xa2   : > { %p9995_p7 = pnand %p9993_p5, %p10237_p8 }
  0xa3   : > { %p10002_p11 = por %p10001_p10, %p10000_p3 }
  0xa4   : > { %p9996_p9 = pneg %p9995_p7 }
  0xa6   : > { %p10003_p12 = pnand %p10002_p11, %p9996_p9 }
  0xa8   : > { %10006 = shalt.err (!%p10003_p12)
}
  0xa9   : > { %9231 = dma.hbm_to_vmem [thread:$0]  (!%p10221_p6), %s13600_s7, 16, %s313_s22, [#allocation17]  }
  0xaa   : > { %s10383_s23 = sadd.s32 1, %s10117_s30   ;;  %s33_s9 = sadd.s32 1, %s10113_s29 }
  0xab   : > { %s30_s15 = ssub.s32 %s10117_s30, %s10383_s23  ;;  %p40_p1 = scmp.ne.s32.totalorder %s10113_s29, %s10109_s28 }
  0xac   : > { %p31_p8 = scmp.eq.s32.totalorder %s30_s15, 0  ;;  %p41_p4 = scmp.eq.s32.totalorder %s10117_s30, 0 }
  0xad   : > { %p46_p13 = scmp.ne.s32.totalorder %s10109_s28, %s10105_s27  ;;  %p13849_p2 = scmp.eq.s32.totalorder %s10205_s11, 0 }
  0xae   : > { %s10394_s18 = scalar_select %p31_p8, %s10113_s29, %s33_s9  }
  0xaf   : > { %p42_p0 = por %p41_p4, %p40_p1  ;;  %p10398_p5 = por %p13849_p2, %p46_p13 }
  0xb0   : > { %p9243_p7 = scmp.lt.s32.totalorder %s10117_s30, 3  ;;  %s323_s25 = sand.u32 1, %s10113_s29  }
  0xb1   : > { %s9174_s22 = smul.u32 3072, %s323_s25  ;;  %s10012_s15 = scalar_lea.hbm %s13593_s0, 147456 }
  0xb2   : > { %s9145_s26 = smul.u32 384, %s10117_s30  ;;  %p10405_p6 = pnand %p9243_p7, %p42_p0 }
  0xb3   : > { %s327_s21 = scalar_lea.vmem [#allocation4], %s9174_s22  ;;  %s10416_s30 = scalar_lea.sflag [#allocation5], %s323_s25 }
  0xb4   : > { %s10412_s27 = scalar_lea.hbm %s13593_s0, %s9145_s26  ;;  %s334_s20 = sshll.u32 %s327_s21, 4  ;;  %s10414_s20 = int_to_ptr.vmem [resolvable:$true] %s334_s20 }
  0xb5   : > { %s10007_s13 = scalar_lea.hbm %s10412_s27, 49152  ;;  %p10009_p3 = pneg %p10405_p6 }
  0xb6   : > { %p10008_p9 = scmp.ne.s32.totalorder %s10412_s27, %s10007_s13  ;;  %p10013_p12 = scmp.lt.u32.totalorder %s10412_s27, %s13593_s0 }
  0xb7   : > { %p10014_p8 = scmp.lt.u32.totalorder %s10012_s15, %s10007_s13  ;;  %p10016_p4 = scmp.lt.u32.totalorder %s10007_s13, %s10412_s27 }
  0xb8   : > { %p10010_p10 = pnand %p10009_p3, %p10008_p9 }
  0xb9   : > { %p10015_p1 = por %p10014_p8, %p10013_p12 }
  0xba   : > { %p10011_p11 = pneg %p10010_p10 }
  0xbb   : > { %p10017_p13 = por %p10016_p4, %p10015_p1 }
  0xbd   : > { %p10018_p0 = pnand %p10017_p13, %p10011_p11 }
  0xbf   : > { %10021 = shalt.err (!%p10018_p0)
}
  0xc0   : > { %s10022_s25 = scalar_lea.vmem %s10414_s20, 49152  ;;  %s10132_s22 = smov [#allocation4]  }
  0xc1   : > { %p10023_p2 = scmp.ne.s32.totalorder %s10414_s20, %s10022_s25  ;;  %s10027_s10 = sshll.u32 %s10132_s22, 4  ;;  %s10028_s10 = int_to_ptr.vmem [resolvable:$false] %s10027_s10 }
  0xc2   : > { %s10029_s17 = scalar_lea.vmem %s10028_s10, 98304  ;;  %p10030_p10 = scmp.lt.s32.totalorder %s10414_s20, %s10028_s10 }
  0xc3   : > { %p10025_p7 = pnand %p10023_p2, %p10009_p3  ;;  %p10031_p12 = scmp.lt.s32.totalorder %s10029_s17, %s10022_s25 }
  0xc5   : > { %p10026_p9 = pneg %p10025_p7  ;;  %p10032_p8 = por %p10031_p12, %p10030_p10 }
  0xc7   : > { %p10033_p1 = pnand %p10032_p8, %p10026_p9 }
  0xc9   : > { %10036 = shalt.err (!%p10033_p1)
}
  0xca   : > { %s10133_s21 = smov 1152   ;;  %s10134_s13 = smov 384  }
  0xcb   : > { %s10135_s19 = smov 24   ;;  %p13852_p3 = scmp.ne.s32.totalorder %s13845_s12, 0 }
  0xcc   : > { %9235 = dma.hbm_to_vmem [thread:$0]  (!%p10405_p6), %s10412_s27, 49152, %s10414_s20, %s10416_s30, %s10133_s21, %s10134_s13, %s10135_s19  }
  0xcd   : > { %346 = sbr.rel (%p13852_p3) target bundleno = 2379 (0x94b), region = 52 }
  0xd4   : > { %s348_s16 = sand.u32 1, %s10109_s28  }
  0xd5   : > { %s9175_s15 = smul.u32 3072, %s348_s16  ;;  %s349_s9 = scalar_lea.sflag [#allocation5], %s348_s16 }
  0xd7   : > { %s10447_s26 = scalar_lea.vmem [#allocation4], %s9175_s15 }
  0xd8   : > { %10080 = dma.done.wait (%p10398_p5), %s349_s9, 49152  }
  0xd9   : > { %10082 = vsyncadd (%p10398_p5), %s349_s9, 4294918144  ;;  %p13853_p11 = scmp.eq.s32.totalorder %s10205_s11, 0 }
  0xdb   : > { %10084 = dma.done.wait (%p13853_p11), [#allocation8], 32768   ;;  %p13854_p6 = pmov %p13853_p11 }
  0xdd   : > { %10086 = vsyncadd (%p13854_p6), [#allocation8], 4294934528  ;;  %p13855_p4 = pmov %p13854_p6 }
  0xdf   : > { %10088 = dma.done.wait (%p13855_p4), [#allocation11], 8256   ;;  %p13856_p13 = pmov %p13855_p4 }
  0xe0   : > { %p13857_p0 = pmov %p13855_p4 }
  0xe1   : > { %10090 = vsyncadd (%p13856_p13), [#allocation11], 4294959040 }
  0xe2   : > { %10092 = dma.done.wait (%p13857_p0), [#allocation14], 2080   ;;  %p13858_p2 = pmov %p13857_p0 }
  0xe3   : > { %p13859_p5 = pmov %p13857_p0 }
  0xe4   : > { %10094 = vsyncadd (%p13858_p2), [#allocation14], 4294965216 }
  0xe5   : > { %10096 = dma.done.wait (%p13859_p5), [#allocation17], 16   ;;  %p13860_p7 = pmov %p13857_p0 }
  0xe6   : > { %p13861_p9 = scmp.ne.s32.totalorder %s10205_s11, 0 }
  0xe7   : > { %10098 = vsyncadd (%p13860_p7), [#allocation17], 4294967280  ;;  %v10136_v0 = vmov (!%p13861_p9), -inf   ;;  %v10137_v1 = vmov (!%p13861_p9), 0.0  }
  0xe8   : > { %413 = sbr.rel (%p13861_p9) target bundleno = 360 (0x168), region = 88  ;;  %414 = vst [vmem:[#allocation2] sm:$0xff] (!%p13861_p9), %v10136_v0  ;;  %415 = vst [vmem:[#allocation2 + $0x8] sm:$0xff] (!%p13861_p9), %v10136_v0 }
  0xe9   : > { %416 = vst [vmem:[#allocation2 + $0x10] sm:$0xff] (!%p13861_p9), %v10136_v0  ;;  %417 = vst [vmem:[#allocation2 + $0x18] sm:$0xff] (!%p13861_p9), %v10136_v0 }
  0xea   : > { %418 = vst [vmem:[#allocation2 + $0x20] sm:$0xff] (!%p13861_p9), %v10136_v0  ;;  %419 = vst [vmem:[#allocation2 + $0x28] sm:$0xff] (!%p13861_p9), %v10136_v0 }
  0xeb   : > { %420 = vst [vmem:[#allocation2 + $0x30] sm:$0xff] (!%p13861_p9), %v10136_v0  ;;  %421 = vst [vmem:[#allocation2 + $0x38] sm:$0xff] (!%p13861_p9), %v10136_v0 }
  0xec   : > { %422 = vst [vmem:[#allocation2 + $0x40] sm:$0xff] (!%p13861_p9), %v10136_v0  ;;  %423 = vst [vmem:[#allocation2 + $0x48] sm:$0xff] (!%p13861_p9), %v10136_v0 }
  0xed   : > { %424 = vst [vmem:[#allocation2 + $0x50] sm:$0xff] (!%p13861_p9), %v10136_v0  ;;  %425 = vst [vmem:[#allocation2 + $0x58] sm:$0xff] (!%p13861_p9), %v10136_v0 }
  0xee   : > { %426 = vst [vmem:[#allocation2 + $0x60] sm:$0xff] (!%p13861_p9), %v10136_v0  ;;  %427 = vst [vmem:[#allocation2 + $0x68] sm:$0xff] (!%p13861_p9), %v10136_v0 }
  0xef   : > { %428 = vst [vmem:[#allocation2 + $0x70] sm:$0xff] %v10136_v0  ;;  %429 = vst [vmem:[#allocation2 + $0x78] sm:$0xff] %v10136_v0 }
  0xf0   : > { %430 = vst [vmem:[#allocation2 + $0x80] sm:$0xff] %v10136_v0  ;;  %431 = vst [vmem:[#allocation2 + $0x88] sm:$0xff] %v10136_v0 }
  0xf1   : > { %432 = vst [vmem:[#allocation2 + $0x90] sm:$0xff] %v10136_v0  ;;  %433 = vst [vmem:[#allocation2 + $0x98] sm:$0xff] %v10136_v0 }
  0xf2   : > { %434 = vst [vmem:[#allocation2 + $0xa0] sm:$0xff] %v10136_v0  ;;  %435 = vst [vmem:[#allocation2 + $0xa8] sm:$0xff] %v10136_v0 }
  0xf3   : > { %436 = vst [vmem:[#allocation2 + $0xb0] sm:$0xff] %v10136_v0  ;;  %437 = vst [vmem:[#allocation2 + $0xb8] sm:$0xff] %v10136_v0 }
  0xf4   : > { %438 = vst [vmem:[#allocation2 + $0xc0] sm:$0xff] %v10136_v0  ;;  %439 = vst [vmem:[#allocation2 + $0xc8] sm:$0xff] %v10136_v0 }
  0xf5   : > { %440 = vst [vmem:[#allocation2 + $0xd0] sm:$0xff] %v10136_v0  ;;  %441 = vst [vmem:[#allocation2 + $0xd8] sm:$0xff] %v10136_v0 }
  0xf6   : > { %442 = vst [vmem:[#allocation2 + $0xe0] sm:$0xff] %v10136_v0  ;;  %443 = vst [vmem:[#allocation2 + $0xe8] sm:$0xff] %v10136_v0 }
  0xf7   : > { %444 = vst [vmem:[#allocation2 + $0xf0] sm:$0xff] %v10136_v0  ;;  %445 = vst [vmem:[#allocation2 + $0xf8] sm:$0xff] %v10136_v0 }
  0xf8   : > { %446 = vst [vmem:[#allocation2 + $0x100] sm:$0xff] %v10136_v0  ;;  %447 = vst [vmem:[#allocation2 + $0x108] sm:$0xff] %v10136_v0 }
  0xf9   : > { %448 = vst [vmem:[#allocation2 + $0x110] sm:$0xff] %v10136_v0  ;;  %449 = vst [vmem:[#allocation2 + $0x118] sm:$0xff] %v10136_v0 }
  0xfa   : > { %450 = vst [vmem:[#allocation2 + $0x120] sm:$0xff] %v10136_v0  ;;  %451 = vst [vmem:[#allocation2 + $0x128] sm:$0xff] %v10136_v0 }
  0xfb   : > { %452 = vst [vmem:[#allocation2 + $0x130] sm:$0xff] %v10136_v0  ;;  %453 = vst [vmem:[#allocation2 + $0x138] sm:$0xff] %v10136_v0 }
  0xfc   : > { %454 = vst [vmem:[#allocation2 + $0x140] sm:$0xff] %v10136_v0  ;;  %455 = vst [vmem:[#allocation2 + $0x148] sm:$0xff] %v10136_v0 }
  0xfd   : > { %456 = vst [vmem:[#allocation2 + $0x150] sm:$0xff] %v10136_v0  ;;  %457 = vst [vmem:[#allocation2 + $0x158] sm:$0xff] %v10136_v0 }
  0xfe   : > { %458 = vst [vmem:[#allocation2 + $0x160] sm:$0xff] %v10136_v0  ;;  %459 = vst [vmem:[#allocation2 + $0x168] sm:$0xff] %v10136_v0 }
  0xff   : > { %460 = vst [vmem:[#allocation2 + $0x170] sm:$0xff] %v10136_v0  ;;  %461 = vst [vmem:[#allocation2 + $0x178] sm:$0xff] %v10136_v0 }
 0x100   : > { %462 = vst [vmem:[#allocation2 + $0x180] sm:$0xff] %v10136_v0  ;;  %463 = vst [vmem:[#allocation2 + $0x188] sm:$0xff] %v10136_v0 }
 0x101   : > { %464 = vst [vmem:[#allocation2 + $0x190] sm:$0xff] %v10136_v0  ;;  %465 = vst [vmem:[#allocation2 + $0x198] sm:$0xff] %v10136_v0 }
 0x102   : > { %466 = vst [vmem:[#allocation2 + $0x1a0] sm:$0xff] %v10136_v0  ;;  %467 = vst [vmem:[#allocation2 + $0x1a8] sm:$0xff] %v10136_v0 }
 0x103   : > { %468 = vst [vmem:[#allocation2 + $0x1b0] sm:$0xff] %v10136_v0  ;;  %469 = vst [vmem:[#allocation2 + $0x1b8] sm:$0xff] %v10136_v0 }
 0x104   : > { %470 = vst [vmem:[#allocation2 + $0x1c0] sm:$0xff] %v10136_v0  ;;  %471 = vst [vmem:[#allocation2 + $0x1c8] sm:$0xff] %v10136_v0 }
 0x105   : > { %472 = vst [vmem:[#allocation2 + $0x1d0] sm:$0xff] %v10136_v0  ;;  %473 = vst [vmem:[#allocation2 + $0x1d8] sm:$0xff] %v10136_v0 }
 0x106   : > { %474 = vst [vmem:[#allocation2 + $0x1e0] sm:$0xff] %v10136_v0  ;;  %475 = vst [vmem:[#allocation2 + $0x1e8] sm:$0xff] %v10136_v0 }
 0x107   : > { %476 = vst [vmem:[#allocation2 + $0x1f0] sm:$0xff] %v10136_v0  ;;  %477 = vst [vmem:[#allocation2 + $0x1f8] sm:$0xff] %v10136_v0 }
 0x108   : > { %478 = vst [vmem:[#allocation2 + $0x200] sm:$0xff] %v10136_v0  ;;  %479 = vst [vmem:[#allocation2 + $0x208] sm:$0xff] %v10136_v0 }
 0x109   : > { %480 = vst [vmem:[#allocation2 + $0x210] sm:$0xff] %v10136_v0  ;;  %481 = vst [vmem:[#allocation2 + $0x218] sm:$0xff] %v10136_v0 }
 0x10a   : > { %482 = vst [vmem:[#allocation2 + $0x220] sm:$0xff] %v10136_v0  ;;  %483 = vst [vmem:[#allocation2 + $0x228] sm:$0xff] %v10136_v0 }
 0x10b   : > { %484 = vst [vmem:[#allocation2 + $0x230] sm:$0xff] %v10136_v0  ;;  %485 = vst [vmem:[#allocation2 + $0x238] sm:$0xff] %v10136_v0 }
 0x10c   : > { %486 = vst [vmem:[#allocation2 + $0x240] sm:$0xff] %v10136_v0  ;;  %487 = vst [vmem:[#allocation2 + $0x248] sm:$0xff] %v10136_v0 }
 0x10d   : > { %488 = vst [vmem:[#allocation2 + $0x250] sm:$0xff] %v10136_v0  ;;  %489 = vst [vmem:[#allocation2 + $0x258] sm:$0xff] %v10136_v0 }
 0x10e   : > { %490 = vst [vmem:[#allocation2 + $0x260] sm:$0xff] %v10136_v0  ;;  %491 = vst [vmem:[#allocation2 + $0x268] sm:$0xff] %v10136_v0 }
 0x10f   : > { %492 = vst [vmem:[#allocation2 + $0x270] sm:$0xff] %v10136_v0  ;;  %493 = vst [vmem:[#allocation2 + $0x278] sm:$0xff] %v10136_v0 }
 0x110   : > { %494 = vst [vmem:[#allocation2 + $0x280] sm:$0xff] %v10136_v0  ;;  %495 = vst [vmem:[#allocation2 + $0x288] sm:$0xff] %v10136_v0 }
 0x111   : > { %496 = vst [vmem:[#allocation2 + $0x290] sm:$0xff] %v10136_v0  ;;  %497 = vst [vmem:[#allocation2 + $0x298] sm:$0xff] %v10136_v0 }
 0x112   : > { %498 = vst [vmem:[#allocation2 + $0x2a0] sm:$0xff] %v10136_v0  ;;  %499 = vst [vmem:[#allocation2 + $0x2a8] sm:$0xff] %v10136_v0 }
 0x113   : > { %500 = vst [vmem:[#allocation2 + $0x2b0] sm:$0xff] %v10136_v0  ;;  %501 = vst [vmem:[#allocation2 + $0x2b8] sm:$0xff] %v10136_v0 }
 0x114   : > { %502 = vst [vmem:[#allocation2 + $0x2c0] sm:$0xff] %v10136_v0  ;;  %503 = vst [vmem:[#allocation2 + $0x2c8] sm:$0xff] %v10136_v0 }
 0x115   : > { %504 = vst [vmem:[#allocation2 + $0x2d0] sm:$0xff] %v10136_v0  ;;  %505 = vst [vmem:[#allocation2 + $0x2d8] sm:$0xff] %v10136_v0 }
 0x116   : > { %506 = vst [vmem:[#allocation2 + $0x2e0] sm:$0xff] %v10136_v0  ;;  %507 = vst [vmem:[#allocation2 + $0x2e8] sm:$0xff] %v10136_v0 }
 0x117   : > { %508 = vst [vmem:[#allocation2 + $0x2f0] sm:$0xff] %v10136_v0  ;;  %509 = vst [vmem:[#allocation2 + $0x2f8] sm:$0xff] %v10136_v0 }
 0x118   : > { %510 = vst [vmem:[#allocation2 + $0x300] sm:$0xff] %v10136_v0  ;;  %511 = vst [vmem:[#allocation2 + $0x308] sm:$0xff] %v10136_v0 }
 0x119   : > { %512 = vst [vmem:[#allocation2 + $0x310] sm:$0xff] %v10136_v0  ;;  %513 = vst [vmem:[#allocation2 + $0x318] sm:$0xff] %v10136_v0 }
 0x11a   : > { %514 = vst [vmem:[#allocation2 + $0x320] sm:$0xff] %v10136_v0  ;;  %515 = vst [vmem:[#allocation2 + $0x328] sm:$0xff] %v10136_v0 }
 0x11b   : > { %516 = vst [vmem:[#allocation2 + $0x330] sm:$0xff] %v10136_v0  ;;  %517 = vst [vmem:[#allocation2 + $0x338] sm:$0xff] %v10136_v0 }
 0x11c   : > { %518 = vst [vmem:[#allocation2 + $0x340] sm:$0xff] %v10136_v0  ;;  %519 = vst [vmem:[#allocation2 + $0x348] sm:$0xff] %v10136_v0 }
 0x11d   : > { %520 = vst [vmem:[#allocation2 + $0x350] sm:$0xff] %v10136_v0  ;;  %521 = vst [vmem:[#allocation2 + $0x358] sm:$0xff] %v10136_v0 }
 0x11e   : > { %522 = vst [vmem:[#allocation2 + $0x360] sm:$0xff] %v10136_v0  ;;  %523 = vst [vmem:[#allocation2 + $0x368] sm:$0xff] %v10136_v0 }
 0x11f   : > { %524 = vst [vmem:[#allocation2 + $0x370] sm:$0xff] %v10136_v0  ;;  %525 = vst [vmem:[#allocation2 + $0x378] sm:$0xff] %v10136_v0 }
 0x120   : > { %526 = vst [vmem:[#allocation2 + $0x380] sm:$0xff] %v10136_v0  ;;  %527 = vst [vmem:[#allocation2 + $0x388] sm:$0xff] %v10136_v0 }
 0x121   : > { %528 = vst [vmem:[#allocation2 + $0x390] sm:$0xff] %v10136_v0  ;;  %529 = vst [vmem:[#allocation2 + $0x398] sm:$0xff] %v10136_v0 }
 0x122   : > { %530 = vst [vmem:[#allocation2 + $0x3a0] sm:$0xff] %v10136_v0  ;;  %531 = vst [vmem:[#allocation2 + $0x3a8] sm:$0xff] %v10136_v0 }
 0x123   : > { %532 = vst [vmem:[#allocation2 + $0x3b0] sm:$0xff] %v10136_v0  ;;  %533 = vst [vmem:[#allocation2 + $0x3b8] sm:$0xff] %v10136_v0 }
 0x124   : > { %534 = vst [vmem:[#allocation2 + $0x3c0] sm:$0xff] %v10136_v0  ;;  %535 = vst [vmem:[#allocation2 + $0x3c8] sm:$0xff] %v10136_v0 }
 0x125   : > { %536 = vst [vmem:[#allocation2 + $0x3d0] sm:$0xff] %v10136_v0  ;;  %537 = vst [vmem:[#allocation2 + $0x3d8] sm:$0xff] %v10136_v0 }
 0x126   : > { %538 = vst [vmem:[#allocation2 + $0x3e0] sm:$0xff] %v10136_v0  ;;  %539 = vst [vmem:[#allocation2 + $0x3e8] sm:$0xff] %v10136_v0 }
 0x127   : > { %540 = vst [vmem:[#allocation2 + $0x3f0] sm:$0xff] %v10136_v0  ;;  %541 = vst [vmem:[#allocation2 + $0x3f8] sm:$0xff] %v10136_v0 }
 0x128   : > { %542 = vst [vmem:[#allocation3] sm:$0xff] %v10137_v1  ;;  %543 = vst [vmem:[#allocation3 + $0x8] sm:$0xff] %v10137_v1 }
 0x129   : > { %544 = vst [vmem:[#allocation3 + $0x10] sm:$0xff] %v10137_v1  ;;  %545 = vst [vmem:[#allocation3 + $0x18] sm:$0xff] %v10137_v1 }
 0x12a   : > { %546 = vst [vmem:[#allocation3 + $0x20] sm:$0xff] %v10137_v1  ;;  %547 = vst [vmem:[#allocation3 + $0x28] sm:$0xff] %v10137_v1 }
 0x12b   : > { %548 = vst [vmem:[#allocation3 + $0x30] sm:$0xff] %v10137_v1  ;;  %549 = vst [vmem:[#allocation3 + $0x38] sm:$0xff] %v10137_v1 }
 0x12c   : > { %550 = vst [vmem:[#allocation3 + $0x40] sm:$0xff] %v10137_v1  ;;  %551 = vst [vmem:[#allocation3 + $0x48] sm:$0xff] %v10137_v1 }
 0x12d   : > { %552 = vst [vmem:[#allocation3 + $0x50] sm:$0xff] %v10137_v1  ;;  %553 = vst [vmem:[#allocation3 + $0x58] sm:$0xff] %v10137_v1 }
 0x12e   : > { %554 = vst [vmem:[#allocation3 + $0x60] sm:$0xff] %v10137_v1  ;;  %555 = vst [vmem:[#allocation3 + $0x68] sm:$0xff] %v10137_v1 }
 0x12f   : > { %556 = vst [vmem:[#allocation3 + $0x70] sm:$0xff] %v10137_v1  ;;  %557 = vst [vmem:[#allocation3 + $0x78] sm:$0xff] %v10137_v1 }
 0x130   : > { %558 = vst [vmem:[#allocation3 + $0x80] sm:$0xff] %v10137_v1  ;;  %559 = vst [vmem:[#allocation3 + $0x88] sm:$0xff] %v10137_v1 }
 0x131   : > { %560 = vst [vmem:[#allocation3 + $0x90] sm:$0xff] %v10137_v1  ;;  %561 = vst [vmem:[#allocation3 + $0x98] sm:$0xff] %v10137_v1 }
 0x132   : > { %562 = vst [vmem:[#allocation3 + $0xa0] sm:$0xff] %v10137_v1  ;;  %563 = vst [vmem:[#allocation3 + $0xa8] sm:$0xff] %v10137_v1 }
 0x133   : > { %564 = vst [vmem:[#allocation3 + $0xb0] sm:$0xff] %v10137_v1  ;;  %565 = vst [vmem:[#allocation3 + $0xb8] sm:$0xff] %v10137_v1 }
 0x134   : > { %566 = vst [vmem:[#allocation3 + $0xc0] sm:$0xff] %v10137_v1  ;;  %567 = vst [vmem:[#allocation3 + $0xc8] sm:$0xff] %v10137_v1 }
 0x135   : > { %568 = vst [vmem:[#allocation3 + $0xd0] sm:$0xff] %v10137_v1  ;;  %569 = vst [vmem:[#allocation3 + $0xd8] sm:$0xff] %v10137_v1 }
 0x136   : > { %570 = vst [vmem:[#allocation3 + $0xe0] sm:$0xff] %v10137_v1  ;;  %571 = vst [vmem:[#allocation3 + $0xe8] sm:$0xff] %v10137_v1 }
 0x137   : > { %572 = vst [vmem:[#allocation3 + $0xf0] sm:$0xff] %v10137_v1  ;;  %573 = vst [vmem:[#allocation3 + $0xf8] sm:$0xff] %v10137_v1 }
 0x138   : > { %574 = vst [vmem:[#allocation3 + $0x100] sm:$0xff] %v10137_v1  ;;  %575 = vst [vmem:[#allocation3 + $0x108] sm:$0xff] %v10137_v1 }
 0x139   : > { %576 = vst [vmem:[#allocation3 + $0x110] sm:$0xff] %v10137_v1  ;;  %577 = vst [vmem:[#allocation3 + $0x118] sm:$0xff] %v10137_v1 }
 0x13a   : > { %578 = vst [vmem:[#allocation3 + $0x120] sm:$0xff] %v10137_v1  ;;  %579 = vst [vmem:[#allocation3 + $0x128] sm:$0xff] %v10137_v1 }
 0x13b   : > { %580 = vst [vmem:[#allocation3 + $0x130] sm:$0xff] %v10137_v1  ;;  %581 = vst [vmem:[#allocation3 + $0x138] sm:$0xff] %v10137_v1 }
 0x13c   : > { %582 = vst [vmem:[#allocation3 + $0x140] sm:$0xff] %v10137_v1  ;;  %583 = vst [vmem:[#allocation3 + $0x148] sm:$0xff] %v10137_v1 }
 0x13d   : > { %584 = vst [vmem:[#allocation3 + $0x150] sm:$0xff] %v10137_v1  ;;  %585 = vst [vmem:[#allocation3 + $0x158] sm:$0xff] %v10137_v1 }
 0x13e   : > { %586 = vst [vmem:[#allocation3 + $0x160] sm:$0xff] %v10137_v1  ;;  %587 = vst [vmem:[#allocation3 + $0x168] sm:$0xff] %v10137_v1 }
 0x13f   : > { %588 = vst [vmem:[#allocation3 + $0x170] sm:$0xff] %v10137_v1  ;;  %589 = vst [vmem:[#allocation3 + $0x178] sm:$0xff] %v10137_v1 }
 0x140   : > { %590 = vst [vmem:[#allocation3 + $0x180] sm:$0xff] %v10137_v1  ;;  %591 = vst [vmem:[#allocation3 + $0x188] sm:$0xff] %v10137_v1 }
 0x141   : > { %592 = vst [vmem:[#allocation3 + $0x190] sm:$0xff] %v10137_v1  ;;  %593 = vst [vmem:[#allocation3 + $0x198] sm:$0xff] %v10137_v1 }
 0x142   : > { %594 = vst [vmem:[#allocation3 + $0x1a0] sm:$0xff] %v10137_v1  ;;  %595 = vst [vmem:[#allocation3 + $0x1a8] sm:$0xff] %v10137_v1 }
 0x143   : > { %596 = vst [vmem:[#allocation3 + $0x1b0] sm:$0xff] %v10137_v1  ;;  %597 = vst [vmem:[#allocation3 + $0x1b8] sm:$0xff] %v10137_v1 }
 0x144   : > { %598 = vst [vmem:[#allocation3 + $0x1c0] sm:$0xff] %v10137_v1  ;;  %599 = vst [vmem:[#allocation3 + $0x1c8] sm:$0xff] %v10137_v1 }
 0x145   : > { %600 = vst [vmem:[#allocation3 + $0x1d0] sm:$0xff] %v10137_v1  ;;  %601 = vst [vmem:[#allocation3 + $0x1d8] sm:$0xff] %v10137_v1 }
 0x146   : > { %602 = vst [vmem:[#allocation3 + $0x1e0] sm:$0xff] %v10137_v1  ;;  %603 = vst [vmem:[#allocation3 + $0x1e8] sm:$0xff] %v10137_v1 }
 0x147   : > { %604 = vst [vmem:[#allocation3 + $0x1f0] sm:$0xff] %v10137_v1  ;;  %605 = vst [vmem:[#allocation3 + $0x1f8] sm:$0xff] %v10137_v1 }
 0x148   : > { %606 = vst [vmem:[#allocation3 + $0x200] sm:$0xff] %v10137_v1  ;;  %607 = vst [vmem:[#allocation3 + $0x208] sm:$0xff] %v10137_v1 }
 0x149   : > { %608 = vst [vmem:[#allocation3 + $0x210] sm:$0xff] %v10137_v1  ;;  %609 = vst [vmem:[#allocation3 + $0x218] sm:$0xff] %v10137_v1 }
 0x14a   : > { %610 = vst [vmem:[#allocation3 + $0x220] sm:$0xff] %v10137_v1  ;;  %611 = vst [vmem:[#allocation3 + $0x228] sm:$0xff] %v10137_v1 }
 0x14b   : > { %612 = vst [vmem:[#allocation3 + $0x230] sm:$0xff] %v10137_v1  ;;  %613 = vst [vmem:[#allocation3 + $0x238] sm:$0xff] %v10137_v1 }
 0x14c   : > { %614 = vst [vmem:[#allocation3 + $0x240] sm:$0xff] %v10137_v1  ;;  %615 = vst [vmem:[#allocation3 + $0x248] sm:$0xff] %v10137_v1 }
 0x14d   : > { %616 = vst [vmem:[#allocation3 + $0x250] sm:$0xff] %v10137_v1  ;;  %617 = vst [vmem:[#allocation3 + $0x258] sm:$0xff] %v10137_v1 }
 0x14e   : > { %618 = vst [vmem:[#allocation3 + $0x260] sm:$0xff] %v10137_v1  ;;  %619 = vst [vmem:[#allocation3 + $0x268] sm:$0xff] %v10137_v1 }
 0x14f   : > { %620 = vst [vmem:[#allocation3 + $0x270] sm:$0xff] %v10137_v1  ;;  %621 = vst [vmem:[#allocation3 + $0x278] sm:$0xff] %v10137_v1 }
 0x150   : > { %622 = vst [vmem:[#allocation3 + $0x280] sm:$0xff] %v10137_v1  ;;  %623 = vst [vmem:[#allocation3 + $0x288] sm:$0xff] %v10137_v1 }
 0x151   : > { %624 = vst [vmem:[#allocation3 + $0x290] sm:$0xff] %v10137_v1  ;;  %625 = vst [vmem:[#allocation3 + $0x298] sm:$0xff] %v10137_v1 }
 0x152   : > { %626 = vst [vmem:[#allocation3 + $0x2a0] sm:$0xff] %v10137_v1  ;;  %627 = vst [vmem:[#allocation3 + $0x2a8] sm:$0xff] %v10137_v1 }
 0x153   : > { %628 = vst [vmem:[#allocation3 + $0x2b0] sm:$0xff] %v10137_v1  ;;  %629 = vst [vmem:[#allocation3 + $0x2b8] sm:$0xff] %v10137_v1 }
 0x154   : > { %630 = vst [vmem:[#allocation3 + $0x2c0] sm:$0xff] %v10137_v1  ;;  %631 = vst [vmem:[#allocation3 + $0x2c8] sm:$0xff] %v10137_v1 }
 0x155   : > { %632 = vst [vmem:[#allocation3 + $0x2d0] sm:$0xff] %v10137_v1  ;;  %633 = vst [vmem:[#allocation3 + $0x2d8] sm:$0xff] %v10137_v1 }
 0x156   : > { %634 = vst [vmem:[#allocation3 + $0x2e0] sm:$0xff] %v10137_v1  ;;  %635 = vst [vmem:[#allocation3 + $0x2e8] sm:$0xff] %v10137_v1 }
 0x157   : > { %636 = vst [vmem:[#allocation3 + $0x2f0] sm:$0xff] %v10137_v1  ;;  %637 = vst [vmem:[#allocation3 + $0x2f8] sm:$0xff] %v10137_v1 }
 0x158   : > { %638 = vst [vmem:[#allocation3 + $0x300] sm:$0xff] %v10137_v1  ;;  %639 = vst [vmem:[#allocation3 + $0x308] sm:$0xff] %v10137_v1 }
 0x159   : > { %640 = vst [vmem:[#allocation3 + $0x310] sm:$0xff] %v10137_v1  ;;  %641 = vst [vmem:[#allocation3 + $0x318] sm:$0xff] %v10137_v1 }
 0x15a   : > { %642 = vst [vmem:[#allocation3 + $0x320] sm:$0xff] %v10137_v1  ;;  %643 = vst [vmem:[#allocation3 + $0x328] sm:$0xff] %v10137_v1 }
 0x15b   : > { %644 = vst [vmem:[#allocation3 + $0x330] sm:$0xff] %v10137_v1  ;;  %645 = vst [vmem:[#allocation3 + $0x338] sm:$0xff] %v10137_v1 }
 0x15c   : > { %646 = vst [vmem:[#allocation3 + $0x340] sm:$0xff] %v10137_v1  ;;  %647 = vst [vmem:[#allocation3 + $0x348] sm:$0xff] %v10137_v1 }
 0x15d   : > { %648 = vst [vmem:[#allocation3 + $0x350] sm:$0xff] %v10137_v1  ;;  %649 = vst [vmem:[#allocation3 + $0x358] sm:$0xff] %v10137_v1 }
 0x15e   : > { %650 = vst [vmem:[#allocation3 + $0x360] sm:$0xff] %v10137_v1  ;;  %651 = vst [vmem:[#allocation3 + $0x368] sm:$0xff] %v10137_v1 }
 0x15f   : > { %652 = vst [vmem:[#allocation3 + $0x370] sm:$0xff] %v10137_v1  ;;  %653 = vst [vmem:[#allocation3 + $0x378] sm:$0xff] %v10137_v1 }
 0x160   : > { %654 = vst [vmem:[#allocation3 + $0x380] sm:$0xff] %v10137_v1  ;;  %655 = vst [vmem:[#allocation3 + $0x388] sm:$0xff] %v10137_v1 }
 0x161   : > { %656 = vst [vmem:[#allocation3 + $0x390] sm:$0xff] %v10137_v1  ;;  %657 = vst [vmem:[#allocation3 + $0x398] sm:$0xff] %v10137_v1 }
 0x162   : > { %658 = vst [vmem:[#allocation3 + $0x3a0] sm:$0xff] %v10137_v1  ;;  %659 = vst [vmem:[#allocation3 + $0x3a8] sm:$0xff] %v10137_v1 }
 0x163   : > { %660 = vst [vmem:[#allocation3 + $0x3b0] sm:$0xff] %v10137_v1  ;;  %661 = vst [vmem:[#allocation3 + $0x3b8] sm:$0xff] %v10137_v1 }
 0x164   : > { %662 = vst [vmem:[#allocation3 + $0x3c0] sm:$0xff] %v10137_v1  ;;  %663 = vst [vmem:[#allocation3 + $0x3c8] sm:$0xff] %v10137_v1 }
 0x165   : > { %664 = vst [vmem:[#allocation3 + $0x3d0] sm:$0xff] %v10137_v1  ;;  %665 = vst [vmem:[#allocation3 + $0x3d8] sm:$0xff] %v10137_v1 }
 0x166   : > { %666 = vst [vmem:[#allocation3 + $0x3e0] sm:$0xff] %v10137_v1  ;;  %667 = vst [vmem:[#allocation3 + $0x3e8] sm:$0xff] %v10137_v1 }
 0x167   : > { %668 = vst [vmem:[#allocation3 + $0x3f0] sm:$0xff] %v10137_v1  ;;  %669 = vst [vmem:[#allocation3 + $0x3f8] sm:$0xff] %v10137_v1 }
 0x168 PF: > { %v670_v2 = vld [vmem:[%s10447_s26] sm:$0xff]  ;;  %v10729_v4 = vld [vmem:[%s10447_s26 + $0x18] sm:$0xff]  ;;  %v799_v6 = vld [vmem:[#allocation2 + $0x8] sm:$0xff]  ;;  %p8803_p10 = scmp.ne.s32.totalorder %s10205_s11, 2 }
 0x169   : > { %v798_v3 = vld [vmem:[#allocation2] sm:$0xff]  ;;  %v672_v7 = vld [vmem:[%s10447_s26 + $0x30] sm:$0xff]  ;;  %v927_v9 = vmax.f32 %v799_v6, %v10729_v4  ;;  %v10734_v11 = vld [vmem:[%s10447_s26 + $0x48] sm:$0xff]  ;;  %vm4845_vm0 = vcmask (!%p8803_p10), 130112   ;;  %vm4852_vm1 = vcmask (!%p8803_p10), 195712   ;;  %vm4859_vm2 = vcmask (!%p8803_p10), 261312  }
 0x16a   : > { %v926_v5 = vmax.f32 %v798_v3, %v670_v2  ;;  %v800_v8 = vld [vmem:[#allocation2 + $0x10] sm:$0xff]  ;;  %v801_v12 = vld [vmem:[#allocation2 + $0x18] sm:$0xff]  ;;  %v10737_v13 = vld [vmem:[%s10447_s26 + $0x60] sm:$0xff]  ;;  %vm4866_vm3 = vcmask (!%p8803_p10), 326912   ;;  %vm4873_vm4 = vcmask (!%p8803_p10), 392512   ;;  %vm4880_vm5 = vcmask (!%p8803_p10), 458112  }
 0x16b   : > { %v928_v10 = vmax.f32 %v800_v8, %v672_v7  ;;  %v929_v14 = vmax.f32 %v801_v12, %v10734_v11  ;;  %v802_v15 = vld [vmem:[#allocation2 + $0x20] sm:$0xff]  ;;  %v675_v16 = vld [vmem:[%s10447_s26 + $0x78] sm:$0xff]  ;;  %v803_v17 = vld [vmem:[#allocation2 + $0x28] sm:$0xff]  ;;  %1055 = vst [vmem:[#allocation2 + $0x8] sm:$0xff] %v927_v9  ;;  %vm4887_vm6 = vcmask (!%p8803_p10), 523712   ;;  %vm4894_vm7 = vcmask (!%p8803_p10), 589312  }
 0x16c   : > { %1054 = vst [vmem:[#allocation2] sm:$0xff] %v926_v5  ;;  %v930_v18 = vmax.f32 %v802_v15, %v10737_v13  ;;  %v931_v19 = vmax.f32 %v803_v17, %v675_v16  ;;  %v10743_v20 = vld [vmem:[%s10447_s26 + $0x90] sm:$0xff]  ;;  %v10746_v22 = vld [vmem:[%s10447_s26 + $0xa8] sm:$0xff]  ;;  %v805_v24 = vld [vmem:[#allocation2 + $0x38] sm:$0xff]  ;;  %vm4901_vm8 = vcmask (!%p8803_p10), 654912   ;;  %vm4908_vm9 = vcmask (!%p8803_p10), 720512  }
 0x16d   : > { %1056 = vst [vmem:[#allocation2 + $0x10] sm:$0xff] %v928_v10  ;;  %v804_v21 = vld [vmem:[#allocation2 + $0x30] sm:$0xff]  ;;  %1057 = vst [vmem:[#allocation2 + $0x18] sm:$0xff] %v929_v14  ;;  %v10750_v25 = vld [vmem:[%s10447_s26 + $0xc0] sm:$0xff]  ;;  %v933_v27 = vmax.f32 %v805_v24, %v10746_v22  ;;  %vm4915_vm10 = vcmask (!%p8803_p10), 786112   ;;  %vm4922_vm11 = vcmask (!%p8803_p10), 851712  }
 0x16e   : > { %v932_v23 = vmax.f32 %v804_v21, %v10743_v20  ;;  %v806_v26 = vld [vmem:[#allocation2 + $0x40] sm:$0xff]  ;;  %1058 = vst [vmem:[#allocation2 + $0x20] sm:$0xff] %v930_v18  ;;  %1059 = vst [vmem:[#allocation2 + $0x28] sm:$0xff] %v931_v19  ;;  %v10755_v29 = vld [vmem:[%s10447_s26 + $0xd8] sm:$0xff]  ;;  %vm4929_vm12 = vcmask (!%p8803_p10), 917312   ;;  %vm4936_vm13 = vcmask (!%p8803_p10), 982912  }
 0x16f   : > { %v934_v28 = vmax.f32 %v806_v26, %v10750_v25  ;;  %v807_v30 = vld [vmem:[#allocation2 + $0x48] sm:$0xff]  ;;  %v10758_v31 = vld [vmem:[%s10447_s26 + $0xf0] sm:$0xff]  ;;  %v809_v35 = vld [vmem:[#allocation2 + $0x58] sm:$0xff]  ;;  %1061 = vst [vmem:[#allocation2 + $0x38] sm:$0xff] %v933_v27  ;;  %vm4943_vm14 = vcmask (!%p8803_p10), 1048512   ;;  %vm5498_vm15 = vcmask (!%p8803_p10), 1041409  }
 0x170   : > { %1060 = vst [vmem:[#allocation2 + $0x30] sm:$0xff] %v932_v23  ;;  %v935_v32 = vmax.f32 %v807_v30, %v10755_v29  ;;  %v808_v33 = vld [vmem:[#allocation2 + $0x50] sm:$0xff]  ;;  %v10762_v34 = vld [vmem:[%s10447_s26 + $0x108] sm:$0xff]  ;;  %v10767_v38 = vld [vmem:[%s10447_s26 + $0x120] sm:$0xff] }
 0x171   : > { %1062 = vst [vmem:[#allocation2 + $0x40] sm:$0xff] %v934_v28  ;;  %v936_v36 = vmax.f32 %v808_v33, %v10758_v31  ;;  %v937_v37 = vmax.f32 %v809_v35, %v10762_v34  ;;  %v810_v39 = vld [vmem:[#allocation2 + $0x60] sm:$0xff]  ;;  %v10770_v40 = vld [vmem:[%s10447_s26 + $0x138] sm:$0xff]  ;;  %v811_v42 = vld [vmem:[#allocation2 + $0x68] sm:$0xff] }
 0x172   : > { %1063 = vst [vmem:[#allocation2 + $0x48] sm:$0xff] %v935_v32  ;;  %v938_v41 = vmax.f32 %v810_v39, %v10767_v38  ;;  %v10774_v43 = vld [vmem:[%s10447_s26 + $0x150] sm:$0xff]  ;;  %v939_v45 = vmax.f32 %v811_v42, %v10770_v40  ;;  %v10779_v47 = vld [vmem:[%s10447_s26 + $0x168] sm:$0xff]  ;;  %v813_v48 = vld [vmem:[#allocation2 + $0x78] sm:$0xff] }
 0x173   : > { %v812_v44 = vld [vmem:[#allocation2 + $0x70] sm:$0xff]  ;;  %1064 = vst [vmem:[#allocation2 + $0x50] sm:$0xff] %v936_v36  ;;  %1065 = vst [vmem:[#allocation2 + $0x58] sm:$0xff] %v937_v37  ;;  %v10782_v49 = vld [vmem:[%s10447_s26 + $0x180] sm:$0xff]  ;;  %v941_v50 = vmax.f32 %v813_v48, %v10779_v47 }
 0x174   : > { %v940_v46 = vmax.f32 %v812_v44, %v10774_v43  ;;  %1066 = vst [vmem:[#allocation2 + $0x60] sm:$0xff] %v938_v41  ;;  %v814_v51 = vld [vmem:[#allocation2 + $0x80] sm:$0xff]  ;;  %v10786_v52 = vld [vmem:[%s10447_s26 + $0x198] sm:$0xff]  ;;  %v815_v53 = vld [vmem:[#allocation2 + $0x88] sm:$0xff] }
 0x175   : > { %1067 = vst [vmem:[#allocation2 + $0x68] sm:$0xff] %v939_v45  ;;  %v942_v54 = vmax.f32 %v814_v51, %v10782_v49  ;;  %v943_v55 = vmax.f32 %v815_v53, %v10786_v52  ;;  %v10791_v56 = vld [vmem:[%s10447_s26 + $0x1b0] sm:$0xff]  ;;  %v10794_v58 = vld [vmem:[%s10447_s26 + $0x1c8] sm:$0xff]  ;;  %1069 = vst [vmem:[#allocation2 + $0x78] sm:$0xff] %v941_v50 }
 0x176   : > { %1068 = vst [vmem:[#allocation2 + $0x70] sm:$0xff] %v940_v46  ;;  %v816_v57 = vld [vmem:[#allocation2 + $0x90] sm:$0xff]  ;;  %v817_v60 = vld [vmem:[#allocation2 + $0x98] sm:$0xff]  ;;  %v10798_v61 = vld [vmem:[%s10447_s26 + $0x1e0] sm:$0xff] }
 0x177   : > { %v944_v59 = vmax.f32 %v816_v57, %v10791_v56  ;;  %v818_v62 = vld [vmem:[#allocation2 + $0xa0] sm:$0xff]  ;;  %1070 = vst [vmem:[#allocation2 + $0x80] sm:$0xff] %v942_v54  ;;  %1071 = vst [vmem:[#allocation2 + $0x88] sm:$0xff] %v943_v55  ;;  %v945_v63 = vmax.f32 %v817_v60, %v10794_v58  ;;  %v10803_v1 = vld [vmem:[%s10447_s26 + $0x1f8] sm:$0xff] }
 0x178   : > { %v946_v0 = vmax.f32 %v818_v62, %v10798_v61  ;;  %v819_v2 = vld [vmem:[#allocation2 + $0xa8] sm:$0xff]  ;;  %v10806_v3 = vld [vmem:[%s10447_s26 + $0x210] sm:$0xff]  ;;  %v821_v8 = vld [vmem:[#allocation2 + $0xb8] sm:$0xff] }
 0x179   : > { %1072 = vst [vmem:[#allocation2 + $0x90] sm:$0xff] %v944_v59  ;;  %v947_v5 = vmax.f32 %v819_v2, %v10803_v1  ;;  %v820_v6 = vld [vmem:[#allocation2 + $0xb0] sm:$0xff]  ;;  %v10810_v7 = vld [vmem:[%s10447_s26 + $0x228] sm:$0xff]  ;;  %1073 = vst [vmem:[#allocation2 + $0x98] sm:$0xff] %v945_v63 }
 0x17a   : > { %1074 = vst [vmem:[#allocation2 + $0xa0] sm:$0xff] %v946_v0  ;;  %v948_v9 = vmax.f32 %v820_v6, %v10806_v3  ;;  %v949_v10 = vmax.f32 %v821_v8, %v10810_v7  ;;  %v10815_v12 = vld [vmem:[%s10447_s26 + $0x240] sm:$0xff]  ;;  %v10818_v15 = vld [vmem:[%s10447_s26 + $0x258] sm:$0xff]  ;;  %v823_v17 = vld [vmem:[#allocation2 + $0xc8] sm:$0xff] }
 0x17b   : > { %v822_v14 = vld [vmem:[#allocation2 + $0xc0] sm:$0xff]  ;;  %1075 = vst [vmem:[#allocation2 + $0xa8] sm:$0xff] %v947_v5  ;;  %v10822_v18 = vld [vmem:[%s10447_s26 + $0x270] sm:$0xff]  ;;  %v951_v21 = vmax.f32 %v823_v17, %v10818_v15  ;;  %v10827_v24 = vld [vmem:[%s10447_s26 + $0x288] sm:$0xff] }
 0x17c   : > { %v950_v16 = vmax.f32 %v822_v14, %v10815_v12  ;;  %v824_v19 = vld [vmem:[#allocation2 + $0xd0] sm:$0xff]  ;;  %1076 = vst [vmem:[#allocation2 + $0xb0] sm:$0xff] %v948_v9  ;;  %1077 = vst [vmem:[#allocation2 + $0xb8] sm:$0xff] %v949_v10  ;;  %v825_v26 = vld [vmem:[#allocation2 + $0xd8] sm:$0xff] }
 0x17d   : > { %v952_v23 = vmax.f32 %v824_v19, %v10822_v18  ;;  %v10830_v27 = vld [vmem:[%s10447_s26 + $0x2a0] sm:$0xff]  ;;  %v953_v28 = vmax.f32 %v825_v26, %v10827_v24  ;;  %v10834_v32 = vld [vmem:[%s10447_s26 + $0x2b8] sm:$0xff]  ;;  %v827_v33 = vld [vmem:[#allocation2 + $0xe8] sm:$0xff]  ;;  %1079 = vst [vmem:[#allocation2 + $0xc8] sm:$0xff] %v951_v21 }
 0x17e   : > { %1078 = vst [vmem:[#allocation2 + $0xc0] sm:$0xff] %v950_v16  ;;  %v826_v30 = vld [vmem:[#allocation2 + $0xe0] sm:$0xff]  ;;  %v955_v36 = vmax.f32 %v827_v33, %v10834_v32  ;;  %v10839_v37 = vld [vmem:[%s10447_s26 + $0x2d0] sm:$0xff]  ;;  %v10842_v41 = vld [vmem:[%s10447_s26 + $0x2e8] sm:$0xff] }
 0x17f   : > { %1080 = vst [vmem:[#allocation2 + $0xd0] sm:$0xff] %v952_v23  ;;  %v954_v35 = vmax.f32 %v826_v30, %v10830_v27  ;;  %v828_v39 = vld [vmem:[#allocation2 + $0xf0] sm:$0xff]  ;;  %1081 = vst [vmem:[#allocation2 + $0xd8] sm:$0xff] %v953_v28  ;;  %v829_v44 = vld [vmem:[#allocation2 + $0xf8] sm:$0xff] }
 0x180   : > { %v956_v42 = vmax.f32 %v828_v39, %v10839_v37  ;;  %v10846_v45 = vld [vmem:[%s10447_s26 + $0x300] sm:$0xff]  ;;  %1083 = vst [vmem:[#allocation2 + $0xe8] sm:$0xff] %v955_v36  ;;  %v957_v48 = vmax.f32 %v829_v44, %v10842_v41  ;;  %v10851_v51 = vld [vmem:[%s10447_s26 + $0x318] sm:$0xff]  ;;  %v831_v53 = vld [vmem:[#allocation2 + $0x108] sm:$0xff] }
 0x181   : > { %v830_v46 = vld [vmem:[#allocation2 + $0x100] sm:$0xff]  ;;  %1082 = vst [vmem:[#allocation2 + $0xe0] sm:$0xff] %v954_v35  ;;  %v10854_v54 = vld [vmem:[%s10447_s26 + $0x330] sm:$0xff]  ;;  %v959_v55 = vmax.f32 %v831_v53, %v10851_v51  ;;  %v10858_v59 = vld [vmem:[%s10447_s26 + $0x348] sm:$0xff] }
 0x182   : > { %v958_v50 = vmax.f32 %v830_v46, %v10846_v45  ;;  %1084 = vst [vmem:[#allocation2 + $0xf0] sm:$0xff] %v956_v42  ;;  %v832_v57 = vld [vmem:[#allocation2 + $0x110] sm:$0xff]  ;;  %v833_v60 = vld [vmem:[#allocation2 + $0x118] sm:$0xff]  ;;  %1085 = vst [vmem:[#allocation2 + $0xf8] sm:$0xff] %v957_v48 }
 0x183   : > { %v960_v62 = vmax.f32 %v832_v57, %v10854_v54  ;;  %v961_v63 = vmax.f32 %v833_v60, %v10858_v59  ;;  %v10863_v0 = vld [vmem:[%s10447_s26 + $0x360] sm:$0xff]  ;;  %v10866_v5 = vld [vmem:[%s10447_s26 + $0x378] sm:$0xff]  ;;  %1087 = vst [vmem:[#allocation2 + $0x108] sm:$0xff] %v959_v55  ;;  %v835_v8 = vld [vmem:[#allocation2 + $0x128] sm:$0xff] }
 0x184   : > { %1086 = vst [vmem:[#allocation2 + $0x100] sm:$0xff] %v958_v50  ;;  %v834_v2 = vld [vmem:[#allocation2 + $0x120] sm:$0xff]  ;;  %v10870_v9 = vld [vmem:[%s10447_s26 + $0x390] sm:$0xff]  ;;  %v963_v14 = vmax.f32 %v835_v8, %v10866_v5  ;;  %v10875_v17 = vld [vmem:[%s10447_s26 + $0x3a8] sm:$0xff] }
 0x185   : > { %v962_v6 = vmax.f32 %v834_v2, %v10863_v0  ;;  %v836_v10 = vld [vmem:[#allocation2 + $0x130] sm:$0xff]  ;;  %1088 = vst [vmem:[#allocation2 + $0x110] sm:$0xff] %v960_v62  ;;  %1089 = vst [vmem:[#allocation2 + $0x118] sm:$0xff] %v961_v63  ;;  %v837_v19 = vld [vmem:[#allocation2 + $0x138] sm:$0xff] }
 0x186   : > { %v964_v16 = vmax.f32 %v836_v10, %v10870_v9  ;;  %v10878_v21 = vld [vmem:[%s10447_s26 + $0x3c0] sm:$0xff]  ;;  %v965_v23 = vmax.f32 %v837_v19, %v10875_v17  ;;  %v10882_v28 = vld [vmem:[%s10447_s26 + $0x3d8] sm:$0xff]  ;;  %v839_v30 = vld [vmem:[#allocation2 + $0x148] sm:$0xff]  ;;  %1091 = vst [vmem:[#allocation2 + $0x128] sm:$0xff] %v963_v14 }
 0x187   : > { %1090 = vst [vmem:[#allocation2 + $0x120] sm:$0xff] %v962_v6  ;;  %v838_v26 = vld [vmem:[#allocation2 + $0x140] sm:$0xff]  ;;  %v967_v35 = vmax.f32 %v839_v30, %v10882_v28  ;;  %v10887_v36 = vld [vmem:[%s10447_s26 + $0x3f0] sm:$0xff]  ;;  %v10890_v42 = vld [vmem:[%s10447_s26 + $0x408] sm:$0xff] }
 0x188   : > { %1092 = vst [vmem:[#allocation2 + $0x130] sm:$0xff] %v964_v16  ;;  %v966_v33 = vmax.f32 %v838_v26, %v10878_v21  ;;  %v840_v39 = vld [vmem:[#allocation2 + $0x150] sm:$0xff]  ;;  %1093 = vst [vmem:[#allocation2 + $0x138] sm:$0xff] %v965_v23  ;;  %v841_v46 = vld [vmem:[#allocation2 + $0x158] sm:$0xff] }
 0x189   : > { %v968_v44 = vmax.f32 %v840_v39, %v10887_v36  ;;  %v10894_v48 = vld [vmem:[%s10447_s26 + $0x420] sm:$0xff]  ;;  %1095 = vst [vmem:[#allocation2 + $0x148] sm:$0xff] %v967_v35  ;;  %v969_v53 = vmax.f32 %v841_v46, %v10890_v42  ;;  %v10899_v57 = vld [vmem:[%s10447_s26 + $0x438] sm:$0xff]  ;;  %v843_v60 = vld [vmem:[#allocation2 + $0x168] sm:$0xff] }
 0x18a   : > { %v842_v50 = vld [vmem:[#allocation2 + $0x160] sm:$0xff]  ;;  %1094 = vst [vmem:[#allocation2 + $0x140] sm:$0xff] %v966_v33  ;;  %v10902_v62 = vld [vmem:[%s10447_s26 + $0x450] sm:$0xff]  ;;  %v971_v63 = vmax.f32 %v843_v60, %v10899_v57  ;;  %v10906_v6 = vld [vmem:[%s10447_s26 + $0x468] sm:$0xff] }
 0x18b   : > { %v970_v55 = vmax.f32 %v842_v50, %v10894_v48  ;;  %1096 = vst [vmem:[#allocation2 + $0x150] sm:$0xff] %v968_v44  ;;  %v844_v2 = vld [vmem:[#allocation2 + $0x170] sm:$0xff]  ;;  %v845_v8 = vld [vmem:[#allocation2 + $0x178] sm:$0xff]  ;;  %1097 = vst [vmem:[#allocation2 + $0x158] sm:$0xff] %v969_v53 }
 0x18c   : > { %v972_v10 = vmax.f32 %v844_v2, %v10902_v62  ;;  %v973_v14 = vmax.f32 %v845_v8, %v10906_v6  ;;  %v10911_v16 = vld [vmem:[%s10447_s26 + $0x480] sm:$0xff]  ;;  %v10914_v23 = vld [vmem:[%s10447_s26 + $0x498] sm:$0xff]  ;;  %1099 = vst [vmem:[#allocation2 + $0x168] sm:$0xff] %v971_v63  ;;  %v847_v30 = vld [vmem:[#allocation2 + $0x188] sm:$0xff] }
 0x18d   : > { %1098 = vst [vmem:[#allocation2 + $0x160] sm:$0xff] %v970_v55  ;;  %13862 = vst [vmem:[#allocation25_spill] sm:$0xff] %v10911_v16  ;;  %v846_v19 = vld [vmem:[#allocation2 + $0x180] sm:$0xff]  ;;  %v10918_v33 = vld [vmem:[%s10447_s26 + $0x4b0] sm:$0xff]  ;;  %v975_v39 = vmax.f32 %v847_v30, %v10914_v23 }
 0x18e   : > { %13863 = vst [vmem:[#allocation26_spill] sm:$0xff] %v10914_v23  ;;  %v974_v26 = vmax.f32 %v846_v19, %v10911_v16  ;;  %13864 = vst [vmem:[#allocation27_spill] sm:$0xff] %v10918_v33  ;;  %v848_v35 = vld [vmem:[#allocation2 + $0x190] sm:$0xff]  ;;  %v10923_v46 = vld [vmem:[%s10447_s26 + $0x4c8] sm:$0xff] }
 0x18f   : > { %1100 = vst [vmem:[#allocation2 + $0x170] sm:$0xff] %v972_v10  ;;  %1101 = vst [vmem:[#allocation2 + $0x178] sm:$0xff] %v973_v14  ;;  %v976_v44 = vmax.f32 %v848_v35, %v10918_v33  ;;  %v849_v50 = vld [vmem:[#allocation2 + $0x198] sm:$0xff]  ;;  %v10926_v53 = vld [vmem:[%s10447_s26 + $0x4e0] sm:$0xff] }
 0x190   : > { %13865 = vst [vmem:[#allocation28_spill] sm:$0xff] %v10923_v46  ;;  %13866 = vst [vmem:[#allocation29_spill] sm:$0xff] %v10926_v53  ;;  %v977_v55 = vmax.f32 %v849_v50, %v10923_v46  ;;  %v850_v60 = vld [vmem:[#allocation2 + $0x1a0] sm:$0xff]  ;;  %v10930_v63 = vld [vmem:[%s10447_s26 + $0x4f8] sm:$0xff] }
 0x191   : > { %1102 = vst [vmem:[#allocation2 + $0x180] sm:$0xff] %v974_v26  ;;  %13867 = vst [vmem:[#allocation30_spill] sm:$0xff] %v10930_v63  ;;  %v851_v2 = vld [vmem:[#allocation2 + $0x1a8] sm:$0xff]  ;;  %v978_v8 = vmax.f32 %v850_v60, %v10926_v53  ;;  %v10935_v14 = vld [vmem:[%s10447_s26 + $0x510] sm:$0xff] }
 0x192   : > { %1103 = vst [vmem:[#allocation2 + $0x188] sm:$0xff] %v975_v39  ;;  %1104 = vst [vmem:[#allocation2 + $0x190] sm:$0xff] %v976_v44  ;;  %v979_v10 = vmax.f32 %v851_v2, %v10930_v63  ;;  %v852_v19 = vld [vmem:[#allocation2 + $0x1b0] sm:$0xff]  ;;  %v10938_v30 = vld [vmem:[%s10447_s26 + $0x528] sm:$0xff] }
 0x193   : > { %13868 = vst [vmem:[#allocation31_spill] sm:$0xff] %v10935_v14  ;;  %13869 = vst [vmem:[#allocation32_spill] sm:$0xff] %v10938_v30  ;;  %v980_v26 = vmax.f32 %v852_v19, %v10935_v14  ;;  %v853_v35 = vld [vmem:[#allocation2 + $0x1b8] sm:$0xff]  ;;  %v10942_v50 = vld [vmem:[%s10447_s26 + $0x540] sm:$0xff] }
 0x194   : > { %1105 = vst [vmem:[#allocation2 + $0x198] sm:$0xff] %v977_v55  ;;  %13870 = vst [vmem:[#allocation33_spill] sm:$0xff] %v10942_v50  ;;  %v854_v39 = vld [vmem:[#allocation2 + $0x1c0] sm:$0xff]  ;;  %v981_v44 = vmax.f32 %v853_v35, %v10938_v30  ;;  %v10947_v2 = vld [vmem:[%s10447_s26 + $0x558] sm:$0xff] }
 0x195   : > { %1106 = vst [vmem:[#allocation2 + $0x1a0] sm:$0xff] %v978_v8  ;;  %1107 = vst [vmem:[#allocation2 + $0x1a8] sm:$0xff] %v979_v10  ;;  %v982_v60 = vmax.f32 %v854_v39, %v10942_v50  ;;  %v855_v63 = vld [vmem:[#allocation2 + $0x1c8] sm:$0xff]  ;;  %v10950_v53 = vld [vmem:[%s10447_s26 + $0x570] sm:$0xff] }
 0x196   : > { %13871 = vst [vmem:[#allocation34_spill] sm:$0xff] %v10947_v2  ;;  %13872 = vst [vmem:[#allocation35_spill] sm:$0xff] %v10950_v53  ;;  %v983_v55 = vmax.f32 %v855_v63, %v10947_v2  ;;  %v856_v19 = vld [vmem:[#allocation2 + $0x1d0] sm:$0xff]  ;;  %v10954_v14 = vld [vmem:[%s10447_s26 + $0x588] sm:$0xff] }
 0x197   : > { %1108 = vst [vmem:[#allocation2 + $0x1b0] sm:$0xff] %v980_v26  ;;  %13873 = vst [vmem:[#allocation36_spill] sm:$0xff] %v10954_v14  ;;  %v857_v8 = vld [vmem:[#allocation2 + $0x1d8] sm:$0xff]  ;;  %v984_v10 = vmax.f32 %v856_v19, %v10950_v53  ;;  %v10959_v39 = vld [vmem:[%s10447_s26 + $0x5a0] sm:$0xff] }
 0x198   : > { %1109 = vst [vmem:[#allocation2 + $0x1b8] sm:$0xff] %v981_v44  ;;  %1110 = vst [vmem:[#allocation2 + $0x1c0] sm:$0xff] %v982_v60  ;;  %v985_v35 = vmax.f32 %v857_v8, %v10954_v14  ;;  %v858_v50 = vld [vmem:[#allocation2 + $0x1e0] sm:$0xff]  ;;  %v10962_v30 = vld [vmem:[%s10447_s26 + $0x5b8] sm:$0xff] }
 0x199   : > { %13874 = vst [vmem:[#allocation37_spill] sm:$0xff] %v10959_v39  ;;  %13875 = vst [vmem:[#allocation38_spill] sm:$0xff] %v10962_v30  ;;  %v986_v63 = vmax.f32 %v858_v50, %v10959_v39  ;;  %v859_v26 = vld [vmem:[#allocation2 + $0x1e8] sm:$0xff]  ;;  %v10966_v2 = vld [vmem:[%s10447_s26 + $0x5d0] sm:$0xff] }
 0x19a   : > { %1111 = vst [vmem:[#allocation2 + $0x1c8] sm:$0xff] %v983_v55  ;;  %13876 = vst [vmem:[#allocation39_spill] sm:$0xff] %v10966_v2  ;;  %v860_v44 = vld [vmem:[#allocation2 + $0x1f0] sm:$0xff]  ;;  %v987_v60 = vmax.f32 %v859_v26, %v10962_v30  ;;  %v10971_v8 = vld [vmem:[%s10447_s26 + $0x5e8] sm:$0xff] }
 0x19b   : > { %1112 = vst [vmem:[#allocation2 + $0x1d0] sm:$0xff] %v984_v10  ;;  %1113 = vst [vmem:[#allocation2 + $0x1d8] sm:$0xff] %v985_v35  ;;  %v988_v19 = vmax.f32 %v860_v44, %v10966_v2  ;;  %v861_v14 = vld [vmem:[#allocation2 + $0x1f8] sm:$0xff]  ;;  %v10974_v53 = vld [vmem:[%s10447_s26 + $0x600] sm:$0xff] }
 0x19c   : > { %13877 = vst [vmem:[#allocation40_spill] sm:$0xff] %v10971_v8  ;;  %13878 = vst [vmem:[#allocation41_spill] sm:$0xff] %v10974_v53  ;;  %v989_v50 = vmax.f32 %v861_v14, %v10971_v8  ;;  %v862_v55 = vld [vmem:[#allocation2 + $0x200] sm:$0xff]  ;;  %v10978_v39 = vld [vmem:[%s10447_s26 + $0x618] sm:$0xff] }
 0x19d   : > { %1114 = vst [vmem:[#allocation2 + $0x1e0] sm:$0xff] %v986_v63  ;;  %13879 = vst [vmem:[#allocation42_spill] sm:$0xff] %v10978_v39  ;;  %v863_v10 = vld [vmem:[#allocation2 + $0x208] sm:$0xff]  ;;  %v990_v35 = vmax.f32 %v862_v55, %v10974_v53  ;;  %v10983_v44 = vld [vmem:[%s10447_s26 + $0x630] sm:$0xff] }
 0x19e   : > { %1115 = vst [vmem:[#allocation2 + $0x1e8] sm:$0xff] %v987_v60  ;;  %1116 = vst [vmem:[#allocation2 + $0x1f0] sm:$0xff] %v988_v19  ;;  %v991_v26 = vmax.f32 %v863_v10, %v10978_v39  ;;  %v864_v2 = vld [vmem:[#allocation2 + $0x210] sm:$0xff]  ;;  %v10986_v30 = vld [vmem:[%s10447_s26 + $0x648] sm:$0xff] }
 0x19f   : > { %13880 = vst [vmem:[#allocation43_spill] sm:$0xff] %v10983_v44  ;;  %13881 = vst [vmem:[#allocation44_spill] sm:$0xff] %v10986_v30  ;;  %v992_v14 = vmax.f32 %v864_v2, %v10983_v44  ;;  %v865_v63 = vld [vmem:[#allocation2 + $0x218] sm:$0xff]  ;;  %v10990_v8 = vld [vmem:[%s10447_s26 + $0x660] sm:$0xff] }
 0x1a0   : > { %1117 = vst [vmem:[#allocation2 + $0x1f8] sm:$0xff] %v989_v50  ;;  %13882 = vst [vmem:[#allocation45_spill] sm:$0xff] %v10990_v8  ;;  %v866_v60 = vld [vmem:[#allocation2 + $0x220] sm:$0xff]  ;;  %v993_v19 = vmax.f32 %v865_v63, %v10986_v30  ;;  %v10995_v10 = vld [vmem:[%s10447_s26 + $0x678] sm:$0xff] }
 0x1a1   : > { %1118 = vst [vmem:[#allocation2 + $0x200] sm:$0xff] %v990_v35  ;;  %1119 = vst [vmem:[#allocation2 + $0x208] sm:$0xff] %v991_v26  ;;  %v994_v55 = vmax.f32 %v866_v60, %v10990_v8  ;;  %v867_v39 = vld [vmem:[#allocation2 + $0x228] sm:$0xff]  ;;  %v10998_v53 = vld [vmem:[%s10447_s26 + $0x690] sm:$0xff] }
 0x1a2   : > { %13883 = vst [vmem:[#allocation46_spill] sm:$0xff] %v10995_v10  ;;  %13884 = vst [vmem:[#allocation47_spill] sm:$0xff] %v10998_v53  ;;  %v995_v2 = vmax.f32 %v867_v39, %v10995_v10  ;;  %v868_v50 = vld [vmem:[#allocation2 + $0x230] sm:$0xff]  ;;  %v11002_v44 = vld [vmem:[%s10447_s26 + $0x6a8] sm:$0xff] }
 0x1a3   : > { %1120 = vst [vmem:[#allocation2 + $0x210] sm:$0xff] %v992_v14  ;;  %13885 = vst [vmem:[#allocation48_spill] sm:$0xff] %v11002_v44  ;;  %v869_v35 = vld [vmem:[#allocation2 + $0x238] sm:$0xff]  ;;  %v996_v26 = vmax.f32 %v868_v50, %v10998_v53  ;;  %v11007_v60 = vld [vmem:[%s10447_s26 + $0x6c0] sm:$0xff] }
 0x1a4   : > { %1121 = vst [vmem:[#allocation2 + $0x218] sm:$0xff] %v993_v19  ;;  %1122 = vst [vmem:[#allocation2 + $0x220] sm:$0xff] %v994_v55  ;;  %v997_v63 = vmax.f32 %v869_v35, %v11002_v44  ;;  %v870_v8 = vld [vmem:[#allocation2 + $0x240] sm:$0xff]  ;;  %v11010_v30 = vld [vmem:[%s10447_s26 + $0x6d8] sm:$0xff] }
 0x1a5   : > { %13886 = vst [vmem:[#allocation49_spill] sm:$0xff] %v11007_v60  ;;  %13887 = vst [vmem:[#allocation50_spill] sm:$0xff] %v11010_v30  ;;  %v998_v39 = vmax.f32 %v870_v8, %v11007_v60  ;;  %v871_v14 = vld [vmem:[#allocation2 + $0x248] sm:$0xff]  ;;  %v11014_v10 = vld [vmem:[%s10447_s26 + $0x6f0] sm:$0xff] }
 0x1a6   : > { %1123 = vst [vmem:[#allocation2 + $0x228] sm:$0xff] %v995_v2  ;;  %13888 = vst [vmem:[#allocation51_spill] sm:$0xff] %v11014_v10  ;;  %v872_v19 = vld [vmem:[#allocation2 + $0x250] sm:$0xff]  ;;  %v999_v55 = vmax.f32 %v871_v14, %v11010_v30  ;;  %v11019_v35 = vld [vmem:[%s10447_s26 + $0x708] sm:$0xff] }
 0x1a7   : > { %1124 = vst [vmem:[#allocation2 + $0x230] sm:$0xff] %v996_v26  ;;  %1125 = vst [vmem:[#allocation2 + $0x238] sm:$0xff] %v997_v63  ;;  %v1000_v50 = vmax.f32 %v872_v19, %v11014_v10  ;;  %v873_v44 = vld [vmem:[#allocation2 + $0x258] sm:$0xff]  ;;  %v11022_v53 = vld [vmem:[%s10447_s26 + $0x720] sm:$0xff] }
 0x1a8   : > { %13889 = vst [vmem:[#allocation52_spill] sm:$0xff] %v11019_v35  ;;  %13890 = vst [vmem:[#allocation53_spill] sm:$0xff] %v11022_v53  ;;  %v1001_v8 = vmax.f32 %v873_v44, %v11019_v35  ;;  %v874_v2 = vld [vmem:[#allocation2 + $0x260] sm:$0xff]  ;;  %v11026_v60 = vld [vmem:[%s10447_s26 + $0x738] sm:$0xff] }
 0x1a9   : > { %1126 = vst [vmem:[#allocation2 + $0x240] sm:$0xff] %v998_v39  ;;  %13891 = vst [vmem:[#allocation54_spill] sm:$0xff] %v11026_v60  ;;  %v875_v26 = vld [vmem:[#allocation2 + $0x268] sm:$0xff]  ;;  %v1002_v63 = vmax.f32 %v874_v2, %v11022_v53  ;;  %v11031_v19 = vld [vmem:[%s10447_s26 + $0x750] sm:$0xff] }
 0x1aa   : > { %1127 = vst [vmem:[#allocation2 + $0x248] sm:$0xff] %v999_v55  ;;  %1128 = vst [vmem:[#allocation2 + $0x250] sm:$0xff] %v1000_v50  ;;  %v1003_v14 = vmax.f32 %v875_v26, %v11026_v60  ;;  %v876_v10 = vld [vmem:[#allocation2 + $0x270] sm:$0xff]  ;;  %v11034_v30 = vld [vmem:[%s10447_s26 + $0x768] sm:$0xff] }
 0x1ab   : > { %13892 = vst [vmem:[#allocation55_spill] sm:$0xff] %v11031_v19  ;;  %13893 = vst [vmem:[#allocation56_spill] sm:$0xff] %v11034_v30  ;;  %v1004_v44 = vmax.f32 %v876_v10, %v11031_v19  ;;  %v877_v39 = vld [vmem:[#allocation2 + $0x278] sm:$0xff]  ;;  %v11038_v35 = vld [vmem:[%s10447_s26 + $0x780] sm:$0xff] }
 0x1ac   : > { %1129 = vst [vmem:[#allocation2 + $0x258] sm:$0xff] %v1001_v8  ;;  %13894 = vst [vmem:[#allocation57_spill] sm:$0xff] %v11038_v35  ;;  %v878_v55 = vld [vmem:[#allocation2 + $0x280] sm:$0xff]  ;;  %v1005_v50 = vmax.f32 %v877_v39, %v11034_v30  ;;  %v11043_v26 = vld [vmem:[%s10447_s26 + $0x798] sm:$0xff] }
 0x1ad   : > { %1130 = vst [vmem:[#allocation2 + $0x260] sm:$0xff] %v1002_v63  ;;  %1131 = vst [vmem:[#allocation2 + $0x268] sm:$0xff] %v1003_v14  ;;  %v1006_v2 = vmax.f32 %v878_v55, %v11038_v35  ;;  %v879_v60 = vld [vmem:[#allocation2 + $0x288] sm:$0xff]  ;;  %v11046_v53 = vld [vmem:[%s10447_s26 + $0x7b0] sm:$0xff] }
 0x1ae   : > { %13895 = vst [vmem:[#allocation58_spill] sm:$0xff] %v11043_v26  ;;  %13896 = vst [vmem:[#allocation59_spill] sm:$0xff] %v11046_v53  ;;  %v1007_v10 = vmax.f32 %v879_v60, %v11043_v26  ;;  %v880_v8 = vld [vmem:[#allocation2 + $0x290] sm:$0xff]  ;;  %v11050_v19 = vld [vmem:[%s10447_s26 + $0x7c8] sm:$0xff] }
 0x1af   : > { %1132 = vst [vmem:[#allocation2 + $0x270] sm:$0xff] %v1004_v44  ;;  %13897 = vst [vmem:[#allocation60_spill] sm:$0xff] %v11050_v19  ;;  %v881_v63 = vld [vmem:[#allocation2 + $0x298] sm:$0xff]  ;;  %v1008_v14 = vmax.f32 %v880_v8, %v11046_v53  ;;  %v11055_v55 = vld [vmem:[%s10447_s26 + $0x7e0] sm:$0xff] }
 0x1b0   : > { %1133 = vst [vmem:[#allocation2 + $0x278] sm:$0xff] %v1005_v50  ;;  %1134 = vst [vmem:[#allocation2 + $0x280] sm:$0xff] %v1006_v2  ;;  %v1009_v39 = vmax.f32 %v881_v63, %v11050_v19  ;;  %v882_v35 = vld [vmem:[#allocation2 + $0x2a0] sm:$0xff]  ;;  %v11058_v30 = vld [vmem:[%s10447_s26 + $0x7f8] sm:$0xff] }
 0x1b1   : > { %13898 = vst [vmem:[#allocation61_spill] sm:$0xff] %v11055_v55  ;;  %13899 = vst [vmem:[#allocation62_spill] sm:$0xff] %v11058_v30  ;;  %v1010_v60 = vmax.f32 %v882_v35, %v11055_v55  ;;  %v883_v44 = vld [vmem:[#allocation2 + $0x2a8] sm:$0xff]  ;;  %v11062_v26 = vld [vmem:[%s10447_s26 + $0x810] sm:$0xff] }
 0x1b2   : > { %1135 = vst [vmem:[#allocation2 + $0x288] sm:$0xff] %v1007_v10  ;;  %13900 = vst [vmem:[#allocation63_spill] sm:$0xff] %v11062_v26  ;;  %v884_v50 = vld [vmem:[#allocation2 + $0x2b0] sm:$0xff]  ;;  %v1011_v2 = vmax.f32 %v883_v44, %v11058_v30  ;;  %v11067_v63 = vld [vmem:[%s10447_s26 + $0x828] sm:$0xff] }
 0x1b3   : > { %1136 = vst [vmem:[#allocation2 + $0x290] sm:$0xff] %v1008_v14  ;;  %1137 = vst [vmem:[#allocation2 + $0x298] sm:$0xff] %v1009_v39  ;;  %v1012_v8 = vmax.f32 %v884_v50, %v11062_v26  ;;  %v885_v19 = vld [vmem:[#allocation2 + $0x2b8] sm:$0xff]  ;;  %v11070_v53 = vld [vmem:[%s10447_s26 + $0x840] sm:$0xff] }
 0x1b4   : > { %13901 = vst [vmem:[#allocation64_spill] sm:$0xff] %v11067_v63  ;;  %13902 = vst [vmem:[#allocation65_spill] sm:$0xff] %v11070_v53  ;;  %v1013_v35 = vmax.f32 %v885_v19, %v11067_v63  ;;  %v886_v10 = vld [vmem:[#allocation2 + $0x2c0] sm:$0xff]  ;;  %v11074_v55 = vld [vmem:[%s10447_s26 + $0x858] sm:$0xff] }
 0x1b5   : > { %1138 = vst [vmem:[#allocation2 + $0x2a0] sm:$0xff] %v1010_v60  ;;  %13903 = vst [vmem:[#allocation66_spill] sm:$0xff] %v11074_v55  ;;  %v887_v14 = vld [vmem:[#allocation2 + $0x2c8] sm:$0xff]  ;;  %v1014_v39 = vmax.f32 %v886_v10, %v11070_v53  ;;  %v11079_v50 = vld [vmem:[%s10447_s26 + $0x870] sm:$0xff] }
 0x1b6   : > { %1139 = vst [vmem:[#allocation2 + $0x2a8] sm:$0xff] %v1011_v2  ;;  %1140 = vst [vmem:[#allocation2 + $0x2b0] sm:$0xff] %v1012_v8  ;;  %v1015_v44 = vmax.f32 %v887_v14, %v11074_v55  ;;  %v888_v26 = vld [vmem:[#allocation2 + $0x2d0] sm:$0xff]  ;;  %v11082_v30 = vld [vmem:[%s10447_s26 + $0x888] sm:$0xff] }
 0x1b7   : > { %13904 = vst [vmem:[#allocation67_spill] sm:$0xff] %v11079_v50  ;;  %13905 = vst [vmem:[#allocation68_spill] sm:$0xff] %v11082_v30  ;;  %v1016_v19 = vmax.f32 %v888_v26, %v11079_v50  ;;  %v889_v60 = vld [vmem:[#allocation2 + $0x2d8] sm:$0xff]  ;;  %v11086_v63 = vld [vmem:[%s10447_s26 + $0x8a0] sm:$0xff] }
 0x1b8   : > { %1141 = vst [vmem:[#allocation2 + $0x2b8] sm:$0xff] %v1013_v35  ;;  %13906 = vst [vmem:[#allocation69_spill] sm:$0xff] %v11086_v63  ;;  %v890_v2 = vld [vmem:[#allocation2 + $0x2e0] sm:$0xff]  ;;  %v1017_v8 = vmax.f32 %v889_v60, %v11082_v30  ;;  %v11091_v14 = vld [vmem:[%s10447_s26 + $0x8b8] sm:$0xff] }
 0x1b9   : > { %1142 = vst [vmem:[#allocation2 + $0x2c0] sm:$0xff] %v1014_v39  ;;  %1143 = vst [vmem:[#allocation2 + $0x2c8] sm:$0xff] %v1015_v44  ;;  %v1018_v10 = vmax.f32 %v890_v2, %v11086_v63  ;;  %v891_v55 = vld [vmem:[#allocation2 + $0x2e8] sm:$0xff]  ;;  %v11094_v53 = vld [vmem:[%s10447_s26 + $0x8d0] sm:$0xff] }
 0x1ba   : > { %13907 = vst [vmem:[#allocation70_spill] sm:$0xff] %v11091_v14  ;;  %13908 = vst [vmem:[#allocation71_spill] sm:$0xff] %v11094_v53  ;;  %v1019_v26 = vmax.f32 %v891_v55, %v11091_v14  ;;  %v892_v35 = vld [vmem:[#allocation2 + $0x2f0] sm:$0xff]  ;;  %v11098_v50 = vld [vmem:[%s10447_s26 + $0x8e8] sm:$0xff] }
 0x1bb   : > { %1144 = vst [vmem:[#allocation2 + $0x2d0] sm:$0xff] %v1016_v19  ;;  %13909 = vst [vmem:[#allocation72_spill] sm:$0xff] %v11098_v50  ;;  %v893_v39 = vld [vmem:[#allocation2 + $0x2f8] sm:$0xff]  ;;  %v1020_v44 = vmax.f32 %v892_v35, %v11094_v53  ;;  %v11103_v2 = vld [vmem:[%s10447_s26 + $0x900] sm:$0xff] }
 0x1bc   : > { %1145 = vst [vmem:[#allocation2 + $0x2d8] sm:$0xff] %v1017_v8  ;;  %1146 = vst [vmem:[#allocation2 + $0x2e0] sm:$0xff] %v1018_v10  ;;  %v1021_v60 = vmax.f32 %v893_v39, %v11098_v50  ;;  %v894_v63 = vld [vmem:[#allocation2 + $0x300] sm:$0xff]  ;;  %v11106_v30 = vld [vmem:[%s10447_s26 + $0x918] sm:$0xff] }
 0x1bd   : > { %13910 = vst [vmem:[#allocation73_spill] sm:$0xff] %v11103_v2  ;;  %13911 = vst [vmem:[#allocation74_spill] sm:$0xff] %v11106_v30  ;;  %v1022_v55 = vmax.f32 %v894_v63, %v11103_v2  ;;  %v895_v19 = vld [vmem:[#allocation2 + $0x308] sm:$0xff]  ;;  %v11110_v14 = vld [vmem:[%s10447_s26 + $0x930] sm:$0xff] }
 0x1be   : > { %1147 = vst [vmem:[#allocation2 + $0x2e8] sm:$0xff] %v1019_v26  ;;  %13912 = vst [vmem:[#allocation75_spill] sm:$0xff] %v11110_v14  ;;  %v896_v8 = vld [vmem:[#allocation2 + $0x310] sm:$0xff]  ;;  %v1023_v10 = vmax.f32 %v895_v19, %v11106_v30  ;;  %v11115_v39 = vld [vmem:[%s10447_s26 + $0x948] sm:$0xff] }
 0x1bf   : > { %1148 = vst [vmem:[#allocation2 + $0x2f0] sm:$0xff] %v1020_v44  ;;  %1149 = vst [vmem:[#allocation2 + $0x2f8] sm:$0xff] %v1021_v60  ;;  %v1024_v35 = vmax.f32 %v896_v8, %v11110_v14  ;;  %v897_v50 = vld [vmem:[#allocation2 + $0x318] sm:$0xff]  ;;  %v11118_v53 = vld [vmem:[%s10447_s26 + $0x960] sm:$0xff] }
 0x1c0   : > { %13913 = vst [vmem:[#allocation76_spill] sm:$0xff] %v11115_v39  ;;  %13914 = vst [vmem:[#allocation77_spill] sm:$0xff] %v11118_v53  ;;  %v1025_v63 = vmax.f32 %v897_v50, %v11115_v39  ;;  %v898_v26 = vld [vmem:[#allocation2 + $0x320] sm:$0xff]  ;;  %v11122_v2 = vld [vmem:[%s10447_s26 + $0x978] sm:$0xff] }
 0x1c1   : > { %1150 = vst [vmem:[#allocation2 + $0x300] sm:$0xff] %v1022_v55  ;;  %13915 = vst [vmem:[#allocation78_spill] sm:$0xff] %v11122_v2  ;;  %v899_v44 = vld [vmem:[#allocation2 + $0x328] sm:$0xff]  ;;  %v1026_v60 = vmax.f32 %v898_v26, %v11118_v53  ;;  %v11127_v8 = vld [vmem:[%s10447_s26 + $0x990] sm:$0xff] }
 0x1c2   : > { %1151 = vst [vmem:[#allocation2 + $0x308] sm:$0xff] %v1023_v10  ;;  %1152 = vst [vmem:[#allocation2 + $0x310] sm:$0xff] %v1024_v35  ;;  %v1027_v19 = vmax.f32 %v899_v44, %v11122_v2  ;;  %v900_v14 = vld [vmem:[#allocation2 + $0x330] sm:$0xff]  ;;  %v11130_v30 = vld [vmem:[%s10447_s26 + $0x9a8] sm:$0xff] }
 0x1c3   : > { %13916 = vst [vmem:[#allocation79_spill] sm:$0xff] %v11127_v8  ;;  %13917 = vst [vmem:[#allocation80_spill] sm:$0xff] %v11130_v30  ;;  %v1028_v50 = vmax.f32 %v900_v14, %v11127_v8  ;;  %v901_v55 = vld [vmem:[#allocation2 + $0x338] sm:$0xff]  ;;  %v11134_v39 = vld [vmem:[%s10447_s26 + $0x9c0] sm:$0xff] }
 0x1c4   : > { %1153 = vst [vmem:[#allocation2 + $0x318] sm:$0xff] %v1025_v63  ;;  %13918 = vst [vmem:[#allocation81_spill] sm:$0xff] %v11134_v39  ;;  %v902_v10 = vld [vmem:[#allocation2 + $0x340] sm:$0xff]  ;;  %v1029_v35 = vmax.f32 %v901_v55, %v11130_v30  ;;  %v11139_v44 = vld [vmem:[%s10447_s26 + $0x9d8] sm:$0xff] }
 0x1c5   : > { %1154 = vst [vmem:[#allocation2 + $0x320] sm:$0xff] %v1026_v60  ;;  %1155 = vst [vmem:[#allocation2 + $0x328] sm:$0xff] %v1027_v19  ;;  %v1030_v26 = vmax.f32 %v902_v10, %v11134_v39  ;;  %v903_v2 = vld [vmem:[#allocation2 + $0x348] sm:$0xff]  ;;  %v11142_v53 = vld [vmem:[%s10447_s26 + $0x9f0] sm:$0xff] }
 0x1c6   : > { %13919 = vst [vmem:[#allocation82_spill] sm:$0xff] %v11139_v44  ;;  %13920 = vst [vmem:[#allocation83_spill] sm:$0xff] %v11142_v53  ;;  %v1031_v14 = vmax.f32 %v903_v2, %v11139_v44  ;;  %v904_v63 = vld [vmem:[#allocation2 + $0x350] sm:$0xff]  ;;  %v11146_v8 = vld [vmem:[%s10447_s26 + $0xa08] sm:$0xff] }
 0x1c7   : > { %1156 = vst [vmem:[#allocation2 + $0x330] sm:$0xff] %v1028_v50  ;;  %13921 = vst [vmem:[#allocation84_spill] sm:$0xff] %v11146_v8  ;;  %v905_v60 = vld [vmem:[#allocation2 + $0x358] sm:$0xff]  ;;  %v1032_v19 = vmax.f32 %v904_v63, %v11142_v53  ;;  %v11151_v10 = vld [vmem:[%s10447_s26 + $0xa20] sm:$0xff] }
 0x1c8   : > { %1157 = vst [vmem:[#allocation2 + $0x338] sm:$0xff] %v1029_v35  ;;  %1158 = vst [vmem:[#allocation2 + $0x340] sm:$0xff] %v1030_v26  ;;  %v1033_v55 = vmax.f32 %v905_v60, %v11146_v8  ;;  %v906_v39 = vld [vmem:[#allocation2 + $0x360] sm:$0xff]  ;;  %v11154_v30 = vld [vmem:[%s10447_s26 + $0xa38] sm:$0xff] }
 0x1c9   : > { %13922 = vst [vmem:[#allocation85_spill] sm:$0xff] %v11151_v10  ;;  %13923 = vst [vmem:[#allocation86_spill] sm:$0xff] %v11154_v30  ;;  %v1034_v2 = vmax.f32 %v906_v39, %v11151_v10  ;;  %v907_v50 = vld [vmem:[#allocation2 + $0x368] sm:$0xff]  ;;  %v11158_v44 = vld [vmem:[%s10447_s26 + $0xa50] sm:$0xff] }
 0x1ca   : > { %1159 = vst [vmem:[#allocation2 + $0x348] sm:$0xff] %v1031_v14  ;;  %13924 = vst [vmem:[#allocation87_spill] sm:$0xff] %v11158_v44  ;;  %v908_v35 = vld [vmem:[#allocation2 + $0x370] sm:$0xff]  ;;  %v1035_v26 = vmax.f32 %v907_v50, %v11154_v30  ;;  %v11163_v60 = vld [vmem:[%s10447_s26 + $0xa68] sm:$0xff] }
 0x1cb   : > { %1160 = vst [vmem:[#allocation2 + $0x350] sm:$0xff] %v1032_v19  ;;  %1161 = vst [vmem:[#allocation2 + $0x358] sm:$0xff] %v1033_v55  ;;  %v1036_v63 = vmax.f32 %v908_v35, %v11158_v44  ;;  %v909_v8 = vld [vmem:[#allocation2 + $0x378] sm:$0xff]  ;;  %v11166_v53 = vld [vmem:[%s10447_s26 + $0xa80] sm:$0xff] }
 0x1cc   : > { %13925 = vst [vmem:[#allocation88_spill] sm:$0xff] %v11163_v60  ;;  %13926 = vst [vmem:[#allocation89_spill] sm:$0xff] %v11166_v53  ;;  %v1037_v39 = vmax.f32 %v909_v8, %v11163_v60  ;;  %v910_v14 = vld [vmem:[#allocation2 + $0x380] sm:$0xff]  ;;  %v11170_v10 = vld [vmem:[%s10447_s26 + $0xa98] sm:$0xff] }
 0x1cd   : > { %1162 = vst [vmem:[#allocation2 + $0x360] sm:$0xff] %v1034_v2  ;;  %13927 = vst [vmem:[#allocation90_spill] sm:$0xff] %v11170_v10  ;;  %v911_v19 = vld [vmem:[#allocation2 + $0x388] sm:$0xff]  ;;  %v1038_v55 = vmax.f32 %v910_v14, %v11166_v53  ;;  %v11175_v35 = vld [vmem:[%s10447_s26 + $0xab0] sm:$0xff] }
 0x1ce   : > { %1163 = vst [vmem:[#allocation2 + $0x368] sm:$0xff] %v1035_v26  ;;  %1164 = vst [vmem:[#allocation2 + $0x370] sm:$0xff] %v1036_v63  ;;  %v1039_v50 = vmax.f32 %v911_v19, %v11170_v10  ;;  %v912_v44 = vld [vmem:[#allocation2 + $0x390] sm:$0xff]  ;;  %v11178_v30 = vld [vmem:[%s10447_s26 + $0xac8] sm:$0xff] }
 0x1cf   : > { %13928 = vst [vmem:[#allocation91_spill] sm:$0xff] %v11175_v35  ;;  %13929 = vst [vmem:[#allocation92_spill] sm:$0xff] %v11178_v30  ;;  %v1040_v8 = vmax.f32 %v912_v44, %v11175_v35  ;;  %v913_v2 = vld [vmem:[#allocation2 + $0x398] sm:$0xff]  ;;  %v11182_v60 = vld [vmem:[%s10447_s26 + $0xae0] sm:$0xff] }
 0x1d0   : > { %1165 = vst [vmem:[#allocation2 + $0x378] sm:$0xff] %v1037_v39  ;;  %13930 = vst [vmem:[#allocation93_spill] sm:$0xff] %v11182_v60  ;;  %v914_v26 = vld [vmem:[#allocation2 + $0x3a0] sm:$0xff]  ;;  %v1041_v63 = vmax.f32 %v913_v2, %v11178_v30  ;;  %v11187_v19 = vld [vmem:[%s10447_s26 + $0xaf8] sm:$0xff] }
 0x1d1   : > { %1166 = vst [vmem:[#allocation2 + $0x380] sm:$0xff] %v1038_v55  ;;  %1167 = vst [vmem:[#allocation2 + $0x388] sm:$0xff] %v1039_v50  ;;  %v1042_v14 = vmax.f32 %v914_v26, %v11182_v60  ;;  %v915_v10 = vld [vmem:[#allocation2 + $0x3a8] sm:$0xff]  ;;  %v11190_v53 = vld [vmem:[%s10447_s26 + $0xb10] sm:$0xff] }
 0x1d2   : > { %13931 = vst [vmem:[#allocation94_spill] sm:$0xff] %v11187_v19  ;;  %13932 = vst [vmem:[#allocation95_spill] sm:$0xff] %v11190_v53  ;;  %v1043_v44 = vmax.f32 %v915_v10, %v11187_v19  ;;  %v916_v39 = vld [vmem:[#allocation2 + $0x3b0] sm:$0xff]  ;;  %v11194_v35 = vld [vmem:[%s10447_s26 + $0xb28] sm:$0xff] }
 0x1d3   : > { %1168 = vst [vmem:[#allocation2 + $0x390] sm:$0xff] %v1040_v8  ;;  %13933 = vst [vmem:[#allocation96_spill] sm:$0xff] %v11194_v35  ;;  %v917_v55 = vld [vmem:[#allocation2 + $0x3b8] sm:$0xff]  ;;  %v1044_v50 = vmax.f32 %v916_v39, %v11190_v53  ;;  %v11199_v26 = vld [vmem:[%s10447_s26 + $0xb40] sm:$0xff] }
 0x1d4   : > { %1169 = vst [vmem:[#allocation2 + $0x398] sm:$0xff] %v1041_v63  ;;  %1170 = vst [vmem:[#allocation2 + $0x3a0] sm:$0xff] %v1042_v14  ;;  %v1045_v2 = vmax.f32 %v917_v55, %v11194_v35  ;;  %v918_v60 = vld [vmem:[#allocation2 + $0x3c0] sm:$0xff]  ;;  %v11202_v30 = vld [vmem:[%s10447_s26 + $0xb58] sm:$0xff] }
 0x1d5   : > { %13934 = vst [vmem:[#allocation97_spill] sm:$0xff] %v11199_v26  ;;  %13935 = vst [vmem:[#allocation98_spill] sm:$0xff] %v11202_v30  ;;  %v1046_v10 = vmax.f32 %v918_v60, %v11199_v26  ;;  %v919_v8 = vld [vmem:[#allocation2 + $0x3c8] sm:$0xff]  ;;  %v11206_v19 = vld [vmem:[%s10447_s26 + $0xb70] sm:$0xff] }
 0x1d6   : > { %1171 = vst [vmem:[#allocation2 + $0x3a8] sm:$0xff] %v1043_v44  ;;  %13936 = vst [vmem:[#allocation99_spill] sm:$0xff] %v11206_v19  ;;  %v920_v63 = vld [vmem:[#allocation2 + $0x3d0] sm:$0xff]  ;;  %v1047_v14 = vmax.f32 %v919_v8, %v11202_v30  ;;  %v11211_v55 = vld [vmem:[%s10447_s26 + $0xb88] sm:$0xff] }
 0x1d7   : > { %1172 = vst [vmem:[#allocation2 + $0x3b0] sm:$0xff] %v1044_v50  ;;  %1173 = vst [vmem:[#allocation2 + $0x3b8] sm:$0xff] %v1045_v2  ;;  %v1048_v39 = vmax.f32 %v920_v63, %v11206_v19  ;;  %v921_v35 = vld [vmem:[#allocation2 + $0x3d8] sm:$0xff]  ;;  %v11214_v53 = vld [vmem:[%s10447_s26 + $0xba0] sm:$0xff] }
 0x1d8   : > { %13937 = vst [vmem:[#allocation100_spill] sm:$0xff] %v11211_v55  ;;  %13938 = vst [vmem:[#allocation101_spill] sm:$0xff] %v11214_v53  ;;  %v1049_v60 = vmax.f32 %v921_v35, %v11211_v55  ;;  %v922_v44 = vld [vmem:[#allocation2 + $0x3e0] sm:$0xff]  ;;  %v11218_v26 = vld [vmem:[%s10447_s26 + $0xbb8] sm:$0xff] }
 0x1d9   : > { %1174 = vst [vmem:[#allocation2 + $0x3c0] sm:$0xff] %v1046_v10  ;;  %13939 = vst [vmem:[#allocation102_spill] sm:$0xff] %v11218_v26  ;;  %v923_v46 = vld [vmem:[#allocation2 + $0x3e8] sm:$0xff]  ;;  %v1050_v50 = vmax.f32 %v922_v44, %v11214_v53  ;;  %v11223_v8 = vld [vmem:[%s10447_s26 + $0xbd0] sm:$0xff] }
 0x1da   : > { %1175 = vst [vmem:[#allocation2 + $0x3c8] sm:$0xff] %v1047_v14  ;;  %1176 = vst [vmem:[#allocation2 + $0x3d0] sm:$0xff] %v1048_v39  ;;  %v1051_v2 = vmax.f32 %v923_v46, %v11218_v26  ;;  %v924_v63 = vld [vmem:[#allocation2 + $0x3f0] sm:$0xff]  ;;  %v11226_v19 = vld [vmem:[%s10447_s26 + $0xbe8] sm:$0xff] }
 0x1db   : > { %13940 = vst [vmem:[#allocation103_spill] sm:$0xff] %v11223_v8  ;;  %13941 = vst [vmem:[#allocation104_spill] sm:$0xff] %v11226_v19  ;;  %v1052_v35 = vmax.f32 %v924_v63, %v11223_v8  ;;  %v925_v10 = vld [vmem:[#allocation2 + $0x3f8] sm:$0xff]  ;;  %v1182_v55 = vld [vmem:[#allocation3] sm:$0xff] }
 0x1dc   : > { %1177 = vst [vmem:[#allocation2 + $0x3d8] sm:$0xff] %v1049_v60  ;;  %v1183_v30 = vld [vmem:[#allocation3 + $0x8] sm:$0xff]  ;;  %1178 = vst [vmem:[#allocation2 + $0x3e0] sm:$0xff] %v1050_v50  ;;  %v1053_v14 = vmax.f32 %v925_v10, %v11226_v19  ;;  %v9304_v39 = vld [vmem:[%s10447_s26] sm:$0xff] }
 0x1dd   : > { %1179 = vst [vmem:[#allocation2 + $0x3e8] sm:$0xff] %v1051_v2  ;;  %v1310_v44 = vadd.f32 %v9304_v39, %v1182_v55  ;;  %v1311_v46 = vadd.f32 %v1183_v30, %v10729_v4  ;;  %v1184_v26 = vld [vmem:[#allocation3 + $0x10] sm:$0xff]  ;;  %v1185_v53 = vld [vmem:[#allocation3 + $0x18] sm:$0xff]  ;;  %v1186_v33 = vld [vmem:[#allocation3 + $0x20] sm:$0xff] }
 0x1de   : > { %1180 = vst [vmem:[#allocation2 + $0x3f0] sm:$0xff] %v1052_v35  ;;  %v9305_v23 = vld [vmem:[%s10447_s26 + $0x30] sm:$0xff]  ;;  %v1313_v63 = vadd.f32 %v1185_v53, %v10734_v11  ;;  %v1314_v8 = vadd.f32 %v1186_v33, %v10737_v13  ;;  %v1187_v16 = vld [vmem:[#allocation3 + $0x28] sm:$0xff]  ;;  %v1189_v2 = vld [vmem:[#allocation3 + $0x38] sm:$0xff] }
 0x1df   : > { %v1312_v60 = vadd.f32 %v9305_v23, %v1184_v26  ;;  %v1188_v50 = vld [vmem:[#allocation3 + $0x30] sm:$0xff]  ;;  %1181 = vst [vmem:[#allocation2 + $0x3f8] sm:$0xff] %v1053_v14  ;;  %1438 = vst [vmem:[#allocation3] sm:$0xff] %v1310_v44  ;;  %v9306_v55 = vld [vmem:[%s10447_s26 + $0x78] sm:$0xff]  ;;  %v1317_v30 = vadd.f32 %v1189_v2, %v10746_v22 }
 0x1e0   : > { %1439 = vst [vmem:[#allocation3 + $0x8] sm:$0xff] %v1311_v46  ;;  %v1315_v10 = vadd.f32 %v9306_v55, %v1187_v16  ;;  %v1316_v4 = vadd.f32 %v1188_v50, %v10743_v20  ;;  %v1190_v39 = vld [vmem:[#allocation3 + $0x40] sm:$0xff]  ;;  %v1191_v35 = vld [vmem:[#allocation3 + $0x48] sm:$0xff]  ;;  %v1192_v19 = vld [vmem:[#allocation3 + $0x50] sm:$0xff] }
 0x1e1   : > { %1440 = vst [vmem:[#allocation3 + $0x10] sm:$0xff] %v1312_v60  ;;  %1441 = vst [vmem:[#allocation3 + $0x18] sm:$0xff] %v1313_v63  ;;  %v1318_v11 = vadd.f32 %v1190_v39, %v10750_v25  ;;  %v1319_v13 = vadd.f32 %v1191_v35, %v10755_v29  ;;  %v1320_v23 = vadd.f32 %v1192_v19, %v10758_v31  ;;  %v1193_v33 = vld [vmem:[#allocation3 + $0x58] sm:$0xff]  ;;  %v1194_v53 = vld [vmem:[#allocation3 + $0x60] sm:$0xff] }
 0x1e2   : > { %1442 = vst [vmem:[#allocation3 + $0x20] sm:$0xff] %v1314_v8  ;;  %v1195_v26 = vld [vmem:[#allocation3 + $0x68] sm:$0xff]  ;;  %1443 = vst [vmem:[#allocation3 + $0x28] sm:$0xff] %v1315_v10  ;;  %v1321_v20 = vadd.f32 %v1193_v33, %v10762_v34  ;;  %v1322_v22 = vadd.f32 %v1194_v53, %v10767_v38  ;;  %v1196_v14 = vld [vmem:[#allocation3 + $0x70] sm:$0xff] }
 0x1e3   : > { %1444 = vst [vmem:[#allocation3 + $0x30] sm:$0xff] %v1316_v4  ;;  %1445 = vst [vmem:[#allocation3 + $0x38] sm:$0xff] %v1317_v30  ;;  %v1323_v16 = vadd.f32 %v1195_v26, %v10770_v40  ;;  %v1197_v8 = vld [vmem:[#allocation3 + $0x78] sm:$0xff]  ;;  %v1198_v44 = vld [vmem:[#allocation3 + $0x80] sm:$0xff]  ;;  %v1324_v25 = vadd.f32 %v1196_v14, %v10774_v43 }
 0x1e4   : > { %1446 = vst [vmem:[#allocation3 + $0x40] sm:$0xff] %v1318_v11  ;;  %1447 = vst [vmem:[#allocation3 + $0x48] sm:$0xff] %v1319_v13  ;;  %v1325_v29 = vadd.f32 %v1197_v8, %v10779_v47  ;;  %v1326_v31 = vadd.f32 %v1198_v44, %v10782_v49  ;;  %v1199_v19 = vld [vmem:[#allocation3 + $0x88] sm:$0xff]  ;;  %v1200_v46 = vld [vmem:[#allocation3 + $0x90] sm:$0xff] }
 0x1e5   : > { %1448 = vst [vmem:[#allocation3 + $0x50] sm:$0xff] %v1320_v23  ;;  %v1201_v60 = vld [vmem:[#allocation3 + $0x98] sm:$0xff]  ;;  %1449 = vst [vmem:[#allocation3 + $0x58] sm:$0xff] %v1321_v20  ;;  %v1327_v34 = vadd.f32 %v1199_v19, %v10786_v52  ;;  %v1328_v38 = vadd.f32 %v1200_v46, %v10791_v56  ;;  %v1202_v63 = vld [vmem:[#allocation3 + $0xa0] sm:$0xff] }
 0x1e6   : > { %1450 = vst [vmem:[#allocation3 + $0x60] sm:$0xff] %v1322_v22  ;;  %1451 = vst [vmem:[#allocation3 + $0x68] sm:$0xff] %v1323_v16  ;;  %v1329_v40 = vadd.f32 %v1201_v60, %v10794_v58  ;;  %v1203_v50 = vld [vmem:[#allocation3 + $0xa8] sm:$0xff]  ;;  %v1204_v2 = vld [vmem:[#allocation3 + $0xb0] sm:$0xff]  ;;  %v1330_v43 = vadd.f32 %v1202_v63, %v10798_v61 }
 0x1e7   : > { %1452 = vst [vmem:[#allocation3 + $0x70] sm:$0xff] %v1324_v25  ;;  %1453 = vst [vmem:[#allocation3 + $0x78] sm:$0xff] %v1325_v29  ;;  %v1331_v47 = vadd.f32 %v1203_v50, %v10803_v1  ;;  %v1332_v49 = vadd.f32 %v1204_v2, %v10806_v3  ;;  %v1205_v55 = vld [vmem:[#allocation3 + $0xb8] sm:$0xff]  ;;  %v1206_v10 = vld [vmem:[#allocation3 + $0xc0] sm:$0xff] }
 0x1e8   : > { %1454 = vst [vmem:[#allocation3 + $0x80] sm:$0xff] %v1326_v31  ;;  %v1207_v4 = vld [vmem:[#allocation3 + $0xc8] sm:$0xff]  ;;  %1455 = vst [vmem:[#allocation3 + $0x88] sm:$0xff] %v1327_v34  ;;  %v1333_v52 = vadd.f32 %v1205_v55, %v10810_v7  ;;  %v1334_v56 = vadd.f32 %v1206_v10, %v10815_v12  ;;  %v1208_v30 = vld [vmem:[#allocation3 + $0xd0] sm:$0xff] }
 0x1e9   : > { %1456 = vst [vmem:[#allocation3 + $0x90] sm:$0xff] %v1328_v38  ;;  %1457 = vst [vmem:[#allocation3 + $0x98] sm:$0xff] %v1329_v40  ;;  %v1335_v58 = vadd.f32 %v1207_v4, %v10818_v15  ;;  %v1209_v39 = vld [vmem:[#allocation3 + $0xd8] sm:$0xff]  ;;  %v1210_v35 = vld [vmem:[#allocation3 + $0xe0] sm:$0xff]  ;;  %v1336_v61 = vadd.f32 %v1208_v30, %v10822_v18 }
 0x1ea   : > { %1458 = vst [vmem:[#allocation3 + $0xa0] sm:$0xff] %v1330_v43  ;;  %1459 = vst [vmem:[#allocation3 + $0xa8] sm:$0xff] %v1331_v47  ;;  %v1337_v1 = vadd.f32 %v1209_v39, %v10827_v24  ;;  %v1338_v3 = vadd.f32 %v1210_v35, %v10830_v27  ;;  %v1211_v11 = vld [vmem:[#allocation3 + $0xe8] sm:$0xff]  ;;  %v1212_v13 = vld [vmem:[#allocation3 + $0xf0] sm:$0xff] }
 0x1eb   : > { %1460 = vst [vmem:[#allocation3 + $0xb0] sm:$0xff] %v1332_v49  ;;  %v1213_v23 = vld [vmem:[#allocation3 + $0xf8] sm:$0xff]  ;;  %1461 = vst [vmem:[#allocation3 + $0xb8] sm:$0xff] %v1333_v52  ;;  %v1339_v7 = vadd.f32 %v1211_v11, %v10834_v32  ;;  %v1340_v12 = vadd.f32 %v1212_v13, %v10839_v37  ;;  %v1214_v33 = vld [vmem:[#allocation3 + $0x100] sm:$0xff] }
 0x1ec   : > { %1462 = vst [vmem:[#allocation3 + $0xc0] sm:$0xff] %v1334_v56  ;;  %1463 = vst [vmem:[#allocation3 + $0xc8] sm:$0xff] %v1335_v58  ;;  %v1341_v15 = vadd.f32 %v1213_v23, %v10842_v41  ;;  %v1215_v53 = vld [vmem:[#allocation3 + $0x108] sm:$0xff]  ;;  %v1216_v26 = vld [vmem:[#allocation3 + $0x110] sm:$0xff]  ;;  %v1342_v18 = vadd.f32 %v1214_v33, %v10846_v45 }
 0x1ed   : > { %1464 = vst [vmem:[#allocation3 + $0xd0] sm:$0xff] %v1336_v61  ;;  %1465 = vst [vmem:[#allocation3 + $0xd8] sm:$0xff] %v1337_v1  ;;  %v1343_v24 = vadd.f32 %v1215_v53, %v10851_v51  ;;  %v1344_v27 = vadd.f32 %v1216_v26, %v10854_v54  ;;  %v1217_v20 = vld [vmem:[#allocation3 + $0x118] sm:$0xff]  ;;  %v1218_v22 = vld [vmem:[#allocation3 + $0x120] sm:$0xff] }
 0x1ee   : > { %1466 = vst [vmem:[#allocation3 + $0xe0] sm:$0xff] %v1338_v3  ;;  %v1219_v16 = vld [vmem:[#allocation3 + $0x128] sm:$0xff]  ;;  %1467 = vst [vmem:[#allocation3 + $0xe8] sm:$0xff] %v1339_v7  ;;  %v1345_v32 = vadd.f32 %v1217_v20, %v10858_v59  ;;  %v1346_v37 = vadd.f32 %v1218_v22, %v10863_v0  ;;  %v1220_v14 = vld [vmem:[#allocation3 + $0x130] sm:$0xff] }
 0x1ef   : > { %1468 = vst [vmem:[#allocation3 + $0xf0] sm:$0xff] %v1340_v12  ;;  %1469 = vst [vmem:[#allocation3 + $0xf8] sm:$0xff] %v1341_v15  ;;  %v1347_v41 = vadd.f32 %v1219_v16, %v10866_v5  ;;  %v1221_v8 = vld [vmem:[#allocation3 + $0x138] sm:$0xff]  ;;  %v1222_v44 = vld [vmem:[#allocation3 + $0x140] sm:$0xff]  ;;  %v1348_v45 = vadd.f32 %v1220_v14, %v10870_v9 }
 0x1f0   : > { %1470 = vst [vmem:[#allocation3 + $0x100] sm:$0xff] %v1342_v18  ;;  %1471 = vst [vmem:[#allocation3 + $0x108] sm:$0xff] %v1343_v24  ;;  %v1349_v51 = vadd.f32 %v1221_v8, %v10875_v17  ;;  %v1350_v54 = vadd.f32 %v1222_v44, %v10878_v21  ;;  %v1223_v25 = vld [vmem:[#allocation3 + $0x148] sm:$0xff]  ;;  %v1224_v29 = vld [vmem:[#allocation3 + $0x150] sm:$0xff] }
 0x1f1   : > { %1472 = vst [vmem:[#allocation3 + $0x110] sm:$0xff] %v1344_v27  ;;  %v1225_v31 = vld [vmem:[#allocation3 + $0x158] sm:$0xff]  ;;  %1473 = vst [vmem:[#allocation3 + $0x118] sm:$0xff] %v1345_v32  ;;  %v1351_v59 = vadd.f32 %v1223_v25, %v10882_v28  ;;  %v1352_v0 = vadd.f32 %v1224_v29, %v10887_v36  ;;  %v1226_v19 = vld [vmem:[#allocation3 + $0x160] sm:$0xff] }
 0x1f2   : > { %1474 = vst [vmem:[#allocation3 + $0x120] sm:$0xff] %v1346_v37  ;;  %1475 = vst [vmem:[#allocation3 + $0x128] sm:$0xff] %v1347_v41  ;;  %v1353_v5 = vadd.f32 %v1225_v31, %v10890_v42  ;;  %v1227_v46 = vld [vmem:[#allocation3 + $0x168] sm:$0xff]  ;;  %v1228_v60 = vld [vmem:[#allocation3 + $0x170] sm:$0xff]  ;;  %v1354_v9 = vadd.f32 %v1226_v19, %v10894_v48 }
 0x1f3   : > { %1476 = vst [vmem:[#allocation3 + $0x130] sm:$0xff] %v1348_v45  ;;  %1477 = vst [vmem:[#allocation3 + $0x138] sm:$0xff] %v1349_v51  ;;  %v1355_v17 = vadd.f32 %v1227_v46, %v10899_v57  ;;  %v1356_v21 = vadd.f32 %v1228_v60, %v10902_v62  ;;  %v1229_v34 = vld [vmem:[#allocation3 + $0x178] sm:$0xff]  ;;  %v1230_v38 = vld [vmem:[#allocation3 + $0x180] sm:$0xff] }
 0x1f4   : > { %1478 = vst [vmem:[#allocation3 + $0x140] sm:$0xff] %v1350_v54  ;;  %v1231_v40 = vld [vmem:[#allocation3 + $0x188] sm:$0xff]  ;;  %1479 = vst [vmem:[#allocation3 + $0x148] sm:$0xff] %v1351_v59  ;;  %v1357_v28 = vadd.f32 %v1229_v34, %v10906_v6  ;;  %v13943_v63 = vld [vmem:[#allocation26_spill] sm:$0xff] }
 0x1f5   : > { %1480 = vst [vmem:[#allocation3 + $0x150] sm:$0xff] %v1352_v0  ;;  %1481 = vst [vmem:[#allocation3 + $0x158] sm:$0xff] %v1353_v5  ;;  %v13942_v36 = vld [vmem:[#allocation25_spill] sm:$0xff]  ;;  %v1359_v50 = vadd.f32 %v1231_v40, %v13943_v63  ;;  %v1233_v43 = vld [vmem:[#allocation3 + $0x198] sm:$0xff] }
 0x1f6   : > { %v1358_v42 = vadd.f32 %v1230_v38, %v13942_v36  ;;  %v1232_v2 = vld [vmem:[#allocation3 + $0x190] sm:$0xff]  ;;  %v1234_v47 = vld [vmem:[#allocation3 + $0x1a0] sm:$0xff]  ;;  %1482 = vst [vmem:[#allocation3 + $0x160] sm:$0xff] %v1354_v9  ;;  %1483 = vst [vmem:[#allocation3 + $0x168] sm:$0xff] %v1355_v17 }
 0x1f7   : > { %1484 = vst [vmem:[#allocation3 + $0x170] sm:$0xff] %v1356_v21  ;;  %v13944_v48 = vld [vmem:[#allocation27_spill] sm:$0xff]  ;;  %v13945_v62 = vld [vmem:[#allocation28_spill] sm:$0xff]  ;;  %v13946_v55 = vld [vmem:[#allocation29_spill] sm:$0xff] }
 0x1f8   : > { %v1360_v57 = vadd.f32 %v1232_v2, %v13944_v48  ;;  %v1361_v49 = vadd.f32 %v1233_v43, %v13945_v62  ;;  %v1362_v10 = vadd.f32 %v1234_v47, %v13946_v55  ;;  %v1235_v4 = vld [vmem:[#allocation3 + $0x1a8] sm:$0xff]  ;;  %v1236_v52 = vld [vmem:[#allocation3 + $0x1b0] sm:$0xff]  ;;  %v1237_v56 = vld [vmem:[#allocation3 + $0x1b8] sm:$0xff]  ;;  %1485 = vst [vmem:[#allocation3 + $0x178] sm:$0xff] %v1357_v28 }
 0x1f9   : > { %1486 = vst [vmem:[#allocation3 + $0x180] sm:$0xff] %v1358_v42  ;;  %1487 = vst [vmem:[#allocation3 + $0x188] sm:$0xff] %v1359_v50  ;;  %v13947_v6 = vld [vmem:[#allocation30_spill] sm:$0xff]  ;;  %v13948_v30 = vld [vmem:[#allocation31_spill] sm:$0xff] }
 0x1fa   : > { %v1363_v58 = vadd.f32 %v1235_v4, %v13947_v6  ;;  %v1364_v39 = vadd.f32 %v1236_v52, %v13948_v30  ;;  %v13949_v35 = vld [vmem:[#allocation32_spill] sm:$0xff]  ;;  %v1240_v11 = vld [vmem:[#allocation3 + $0x1d0] sm:$0xff]  ;;  %1488 = vst [vmem:[#allocation3 + $0x190] sm:$0xff] %v1360_v57  ;;  %1489 = vst [vmem:[#allocation3 + $0x198] sm:$0xff] %v1361_v49 }
 0x1fb   : > { %v1365_v61 = vadd.f32 %v1237_v56, %v13949_v35  ;;  %v1238_v1 = vld [vmem:[#allocation3 + $0x1c0] sm:$0xff]  ;;  %v1239_v3 = vld [vmem:[#allocation3 + $0x1c8] sm:$0xff]  ;;  %1490 = vst [vmem:[#allocation3 + $0x1a0] sm:$0xff] %v1362_v10  ;;  %v13951_v7 = vld [vmem:[#allocation34_spill] sm:$0xff] }
 0x1fc   : > { %v13950_v13 = vld [vmem:[#allocation33_spill] sm:$0xff]  ;;  %v1367_v12 = vadd.f32 %v1239_v3, %v13951_v7  ;;  %v13952_v15 = vld [vmem:[#allocation35_spill] sm:$0xff]  ;;  %1491 = vst [vmem:[#allocation3 + $0x1a8] sm:$0xff] %v1363_v58  ;;  %1492 = vst [vmem:[#allocation3 + $0x1b0] sm:$0xff] %v1364_v39 }
 0x1fd   : > { %v1366_v23 = vadd.f32 %v1238_v1, %v13950_v13  ;;  %v1368_v33 = vadd.f32 %v1240_v11, %v13952_v15  ;;  %v1241_v53 = vld [vmem:[#allocation3 + $0x1d8] sm:$0xff]  ;;  %v1242_v26 = vld [vmem:[#allocation3 + $0x1e0] sm:$0xff]  ;;  %v1243_v18 = vld [vmem:[#allocation3 + $0x1e8] sm:$0xff]  ;;  %1493 = vst [vmem:[#allocation3 + $0x1b8] sm:$0xff] %v1365_v61 }
 0x1fe   : > { %v13953_v24 = vld [vmem:[#allocation36_spill] sm:$0xff]  ;;  %v13954_v20 = vld [vmem:[#allocation37_spill] sm:$0xff]  ;;  %v13955_v16 = vld [vmem:[#allocation38_spill] sm:$0xff]  ;;  %1495 = vst [vmem:[#allocation3 + $0x1c8] sm:$0xff] %v1367_v12 }
 0x1ff   : > { %v1369_v27 = vadd.f32 %v1241_v53, %v13953_v24  ;;  %v1370_v22 = vadd.f32 %v1242_v26, %v13954_v20  ;;  %v1371_v32 = vadd.f32 %v1243_v18, %v13955_v16  ;;  %v1244_v37 = vld [vmem:[#allocation3 + $0x1f0] sm:$0xff]  ;;  %v1245_v41 = vld [vmem:[#allocation3 + $0x1f8] sm:$0xff]  ;;  %v1246_v14 = vld [vmem:[#allocation3 + $0x200] sm:$0xff]  ;;  %1494 = vst [vmem:[#allocation3 + $0x1c0] sm:$0xff] %v1366_v23 }
 0x200   : > { %1496 = vst [vmem:[#allocation3 + $0x1d0] sm:$0xff] %v1368_v33  ;;  %v13956_v8 = vld [vmem:[#allocation39_spill] sm:$0xff]  ;;  %v13957_v45 = vld [vmem:[#allocation40_spill] sm:$0xff]  ;;  %v13958_v54 = vld [vmem:[#allocation41_spill] sm:$0xff] }
 0x201   : > { %v1372_v44 = vadd.f32 %v1244_v37, %v13956_v8  ;;  %v1373_v51 = vadd.f32 %v1245_v41, %v13957_v45  ;;  %v1374_v25 = vadd.f32 %v1246_v14, %v13958_v54  ;;  %v1247_v29 = vld [vmem:[#allocation3 + $0x208] sm:$0xff]  ;;  %v1248_v31 = vld [vmem:[#allocation3 + $0x210] sm:$0xff]  ;;  %v1249_v59 = vld [vmem:[#allocation3 + $0x218] sm:$0xff]  ;;  %1497 = vst [vmem:[#allocation3 + $0x1d8] sm:$0xff] %v1369_v27 }
 0x202   : > { %1498 = vst [vmem:[#allocation3 + $0x1e0] sm:$0xff] %v1370_v22  ;;  %1499 = vst [vmem:[#allocation3 + $0x1e8] sm:$0xff] %v1371_v32  ;;  %v13959_v0 = vld [vmem:[#allocation42_spill] sm:$0xff]  ;;  %v13960_v19 = vld [vmem:[#allocation43_spill] sm:$0xff] }
 0x203   : > { %v1375_v5 = vadd.f32 %v1247_v29, %v13959_v0  ;;  %v1376_v46 = vadd.f32 %v1248_v31, %v13960_v19  ;;  %v13961_v60 = vld [vmem:[#allocation44_spill] sm:$0xff]  ;;  %v1252_v34 = vld [vmem:[#allocation3 + $0x230] sm:$0xff]  ;;  %1500 = vst [vmem:[#allocation3 + $0x1f0] sm:$0xff] %v1372_v44  ;;  %1501 = vst [vmem:[#allocation3 + $0x1f8] sm:$0xff] %v1373_v51 }
 0x204   : > { %v1377_v9 = vadd.f32 %v1249_v59, %v13961_v60  ;;  %v1250_v17 = vld [vmem:[#allocation3 + $0x220] sm:$0xff]  ;;  %v1251_v21 = vld [vmem:[#allocation3 + $0x228] sm:$0xff]  ;;  %1502 = vst [vmem:[#allocation3 + $0x200] sm:$0xff] %v1374_v25  ;;  %v13963_v28 = vld [vmem:[#allocation46_spill] sm:$0xff] }
 0x205   : > { %v13962_v38 = vld [vmem:[#allocation45_spill] sm:$0xff]  ;;  %v1379_v36 = vadd.f32 %v1251_v21, %v13963_v28  ;;  %v13964_v42 = vld [vmem:[#allocation47_spill] sm:$0xff]  ;;  %1503 = vst [vmem:[#allocation3 + $0x208] sm:$0xff] %v1375_v5  ;;  %1504 = vst [vmem:[#allocation3 + $0x210] sm:$0xff] %v1376_v46 }
 0x206   : > { %v1378_v40 = vadd.f32 %v1250_v17, %v13962_v38  ;;  %v1380_v63 = vadd.f32 %v1252_v34, %v13964_v42  ;;  %v1253_v50 = vld [vmem:[#allocation3 + $0x238] sm:$0xff]  ;;  %v1254_v2 = vld [vmem:[#allocation3 + $0x240] sm:$0xff]  ;;  %v1255_v43 = vld [vmem:[#allocation3 + $0x248] sm:$0xff]  ;;  %1505 = vst [vmem:[#allocation3 + $0x218] sm:$0xff] %v1377_v9 }
 0x207   : > { %v13965_v47 = vld [vmem:[#allocation48_spill] sm:$0xff]  ;;  %v13966_v57 = vld [vmem:[#allocation49_spill] sm:$0xff]  ;;  %v13967_v49 = vld [vmem:[#allocation50_spill] sm:$0xff]  ;;  %1507 = vst [vmem:[#allocation3 + $0x228] sm:$0xff] %v1379_v36 }
 0x208   : > { %v1381_v48 = vadd.f32 %v1253_v50, %v13965_v47  ;;  %v1382_v62 = vadd.f32 %v1254_v2, %v13966_v57  ;;  %v1383_v55 = vadd.f32 %v1255_v43, %v13967_v49  ;;  %v1256_v10 = vld [vmem:[#allocation3 + $0x250] sm:$0xff]  ;;  %v1257_v4 = vld [vmem:[#allocation3 + $0x258] sm:$0xff]  ;;  %v1258_v52 = vld [vmem:[#allocation3 + $0x260] sm:$0xff]  ;;  %1506 = vst [vmem:[#allocation3 + $0x220] sm:$0xff] %v1378_v40 }
 0x209   : > { %1508 = vst [vmem:[#allocation3 + $0x230] sm:$0xff] %v1380_v63  ;;  %v13968_v56 = vld [vmem:[#allocation51_spill] sm:$0xff]  ;;  %v13969_v58 = vld [vmem:[#allocation52_spill] sm:$0xff]  ;;  %v13970_v39 = vld [vmem:[#allocation53_spill] sm:$0xff] }
 0x20a   : > { %v1384_v6 = vadd.f32 %v1256_v10, %v13968_v56  ;;  %v1385_v30 = vadd.f32 %v1257_v4, %v13969_v58  ;;  %v1386_v35 = vadd.f32 %v1258_v52, %v13970_v39  ;;  %v1259_v61 = vld [vmem:[#allocation3 + $0x268] sm:$0xff]  ;;  %v1260_v1 = vld [vmem:[#allocation3 + $0x270] sm:$0xff]  ;;  %v1261_v3 = vld [vmem:[#allocation3 + $0x278] sm:$0xff]  ;;  %1509 = vst [vmem:[#allocation3 + $0x238] sm:$0xff] %v1381_v48 }
 0x20b   : > { %1510 = vst [vmem:[#allocation3 + $0x240] sm:$0xff] %v1382_v62  ;;  %1511 = vst [vmem:[#allocation3 + $0x248] sm:$0xff] %v1383_v55  ;;  %v13971_v11 = vld [vmem:[#allocation54_spill] sm:$0xff]  ;;  %v13972_v23 = vld [vmem:[#allocation55_spill] sm:$0xff] }
 0x20c   : > { %v1387_v13 = vadd.f32 %v1259_v61, %v13971_v11  ;;  %v1388_v7 = vadd.f32 %v1260_v1, %v13972_v23  ;;  %v13973_v12 = vld [vmem:[#allocation56_spill] sm:$0xff]  ;;  %v1264_v26 = vld [vmem:[#allocation3 + $0x290] sm:$0xff]  ;;  %1512 = vst [vmem:[#allocation3 + $0x250] sm:$0xff] %v1384_v6  ;;  %1513 = vst [vmem:[#allocation3 + $0x258] sm:$0xff] %v1385_v30 }
 0x20d   : > { %v1389_v15 = vadd.f32 %v1261_v3, %v13973_v12  ;;  %v1262_v33 = vld [vmem:[#allocation3 + $0x280] sm:$0xff]  ;;  %v1263_v53 = vld [vmem:[#allocation3 + $0x288] sm:$0xff]  ;;  %1514 = vst [vmem:[#allocation3 + $0x260] sm:$0xff] %v1386_v35  ;;  %v13975_v27 = vld [vmem:[#allocation58_spill] sm:$0xff] }
 0x20e   : > { %v13974_v18 = vld [vmem:[#allocation57_spill] sm:$0xff]  ;;  %v1391_v20 = vadd.f32 %v1263_v53, %v13975_v27  ;;  %v13976_v22 = vld [vmem:[#allocation59_spill] sm:$0xff]  ;;  %1515 = vst [vmem:[#allocation3 + $0x268] sm:$0xff] %v1387_v13  ;;  %1516 = vst [vmem:[#allocation3 + $0x270] sm:$0xff] %v1388_v7 }
 0x20f   : > { %v1390_v24 = vadd.f32 %v1262_v33, %v13974_v18  ;;  %v1392_v16 = vadd.f32 %v1264_v26, %v13976_v22  ;;  %v1265_v32 = vld [vmem:[#allocation3 + $0x298] sm:$0xff]  ;;  %v1266_v37 = vld [vmem:[#allocation3 + $0x2a0] sm:$0xff]  ;;  %v1267_v41 = vld [vmem:[#allocation3 + $0x2a8] sm:$0xff]  ;;  %1517 = vst [vmem:[#allocation3 + $0x278] sm:$0xff] %v1389_v15 }
 0x210   : > { %v13977_v14 = vld [vmem:[#allocation60_spill] sm:$0xff]  ;;  %v13978_v44 = vld [vmem:[#allocation61_spill] sm:$0xff]  ;;  %v13979_v51 = vld [vmem:[#allocation62_spill] sm:$0xff]  ;;  %1519 = vst [vmem:[#allocation3 + $0x288] sm:$0xff] %v1391_v20 }
 0x211   : > { %v1393_v8 = vadd.f32 %v1265_v32, %v13977_v14  ;;  %v1394_v45 = vadd.f32 %v1266_v37, %v13978_v44  ;;  %v1395_v54 = vadd.f32 %v1267_v41, %v13979_v51  ;;  %v1268_v25 = vld [vmem:[#allocation3 + $0x2b0] sm:$0xff]  ;;  %v1269_v29 = vld [vmem:[#allocation3 + $0x2b8] sm:$0xff]  ;;  %v1270_v31 = vld [vmem:[#allocation3 + $0x2c0] sm:$0xff]  ;;  %1518 = vst [vmem:[#allocation3 + $0x280] sm:$0xff] %v1390_v24 }
 0x212   : > { %1520 = vst [vmem:[#allocation3 + $0x290] sm:$0xff] %v1392_v16  ;;  %v13980_v59 = vld [vmem:[#allocation63_spill] sm:$0xff]  ;;  %v13981_v5 = vld [vmem:[#allocation64_spill] sm:$0xff]  ;;  %v13982_v46 = vld [vmem:[#allocation65_spill] sm:$0xff] }
 0x213   : > { %v1396_v0 = vadd.f32 %v1268_v25, %v13980_v59  ;;  %v1397_v19 = vadd.f32 %v1269_v29, %v13981_v5  ;;  %v1398_v60 = vadd.f32 %v1270_v31, %v13982_v46  ;;  %v1271_v9 = vld [vmem:[#allocation3 + $0x2c8] sm:$0xff]  ;;  %v1272_v17 = vld [vmem:[#allocation3 + $0x2d0] sm:$0xff]  ;;  %v1273_v21 = vld [vmem:[#allocation3 + $0x2d8] sm:$0xff]  ;;  %1521 = vst [vmem:[#allocation3 + $0x298] sm:$0xff] %v1393_v8 }
 0x214   : > { %1522 = vst [vmem:[#allocation3 + $0x2a0] sm:$0xff] %v1394_v45  ;;  %1523 = vst [vmem:[#allocation3 + $0x2a8] sm:$0xff] %v1395_v54  ;;  %v13983_v34 = vld [vmem:[#allocation66_spill] sm:$0xff]  ;;  %v13984_v40 = vld [vmem:[#allocation67_spill] sm:$0xff] }
 0x215   : > { %v1399_v38 = vadd.f32 %v1271_v9, %v13983_v34  ;;  %v1400_v28 = vadd.f32 %v1272_v17, %v13984_v40  ;;  %v13985_v36 = vld [vmem:[#allocation68_spill] sm:$0xff]  ;;  %v1276_v2 = vld [vmem:[#allocation3 + $0x2f0] sm:$0xff]  ;;  %1524 = vst [vmem:[#allocation3 + $0x2b0] sm:$0xff] %v1396_v0  ;;  %1525 = vst [vmem:[#allocation3 + $0x2b8] sm:$0xff] %v1397_v19 }
 0x216   : > { %v1401_v42 = vadd.f32 %v1273_v21, %v13985_v36  ;;  %v1274_v63 = vld [vmem:[#allocation3 + $0x2e0] sm:$0xff]  ;;  %v1275_v50 = vld [vmem:[#allocation3 + $0x2e8] sm:$0xff]  ;;  %1526 = vst [vmem:[#allocation3 + $0x2c0] sm:$0xff] %v1398_v60  ;;  %v13987_v48 = vld [vmem:[#allocation70_spill] sm:$0xff] }
 0x217   : > { %v13986_v43 = vld [vmem:[#allocation69_spill] sm:$0xff]  ;;  %v1403_v57 = vadd.f32 %v1275_v50, %v13987_v48  ;;  %v13988_v62 = vld [vmem:[#allocation71_spill] sm:$0xff]  ;;  %1527 = vst [vmem:[#allocation3 + $0x2c8] sm:$0xff] %v1399_v38  ;;  %1528 = vst [vmem:[#allocation3 + $0x2d0] sm:$0xff] %v1400_v28 }
 0x218   : > { %v1402_v47 = vadd.f32 %v1274_v63, %v13986_v43  ;;  %v1404_v49 = vadd.f32 %v1276_v2, %v13988_v62  ;;  %v1277_v55 = vld [vmem:[#allocation3 + $0x2f8] sm:$0xff]  ;;  %v1278_v10 = vld [vmem:[#allocation3 + $0x300] sm:$0xff]  ;;  %v1279_v4 = vld [vmem:[#allocation3 + $0x308] sm:$0xff]  ;;  %1529 = vst [vmem:[#allocation3 + $0x2d8] sm:$0xff] %v1401_v42 }
 0x219   : > { %v13989_v52 = vld [vmem:[#allocation72_spill] sm:$0xff]  ;;  %v13990_v6 = vld [vmem:[#allocation73_spill] sm:$0xff]  ;;  %v13991_v30 = vld [vmem:[#allocation74_spill] sm:$0xff]  ;;  %1531 = vst [vmem:[#allocation3 + $0x2e8] sm:$0xff] %v1403_v57 }
 0x21a   : > { %v1405_v56 = vadd.f32 %v1277_v55, %v13989_v52  ;;  %v1406_v58 = vadd.f32 %v1278_v10, %v13990_v6  ;;  %v1407_v39 = vadd.f32 %v1279_v4, %v13991_v30  ;;  %v1280_v35 = vld [vmem:[#allocation3 + $0x310] sm:$0xff]  ;;  %v1281_v61 = vld [vmem:[#allocation3 + $0x318] sm:$0xff]  ;;  %v1282_v1 = vld [vmem:[#allocation3 + $0x320] sm:$0xff]  ;;  %1530 = vst [vmem:[#allocation3 + $0x2e0] sm:$0xff] %v1402_v47 }
 0x21b   : > { %1532 = vst [vmem:[#allocation3 + $0x2f0] sm:$0xff] %v1404_v49  ;;  %v13992_v3 = vld [vmem:[#allocation75_spill] sm:$0xff]  ;;  %v13993_v13 = vld [vmem:[#allocation76_spill] sm:$0xff]  ;;  %v13994_v7 = vld [vmem:[#allocation77_spill] sm:$0xff] }
 0x21c   : > { %v1408_v11 = vadd.f32 %v1280_v35, %v13992_v3  ;;  %v1409_v23 = vadd.f32 %v1281_v61, %v13993_v13  ;;  %v1410_v12 = vadd.f32 %v1282_v1, %v13994_v7  ;;  %v1283_v15 = vld [vmem:[#allocation3 + $0x328] sm:$0xff]  ;;  %v1284_v33 = vld [vmem:[#allocation3 + $0x330] sm:$0xff]  ;;  %v1285_v53 = vld [vmem:[#allocation3 + $0x338] sm:$0xff]  ;;  %1533 = vst [vmem:[#allocation3 + $0x2f8] sm:$0xff] %v1405_v56 }
 0x21d   : > { %1534 = vst [vmem:[#allocation3 + $0x300] sm:$0xff] %v1406_v58  ;;  %1535 = vst [vmem:[#allocation3 + $0x308] sm:$0xff] %v1407_v39  ;;  %v13995_v26 = vld [vmem:[#allocation78_spill] sm:$0xff]  ;;  %v13996_v24 = vld [vmem:[#allocation79_spill] sm:$0xff] }
 0x21e   : > { %v1411_v18 = vadd.f32 %v1283_v15, %v13995_v26  ;;  %v1412_v27 = vadd.f32 %v1284_v33, %v13996_v24  ;;  %v13997_v20 = vld [vmem:[#allocation80_spill] sm:$0xff]  ;;  %v1288_v37 = vld [vmem:[#allocation3 + $0x350] sm:$0xff]  ;;  %1536 = vst [vmem:[#allocation3 + $0x310] sm:$0xff] %v1408_v11  ;;  %1537 = vst [vmem:[#allocation3 + $0x318] sm:$0xff] %v1409_v23 }
 0x21f   : > { %v1413_v22 = vadd.f32 %v1285_v53, %v13997_v20  ;;  %v1286_v16 = vld [vmem:[#allocation3 + $0x340] sm:$0xff]  ;;  %v1287_v32 = vld [vmem:[#allocation3 + $0x348] sm:$0xff]  ;;  %1538 = vst [vmem:[#allocation3 + $0x320] sm:$0xff] %v1410_v12  ;;  %v13999_v8 = vld [vmem:[#allocation82_spill] sm:$0xff] }
 0x220   : > { %v13998_v41 = vld [vmem:[#allocation81_spill] sm:$0xff]  ;;  %v1415_v44 = vadd.f32 %v1287_v32, %v13999_v8  ;;  %v14000_v45 = vld [vmem:[#allocation83_spill] sm:$0xff]  ;;  %1539 = vst [vmem:[#allocation3 + $0x328] sm:$0xff] %v1411_v18  ;;  %1540 = vst [vmem:[#allocation3 + $0x330] sm:$0xff] %v1412_v27 }
 0x221   : > { %v1414_v14 = vadd.f32 %v1286_v16, %v13998_v41  ;;  %v1416_v51 = vadd.f32 %v1288_v37, %v14000_v45  ;;  %v1289_v54 = vld [vmem:[#allocation3 + $0x358] sm:$0xff]  ;;  %v1290_v25 = vld [vmem:[#allocation3 + $0x360] sm:$0xff]  ;;  %v1291_v29 = vld [vmem:[#allocation3 + $0x368] sm:$0xff]  ;;  %1541 = vst [vmem:[#allocation3 + $0x338] sm:$0xff] %v1413_v22 }
 0x222   : > { %v14001_v31 = vld [vmem:[#allocation84_spill] sm:$0xff]  ;;  %v14002_v0 = vld [vmem:[#allocation85_spill] sm:$0xff]  ;;  %v14003_v19 = vld [vmem:[#allocation86_spill] sm:$0xff]  ;;  %1543 = vst [vmem:[#allocation3 + $0x348] sm:$0xff] %v1415_v44 }
 0x223   : > { %v1417_v59 = vadd.f32 %v1289_v54, %v14001_v31  ;;  %v1418_v5 = vadd.f32 %v1290_v25, %v14002_v0  ;;  %v1419_v46 = vadd.f32 %v1291_v29, %v14003_v19  ;;  %v1292_v60 = vld [vmem:[#allocation3 + $0x370] sm:$0xff]  ;;  %v1293_v9 = vld [vmem:[#allocation3 + $0x378] sm:$0xff]  ;;  %v1294_v17 = vld [vmem:[#allocation3 + $0x380] sm:$0xff]  ;;  %1542 = vst [vmem:[#allocation3 + $0x340] sm:$0xff] %v1414_v14 }
 0x224   : > { %1544 = vst [vmem:[#allocation3 + $0x350] sm:$0xff] %v1416_v51  ;;  %v14004_v21 = vld [vmem:[#allocation87_spill] sm:$0xff]  ;;  %v14005_v38 = vld [vmem:[#allocation88_spill] sm:$0xff]  ;;  %v14006_v28 = vld [vmem:[#allocation89_spill] sm:$0xff] }
 0x225   : > { %v1420_v34 = vadd.f32 %v1292_v60, %v14004_v21  ;;  %v1421_v40 = vadd.f32 %v1293_v9, %v14005_v38  ;;  %v1422_v36 = vadd.f32 %v1294_v17, %v14006_v28  ;;  %v1295_v42 = vld [vmem:[#allocation3 + $0x388] sm:$0xff]  ;;  %v1296_v63 = vld [vmem:[#allocation3 + $0x390] sm:$0xff]  ;;  %v1297_v50 = vld [vmem:[#allocation3 + $0x398] sm:$0xff]  ;;  %1545 = vst [vmem:[#allocation3 + $0x358] sm:$0xff] %v1417_v59 }
 0x226   : > { %1546 = vst [vmem:[#allocation3 + $0x360] sm:$0xff] %v1418_v5  ;;  %1547 = vst [vmem:[#allocation3 + $0x368] sm:$0xff] %v1419_v46  ;;  %v14007_v2 = vld [vmem:[#allocation90_spill] sm:$0xff]  ;;  %v14008_v47 = vld [vmem:[#allocation91_spill] sm:$0xff] }
 0x227   : > { %v1423_v43 = vadd.f32 %v1295_v42, %v14007_v2  ;;  %v1424_v48 = vadd.f32 %v1296_v63, %v14008_v47  ;;  %v14009_v57 = vld [vmem:[#allocation92_spill] sm:$0xff]  ;;  %v1300_v10 = vld [vmem:[#allocation3 + $0x3b0] sm:$0xff]  ;;  %1548 = vst [vmem:[#allocation3 + $0x370] sm:$0xff] %v1420_v34  ;;  %1549 = vst [vmem:[#allocation3 + $0x378] sm:$0xff] %v1421_v40 }
 0x228   : > { %v1425_v62 = vadd.f32 %v1297_v50, %v14009_v57  ;;  %v1298_v49 = vld [vmem:[#allocation3 + $0x3a0] sm:$0xff]  ;;  %v1299_v55 = vld [vmem:[#allocation3 + $0x3a8] sm:$0xff]  ;;  %1550 = vst [vmem:[#allocation3 + $0x380] sm:$0xff] %v1422_v36  ;;  %v14011_v56 = vld [vmem:[#allocation94_spill] sm:$0xff] }
 0x229   : > { %v14010_v4 = vld [vmem:[#allocation93_spill] sm:$0xff]  ;;  %v1427_v6 = vadd.f32 %v1299_v55, %v14011_v56  ;;  %v14012_v58 = vld [vmem:[#allocation95_spill] sm:$0xff]  ;;  %1551 = vst [vmem:[#allocation3 + $0x388] sm:$0xff] %v1423_v43  ;;  %1552 = vst [vmem:[#allocation3 + $0x390] sm:$0xff] %v1424_v48 }
 0x22a   : > { %v1426_v52 = vadd.f32 %v1298_v49, %v14010_v4  ;;  %v1428_v30 = vadd.f32 %v1300_v10, %v14012_v58  ;;  %v1301_v39 = vld [vmem:[#allocation3 + $0x3b8] sm:$0xff]  ;;  %v1302_v35 = vld [vmem:[#allocation3 + $0x3c0] sm:$0xff]  ;;  %v1303_v61 = vld [vmem:[#allocation3 + $0x3c8] sm:$0xff]  ;;  %1553 = vst [vmem:[#allocation3 + $0x398] sm:$0xff] %v1425_v62 }
 0x22b   : > { %v14013_v1 = vld [vmem:[#allocation96_spill] sm:$0xff]  ;;  %v14014_v11 = vld [vmem:[#allocation97_spill] sm:$0xff]  ;;  %v14015_v23 = vld [vmem:[#allocation98_spill] sm:$0xff]  ;;  %1555 = vst [vmem:[#allocation3 + $0x3a8] sm:$0xff] %v1427_v6 }
 0x22c   : > { %v1429_v3 = vadd.f32 %v1301_v39, %v14013_v1  ;;  %v1430_v13 = vadd.f32 %v1302_v35, %v14014_v11  ;;  %v1431_v7 = vadd.f32 %v1303_v61, %v14015_v23  ;;  %v1304_v12 = vld [vmem:[#allocation3 + $0x3d0] sm:$0xff]  ;;  %v1305_v15 = vld [vmem:[#allocation3 + $0x3d8] sm:$0xff]  ;;  %v1306_v33 = vld [vmem:[#allocation3 + $0x3e0] sm:$0xff]  ;;  %1554 = vst [vmem:[#allocation3 + $0x3a0] sm:$0xff] %v1426_v52 }
 0x22d   : > { %1556 = vst [vmem:[#allocation3 + $0x3b0] sm:$0xff] %v1428_v30  ;;  %v14016_v53 = vld [vmem:[#allocation99_spill] sm:$0xff]  ;;  %v14017_v18 = vld [vmem:[#allocation100_spill] sm:$0xff]  ;;  %v14018_v27 = vld [vmem:[#allocation101_spill] sm:$0xff] }
 0x22e   : > { %v1432_v26 = vadd.f32 %v1304_v12, %v14016_v53  ;;  %v1433_v24 = vadd.f32 %v1305_v15, %v14017_v18  ;;  %v1434_v20 = vadd.f32 %v1306_v33, %v14018_v27  ;;  %v1307_v22 = vld [vmem:[#allocation3 + $0x3e8] sm:$0xff]  ;;  %v1308_v16 = vld [vmem:[#allocation3 + $0x3f0] sm:$0xff]  ;;  %v1309_v32 = vld [vmem:[#allocation3 + $0x3f8] sm:$0xff]  ;;  %1557 = vst [vmem:[#allocation3 + $0x3b8] sm:$0xff] %v1429_v3 }
 0x22f   : > { %1558 = vst [vmem:[#allocation3 + $0x3c0] sm:$0xff] %v1430_v13  ;;  %1559 = vst [vmem:[#allocation3 + $0x3c8] sm:$0xff] %v1431_v7  ;;  %v14019_v37 = vld [vmem:[#allocation102_spill] sm:$0xff]  ;;  %v14020_v14 = vld [vmem:[#allocation103_spill] sm:$0xff] }
 0x230   : > { %v1435_v41 = vadd.f32 %v1307_v22, %v14019_v37  ;;  %v1436_v8 = vadd.f32 %v1308_v16, %v14020_v14  ;;  %v14021_v44 = vld [vmem:[#allocation104_spill] sm:$0xff]  ;;  %1560 = vst [vmem:[#allocation3 + $0x3d0] sm:$0xff] %v1432_v26  ;;  %1561 = vst [vmem:[#allocation3 + $0x3d8] sm:$0xff] %v1433_v24  ;;  %v1568_v59 = vld [vmem:[%s10447_s26 + $0x38] sm:$0xff] }
 0x231   : > { %v1437_v45 = vadd.f32 %v1309_v32, %v14021_v44  ;;  %v1566_v51 = vld [vmem:[%s10447_s26 + $0x8] sm:$0xff]  ;;  %v1694_v54 = vld [vmem:[#allocation2] sm:$0xff]  ;;  %1562 = vst [vmem:[#allocation3 + $0x3e0] sm:$0xff] %v1434_v20  ;;  %v1696_v0 = vld [vmem:[#allocation2 + $0x10] sm:$0xff] }
 0x232   : > { %v1567_v25 = vld [vmem:[%s10447_s26 + $0x20] sm:$0xff]  ;;  %v1822_v29 = vmax.f32 %v1694_v54, %v1566_v51  ;;  %v1695_v31 = vld [vmem:[#allocation2 + $0x8] sm:$0xff]  ;;  %1563 = vst [vmem:[#allocation3 + $0x3e8] sm:$0xff] %v1435_v41  ;;  %1564 = vst [vmem:[#allocation3 + $0x3f0] sm:$0xff] %v1436_v8  ;;  %v1824_v19 = vmax.f32 %v1696_v0, %v1568_v59 }
 0x233   : > { %1565 = vst [vmem:[#allocation3 + $0x3f8] sm:$0xff] %v1437_v45  ;;  %v1823_v5 = vmax.f32 %v1695_v31, %v1567_v25  ;;  %v11362_v46 = vld [vmem:[%s10447_s26 + $0x50] sm:$0xff]  ;;  %v1697_v60 = vld [vmem:[#allocation2 + $0x18] sm:$0xff]  ;;  %v11365_v9 = vld [vmem:[%s10447_s26 + $0x68] sm:$0xff] }
 0x234   : > { %1950 = vst [vmem:[#allocation2] sm:$0xff] %v1822_v29  ;;  %v1825_v17 = vmax.f32 %v1697_v60, %v11362_v46  ;;  %v1698_v21 = vld [vmem:[#allocation2 + $0x20] sm:$0xff]  ;;  %v1699_v38 = vld [vmem:[#allocation2 + $0x28] sm:$0xff]  ;;  %1952 = vst [vmem:[#allocation2 + $0x10] sm:$0xff] %v1824_v19 }
 0x235   : > { %v1571_v34 = vld [vmem:[%s10447_s26 + $0x80] sm:$0xff]  ;;  %1951 = vst [vmem:[#allocation2 + $0x8] sm:$0xff] %v1823_v5  ;;  %v1826_v40 = vmax.f32 %v1698_v21, %v11365_v9  ;;  %v11371_v36 = vld [vmem:[%s10447_s26 + $0x98] sm:$0xff]  ;;  %v1700_v42 = vld [vmem:[#allocation2 + $0x30] sm:$0xff] }
 0x236   : > { %v1827_v28 = vmax.f32 %v1699_v38, %v1571_v34  ;;  %v11374_v63 = vld [vmem:[%s10447_s26 + $0xb0] sm:$0xff]  ;;  %1953 = vst [vmem:[#allocation2 + $0x18] sm:$0xff] %v1825_v17  ;;  %v1828_v50 = vmax.f32 %v1700_v42, %v11371_v36  ;;  %v1701_v2 = vld [vmem:[#allocation2 + $0x38] sm:$0xff]  ;;  %v11378_v43 = vld [vmem:[%s10447_s26 + $0xc8] sm:$0xff] }
 0x237   : > { %v1702_v47 = vld [vmem:[#allocation2 + $0x40] sm:$0xff]  ;;  %1954 = vst [vmem:[#allocation2 + $0x20] sm:$0xff] %v1826_v40  ;;  %v1829_v48 = vmax.f32 %v1701_v2, %v11374_v63  ;;  %v1703_v49 = vld [vmem:[#allocation2 + $0x48] sm:$0xff]  ;;  %v11386_v55 = vld [vmem:[%s10447_s26 + $0xf8] sm:$0xff] }
 0x238   : > { %1955 = vst [vmem:[#allocation2 + $0x28] sm:$0xff] %v1827_v28  ;;  %v1830_v57 = vmax.f32 %v1702_v47, %v11378_v43  ;;  %v11383_v62 = vld [vmem:[%s10447_s26 + $0xe0] sm:$0xff]  ;;  %1956 = vst [vmem:[#allocation2 + $0x30] sm:$0xff] %v1828_v50  ;;  %v1704_v4 = vld [vmem:[#allocation2 + $0x50] sm:$0xff] }
 0x239   : > { %v1831_v10 = vmax.f32 %v1703_v49, %v11383_v62  ;;  %v11390_v52 = vld [vmem:[%s10447_s26 + $0x110] sm:$0xff]  ;;  %v1705_v56 = vld [vmem:[#allocation2 + $0x58] sm:$0xff]  ;;  %1957 = vst [vmem:[#allocation2 + $0x38] sm:$0xff] %v1829_v48  ;;  %v1832_v6 = vmax.f32 %v1704_v4, %v11386_v55  ;;  %v11395_v30 = vld [vmem:[%s10447_s26 + $0x128] sm:$0xff] }
 0x23a   : > { %1958 = vst [vmem:[#allocation2 + $0x40] sm:$0xff] %v1830_v57  ;;  %v1833_v58 = vmax.f32 %v1705_v56, %v11390_v52  ;;  %v1706_v39 = vld [vmem:[#allocation2 + $0x60] sm:$0xff]  ;;  %v1707_v1 = vld [vmem:[#allocation2 + $0x68] sm:$0xff]  ;;  %v11402_v3 = vld [vmem:[%s10447_s26 + $0x158] sm:$0xff] }
 0x23b   : > { %v11398_v35 = vld [vmem:[%s10447_s26 + $0x140] sm:$0xff]  ;;  %1959 = vst [vmem:[#allocation2 + $0x48] sm:$0xff] %v1831_v10  ;;  %v1834_v61 = vmax.f32 %v1706_v39, %v11395_v30  ;;  %v1708_v11 = vld [vmem:[#allocation2 + $0x70] sm:$0xff]  ;;  %1960 = vst [vmem:[#allocation2 + $0x50] sm:$0xff] %v1832_v6 }
 0x23c   : > { %1961 = vst [vmem:[#allocation2 + $0x58] sm:$0xff] %v1833_v58  ;;  %v1835_v13 = vmax.f32 %v1707_v1, %v11398_v35  ;;  %v1836_v23 = vmax.f32 %v1708_v11, %v11402_v3  ;;  %v11407_v7 = vld [vmem:[%s10447_s26 + $0x170] sm:$0xff]  ;;  %v1709_v12 = vld [vmem:[#allocation2 + $0x78] sm:$0xff]  ;;  %v11410_v15 = vld [vmem:[%s10447_s26 + $0x188] sm:$0xff] }
 0x23d   : > { %1962 = vst [vmem:[#allocation2 + $0x60] sm:$0xff] %v1834_v61  ;;  %v1837_v33 = vmax.f32 %v1709_v12, %v11407_v7  ;;  %v1710_v53 = vld [vmem:[#allocation2 + $0x80] sm:$0xff]  ;;  %v1711_v18 = vld [vmem:[#allocation2 + $0x88] sm:$0xff]  ;;  %v11419_v20 = vld [vmem:[%s10447_s26 + $0x1b8] sm:$0xff] }
 0x23e   : > { %v11414_v26 = vld [vmem:[%s10447_s26 + $0x1a0] sm:$0xff]  ;;  %1963 = vst [vmem:[#allocation2 + $0x68] sm:$0xff] %v1835_v13  ;;  %1964 = vst [vmem:[#allocation2 + $0x70] sm:$0xff] %v1836_v23  ;;  %v1838_v24 = vmax.f32 %v1710_v53, %v11410_v15  ;;  %v1712_v22 = vld [vmem:[#allocation2 + $0x90] sm:$0xff] }
 0x23f   : > { %v1839_v27 = vmax.f32 %v1711_v18, %v11414_v26  ;;  %v11422_v16 = vld [vmem:[%s10447_s26 + $0x1d0] sm:$0xff]  ;;  %1965 = vst [vmem:[#allocation2 + $0x78] sm:$0xff] %v1837_v33  ;;  %v1840_v32 = vmax.f32 %v1712_v22, %v11419_v20  ;;  %v1713_v37 = vld [vmem:[#allocation2 + $0x98] sm:$0xff]  ;;  %v11426_v41 = vld [vmem:[%s10447_s26 + $0x1e8] sm:$0xff] }
 0x240   : > { %v1714_v14 = vld [vmem:[#allocation2 + $0xa0] sm:$0xff]  ;;  %1966 = vst [vmem:[#allocation2 + $0x80] sm:$0xff] %v1838_v24  ;;  %v1841_v8 = vmax.f32 %v1713_v37, %v11422_v16  ;;  %v1715_v51 = vld [vmem:[#allocation2 + $0xa8] sm:$0xff]  ;;  %v11434_v54 = vld [vmem:[%s10447_s26 + $0x218] sm:$0xff] }
 0x241   : > { %1967 = vst [vmem:[#allocation2 + $0x88] sm:$0xff] %v1839_v27  ;;  %v1842_v44 = vmax.f32 %v1714_v14, %v11426_v41  ;;  %v11431_v45 = vld [vmem:[%s10447_s26 + $0x200] sm:$0xff]  ;;  %1968 = vst [vmem:[#allocation2 + $0x90] sm:$0xff] %v1840_v32  ;;  %v1716_v29 = vld [vmem:[#allocation2 + $0xb0] sm:$0xff] }
 0x242   : > { %v1843_v25 = vmax.f32 %v1715_v51, %v11431_v45  ;;  %v11438_v31 = vld [vmem:[%s10447_s26 + $0x230] sm:$0xff]  ;;  %v1717_v59 = vld [vmem:[#allocation2 + $0xb8] sm:$0xff]  ;;  %1969 = vst [vmem:[#allocation2 + $0x98] sm:$0xff] %v1841_v8  ;;  %v1844_v0 = vmax.f32 %v1716_v29, %v11434_v54  ;;  %v11443_v19 = vld [vmem:[%s10447_s26 + $0x248] sm:$0xff] }
 0x243   : > { %1970 = vst [vmem:[#allocation2 + $0xa0] sm:$0xff] %v1842_v44  ;;  %v1845_v5 = vmax.f32 %v1717_v59, %v11438_v31  ;;  %v1718_v60 = vld [vmem:[#allocation2 + $0xc0] sm:$0xff]  ;;  %v1719_v34 = vld [vmem:[#allocation2 + $0xc8] sm:$0xff]  ;;  %v11450_v38 = vld [vmem:[%s10447_s26 + $0x278] sm:$0xff] }
 0x244   : > { %v11446_v17 = vld [vmem:[%s10447_s26 + $0x260] sm:$0xff]  ;;  %1971 = vst [vmem:[#allocation2 + $0xa8] sm:$0xff] %v1843_v25  ;;  %v1846_v21 = vmax.f32 %v1718_v60, %v11443_v19  ;;  %v1720_v40 = vld [vmem:[#allocation2 + $0xd0] sm:$0xff]  ;;  %1972 = vst [vmem:[#allocation2 + $0xb0] sm:$0xff] %v1844_v0 }
 0x245   : > { %1973 = vst [vmem:[#allocation2 + $0xb8] sm:$0xff] %v1845_v5  ;;  %v1847_v28 = vmax.f32 %v1719_v34, %v11446_v17  ;;  %v1848_v42 = vmax.f32 %v1720_v40, %v11450_v38  ;;  %v11455_v50 = vld [vmem:[%s10447_s26 + $0x290] sm:$0xff]  ;;  %v1721_v2 = vld [vmem:[#allocation2 + $0xd8] sm:$0xff]  ;;  %v11458_v47 = vld [vmem:[%s10447_s26 + $0x2a8] sm:$0xff] }
 0x246   : > { %1974 = vst [vmem:[#allocation2 + $0xc0] sm:$0xff] %v1846_v21  ;;  %v1849_v48 = vmax.f32 %v1721_v2, %v11455_v50  ;;  %v1722_v57 = vld [vmem:[#allocation2 + $0xe0] sm:$0xff]  ;;  %v1723_v10 = vld [vmem:[#allocation2 + $0xe8] sm:$0xff]  ;;  %v11467_v6 = vld [vmem:[%s10447_s26 + $0x2d8] sm:$0xff] }
 0x247   : > { %v11462_v49 = vld [vmem:[%s10447_s26 + $0x2c0] sm:$0xff]  ;;  %1975 = vst [vmem:[#allocation2 + $0xc8] sm:$0xff] %v1847_v28  ;;  %1976 = vst [vmem:[#allocation2 + $0xd0] sm:$0xff] %v1848_v42  ;;  %v1850_v4 = vmax.f32 %v1722_v57, %v11458_v47  ;;  %v1724_v58 = vld [vmem:[#allocation2 + $0xf0] sm:$0xff] }
 0x248   : > { %v1851_v56 = vmax.f32 %v1723_v10, %v11462_v49  ;;  %v11470_v39 = vld [vmem:[%s10447_s26 + $0x2f0] sm:$0xff]  ;;  %1977 = vst [vmem:[#allocation2 + $0xd8] sm:$0xff] %v1849_v48  ;;  %v1852_v61 = vmax.f32 %v1724_v58, %v11467_v6  ;;  %v1725_v1 = vld [vmem:[#allocation2 + $0xf8] sm:$0xff]  ;;  %v11474_v11 = vld [vmem:[%s10447_s26 + $0x308] sm:$0xff] }
 0x249   : > { %v1726_v13 = vld [vmem:[#allocation2 + $0x100] sm:$0xff]  ;;  %1978 = vst [vmem:[#allocation2 + $0xe0] sm:$0xff] %v1850_v4  ;;  %v1853_v23 = vmax.f32 %v1725_v1, %v11470_v39  ;;  %v1727_v53 = vld [vmem:[#allocation2 + $0x108] sm:$0xff]  ;;  %v11482_v18 = vld [vmem:[%s10447_s26 + $0x338] sm:$0xff] }
 0x24a   : > { %1979 = vst [vmem:[#allocation2 + $0xe8] sm:$0xff] %v1851_v56  ;;  %v1854_v12 = vmax.f32 %v1726_v13, %v11474_v11  ;;  %v11479_v33 = vld [vmem:[%s10447_s26 + $0x320] sm:$0xff]  ;;  %1980 = vst [vmem:[#allocation2 + $0xf0] sm:$0xff] %v1852_v61  ;;  %v1728_v27 = vld [vmem:[#allocation2 + $0x110] sm:$0xff] }
 0x24b   : > { %v1855_v24 = vmax.f32 %v1727_v53, %v11479_v33  ;;  %v11486_v22 = vld [vmem:[%s10447_s26 + $0x350] sm:$0xff]  ;;  %v1729_v32 = vld [vmem:[#allocation2 + $0x118] sm:$0xff]  ;;  %1981 = vst [vmem:[#allocation2 + $0xf8] sm:$0xff] %v1853_v23  ;;  %v1856_v37 = vmax.f32 %v1728_v27, %v11482_v18  ;;  %v11491_v8 = vld [vmem:[%s10447_s26 + $0x368] sm:$0xff] }
 0x24c   : > { %1982 = vst [vmem:[#allocation2 + $0x100] sm:$0xff] %v1854_v12  ;;  %v1857_v14 = vmax.f32 %v1729_v32, %v11486_v22  ;;  %v1730_v44 = vld [vmem:[#allocation2 + $0x120] sm:$0xff]  ;;  %v1731_v29 = vld [vmem:[#allocation2 + $0x128] sm:$0xff]  ;;  %v11498_v59 = vld [vmem:[%s10447_s26 + $0x398] sm:$0xff] }
 0x24d   : > { %v11494_v51 = vld [vmem:[%s10447_s26 + $0x380] sm:$0xff]  ;;  %1983 = vst [vmem:[#allocation2 + $0x108] sm:$0xff] %v1855_v24  ;;  %v1858_v25 = vmax.f32 %v1730_v44, %v11491_v8  ;;  %v1732_v0 = vld [vmem:[#allocation2 + $0x130] sm:$0xff]  ;;  %1984 = vst [vmem:[#allocation2 + $0x110] sm:$0xff] %v1856_v37 }
 0x24e   : > { %1985 = vst [vmem:[#allocation2 + $0x118] sm:$0xff] %v1857_v14  ;;  %v1859_v5 = vmax.f32 %v1731_v29, %v11494_v51  ;;  %v1860_v60 = vmax.f32 %v1732_v0, %v11498_v59  ;;  %v11503_v21 = vld [vmem:[%s10447_s26 + $0x3b0] sm:$0xff]  ;;  %v1733_v34 = vld [vmem:[#allocation2 + $0x138] sm:$0xff]  ;;  %v11506_v40 = vld [vmem:[%s10447_s26 + $0x3c8] sm:$0xff] }
 0x24f   : > { %1986 = vst [vmem:[#allocation2 + $0x120] sm:$0xff] %v1858_v25  ;;  %v1861_v28 = vmax.f32 %v1733_v34, %v11503_v21  ;;  %v1734_v42 = vld [vmem:[#allocation2 + $0x140] sm:$0xff]  ;;  %v1735_v48 = vld [vmem:[#allocation2 + $0x148] sm:$0xff]  ;;  %v11515_v4 = vld [vmem:[%s10447_s26 + $0x3f8] sm:$0xff] }
 0x250   : > { %v11510_v2 = vld [vmem:[%s10447_s26 + $0x3e0] sm:$0xff]  ;;  %1987 = vst [vmem:[#allocation2 + $0x128] sm:$0xff] %v1859_v5  ;;  %1988 = vst [vmem:[#allocation2 + $0x130] sm:$0xff] %v1860_v60  ;;  %v1862_v57 = vmax.f32 %v1734_v42, %v11506_v40  ;;  %v1736_v56 = vld [vmem:[#allocation2 + $0x150] sm:$0xff] }
 0x251   : > { %v1863_v10 = vmax.f32 %v1735_v48, %v11510_v2  ;;  %v11518_v58 = vld [vmem:[%s10447_s26 + $0x410] sm:$0xff]  ;;  %1989 = vst [vmem:[#allocation2 + $0x138] sm:$0xff] %v1861_v28  ;;  %v1864_v61 = vmax.f32 %v1736_v56, %v11515_v4  ;;  %v1737_v1 = vld [vmem:[#allocation2 + $0x158] sm:$0xff]  ;;  %v11522_v13 = vld [vmem:[%s10447_s26 + $0x428] sm:$0xff] }
 0x252   : > { %v1738_v23 = vld [vmem:[#allocation2 + $0x160] sm:$0xff]  ;;  %1990 = vst [vmem:[#allocation2 + $0x140] sm:$0xff] %v1862_v57  ;;  %v1865_v12 = vmax.f32 %v1737_v1, %v11518_v58  ;;  %v1739_v27 = vld [vmem:[#allocation2 + $0x168] sm:$0xff]  ;;  %v11530_v32 = vld [vmem:[%s10447_s26 + $0x458] sm:$0xff] }
 0x253   : > { %1991 = vst [vmem:[#allocation2 + $0x148] sm:$0xff] %v1863_v10  ;;  %v1866_v53 = vmax.f32 %v1738_v23, %v11522_v13  ;;  %v11527_v24 = vld [vmem:[%s10447_s26 + $0x440] sm:$0xff]  ;;  %1992 = vst [vmem:[#allocation2 + $0x150] sm:$0xff] %v1864_v61  ;;  %v1740_v14 = vld [vmem:[#allocation2 + $0x170] sm:$0xff] }
 0x254   : > { %v1867_v37 = vmax.f32 %v1739_v27, %v11527_v24  ;;  %v11534_v44 = vld [vmem:[%s10447_s26 + $0x470] sm:$0xff]  ;;  %v1741_v25 = vld [vmem:[#allocation2 + $0x178] sm:$0xff]  ;;  %1993 = vst [vmem:[#allocation2 + $0x158] sm:$0xff] %v1865_v12  ;;  %v1868_v29 = vmax.f32 %v1740_v14, %v11530_v32  ;;  %v11539_v5 = vld [vmem:[%s10447_s26 + $0x488] sm:$0xff] }
 0x255   : > { %1994 = vst [vmem:[#allocation2 + $0x160] sm:$0xff] %v1866_v53  ;;  %v1869_v0 = vmax.f32 %v1741_v25, %v11534_v44  ;;  %14022 = vst [vmem:[#allocation25_spill] sm:$0xff] %v11539_v5  ;;  %v1742_v60 = vld [vmem:[#allocation2 + $0x180] sm:$0xff]  ;;  %v1743_v42 = vld [vmem:[#allocation2 + $0x188] sm:$0xff] }
 0x256   : > { %v11542_v34 = vld [vmem:[%s10447_s26 + $0x4a0] sm:$0xff]  ;;  %1995 = vst [vmem:[#allocation2 + $0x168] sm:$0xff] %v1867_v37  ;;  %v1870_v28 = vmax.f32 %v1742_v60, %v11539_v5  ;;  %v11546_v48 = vld [vmem:[%s10447_s26 + $0x4b8] sm:$0xff]  ;;  %v1744_v57 = vld [vmem:[#allocation2 + $0x190] sm:$0xff] }
 0x257   : > { %14023 = vst [vmem:[#allocation26_spill] sm:$0xff] %v11542_v34  ;;  %14024 = vst [vmem:[#allocation27_spill] sm:$0xff] %v11546_v48  ;;  %v1871_v10 = vmax.f32 %v1743_v42, %v11542_v34  ;;  %v1872_v56 = vmax.f32 %v1744_v57, %v11546_v48  ;;  %v11551_v61 = vld [vmem:[%s10447_s26 + $0x4d0] sm:$0xff]  ;;  %v1745_v1 = vld [vmem:[#allocation2 + $0x198] sm:$0xff] }
 0x258   : > { %1996 = vst [vmem:[#allocation2 + $0x170] sm:$0xff] %v1868_v29  ;;  %1997 = vst [vmem:[#allocation2 + $0x178] sm:$0xff] %v1869_v0  ;;  %v11554_v23 = vld [vmem:[%s10447_s26 + $0x4e8] sm:$0xff]  ;;  %v1873_v12 = vmax.f32 %v1745_v1, %v11551_v61  ;;  %v1746_v53 = vld [vmem:[#allocation2 + $0x1a0] sm:$0xff] }
 0x259   : > { %14025 = vst [vmem:[#allocation28_spill] sm:$0xff] %v11551_v61  ;;  %14026 = vst [vmem:[#allocation29_spill] sm:$0xff] %v11554_v23  ;;  %v11558_v27 = vld [vmem:[%s10447_s26 + $0x500] sm:$0xff]  ;;  %v1747_v37 = vld [vmem:[#allocation2 + $0x1a8] sm:$0xff]  ;;  %v1874_v14 = vmax.f32 %v1746_v53, %v11554_v23 }
 0x25a   : > { %1998 = vst [vmem:[#allocation2 + $0x180] sm:$0xff] %v1870_v28  ;;  %14027 = vst [vmem:[#allocation30_spill] sm:$0xff] %v11558_v27  ;;  %v1875_v25 = vmax.f32 %v1747_v37, %v11558_v27  ;;  %v11563_v29 = vld [vmem:[%s10447_s26 + $0x518] sm:$0xff]  ;;  %v1748_v0 = vld [vmem:[#allocation2 + $0x1b0] sm:$0xff] }
 0x25b   : > { %1999 = vst [vmem:[#allocation2 + $0x188] sm:$0xff] %v1871_v10  ;;  %2000 = vst [vmem:[#allocation2 + $0x190] sm:$0xff] %v1872_v56  ;;  %v11566_v60 = vld [vmem:[%s10447_s26 + $0x530] sm:$0xff]  ;;  %v1876_v28 = vmax.f32 %v1748_v0, %v11563_v29  ;;  %v1749_v42 = vld [vmem:[#allocation2 + $0x1b8] sm:$0xff] }
 0x25c   : > { %14028 = vst [vmem:[#allocation31_spill] sm:$0xff] %v11563_v29  ;;  %14029 = vst [vmem:[#allocation32_spill] sm:$0xff] %v11566_v60  ;;  %v11570_v57 = vld [vmem:[%s10447_s26 + $0x548] sm:$0xff]  ;;  %v1750_v10 = vld [vmem:[#allocation2 + $0x1c0] sm:$0xff]  ;;  %v1877_v56 = vmax.f32 %v1749_v42, %v11566_v60 }
 0x25d   : > { %2001 = vst [vmem:[#allocation2 + $0x198] sm:$0xff] %v1873_v12  ;;  %14030 = vst [vmem:[#allocation33_spill] sm:$0xff] %v11570_v57  ;;  %v1878_v1 = vmax.f32 %v1750_v10, %v11570_v57  ;;  %v11575_v53 = vld [vmem:[%s10447_s26 + $0x560] sm:$0xff]  ;;  %v1751_v37 = vld [vmem:[#allocation2 + $0x1c8] sm:$0xff] }
 0x25e   : > { %2002 = vst [vmem:[#allocation2 + $0x1a0] sm:$0xff] %v1874_v14  ;;  %2003 = vst [vmem:[#allocation2 + $0x1a8] sm:$0xff] %v1875_v25  ;;  %v11578_v27 = vld [vmem:[%s10447_s26 + $0x578] sm:$0xff]  ;;  %v1879_v12 = vmax.f32 %v1751_v37, %v11575_v53  ;;  %v1752_v0 = vld [vmem:[#allocation2 + $0x1d0] sm:$0xff] }
 0x25f   : > { %14031 = vst [vmem:[#allocation34_spill] sm:$0xff] %v11575_v53  ;;  %14032 = vst [vmem:[#allocation35_spill] sm:$0xff] %v11578_v27  ;;  %v11582_v29 = vld [vmem:[%s10447_s26 + $0x590] sm:$0xff]  ;;  %v1753_v14 = vld [vmem:[#allocation2 + $0x1d8] sm:$0xff]  ;;  %v1880_v25 = vmax.f32 %v1752_v0, %v11578_v27 }
 0x260   : > { %2004 = vst [vmem:[#allocation2 + $0x1b0] sm:$0xff] %v1876_v28  ;;  %14033 = vst [vmem:[#allocation36_spill] sm:$0xff] %v11582_v29  ;;  %v1881_v42 = vmax.f32 %v1753_v14, %v11582_v29  ;;  %v11587_v10 = vld [vmem:[%s10447_s26 + $0x5a8] sm:$0xff]  ;;  %v1754_v57 = vld [vmem:[#allocation2 + $0x1e0] sm:$0xff] }
 0x261   : > { %2005 = vst [vmem:[#allocation2 + $0x1b8] sm:$0xff] %v1877_v56  ;;  %2006 = vst [vmem:[#allocation2 + $0x1c0] sm:$0xff] %v1878_v1  ;;  %v11590_v60 = vld [vmem:[%s10447_s26 + $0x5c0] sm:$0xff]  ;;  %v1882_v28 = vmax.f32 %v1754_v57, %v11587_v10  ;;  %v1755_v37 = vld [vmem:[#allocation2 + $0x1e8] sm:$0xff] }
 0x262   : > { %14034 = vst [vmem:[#allocation37_spill] sm:$0xff] %v11587_v10  ;;  %14035 = vst [vmem:[#allocation38_spill] sm:$0xff] %v11590_v60  ;;  %v11594_v53 = vld [vmem:[%s10447_s26 + $0x5d8] sm:$0xff]  ;;  %v1756_v56 = vld [vmem:[#allocation2 + $0x1f0] sm:$0xff]  ;;  %v1883_v1 = vmax.f32 %v1755_v37, %v11590_v60 }
 0x263   : > { %2007 = vst [vmem:[#allocation2 + $0x1c8] sm:$0xff] %v1879_v12  ;;  %14036 = vst [vmem:[#allocation39_spill] sm:$0xff] %v11594_v53  ;;  %v1884_v0 = vmax.f32 %v1756_v56, %v11594_v53  ;;  %v11599_v14 = vld [vmem:[%s10447_s26 + $0x5f0] sm:$0xff]  ;;  %v1757_v29 = vld [vmem:[#allocation2 + $0x1f8] sm:$0xff] }
 0x264   : > { %2008 = vst [vmem:[#allocation2 + $0x1d0] sm:$0xff] %v1880_v25  ;;  %2009 = vst [vmem:[#allocation2 + $0x1d8] sm:$0xff] %v1881_v42  ;;  %v11602_v27 = vld [vmem:[%s10447_s26 + $0x608] sm:$0xff]  ;;  %v1885_v57 = vmax.f32 %v1757_v29, %v11599_v14  ;;  %v1758_v12 = vld [vmem:[#allocation2 + $0x200] sm:$0xff] }
 0x265   : > { %14037 = vst [vmem:[#allocation40_spill] sm:$0xff] %v11599_v14  ;;  %14038 = vst [vmem:[#allocation41_spill] sm:$0xff] %v11602_v27  ;;  %v11606_v10 = vld [vmem:[%s10447_s26 + $0x620] sm:$0xff]  ;;  %v1759_v25 = vld [vmem:[#allocation2 + $0x208] sm:$0xff]  ;;  %v1886_v42 = vmax.f32 %v1758_v12, %v11602_v27 }
 0x266   : > { %2010 = vst [vmem:[#allocation2 + $0x1e0] sm:$0xff] %v1882_v28  ;;  %14039 = vst [vmem:[#allocation42_spill] sm:$0xff] %v11606_v10  ;;  %v1887_v37 = vmax.f32 %v1759_v25, %v11606_v10  ;;  %v11611_v56 = vld [vmem:[%s10447_s26 + $0x638] sm:$0xff]  ;;  %v1760_v53 = vld [vmem:[#allocation2 + $0x210] sm:$0xff] }
 0x267   : > { %2011 = vst [vmem:[#allocation2 + $0x1e8] sm:$0xff] %v1883_v1  ;;  %2012 = vst [vmem:[#allocation2 + $0x1f0] sm:$0xff] %v1884_v0  ;;  %v11614_v60 = vld [vmem:[%s10447_s26 + $0x650] sm:$0xff]  ;;  %v1888_v29 = vmax.f32 %v1760_v53, %v11611_v56  ;;  %v1761_v28 = vld [vmem:[#allocation2 + $0x218] sm:$0xff] }
 0x268   : > { %14040 = vst [vmem:[#allocation43_spill] sm:$0xff] %v11611_v56  ;;  %14041 = vst [vmem:[#allocation44_spill] sm:$0xff] %v11614_v60  ;;  %v11618_v14 = vld [vmem:[%s10447_s26 + $0x668] sm:$0xff]  ;;  %v1762_v1 = vld [vmem:[#allocation2 + $0x220] sm:$0xff]  ;;  %v1889_v0 = vmax.f32 %v1761_v28, %v11614_v60 }
 0x269   : > { %2013 = vst [vmem:[#allocation2 + $0x1f8] sm:$0xff] %v1885_v57  ;;  %14042 = vst [vmem:[#allocation45_spill] sm:$0xff] %v11618_v14  ;;  %v1890_v12 = vmax.f32 %v1762_v1, %v11618_v14  ;;  %v11623_v25 = vld [vmem:[%s10447_s26 + $0x680] sm:$0xff]  ;;  %v1763_v10 = vld [vmem:[#allocation2 + $0x228] sm:$0xff] }
 0x26a   : > { %2014 = vst [vmem:[#allocation2 + $0x200] sm:$0xff] %v1886_v42  ;;  %2015 = vst [vmem:[#allocation2 + $0x208] sm:$0xff] %v1887_v37  ;;  %v11626_v27 = vld [vmem:[%s10447_s26 + $0x698] sm:$0xff]  ;;  %v1891_v53 = vmax.f32 %v1763_v10, %v11623_v25  ;;  %v1764_v57 = vld [vmem:[#allocation2 + $0x230] sm:$0xff] }
 0x26b   : > { %14043 = vst [vmem:[#allocation46_spill] sm:$0xff] %v11623_v25  ;;  %14044 = vst [vmem:[#allocation47_spill] sm:$0xff] %v11626_v27  ;;  %v11630_v56 = vld [vmem:[%s10447_s26 + $0x6b0] sm:$0xff]  ;;  %v1765_v42 = vld [vmem:[#allocation2 + $0x238] sm:$0xff]  ;;  %v1892_v37 = vmax.f32 %v1764_v57, %v11626_v27 }
 0x26c   : > { %2016 = vst [vmem:[#allocation2 + $0x210] sm:$0xff] %v1888_v29  ;;  %14045 = vst [vmem:[#allocation48_spill] sm:$0xff] %v11630_v56  ;;  %v1893_v28 = vmax.f32 %v1765_v42, %v11630_v56  ;;  %v11635_v1 = vld [vmem:[%s10447_s26 + $0x6c8] sm:$0xff]  ;;  %v1766_v14 = vld [vmem:[#allocation2 + $0x240] sm:$0xff] }
 0x26d   : > { %2017 = vst [vmem:[#allocation2 + $0x218] sm:$0xff] %v1889_v0  ;;  %2018 = vst [vmem:[#allocation2 + $0x220] sm:$0xff] %v1890_v12  ;;  %v11638_v60 = vld [vmem:[%s10447_s26 + $0x6e0] sm:$0xff]  ;;  %v1894_v10 = vmax.f32 %v1766_v14, %v11635_v1  ;;  %v1767_v29 = vld [vmem:[#allocation2 + $0x248] sm:$0xff] }
 0x26e   : > { %14046 = vst [vmem:[#allocation49_spill] sm:$0xff] %v11635_v1  ;;  %14047 = vst [vmem:[#allocation50_spill] sm:$0xff] %v11638_v60  ;;  %v11642_v25 = vld [vmem:[%s10447_s26 + $0x6f8] sm:$0xff]  ;;  %v1768_v0 = vld [vmem:[#allocation2 + $0x250] sm:$0xff]  ;;  %v1895_v12 = vmax.f32 %v1767_v29, %v11638_v60 }
 0x26f   : > { %2019 = vst [vmem:[#allocation2 + $0x228] sm:$0xff] %v1891_v53  ;;  %14048 = vst [vmem:[#allocation51_spill] sm:$0xff] %v11642_v25  ;;  %v1896_v57 = vmax.f32 %v1768_v0, %v11642_v25  ;;  %v11647_v42 = vld [vmem:[%s10447_s26 + $0x710] sm:$0xff]  ;;  %v1769_v56 = vld [vmem:[#allocation2 + $0x258] sm:$0xff] }
 0x270   : > { %2020 = vst [vmem:[#allocation2 + $0x230] sm:$0xff] %v1892_v37  ;;  %2021 = vst [vmem:[#allocation2 + $0x238] sm:$0xff] %v1893_v28  ;;  %v11650_v27 = vld [vmem:[%s10447_s26 + $0x728] sm:$0xff]  ;;  %v1897_v14 = vmax.f32 %v1769_v56, %v11647_v42  ;;  %v1770_v53 = vld [vmem:[#allocation2 + $0x260] sm:$0xff] }
 0x271   : > { %14049 = vst [vmem:[#allocation52_spill] sm:$0xff] %v11647_v42  ;;  %14050 = vst [vmem:[#allocation53_spill] sm:$0xff] %v11650_v27  ;;  %v11654_v1 = vld [vmem:[%s10447_s26 + $0x740] sm:$0xff]  ;;  %v1771_v37 = vld [vmem:[#allocation2 + $0x268] sm:$0xff]  ;;  %v1898_v28 = vmax.f32 %v1770_v53, %v11650_v27 }
 0x272   : > { %2022 = vst [vmem:[#allocation2 + $0x240] sm:$0xff] %v1894_v10  ;;  %14051 = vst [vmem:[#allocation54_spill] sm:$0xff] %v11654_v1  ;;  %v1899_v29 = vmax.f32 %v1771_v37, %v11654_v1  ;;  %v11659_v0 = vld [vmem:[%s10447_s26 + $0x758] sm:$0xff]  ;;  %v1772_v25 = vld [vmem:[#allocation2 + $0x270] sm:$0xff] }
 0x273   : > { %2023 = vst [vmem:[#allocation2 + $0x248] sm:$0xff] %v1895_v12  ;;  %2024 = vst [vmem:[#allocation2 + $0x250] sm:$0xff] %v1896_v57  ;;  %v11662_v60 = vld [vmem:[%s10447_s26 + $0x770] sm:$0xff]  ;;  %v1900_v56 = vmax.f32 %v1772_v25, %v11659_v0  ;;  %v1773_v10 = vld [vmem:[#allocation2 + $0x278] sm:$0xff] }
 0x274   : > { %14052 = vst [vmem:[#allocation55_spill] sm:$0xff] %v11659_v0  ;;  %14053 = vst [vmem:[#allocation56_spill] sm:$0xff] %v11662_v60  ;;  %v11666_v42 = vld [vmem:[%s10447_s26 + $0x788] sm:$0xff]  ;;  %v1774_v12 = vld [vmem:[#allocation2 + $0x280] sm:$0xff]  ;;  %v1901_v57 = vmax.f32 %v1773_v10, %v11662_v60 }
 0x275   : > { %2025 = vst [vmem:[#allocation2 + $0x258] sm:$0xff] %v1897_v14  ;;  %14054 = vst [vmem:[#allocation57_spill] sm:$0xff] %v11666_v42  ;;  %v1902_v53 = vmax.f32 %v1774_v12, %v11666_v42  ;;  %v11671_v37 = vld [vmem:[%s10447_s26 + $0x7a0] sm:$0xff]  ;;  %v1775_v1 = vld [vmem:[#allocation2 + $0x288] sm:$0xff] }
 0x276   : > { %2026 = vst [vmem:[#allocation2 + $0x260] sm:$0xff] %v1898_v28  ;;  %2027 = vst [vmem:[#allocation2 + $0x268] sm:$0xff] %v1899_v29  ;;  %v11674_v27 = vld [vmem:[%s10447_s26 + $0x7b8] sm:$0xff]  ;;  %v1903_v25 = vmax.f32 %v1775_v1, %v11671_v37  ;;  %v1776_v14 = vld [vmem:[#allocation2 + $0x290] sm:$0xff] }
 0x277   : > { %14055 = vst [vmem:[#allocation58_spill] sm:$0xff] %v11671_v37  ;;  %14056 = vst [vmem:[#allocation59_spill] sm:$0xff] %v11674_v27  ;;  %v11678_v0 = vld [vmem:[%s10447_s26 + $0x7d0] sm:$0xff]  ;;  %v1777_v28 = vld [vmem:[#allocation2 + $0x298] sm:$0xff]  ;;  %v1904_v29 = vmax.f32 %v1776_v14, %v11674_v27 }
 0x278   : > { %2028 = vst [vmem:[#allocation2 + $0x270] sm:$0xff] %v1900_v56  ;;  %14057 = vst [vmem:[#allocation60_spill] sm:$0xff] %v11678_v0  ;;  %v1905_v10 = vmax.f32 %v1777_v28, %v11678_v0  ;;  %v11683_v12 = vld [vmem:[%s10447_s26 + $0x7e8] sm:$0xff]  ;;  %v1778_v42 = vld [vmem:[#allocation2 + $0x2a0] sm:$0xff] }
 0x279   : > { %2029 = vst [vmem:[#allocation2 + $0x278] sm:$0xff] %v1901_v57  ;;  %2030 = vst [vmem:[#allocation2 + $0x280] sm:$0xff] %v1902_v53  ;;  %v11686_v60 = vld [vmem:[%s10447_s26 + $0x800] sm:$0xff]  ;;  %v1906_v1 = vmax.f32 %v1778_v42, %v11683_v12  ;;  %v1779_v56 = vld [vmem:[#allocation2 + $0x2a8] sm:$0xff] }
 0x27a   : > { %14058 = vst [vmem:[#allocation61_spill] sm:$0xff] %v11683_v12  ;;  %14059 = vst [vmem:[#allocation62_spill] sm:$0xff] %v11686_v60  ;;  %v11690_v37 = vld [vmem:[%s10447_s26 + $0x818] sm:$0xff]  ;;  %v1780_v57 = vld [vmem:[#allocation2 + $0x2b0] sm:$0xff]  ;;  %v1907_v53 = vmax.f32 %v1779_v56, %v11686_v60 }
 0x27b   : > { %2031 = vst [vmem:[#allocation2 + $0x288] sm:$0xff] %v1903_v25  ;;  %14060 = vst [vmem:[#allocation63_spill] sm:$0xff] %v11690_v37  ;;  %v1908_v14 = vmax.f32 %v1780_v57, %v11690_v37  ;;  %v11695_v28 = vld [vmem:[%s10447_s26 + $0x830] sm:$0xff]  ;;  %v1781_v0 = vld [vmem:[#allocation2 + $0x2b8] sm:$0xff] }
 0x27c   : > { %2032 = vst [vmem:[#allocation2 + $0x290] sm:$0xff] %v1904_v29  ;;  %2033 = vst [vmem:[#allocation2 + $0x298] sm:$0xff] %v1905_v10  ;;  %v11698_v27 = vld [vmem:[%s10447_s26 + $0x848] sm:$0xff]  ;;  %v1909_v42 = vmax.f32 %v1781_v0, %v11695_v28  ;;  %v1782_v25 = vld [vmem:[#allocation2 + $0x2c0] sm:$0xff] }
 0x27d   : > { %14061 = vst [vmem:[#allocation64_spill] sm:$0xff] %v11695_v28  ;;  %14062 = vst [vmem:[#allocation65_spill] sm:$0xff] %v11698_v27  ;;  %v11702_v12 = vld [vmem:[%s10447_s26 + $0x860] sm:$0xff]  ;;  %v1783_v29 = vld [vmem:[#allocation2 + $0x2c8] sm:$0xff]  ;;  %v1910_v10 = vmax.f32 %v1782_v25, %v11698_v27 }
 0x27e   : > { %2034 = vst [vmem:[#allocation2 + $0x2a0] sm:$0xff] %v1906_v1  ;;  %14063 = vst [vmem:[#allocation66_spill] sm:$0xff] %v11702_v12  ;;  %v1911_v56 = vmax.f32 %v1783_v29, %v11702_v12  ;;  %v11707_v57 = vld [vmem:[%s10447_s26 + $0x878] sm:$0xff]  ;;  %v1784_v37 = vld [vmem:[#allocation2 + $0x2d0] sm:$0xff] }
 0x27f   : > { %2035 = vst [vmem:[#allocation2 + $0x2a8] sm:$0xff] %v1907_v53  ;;  %2036 = vst [vmem:[#allocation2 + $0x2b0] sm:$0xff] %v1908_v14  ;;  %v11710_v60 = vld [vmem:[%s10447_s26 + $0x890] sm:$0xff]  ;;  %v1912_v0 = vmax.f32 %v1784_v37, %v11707_v57  ;;  %v1785_v1 = vld [vmem:[#allocation2 + $0x2d8] sm:$0xff] }
 0x280   : > { %14064 = vst [vmem:[#allocation67_spill] sm:$0xff] %v11707_v57  ;;  %14065 = vst [vmem:[#allocation68_spill] sm:$0xff] %v11710_v60  ;;  %v11714_v28 = vld [vmem:[%s10447_s26 + $0x8a8] sm:$0xff]  ;;  %v1786_v53 = vld [vmem:[#allocation2 + $0x2e0] sm:$0xff]  ;;  %v1913_v14 = vmax.f32 %v1785_v1, %v11710_v60 }
 0x281   : > { %2037 = vst [vmem:[#allocation2 + $0x2b8] sm:$0xff] %v1909_v42  ;;  %14066 = vst [vmem:[#allocation69_spill] sm:$0xff] %v11714_v28  ;;  %v1914_v25 = vmax.f32 %v1786_v53, %v11714_v28  ;;  %v11719_v29 = vld [vmem:[%s10447_s26 + $0x8c0] sm:$0xff]  ;;  %v1787_v12 = vld [vmem:[#allocation2 + $0x2e8] sm:$0xff] }
 0x282   : > { %2038 = vst [vmem:[#allocation2 + $0x2c0] sm:$0xff] %v1910_v10  ;;  %2039 = vst [vmem:[#allocation2 + $0x2c8] sm:$0xff] %v1911_v56  ;;  %v11722_v27 = vld [vmem:[%s10447_s26 + $0x8d8] sm:$0xff]  ;;  %v1915_v37 = vmax.f32 %v1787_v12, %v11719_v29  ;;  %v1788_v42 = vld [vmem:[#allocation2 + $0x2f0] sm:$0xff] }
 0x283   : > { %14067 = vst [vmem:[#allocation70_spill] sm:$0xff] %v11719_v29  ;;  %14068 = vst [vmem:[#allocation71_spill] sm:$0xff] %v11722_v27  ;;  %v11726_v57 = vld [vmem:[%s10447_s26 + $0x8f0] sm:$0xff]  ;;  %v1789_v10 = vld [vmem:[#allocation2 + $0x2f8] sm:$0xff]  ;;  %v1916_v56 = vmax.f32 %v1788_v42, %v11722_v27 }
 0x284   : > { %2040 = vst [vmem:[#allocation2 + $0x2d0] sm:$0xff] %v1912_v0  ;;  %14069 = vst [vmem:[#allocation72_spill] sm:$0xff] %v11726_v57  ;;  %v1917_v1 = vmax.f32 %v1789_v10, %v11726_v57  ;;  %v11731_v53 = vld [vmem:[%s10447_s26 + $0x908] sm:$0xff]  ;;  %v1790_v28 = vld [vmem:[#allocation2 + $0x300] sm:$0xff] }
 0x285   : > { %2041 = vst [vmem:[#allocation2 + $0x2d8] sm:$0xff] %v1913_v14  ;;  %2042 = vst [vmem:[#allocation2 + $0x2e0] sm:$0xff] %v1914_v25  ;;  %v11734_v60 = vld [vmem:[%s10447_s26 + $0x920] sm:$0xff]  ;;  %v1918_v12 = vmax.f32 %v1790_v28, %v11731_v53  ;;  %v1791_v0 = vld [vmem:[#allocation2 + $0x308] sm:$0xff] }
 0x286   : > { %14070 = vst [vmem:[#allocation73_spill] sm:$0xff] %v11731_v53  ;;  %14071 = vst [vmem:[#allocation74_spill] sm:$0xff] %v11734_v60  ;;  %v11738_v29 = vld [vmem:[%s10447_s26 + $0x938] sm:$0xff]  ;;  %v1792_v14 = vld [vmem:[#allocation2 + $0x310] sm:$0xff]  ;;  %v1919_v25 = vmax.f32 %v1791_v0, %v11734_v60 }
 0x287   : > { %2043 = vst [vmem:[#allocation2 + $0x2e8] sm:$0xff] %v1915_v37  ;;  %14072 = vst [vmem:[#allocation75_spill] sm:$0xff] %v11738_v29  ;;  %v1920_v42 = vmax.f32 %v1792_v14, %v11738_v29  ;;  %v11743_v10 = vld [vmem:[%s10447_s26 + $0x950] sm:$0xff]  ;;  %v1793_v57 = vld [vmem:[#allocation2 + $0x318] sm:$0xff] }
 0x288   : > { %2044 = vst [vmem:[#allocation2 + $0x2f0] sm:$0xff] %v1916_v56  ;;  %2045 = vst [vmem:[#allocation2 + $0x2f8] sm:$0xff] %v1917_v1  ;;  %v11746_v27 = vld [vmem:[%s10447_s26 + $0x968] sm:$0xff]  ;;  %v1921_v28 = vmax.f32 %v1793_v57, %v11743_v10  ;;  %v1794_v37 = vld [vmem:[#allocation2 + $0x320] sm:$0xff] }
 0x289   : > { %14073 = vst [vmem:[#allocation76_spill] sm:$0xff] %v11743_v10  ;;  %14074 = vst [vmem:[#allocation77_spill] sm:$0xff] %v11746_v27  ;;  %v11750_v53 = vld [vmem:[%s10447_s26 + $0x980] sm:$0xff]  ;;  %v1795_v56 = vld [vmem:[#allocation2 + $0x328] sm:$0xff]  ;;  %v1922_v1 = vmax.f32 %v1794_v37, %v11746_v27 }
 0x28a   : > { %2046 = vst [vmem:[#allocation2 + $0x300] sm:$0xff] %v1918_v12  ;;  %14075 = vst [vmem:[#allocation78_spill] sm:$0xff] %v11750_v53  ;;  %v1923_v0 = vmax.f32 %v1795_v56, %v11750_v53  ;;  %v11755_v14 = vld [vmem:[%s10447_s26 + $0x998] sm:$0xff]  ;;  %v1796_v29 = vld [vmem:[#allocation2 + $0x330] sm:$0xff] }
 0x28b   : > { %2047 = vst [vmem:[#allocation2 + $0x308] sm:$0xff] %v1919_v25  ;;  %2048 = vst [vmem:[#allocation2 + $0x310] sm:$0xff] %v1920_v42  ;;  %v11758_v60 = vld [vmem:[%s10447_s26 + $0x9b0] sm:$0xff]  ;;  %v1924_v57 = vmax.f32 %v1796_v29, %v11755_v14  ;;  %v1797_v12 = vld [vmem:[#allocation2 + $0x338] sm:$0xff] }
 0x28c   : > { %14076 = vst [vmem:[#allocation79_spill] sm:$0xff] %v11755_v14  ;;  %14077 = vst [vmem:[#allocation80_spill] sm:$0xff] %v11758_v60  ;;  %v11762_v10 = vld [vmem:[%s10447_s26 + $0x9c8] sm:$0xff]  ;;  %v1798_v25 = vld [vmem:[#allocation2 + $0x340] sm:$0xff]  ;;  %v1925_v42 = vmax.f32 %v1797_v12, %v11758_v60 }
 0x28d   : > { %2049 = vst [vmem:[#allocation2 + $0x318] sm:$0xff] %v1921_v28  ;;  %14078 = vst [vmem:[#allocation81_spill] sm:$0xff] %v11762_v10  ;;  %v1926_v37 = vmax.f32 %v1798_v25, %v11762_v10  ;;  %v11767_v56 = vld [vmem:[%s10447_s26 + $0x9e0] sm:$0xff]  ;;  %v1799_v53 = vld [vmem:[#allocation2 + $0x348] sm:$0xff] }
 0x28e   : > { %2050 = vst [vmem:[#allocation2 + $0x320] sm:$0xff] %v1922_v1  ;;  %2051 = vst [vmem:[#allocation2 + $0x328] sm:$0xff] %v1923_v0  ;;  %v11770_v27 = vld [vmem:[%s10447_s26 + $0x9f8] sm:$0xff]  ;;  %v1927_v29 = vmax.f32 %v1799_v53, %v11767_v56  ;;  %v1800_v28 = vld [vmem:[#allocation2 + $0x350] sm:$0xff] }
 0x28f   : > { %14079 = vst [vmem:[#allocation82_spill] sm:$0xff] %v11767_v56  ;;  %14080 = vst [vmem:[#allocation83_spill] sm:$0xff] %v11770_v27  ;;  %v11774_v14 = vld [vmem:[%s10447_s26 + $0xa10] sm:$0xff]  ;;  %v1801_v1 = vld [vmem:[#allocation2 + $0x358] sm:$0xff]  ;;  %v1928_v0 = vmax.f32 %v1800_v28, %v11770_v27 }
 0x290   : > { %2052 = vst [vmem:[#allocation2 + $0x330] sm:$0xff] %v1924_v57  ;;  %14081 = vst [vmem:[#allocation84_spill] sm:$0xff] %v11774_v14  ;;  %v1929_v12 = vmax.f32 %v1801_v1, %v11774_v14  ;;  %v11779_v25 = vld [vmem:[%s10447_s26 + $0xa28] sm:$0xff]  ;;  %v1802_v10 = vld [vmem:[#allocation2 + $0x360] sm:$0xff] }
 0x291   : > { %2053 = vst [vmem:[#allocation2 + $0x338] sm:$0xff] %v1925_v42  ;;  %2054 = vst [vmem:[#allocation2 + $0x340] sm:$0xff] %v1926_v37  ;;  %v11782_v60 = vld [vmem:[%s10447_s26 + $0xa40] sm:$0xff]  ;;  %v1930_v53 = vmax.f32 %v1802_v10, %v11779_v25  ;;  %v1803_v57 = vld [vmem:[#allocation2 + $0x368] sm:$0xff] }
 0x292   : > { %14082 = vst [vmem:[#allocation85_spill] sm:$0xff] %v11779_v25  ;;  %14083 = vst [vmem:[#allocation86_spill] sm:$0xff] %v11782_v60  ;;  %v11786_v56 = vld [vmem:[%s10447_s26 + $0xa58] sm:$0xff]  ;;  %v1804_v42 = vld [vmem:[#allocation2 + $0x370] sm:$0xff]  ;;  %v1931_v37 = vmax.f32 %v1803_v57, %v11782_v60 }
 0x293   : > { %2055 = vst [vmem:[#allocation2 + $0x348] sm:$0xff] %v1927_v29  ;;  %14084 = vst [vmem:[#allocation87_spill] sm:$0xff] %v11786_v56  ;;  %v1932_v28 = vmax.f32 %v1804_v42, %v11786_v56  ;;  %v11791_v1 = vld [vmem:[%s10447_s26 + $0xa70] sm:$0xff]  ;;  %v1805_v14 = vld [vmem:[#allocation2 + $0x378] sm:$0xff] }
 0x294   : > { %2056 = vst [vmem:[#allocation2 + $0x350] sm:$0xff] %v1928_v0  ;;  %2057 = vst [vmem:[#allocation2 + $0x358] sm:$0xff] %v1929_v12  ;;  %v11794_v27 = vld [vmem:[%s10447_s26 + $0xa88] sm:$0xff]  ;;  %v1933_v10 = vmax.f32 %v1805_v14, %v11791_v1  ;;  %v1806_v29 = vld [vmem:[#allocation2 + $0x380] sm:$0xff] }
 0x295   : > { %14085 = vst [vmem:[#allocation88_spill] sm:$0xff] %v11791_v1  ;;  %14086 = vst [vmem:[#allocation89_spill] sm:$0xff] %v11794_v27  ;;  %v11798_v25 = vld [vmem:[%s10447_s26 + $0xaa0] sm:$0xff]  ;;  %v1807_v0 = vld [vmem:[#allocation2 + $0x388] sm:$0xff]  ;;  %v1934_v12 = vmax.f32 %v1806_v29, %v11794_v27 }
 0x296   : > { %2058 = vst [vmem:[#allocation2 + $0x360] sm:$0xff] %v1930_v53  ;;  %14087 = vst [vmem:[#allocation90_spill] sm:$0xff] %v11798_v25  ;;  %v1935_v57 = vmax.f32 %v1807_v0, %v11798_v25  ;;  %v11803_v42 = vld [vmem:[%s10447_s26 + $0xab8] sm:$0xff]  ;;  %v1808_v56 = vld [vmem:[#allocation2 + $0x390] sm:$0xff] }
 0x297   : > { %2059 = vst [vmem:[#allocation2 + $0x368] sm:$0xff] %v1931_v37  ;;  %2060 = vst [vmem:[#allocation2 + $0x370] sm:$0xff] %v1932_v28  ;;  %v11806_v60 = vld [vmem:[%s10447_s26 + $0xad0] sm:$0xff]  ;;  %v1936_v14 = vmax.f32 %v1808_v56, %v11803_v42  ;;  %v1809_v53 = vld [vmem:[#allocation2 + $0x398] sm:$0xff] }
 0x298   : > { %14088 = vst [vmem:[#allocation91_spill] sm:$0xff] %v11803_v42  ;;  %14089 = vst [vmem:[#allocation92_spill] sm:$0xff] %v11806_v60  ;;  %v11810_v1 = vld [vmem:[%s10447_s26 + $0xae8] sm:$0xff]  ;;  %v1810_v37 = vld [vmem:[#allocation2 + $0x3a0] sm:$0xff]  ;;  %v1937_v28 = vmax.f32 %v1809_v53, %v11806_v60 }
 0x299   : > { %2061 = vst [vmem:[#allocation2 + $0x378] sm:$0xff] %v1933_v10  ;;  %14090 = vst [vmem:[#allocation93_spill] sm:$0xff] %v11810_v1  ;;  %v1938_v29 = vmax.f32 %v1810_v37, %v11810_v1  ;;  %v11815_v0 = vld [vmem:[%s10447_s26 + $0xb00] sm:$0xff]  ;;  %v1811_v25 = vld [vmem:[#allocation2 + $0x3a8] sm:$0xff] }
 0x29a   : > { %2062 = vst [vmem:[#allocation2 + $0x380] sm:$0xff] %v1934_v12  ;;  %2063 = vst [vmem:[#allocation2 + $0x388] sm:$0xff] %v1935_v57  ;;  %v11818_v27 = vld [vmem:[%s10447_s26 + $0xb18] sm:$0xff]  ;;  %v1939_v56 = vmax.f32 %v1811_v25, %v11815_v0  ;;  %v1812_v10 = vld [vmem:[#allocation2 + $0x3b0] sm:$0xff] }
 0x29b   : > { %14091 = vst [vmem:[#allocation94_spill] sm:$0xff] %v11815_v0  ;;  %14092 = vst [vmem:[#allocation95_spill] sm:$0xff] %v11818_v27  ;;  %v11822_v42 = vld [vmem:[%s10447_s26 + $0xb30] sm:$0xff]  ;;  %v1813_v12 = vld [vmem:[#allocation2 + $0x3b8] sm:$0xff]  ;;  %v1940_v57 = vmax.f32 %v1812_v10, %v11818_v27 }
 0x29c   : > { %2064 = vst [vmem:[#allocation2 + $0x390] sm:$0xff] %v1936_v14  ;;  %14093 = vst [vmem:[#allocation96_spill] sm:$0xff] %v11822_v42  ;;  %v1941_v53 = vmax.f32 %v1813_v12, %v11822_v42  ;;  %v11827_v37 = vld [vmem:[%s10447_s26 + $0xb48] sm:$0xff]  ;;  %v1814_v1 = vld [vmem:[#allocation2 + $0x3c0] sm:$0xff] }
 0x29d   : > { %2065 = vst [vmem:[#allocation2 + $0x398] sm:$0xff] %v1937_v28  ;;  %2066 = vst [vmem:[#allocation2 + $0x3a0] sm:$0xff] %v1938_v29  ;;  %v11830_v60 = vld [vmem:[%s10447_s26 + $0xb60] sm:$0xff]  ;;  %v1942_v25 = vmax.f32 %v1814_v1, %v11827_v37  ;;  %v1815_v14 = vld [vmem:[#allocation2 + $0x3c8] sm:$0xff] }
 0x29e   : > { %14094 = vst [vmem:[#allocation97_spill] sm:$0xff] %v11827_v37  ;;  %14095 = vst [vmem:[#allocation98_spill] sm:$0xff] %v11830_v60  ;;  %v11834_v0 = vld [vmem:[%s10447_s26 + $0xb78] sm:$0xff]  ;;  %v1816_v28 = vld [vmem:[#allocation2 + $0x3d0] sm:$0xff]  ;;  %v1943_v29 = vmax.f32 %v1815_v14, %v11830_v60 }
 0x29f   : > { %2067 = vst [vmem:[#allocation2 + $0x3a8] sm:$0xff] %v1939_v56  ;;  %14096 = vst [vmem:[#allocation99_spill] sm:$0xff] %v11834_v0  ;;  %v1944_v10 = vmax.f32 %v1816_v28, %v11834_v0  ;;  %v11839_v12 = vld [vmem:[%s10447_s26 + $0xb90] sm:$0xff]  ;;  %v1817_v42 = vld [vmem:[#allocation2 + $0x3d8] sm:$0xff] }
 0x2a0   : > { %2068 = vst [vmem:[#allocation2 + $0x3b0] sm:$0xff] %v1940_v57  ;;  %2069 = vst [vmem:[#allocation2 + $0x3b8] sm:$0xff] %v1941_v53  ;;  %v11842_v27 = vld [vmem:[%s10447_s26 + $0xba8] sm:$0xff]  ;;  %v1945_v1 = vmax.f32 %v1817_v42, %v11839_v12  ;;  %v1818_v56 = vld [vmem:[#allocation2 + $0x3e0] sm:$0xff] }
 0x2a1   : > { %14097 = vst [vmem:[#allocation100_spill] sm:$0xff] %v11839_v12  ;;  %14098 = vst [vmem:[#allocation101_spill] sm:$0xff] %v11842_v27  ;;  %v11846_v37 = vld [vmem:[%s10447_s26 + $0xbc0] sm:$0xff]  ;;  %v1819_v23 = vld [vmem:[#allocation2 + $0x3e8] sm:$0xff]  ;;  %v1946_v57 = vmax.f32 %v1818_v56, %v11842_v27 }
 0x2a2   : > { %2070 = vst [vmem:[#allocation2 + $0x3c0] sm:$0xff] %v1942_v25  ;;  %14099 = vst [vmem:[#allocation102_spill] sm:$0xff] %v11846_v37  ;;  %v1947_v53 = vmax.f32 %v1819_v23, %v11846_v37  ;;  %v11851_v14 = vld [vmem:[%s10447_s26 + $0xbd8] sm:$0xff]  ;;  %v1820_v28 = vld [vmem:[#allocation2 + $0x3f0] sm:$0xff] }
 0x2a3   : > { %2071 = vst [vmem:[#allocation2 + $0x3c8] sm:$0xff] %v1943_v29  ;;  %2072 = vst [vmem:[#allocation2 + $0x3d0] sm:$0xff] %v1944_v10  ;;  %v11854_v0 = vld [vmem:[%s10447_s26 + $0xbf0] sm:$0xff]  ;;  %v1948_v42 = vmax.f32 %v1820_v28, %v11851_v14  ;;  %v1821_v25 = vld [vmem:[#allocation2 + $0x3f8] sm:$0xff] }
 0x2a4   : > { %14100 = vst [vmem:[#allocation103_spill] sm:$0xff] %v11851_v14  ;;  %14101 = vst [vmem:[#allocation104_spill] sm:$0xff] %v11854_v0  ;;  %v2078_v12 = vld [vmem:[#allocation3] sm:$0xff]  ;;  %v2079_v60 = vld [vmem:[#allocation3 + $0x8] sm:$0xff]  ;;  %v1949_v29 = vmax.f32 %v1821_v25, %v11854_v0 }
 0x2a5   : > { %2073 = vst [vmem:[#allocation2 + $0x3d8] sm:$0xff] %v1945_v1  ;;  %2074 = vst [vmem:[#allocation2 + $0x3e0] sm:$0xff] %v1946_v57  ;;  %v9307_v10 = vld [vmem:[%s10447_s26 + $0x8] sm:$0xff]  ;;  %v9308_v27 = vld [vmem:[%s10447_s26 + $0x20] sm:$0xff] }
 0x2a6   : > { %2075 = vst [vmem:[#allocation2 + $0x3e8] sm:$0xff] %v1947_v53  ;;  %v2206_v56 = vadd.f32 %v9307_v10, %v2078_v12  ;;  %v2207_v23 = vadd.f32 %v9308_v27, %v2079_v60  ;;  %v2080_v37 = vld [vmem:[#allocation3 + $0x10] sm:$0xff]  ;;  %v2081_v61 = vld [vmem:[#allocation3 + $0x18] sm:$0xff]  ;;  %v2082_v48 = vld [vmem:[#allocation3 + $0x20] sm:$0xff] }
 0x2a7   : > { %2076 = vst [vmem:[#allocation2 + $0x3f0] sm:$0xff] %v1948_v42  ;;  %v9309_v1 = vld [vmem:[%s10447_s26 + $0x38] sm:$0xff]  ;;  %v2209_v28 = vadd.f32 %v2081_v61, %v11362_v46  ;;  %v2210_v14 = vadd.f32 %v2082_v48, %v11365_v9  ;;  %v2083_v5 = vld [vmem:[#allocation3 + $0x28] sm:$0xff]  ;;  %v2084_v57 = vld [vmem:[#allocation3 + $0x30] sm:$0xff] }
 0x2a8   : > { %v2208_v34 = vadd.f32 %v9309_v1, %v2080_v37  ;;  %v2085_v53 = vld [vmem:[#allocation3 + $0x38] sm:$0xff]  ;;  %2077 = vst [vmem:[#allocation2 + $0x3f8] sm:$0xff] %v1949_v29  ;;  %2334 = vst [vmem:[#allocation3] sm:$0xff] %v2206_v56  ;;  %v9310_v12 = vld [vmem:[%s10447_s26 + $0x80] sm:$0xff]  ;;  %v2212_v27 = vadd.f32 %v2084_v57, %v11371_v36 }
 0x2a9   : > { %2335 = vst [vmem:[#allocation3 + $0x8] sm:$0xff] %v2207_v23  ;;  %v2211_v25 = vadd.f32 %v9310_v12, %v2083_v5  ;;  %v2213_v60 = vadd.f32 %v2085_v53, %v11374_v63  ;;  %v2086_v10 = vld [vmem:[#allocation3 + $0x40] sm:$0xff]  ;;  %v2087_v42 = vld [vmem:[#allocation3 + $0x48] sm:$0xff]  ;;  %v2088_v0 = vld [vmem:[#allocation3 + $0x50] sm:$0xff] }
 0x2aa   : > { %2336 = vst [vmem:[#allocation3 + $0x10] sm:$0xff] %v2208_v34  ;;  %2337 = vst [vmem:[#allocation3 + $0x18] sm:$0xff] %v2209_v28  ;;  %v2214_v46 = vadd.f32 %v2086_v10, %v11378_v43  ;;  %v2215_v9 = vadd.f32 %v2087_v42, %v11383_v62  ;;  %v2216_v48 = vadd.f32 %v2088_v0, %v11386_v55  ;;  %v2089_v61 = vld [vmem:[#allocation3 + $0x58] sm:$0xff]  ;;  %v2090_v37 = vld [vmem:[#allocation3 + $0x60] sm:$0xff] }
 0x2ab   : > { %2338 = vst [vmem:[#allocation3 + $0x20] sm:$0xff] %v2210_v14  ;;  %v2091_v29 = vld [vmem:[#allocation3 + $0x68] sm:$0xff]  ;;  %2339 = vst [vmem:[#allocation3 + $0x28] sm:$0xff] %v2211_v25  ;;  %v2217_v36 = vadd.f32 %v2089_v61, %v11390_v52  ;;  %v2218_v63 = vadd.f32 %v2090_v37, %v11395_v30  ;;  %v2092_v34 = vld [vmem:[#allocation3 + $0x70] sm:$0xff] }
 0x2ac   : > { %2340 = vst [vmem:[#allocation3 + $0x30] sm:$0xff] %v2212_v27  ;;  %2341 = vst [vmem:[#allocation3 + $0x38] sm:$0xff] %v2213_v60  ;;  %v2219_v5 = vadd.f32 %v2091_v29, %v11398_v35  ;;  %v2093_v14 = vld [vmem:[#allocation3 + $0x78] sm:$0xff]  ;;  %v2094_v56 = vld [vmem:[#allocation3 + $0x80] sm:$0xff]  ;;  %v2220_v43 = vadd.f32 %v2092_v34, %v11402_v3 }
 0x2ad   : > { %2342 = vst [vmem:[#allocation3 + $0x40] sm:$0xff] %v2214_v46  ;;  %2343 = vst [vmem:[#allocation3 + $0x48] sm:$0xff] %v2215_v9  ;;  %v2221_v62 = vadd.f32 %v2093_v14, %v11407_v7  ;;  %v2222_v55 = vadd.f32 %v2094_v56, %v11410_v15  ;;  %v2095_v0 = vld [vmem:[#allocation3 + $0x88] sm:$0xff]  ;;  %v2096_v23 = vld [vmem:[#allocation3 + $0x90] sm:$0xff] }
 0x2ae   : > { %2344 = vst [vmem:[#allocation3 + $0x50] sm:$0xff] %v2216_v48  ;;  %v2097_v1 = vld [vmem:[#allocation3 + $0x98] sm:$0xff]  ;;  %2345 = vst [vmem:[#allocation3 + $0x58] sm:$0xff] %v2217_v36  ;;  %v2223_v52 = vadd.f32 %v2095_v0, %v11414_v26  ;;  %v2224_v30 = vadd.f32 %v2096_v23, %v11419_v20  ;;  %v2098_v28 = vld [vmem:[#allocation3 + $0xa0] sm:$0xff] }
 0x2af   : > { %2346 = vst [vmem:[#allocation3 + $0x60] sm:$0xff] %v2218_v63  ;;  %2347 = vst [vmem:[#allocation3 + $0x68] sm:$0xff] %v2219_v5  ;;  %v2225_v35 = vadd.f32 %v2097_v1, %v11422_v16  ;;  %v2099_v57 = vld [vmem:[#allocation3 + $0xa8] sm:$0xff]  ;;  %v2100_v53 = vld [vmem:[#allocation3 + $0xb0] sm:$0xff]  ;;  %v2226_v3 = vadd.f32 %v2098_v28, %v11426_v41 }
 0x2b0   : > { %2348 = vst [vmem:[#allocation3 + $0x70] sm:$0xff] %v2220_v43  ;;  %2349 = vst [vmem:[#allocation3 + $0x78] sm:$0xff] %v2221_v62  ;;  %v2227_v7 = vadd.f32 %v2099_v57, %v11431_v45  ;;  %v2228_v15 = vadd.f32 %v2100_v53, %v11434_v54  ;;  %v2101_v12 = vld [vmem:[#allocation3 + $0xb8] sm:$0xff]  ;;  %v2102_v25 = vld [vmem:[#allocation3 + $0xc0] sm:$0xff] }
 0x2b1   : > { %2350 = vst [vmem:[#allocation3 + $0x80] sm:$0xff] %v2222_v55  ;;  %v2103_v27 = vld [vmem:[#allocation3 + $0xc8] sm:$0xff]  ;;  %2351 = vst [vmem:[#allocation3 + $0x88] sm:$0xff] %v2223_v52  ;;  %v2229_v26 = vadd.f32 %v2101_v12, %v11438_v31  ;;  %v2230_v20 = vadd.f32 %v2102_v25, %v11443_v19  ;;  %v2104_v60 = vld [vmem:[#allocation3 + $0xd0] sm:$0xff] }
 0x2b2   : > { %2352 = vst [vmem:[#allocation3 + $0x90] sm:$0xff] %v2224_v30  ;;  %2353 = vst [vmem:[#allocation3 + $0x98] sm:$0xff] %v2225_v35  ;;  %v2231_v16 = vadd.f32 %v2103_v27, %v11446_v17  ;;  %v2105_v10 = vld [vmem:[#allocation3 + $0xd8] sm:$0xff]  ;;  %v2106_v42 = vld [vmem:[#allocation3 + $0xe0] sm:$0xff]  ;;  %v2232_v41 = vadd.f32 %v2104_v60, %v11450_v38 }
 0x2b3   : > { %2354 = vst [vmem:[#allocation3 + $0xa0] sm:$0xff] %v2226_v3  ;;  %2355 = vst [vmem:[#allocation3 + $0xa8] sm:$0xff] %v2227_v7  ;;  %v2233_v45 = vadd.f32 %v2105_v10, %v11455_v50  ;;  %v2234_v54 = vadd.f32 %v2106_v42, %v11458_v47  ;;  %v2107_v46 = vld [vmem:[#allocation3 + $0xe8] sm:$0xff]  ;;  %v2108_v9 = vld [vmem:[#allocation3 + $0xf0] sm:$0xff] }
 0x2b4   : > { %2356 = vst [vmem:[#allocation3 + $0xb0] sm:$0xff] %v2228_v15  ;;  %v2109_v48 = vld [vmem:[#allocation3 + $0xf8] sm:$0xff]  ;;  %2357 = vst [vmem:[#allocation3 + $0xb8] sm:$0xff] %v2229_v26  ;;  %v2235_v31 = vadd.f32 %v2107_v46, %v11462_v49  ;;  %v2236_v19 = vadd.f32 %v2108_v9, %v11467_v6  ;;  %v2110_v61 = vld [vmem:[#allocation3 + $0x100] sm:$0xff] }
 0x2b5   : > { %2358 = vst [vmem:[#allocation3 + $0xc0] sm:$0xff] %v2230_v20  ;;  %2359 = vst [vmem:[#allocation3 + $0xc8] sm:$0xff] %v2231_v16  ;;  %v2237_v17 = vadd.f32 %v2109_v48, %v11470_v39  ;;  %v2111_v37 = vld [vmem:[#allocation3 + $0x108] sm:$0xff]  ;;  %v2112_v29 = vld [vmem:[#allocation3 + $0x110] sm:$0xff]  ;;  %v2238_v38 = vadd.f32 %v2110_v61, %v11474_v11 }
 0x2b6   : > { %2360 = vst [vmem:[#allocation3 + $0xd0] sm:$0xff] %v2232_v41  ;;  %2361 = vst [vmem:[#allocation3 + $0xd8] sm:$0xff] %v2233_v45  ;;  %v2239_v50 = vadd.f32 %v2111_v37, %v11479_v33  ;;  %v2240_v47 = vadd.f32 %v2112_v29, %v11482_v18  ;;  %v2113_v36 = vld [vmem:[#allocation3 + $0x118] sm:$0xff]  ;;  %v2114_v63 = vld [vmem:[#allocation3 + $0x120] sm:$0xff] }
 0x2b7   : > { %2362 = vst [vmem:[#allocation3 + $0xe0] sm:$0xff] %v2234_v54  ;;  %v2115_v5 = vld [vmem:[#allocation3 + $0x128] sm:$0xff]  ;;  %2363 = vst [vmem:[#allocation3 + $0xe8] sm:$0xff] %v2235_v31  ;;  %v2241_v49 = vadd.f32 %v2113_v36, %v11486_v22  ;;  %v2242_v6 = vadd.f32 %v2114_v63, %v11491_v8  ;;  %v2116_v34 = vld [vmem:[#allocation3 + $0x130] sm:$0xff] }
 0x2b8   : > { %2364 = vst [vmem:[#allocation3 + $0xf0] sm:$0xff] %v2236_v19  ;;  %2365 = vst [vmem:[#allocation3 + $0xf8] sm:$0xff] %v2237_v17  ;;  %v2243_v39 = vadd.f32 %v2115_v5, %v11494_v51  ;;  %v2117_v14 = vld [vmem:[#allocation3 + $0x138] sm:$0xff]  ;;  %v2118_v56 = vld [vmem:[#allocation3 + $0x140] sm:$0xff]  ;;  %v2244_v11 = vadd.f32 %v2116_v34, %v11498_v59 }
 0x2b9   : > { %2366 = vst [vmem:[#allocation3 + $0x100] sm:$0xff] %v2238_v38  ;;  %2367 = vst [vmem:[#allocation3 + $0x108] sm:$0xff] %v2239_v50  ;;  %v2245_v33 = vadd.f32 %v2117_v14, %v11503_v21  ;;  %v2246_v18 = vadd.f32 %v2118_v56, %v11506_v40  ;;  %v2119_v43 = vld [vmem:[#allocation3 + $0x148] sm:$0xff]  ;;  %v2120_v62 = vld [vmem:[#allocation3 + $0x150] sm:$0xff] }
 0x2ba   : > { %2368 = vst [vmem:[#allocation3 + $0x110] sm:$0xff] %v2240_v47  ;;  %v2121_v55 = vld [vmem:[#allocation3 + $0x158] sm:$0xff]  ;;  %2369 = vst [vmem:[#allocation3 + $0x118] sm:$0xff] %v2241_v49  ;;  %v2247_v22 = vadd.f32 %v2119_v43, %v11510_v2  ;;  %v2248_v8 = vadd.f32 %v2120_v62, %v11515_v4  ;;  %v2122_v0 = vld [vmem:[#allocation3 + $0x160] sm:$0xff] }
 0x2bb   : > { %2370 = vst [vmem:[#allocation3 + $0x120] sm:$0xff] %v2242_v6  ;;  %2371 = vst [vmem:[#allocation3 + $0x128] sm:$0xff] %v2243_v39  ;;  %v2249_v51 = vadd.f32 %v2121_v55, %v11518_v58  ;;  %v2123_v23 = vld [vmem:[#allocation3 + $0x168] sm:$0xff]  ;;  %v2124_v1 = vld [vmem:[#allocation3 + $0x170] sm:$0xff]  ;;  %v2250_v59 = vadd.f32 %v2122_v0, %v11522_v13 }
 0x2bc   : > { %2372 = vst [vmem:[#allocation3 + $0x130] sm:$0xff] %v2244_v11  ;;  %2373 = vst [vmem:[#allocation3 + $0x138] sm:$0xff] %v2245_v33  ;;  %v2251_v21 = vadd.f32 %v2123_v23, %v11527_v24  ;;  %v2252_v40 = vadd.f32 %v2124_v1, %v11530_v32  ;;  %v2125_v52 = vld [vmem:[#allocation3 + $0x178] sm:$0xff]  ;;  %v2126_v30 = vld [vmem:[#allocation3 + $0x180] sm:$0xff] }
 0x2bd   : > { %2374 = vst [vmem:[#allocation3 + $0x140] sm:$0xff] %v2246_v18  ;;  %v2127_v35 = vld [vmem:[#allocation3 + $0x188] sm:$0xff]  ;;  %2375 = vst [vmem:[#allocation3 + $0x148] sm:$0xff] %v2247_v22  ;;  %v2253_v2 = vadd.f32 %v2125_v52, %v11534_v44  ;;  %v14103_v28 = vld [vmem:[#allocation26_spill] sm:$0xff] }
 0x2be   : > { %2376 = vst [vmem:[#allocation3 + $0x150] sm:$0xff] %v2248_v8  ;;  %2377 = vst [vmem:[#allocation3 + $0x158] sm:$0xff] %v2249_v51  ;;  %v14102_v4 = vld [vmem:[#allocation25_spill] sm:$0xff]  ;;  %v2255_v57 = vadd.f32 %v2127_v35, %v14103_v28  ;;  %v2129_v3 = vld [vmem:[#allocation3 + $0x198] sm:$0xff] }
 0x2bf   : > { %v2254_v58 = vadd.f32 %v2126_v30, %v14102_v4  ;;  %v2128_v53 = vld [vmem:[#allocation3 + $0x190] sm:$0xff]  ;;  %v2130_v7 = vld [vmem:[#allocation3 + $0x1a0] sm:$0xff]  ;;  %2378 = vst [vmem:[#allocation3 + $0x160] sm:$0xff] %v2250_v59  ;;  %2379 = vst [vmem:[#allocation3 + $0x168] sm:$0xff] %v2251_v21 }
 0x2c0   : > { %2380 = vst [vmem:[#allocation3 + $0x170] sm:$0xff] %v2252_v40  ;;  %v14104_v13 = vld [vmem:[#allocation27_spill] sm:$0xff]  ;;  %v14105_v32 = vld [vmem:[#allocation28_spill] sm:$0xff]  ;;  %v14106_v12 = vld [vmem:[#allocation29_spill] sm:$0xff] }
 0x2c1   : > { %v2256_v24 = vadd.f32 %v2128_v53, %v14104_v13  ;;  %v2257_v15 = vadd.f32 %v2129_v3, %v14105_v32  ;;  %v2258_v25 = vadd.f32 %v2130_v7, %v14106_v12  ;;  %v2131_v27 = vld [vmem:[#allocation3 + $0x1a8] sm:$0xff]  ;;  %v2132_v26 = vld [vmem:[#allocation3 + $0x1b0] sm:$0xff]  ;;  %v2133_v20 = vld [vmem:[#allocation3 + $0x1b8] sm:$0xff]  ;;  %2381 = vst [vmem:[#allocation3 + $0x178] sm:$0xff] %v2253_v2 }
 0x2c2   : > { %2382 = vst [vmem:[#allocation3 + $0x180] sm:$0xff] %v2254_v58  ;;  %2383 = vst [vmem:[#allocation3 + $0x188] sm:$0xff] %v2255_v57  ;;  %v14107_v44 = vld [vmem:[#allocation30_spill] sm:$0xff]  ;;  %v14108_v60 = vld [vmem:[#allocation31_spill] sm:$0xff] }
 0x2c3   : > { %v2259_v16 = vadd.f32 %v2131_v27, %v14107_v44  ;;  %v2260_v10 = vadd.f32 %v2132_v26, %v14108_v60  ;;  %v14109_v42 = vld [vmem:[#allocation32_spill] sm:$0xff]  ;;  %v2136_v46 = vld [vmem:[#allocation3 + $0x1d0] sm:$0xff]  ;;  %2384 = vst [vmem:[#allocation3 + $0x190] sm:$0xff] %v2256_v24  ;;  %2385 = vst [vmem:[#allocation3 + $0x198] sm:$0xff] %v2257_v15 }
 0x2c4   : > { %v2261_v41 = vadd.f32 %v2133_v20, %v14109_v42  ;;  %v2134_v45 = vld [vmem:[#allocation3 + $0x1c0] sm:$0xff]  ;;  %v2135_v54 = vld [vmem:[#allocation3 + $0x1c8] sm:$0xff]  ;;  %2386 = vst [vmem:[#allocation3 + $0x1a0] sm:$0xff] %v2258_v25  ;;  %v14111_v31 = vld [vmem:[#allocation34_spill] sm:$0xff] }
 0x2c5   : > { %v14110_v9 = vld [vmem:[#allocation33_spill] sm:$0xff]  ;;  %v2263_v19 = vadd.f32 %v2135_v54, %v14111_v31  ;;  %v14112_v17 = vld [vmem:[#allocation35_spill] sm:$0xff]  ;;  %2387 = vst [vmem:[#allocation3 + $0x1a8] sm:$0xff] %v2259_v16  ;;  %2388 = vst [vmem:[#allocation3 + $0x1b0] sm:$0xff] %v2260_v10 }
 0x2c6   : > { %v2262_v48 = vadd.f32 %v2134_v45, %v14110_v9  ;;  %v2264_v61 = vadd.f32 %v2136_v46, %v14112_v17  ;;  %v2137_v37 = vld [vmem:[#allocation3 + $0x1d8] sm:$0xff]  ;;  %v2138_v29 = vld [vmem:[#allocation3 + $0x1e0] sm:$0xff]  ;;  %v2139_v38 = vld [vmem:[#allocation3 + $0x1e8] sm:$0xff]  ;;  %2389 = vst [vmem:[#allocation3 + $0x1b8] sm:$0xff] %v2261_v41 }
 0x2c7   : > { %v14113_v50 = vld [vmem:[#allocation36_spill] sm:$0xff]  ;;  %v14114_v36 = vld [vmem:[#allocation37_spill] sm:$0xff]  ;;  %v14115_v5 = vld [vmem:[#allocation38_spill] sm:$0xff]  ;;  %2391 = vst [vmem:[#allocation3 + $0x1c8] sm:$0xff] %v2263_v19 }
 0x2c8   : > { %v2265_v47 = vadd.f32 %v2137_v37, %v14113_v50  ;;  %v2266_v63 = vadd.f32 %v2138_v29, %v14114_v36  ;;  %v2267_v49 = vadd.f32 %v2139_v38, %v14115_v5  ;;  %v2140_v6 = vld [vmem:[#allocation3 + $0x1f0] sm:$0xff]  ;;  %v2141_v39 = vld [vmem:[#allocation3 + $0x1f8] sm:$0xff]  ;;  %v2142_v34 = vld [vmem:[#allocation3 + $0x200] sm:$0xff]  ;;  %2390 = vst [vmem:[#allocation3 + $0x1c0] sm:$0xff] %v2262_v48 }
 0x2c9   : > { %2392 = vst [vmem:[#allocation3 + $0x1d0] sm:$0xff] %v2264_v61  ;;  %v14116_v14 = vld [vmem:[#allocation39_spill] sm:$0xff]  ;;  %v14117_v11 = vld [vmem:[#allocation40_spill] sm:$0xff]  ;;  %v14118_v18 = vld [vmem:[#allocation41_spill] sm:$0xff] }
 0x2ca   : > { %v2268_v56 = vadd.f32 %v2140_v6, %v14116_v14  ;;  %v2269_v33 = vadd.f32 %v2141_v39, %v14117_v11  ;;  %v2270_v43 = vadd.f32 %v2142_v34, %v14118_v18  ;;  %v2143_v62 = vld [vmem:[#allocation3 + $0x208] sm:$0xff]  ;;  %v2144_v55 = vld [vmem:[#allocation3 + $0x210] sm:$0xff]  ;;  %v2145_v22 = vld [vmem:[#allocation3 + $0x218] sm:$0xff]  ;;  %2393 = vst [vmem:[#allocation3 + $0x1d8] sm:$0xff] %v2265_v47 }
 0x2cb   : > { %2394 = vst [vmem:[#allocation3 + $0x1e0] sm:$0xff] %v2266_v63  ;;  %2395 = vst [vmem:[#allocation3 + $0x1e8] sm:$0xff] %v2267_v49  ;;  %v14119_v8 = vld [vmem:[#allocation42_spill] sm:$0xff]  ;;  %v14120_v0 = vld [vmem:[#allocation43_spill] sm:$0xff] }
 0x2cc   : > { %v2271_v51 = vadd.f32 %v2143_v62, %v14119_v8  ;;  %v2272_v23 = vadd.f32 %v2144_v55, %v14120_v0  ;;  %v14121_v1 = vld [vmem:[#allocation44_spill] sm:$0xff]  ;;  %v2148_v52 = vld [vmem:[#allocation3 + $0x230] sm:$0xff]  ;;  %2396 = vst [vmem:[#allocation3 + $0x1f0] sm:$0xff] %v2268_v56  ;;  %2397 = vst [vmem:[#allocation3 + $0x1f8] sm:$0xff] %v2269_v33 }
 0x2cd   : > { %v2273_v59 = vadd.f32 %v2145_v22, %v14121_v1  ;;  %v2146_v21 = vld [vmem:[#allocation3 + $0x220] sm:$0xff]  ;;  %v2147_v40 = vld [vmem:[#allocation3 + $0x228] sm:$0xff]  ;;  %2398 = vst [vmem:[#allocation3 + $0x200] sm:$0xff] %v2270_v43  ;;  %v14123_v2 = vld [vmem:[#allocation46_spill] sm:$0xff] }
 0x2ce   : > { %v14122_v30 = vld [vmem:[#allocation45_spill] sm:$0xff]  ;;  %v2275_v4 = vadd.f32 %v2147_v40, %v14123_v2  ;;  %v14124_v58 = vld [vmem:[#allocation47_spill] sm:$0xff]  ;;  %2399 = vst [vmem:[#allocation3 + $0x208] sm:$0xff] %v2271_v51  ;;  %2400 = vst [vmem:[#allocation3 + $0x210] sm:$0xff] %v2272_v23 }
 0x2cf   : > { %v2274_v35 = vadd.f32 %v2146_v21, %v14122_v30  ;;  %v2276_v28 = vadd.f32 %v2148_v52, %v14124_v58  ;;  %v2149_v57 = vld [vmem:[#allocation3 + $0x238] sm:$0xff]  ;;  %v2150_v53 = vld [vmem:[#allocation3 + $0x240] sm:$0xff]  ;;  %v2151_v3 = vld [vmem:[#allocation3 + $0x248] sm:$0xff]  ;;  %2401 = vst [vmem:[#allocation3 + $0x218] sm:$0xff] %v2273_v59 }
 0x2d0   : > { %v14125_v7 = vld [vmem:[#allocation48_spill] sm:$0xff]  ;;  %v14126_v24 = vld [vmem:[#allocation49_spill] sm:$0xff]  ;;  %v14127_v15 = vld [vmem:[#allocation50_spill] sm:$0xff]  ;;  %2403 = vst [vmem:[#allocation3 + $0x228] sm:$0xff] %v2275_v4 }
 0x2d1   : > { %v2277_v13 = vadd.f32 %v2149_v57, %v14125_v7  ;;  %v2278_v32 = vadd.f32 %v2150_v53, %v14126_v24  ;;  %v2279_v12 = vadd.f32 %v2151_v3, %v14127_v15  ;;  %v2152_v25 = vld [vmem:[#allocation3 + $0x250] sm:$0xff]  ;;  %v2153_v27 = vld [vmem:[#allocation3 + $0x258] sm:$0xff]  ;;  %v2154_v26 = vld [vmem:[#allocation3 + $0x260] sm:$0xff]  ;;  %2402 = vst [vmem:[#allocation3 + $0x220] sm:$0xff] %v2274_v35 }
 0x2d2   : > { %2404 = vst [vmem:[#allocation3 + $0x230] sm:$0xff] %v2276_v28  ;;  %v14128_v20 = vld [vmem:[#allocation51_spill] sm:$0xff]  ;;  %v14129_v16 = vld [vmem:[#allocation52_spill] sm:$0xff]  ;;  %v14130_v10 = vld [vmem:[#allocation53_spill] sm:$0xff] }
 0x2d3   : > { %v2280_v44 = vadd.f32 %v2152_v25, %v14128_v20  ;;  %v2281_v60 = vadd.f32 %v2153_v27, %v14129_v16  ;;  %v2282_v42 = vadd.f32 %v2154_v26, %v14130_v10  ;;  %v2155_v41 = vld [vmem:[#allocation3 + $0x268] sm:$0xff]  ;;  %v2156_v45 = vld [vmem:[#allocation3 + $0x270] sm:$0xff]  ;;  %v2157_v54 = vld [vmem:[#allocation3 + $0x278] sm:$0xff]  ;;  %2405 = vst [vmem:[#allocation3 + $0x238] sm:$0xff] %v2277_v13 }
 0x2d4   : > { %2406 = vst [vmem:[#allocation3 + $0x240] sm:$0xff] %v2278_v32  ;;  %2407 = vst [vmem:[#allocation3 + $0x248] sm:$0xff] %v2279_v12  ;;  %v14131_v46 = vld [vmem:[#allocation54_spill] sm:$0xff]  ;;  %v14132_v48 = vld [vmem:[#allocation55_spill] sm:$0xff] }
 0x2d5   : > { %v2283_v9 = vadd.f32 %v2155_v41, %v14131_v46  ;;  %v2284_v31 = vadd.f32 %v2156_v45, %v14132_v48  ;;  %v14133_v19 = vld [vmem:[#allocation56_spill] sm:$0xff]  ;;  %v2160_v29 = vld [vmem:[#allocation3 + $0x290] sm:$0xff]  ;;  %2408 = vst [vmem:[#allocation3 + $0x250] sm:$0xff] %v2280_v44  ;;  %2409 = vst [vmem:[#allocation3 + $0x258] sm:$0xff] %v2281_v60 }
 0x2d6   : > { %v2285_v17 = vadd.f32 %v2157_v54, %v14133_v19  ;;  %v2158_v61 = vld [vmem:[#allocation3 + $0x280] sm:$0xff]  ;;  %v2159_v37 = vld [vmem:[#allocation3 + $0x288] sm:$0xff]  ;;  %2410 = vst [vmem:[#allocation3 + $0x260] sm:$0xff] %v2282_v42  ;;  %v14135_v47 = vld [vmem:[#allocation58_spill] sm:$0xff] }
 0x2d7   : > { %v14134_v38 = vld [vmem:[#allocation57_spill] sm:$0xff]  ;;  %v2287_v36 = vadd.f32 %v2159_v37, %v14135_v47  ;;  %v14136_v63 = vld [vmem:[#allocation59_spill] sm:$0xff]  ;;  %2411 = vst [vmem:[#allocation3 + $0x268] sm:$0xff] %v2283_v9  ;;  %2412 = vst [vmem:[#allocation3 + $0x270] sm:$0xff] %v2284_v31 }
 0x2d8   : > { %v2286_v50 = vadd.f32 %v2158_v61, %v14134_v38  ;;  %v2288_v5 = vadd.f32 %v2160_v29, %v14136_v63  ;;  %v2161_v49 = vld [vmem:[#allocation3 + $0x298] sm:$0xff]  ;;  %v2162_v6 = vld [vmem:[#allocation3 + $0x2a0] sm:$0xff]  ;;  %v2163_v39 = vld [vmem:[#allocation3 + $0x2a8] sm:$0xff]  ;;  %2413 = vst [vmem:[#allocation3 + $0x278] sm:$0xff] %v2285_v17 }
 0x2d9   : > { %v14137_v34 = vld [vmem:[#allocation60_spill] sm:$0xff]  ;;  %v14138_v56 = vld [vmem:[#allocation61_spill] sm:$0xff]  ;;  %v14139_v33 = vld [vmem:[#allocation62_spill] sm:$0xff]  ;;  %2415 = vst [vmem:[#allocation3 + $0x288] sm:$0xff] %v2287_v36 }
 0x2da   : > { %v2289_v14 = vadd.f32 %v2161_v49, %v14137_v34  ;;  %v2290_v11 = vadd.f32 %v2162_v6, %v14138_v56  ;;  %v2291_v18 = vadd.f32 %v2163_v39, %v14139_v33  ;;  %v2164_v43 = vld [vmem:[#allocation3 + $0x2b0] sm:$0xff]  ;;  %v2165_v62 = vld [vmem:[#allocation3 + $0x2b8] sm:$0xff]  ;;  %v2166_v55 = vld [vmem:[#allocation3 + $0x2c0] sm:$0xff]  ;;  %2414 = vst [vmem:[#allocation3 + $0x280] sm:$0xff] %v2286_v50 }
 0x2db   : > { %2416 = vst [vmem:[#allocation3 + $0x290] sm:$0xff] %v2288_v5  ;;  %v14140_v22 = vld [vmem:[#allocation63_spill] sm:$0xff]  ;;  %v14141_v51 = vld [vmem:[#allocation64_spill] sm:$0xff]  ;;  %v14142_v23 = vld [vmem:[#allocation65_spill] sm:$0xff] }
 0x2dc   : > { %v2292_v8 = vadd.f32 %v2164_v43, %v14140_v22  ;;  %v2293_v0 = vadd.f32 %v2165_v62, %v14141_v51  ;;  %v2294_v1 = vadd.f32 %v2166_v55, %v14142_v23  ;;  %v2167_v59 = vld [vmem:[#allocation3 + $0x2c8] sm:$0xff]  ;;  %v2168_v21 = vld [vmem:[#allocation3 + $0x2d0] sm:$0xff]  ;;  %v2169_v40 = vld [vmem:[#allocation3 + $0x2d8] sm:$0xff]  ;;  %2417 = vst [vmem:[#allocation3 + $0x298] sm:$0xff] %v2289_v14 }
 0x2dd   : > { %2418 = vst [vmem:[#allocation3 + $0x2a0] sm:$0xff] %v2290_v11  ;;  %2419 = vst [vmem:[#allocation3 + $0x2a8] sm:$0xff] %v2291_v18  ;;  %v14143_v52 = vld [vmem:[#allocation66_spill] sm:$0xff]  ;;  %v14144_v35 = vld [vmem:[#allocation67_spill] sm:$0xff] }
 0x2de   : > { %v2295_v30 = vadd.f32 %v2167_v59, %v14143_v52  ;;  %v2296_v2 = vadd.f32 %v2168_v21, %v14144_v35  ;;  %v14145_v4 = vld [vmem:[#allocation68_spill] sm:$0xff]  ;;  %v2172_v53 = vld [vmem:[#allocation3 + $0x2f0] sm:$0xff]  ;;  %2420 = vst [vmem:[#allocation3 + $0x2b0] sm:$0xff] %v2292_v8  ;;  %2421 = vst [vmem:[#allocation3 + $0x2b8] sm:$0xff] %v2293_v0 }
 0x2df   : > { %v2297_v58 = vadd.f32 %v2169_v40, %v14145_v4  ;;  %v2170_v28 = vld [vmem:[#allocation3 + $0x2e0] sm:$0xff]  ;;  %v2171_v57 = vld [vmem:[#allocation3 + $0x2e8] sm:$0xff]  ;;  %2422 = vst [vmem:[#allocation3 + $0x2c0] sm:$0xff] %v2294_v1  ;;  %v14147_v13 = vld [vmem:[#allocation70_spill] sm:$0xff] }
 0x2e0   : > { %v14146_v3 = vld [vmem:[#allocation69_spill] sm:$0xff]  ;;  %v2299_v24 = vadd.f32 %v2171_v57, %v14147_v13  ;;  %v14148_v32 = vld [vmem:[#allocation71_spill] sm:$0xff]  ;;  %2423 = vst [vmem:[#allocation3 + $0x2c8] sm:$0xff] %v2295_v30  ;;  %2424 = vst [vmem:[#allocation3 + $0x2d0] sm:$0xff] %v2296_v2 }
 0x2e1   : > { %v2298_v7 = vadd.f32 %v2170_v28, %v14146_v3  ;;  %v2300_v15 = vadd.f32 %v2172_v53, %v14148_v32  ;;  %v2173_v12 = vld [vmem:[#allocation3 + $0x2f8] sm:$0xff]  ;;  %v2174_v25 = vld [vmem:[#allocation3 + $0x300] sm:$0xff]  ;;  %v2175_v27 = vld [vmem:[#allocation3 + $0x308] sm:$0xff]  ;;  %2425 = vst [vmem:[#allocation3 + $0x2d8] sm:$0xff] %v2297_v58 }
 0x2e2   : > { %v14149_v26 = vld [vmem:[#allocation72_spill] sm:$0xff]  ;;  %v14150_v44 = vld [vmem:[#allocation73_spill] sm:$0xff]  ;;  %v14151_v60 = vld [vmem:[#allocation74_spill] sm:$0xff]  ;;  %2427 = vst [vmem:[#allocation3 + $0x2e8] sm:$0xff] %v2299_v24 }
 0x2e3   : > { %v2301_v20 = vadd.f32 %v2173_v12, %v14149_v26  ;;  %v2302_v16 = vadd.f32 %v2174_v25, %v14150_v44  ;;  %v2303_v10 = vadd.f32 %v2175_v27, %v14151_v60  ;;  %v2176_v42 = vld [vmem:[#allocation3 + $0x310] sm:$0xff]  ;;  %v2177_v41 = vld [vmem:[#allocation3 + $0x318] sm:$0xff]  ;;  %v2178_v45 = vld [vmem:[#allocation3 + $0x320] sm:$0xff]  ;;  %2426 = vst [vmem:[#allocation3 + $0x2e0] sm:$0xff] %v2298_v7 }
 0x2e4   : > { %2428 = vst [vmem:[#allocation3 + $0x2f0] sm:$0xff] %v2300_v15  ;;  %v14152_v54 = vld [vmem:[#allocation75_spill] sm:$0xff]  ;;  %v14153_v9 = vld [vmem:[#allocation76_spill] sm:$0xff]  ;;  %v14154_v31 = vld [vmem:[#allocation77_spill] sm:$0xff] }
 0x2e5   : > { %v2304_v46 = vadd.f32 %v2176_v42, %v14152_v54  ;;  %v2305_v48 = vadd.f32 %v2177_v41, %v14153_v9  ;;  %v2306_v19 = vadd.f32 %v2178_v45, %v14154_v31  ;;  %v2179_v17 = vld [vmem:[#allocation3 + $0x328] sm:$0xff]  ;;  %v2180_v61 = vld [vmem:[#allocation3 + $0x330] sm:$0xff]  ;;  %v2181_v37 = vld [vmem:[#allocation3 + $0x338] sm:$0xff]  ;;  %2429 = vst [vmem:[#allocation3 + $0x2f8] sm:$0xff] %v2301_v20 }
 0x2e6   : > { %2430 = vst [vmem:[#allocation3 + $0x300] sm:$0xff] %v2302_v16  ;;  %2431 = vst [vmem:[#allocation3 + $0x308] sm:$0xff] %v2303_v10  ;;  %v14155_v29 = vld [vmem:[#allocation78_spill] sm:$0xff]  ;;  %v14156_v50 = vld [vmem:[#allocation79_spill] sm:$0xff] }
 0x2e7   : > { %v2307_v38 = vadd.f32 %v2179_v17, %v14155_v29  ;;  %v2308_v47 = vadd.f32 %v2180_v61, %v14156_v50  ;;  %v14157_v36 = vld [vmem:[#allocation80_spill] sm:$0xff]  ;;  %v2184_v6 = vld [vmem:[#allocation3 + $0x350] sm:$0xff]  ;;  %2432 = vst [vmem:[#allocation3 + $0x310] sm:$0xff] %v2304_v46  ;;  %2433 = vst [vmem:[#allocation3 + $0x318] sm:$0xff] %v2305_v48 }
 0x2e8   : > { %v2309_v63 = vadd.f32 %v2181_v37, %v14157_v36  ;;  %v2182_v5 = vld [vmem:[#allocation3 + $0x340] sm:$0xff]  ;;  %v2183_v49 = vld [vmem:[#allocation3 + $0x348] sm:$0xff]  ;;  %2434 = vst [vmem:[#allocation3 + $0x320] sm:$0xff] %v2306_v19  ;;  %v14159_v14 = vld [vmem:[#allocation82_spill] sm:$0xff] }
 0x2e9   : > { %v14158_v39 = vld [vmem:[#allocation81_spill] sm:$0xff]  ;;  %v2311_v56 = vadd.f32 %v2183_v49, %v14159_v14  ;;  %v14160_v11 = vld [vmem:[#allocation83_spill] sm:$0xff]  ;;  %2435 = vst [vmem:[#allocation3 + $0x328] sm:$0xff] %v2307_v38  ;;  %2436 = vst [vmem:[#allocation3 + $0x330] sm:$0xff] %v2308_v47 }
 0x2ea   : > { %v2310_v34 = vadd.f32 %v2182_v5, %v14158_v39  ;;  %v2312_v33 = vadd.f32 %v2184_v6, %v14160_v11  ;;  %v2185_v18 = vld [vmem:[#allocation3 + $0x358] sm:$0xff]  ;;  %v2186_v43 = vld [vmem:[#allocation3 + $0x360] sm:$0xff]  ;;  %v2187_v62 = vld [vmem:[#allocation3 + $0x368] sm:$0xff]  ;;  %2437 = vst [vmem:[#allocation3 + $0x338] sm:$0xff] %v2309_v63 }
 0x2eb   : > { %v14161_v55 = vld [vmem:[#allocation84_spill] sm:$0xff]  ;;  %v14162_v8 = vld [vmem:[#allocation85_spill] sm:$0xff]  ;;  %v14163_v0 = vld [vmem:[#allocation86_spill] sm:$0xff]  ;;  %2439 = vst [vmem:[#allocation3 + $0x348] sm:$0xff] %v2311_v56 }
 0x2ec   : > { %v2313_v22 = vadd.f32 %v2185_v18, %v14161_v55  ;;  %v2314_v51 = vadd.f32 %v2186_v43, %v14162_v8  ;;  %v2315_v23 = vadd.f32 %v2187_v62, %v14163_v0  ;;  %v2188_v1 = vld [vmem:[#allocation3 + $0x370] sm:$0xff]  ;;  %v2189_v59 = vld [vmem:[#allocation3 + $0x378] sm:$0xff]  ;;  %v2190_v21 = vld [vmem:[#allocation3 + $0x380] sm:$0xff]  ;;  %2438 = vst [vmem:[#allocation3 + $0x340] sm:$0xff] %v2310_v34 }
 0x2ed   : > { %2440 = vst [vmem:[#allocation3 + $0x350] sm:$0xff] %v2312_v33  ;;  %v14164_v40 = vld [vmem:[#allocation87_spill] sm:$0xff]  ;;  %v14165_v30 = vld [vmem:[#allocation88_spill] sm:$0xff]  ;;  %v14166_v2 = vld [vmem:[#allocation89_spill] sm:$0xff] }
 0x2ee   : > { %v2316_v52 = vadd.f32 %v2188_v1, %v14164_v40  ;;  %v2317_v35 = vadd.f32 %v2189_v59, %v14165_v30  ;;  %v2318_v4 = vadd.f32 %v2190_v21, %v14166_v2  ;;  %v2191_v58 = vld [vmem:[#allocation3 + $0x388] sm:$0xff]  ;;  %v2192_v28 = vld [vmem:[#allocation3 + $0x390] sm:$0xff]  ;;  %v2193_v57 = vld [vmem:[#allocation3 + $0x398] sm:$0xff]  ;;  %2441 = vst [vmem:[#allocation3 + $0x358] sm:$0xff] %v2313_v22 }
 0x2ef   : > { %2442 = vst [vmem:[#allocation3 + $0x360] sm:$0xff] %v2314_v51  ;;  %2443 = vst [vmem:[#allocation3 + $0x368] sm:$0xff] %v2315_v23  ;;  %v14167_v53 = vld [vmem:[#allocation90_spill] sm:$0xff]  ;;  %v14168_v7 = vld [vmem:[#allocation91_spill] sm:$0xff] }
 0x2f0   : > { %v2319_v3 = vadd.f32 %v2191_v58, %v14167_v53  ;;  %v2320_v13 = vadd.f32 %v2192_v28, %v14168_v7  ;;  %v14169_v24 = vld [vmem:[#allocation92_spill] sm:$0xff]  ;;  %v2196_v25 = vld [vmem:[#allocation3 + $0x3b0] sm:$0xff]  ;;  %2444 = vst [vmem:[#allocation3 + $0x370] sm:$0xff] %v2316_v52  ;;  %2445 = vst [vmem:[#allocation3 + $0x378] sm:$0xff] %v2317_v35 }
 0x2f1   : > { %v2321_v32 = vadd.f32 %v2193_v57, %v14169_v24  ;;  %v2194_v15 = vld [vmem:[#allocation3 + $0x3a0] sm:$0xff]  ;;  %v2195_v12 = vld [vmem:[#allocation3 + $0x3a8] sm:$0xff]  ;;  %2446 = vst [vmem:[#allocation3 + $0x380] sm:$0xff] %v2318_v4  ;;  %v14171_v20 = vld [vmem:[#allocation94_spill] sm:$0xff] }
 0x2f2   : > { %v14170_v27 = vld [vmem:[#allocation93_spill] sm:$0xff]  ;;  %v2323_v44 = vadd.f32 %v2195_v12, %v14171_v20  ;;  %v14172_v16 = vld [vmem:[#allocation95_spill] sm:$0xff]  ;;  %2447 = vst [vmem:[#allocation3 + $0x388] sm:$0xff] %v2319_v3  ;;  %2448 = vst [vmem:[#allocation3 + $0x390] sm:$0xff] %v2320_v13 }
 0x2f3   : > { %v2322_v26 = vadd.f32 %v2194_v15, %v14170_v27  ;;  %v2324_v60 = vadd.f32 %v2196_v25, %v14172_v16  ;;  %v2197_v10 = vld [vmem:[#allocation3 + $0x3b8] sm:$0xff]  ;;  %v2198_v42 = vld [vmem:[#allocation3 + $0x3c0] sm:$0xff]  ;;  %v2199_v41 = vld [vmem:[#allocation3 + $0x3c8] sm:$0xff]  ;;  %2449 = vst [vmem:[#allocation3 + $0x398] sm:$0xff] %v2321_v32 }
 0x2f4   : > { %v14173_v45 = vld [vmem:[#allocation96_spill] sm:$0xff]  ;;  %v14174_v46 = vld [vmem:[#allocation97_spill] sm:$0xff]  ;;  %v14175_v48 = vld [vmem:[#allocation98_spill] sm:$0xff]  ;;  %2451 = vst [vmem:[#allocation3 + $0x3a8] sm:$0xff] %v2323_v44 }
 0x2f5   : > { %v2325_v54 = vadd.f32 %v2197_v10, %v14173_v45  ;;  %v2326_v9 = vadd.f32 %v2198_v42, %v14174_v46  ;;  %v2327_v31 = vadd.f32 %v2199_v41, %v14175_v48  ;;  %v2200_v19 = vld [vmem:[#allocation3 + $0x3d0] sm:$0xff]  ;;  %v2201_v17 = vld [vmem:[#allocation3 + $0x3d8] sm:$0xff]  ;;  %v2202_v61 = vld [vmem:[#allocation3 + $0x3e0] sm:$0xff]  ;;  %2450 = vst [vmem:[#allocation3 + $0x3a0] sm:$0xff] %v2322_v26 }
 0x2f6   : > { %2452 = vst [vmem:[#allocation3 + $0x3b0] sm:$0xff] %v2324_v60  ;;  %v14176_v37 = vld [vmem:[#allocation99_spill] sm:$0xff]  ;;  %v14177_v38 = vld [vmem:[#allocation100_spill] sm:$0xff]  ;;  %v14178_v47 = vld [vmem:[#allocation101_spill] sm:$0xff] }
 0x2f7   : > { %v2328_v29 = vadd.f32 %v2200_v19, %v14176_v37  ;;  %v2329_v50 = vadd.f32 %v2201_v17, %v14177_v38  ;;  %v2330_v36 = vadd.f32 %v2202_v61, %v14178_v47  ;;  %v2203_v63 = vld [vmem:[#allocation3 + $0x3e8] sm:$0xff]  ;;  %v2204_v5 = vld [vmem:[#allocation3 + $0x3f0] sm:$0xff]  ;;  %v2205_v49 = vld [vmem:[#allocation3 + $0x3f8] sm:$0xff]  ;;  %2453 = vst [vmem:[#allocation3 + $0x3b8] sm:$0xff] %v2325_v54 }
 0x2f8   : > { %2454 = vst [vmem:[#allocation3 + $0x3c0] sm:$0xff] %v2326_v9  ;;  %2455 = vst [vmem:[#allocation3 + $0x3c8] sm:$0xff] %v2327_v31  ;;  %v14179_v6 = vld [vmem:[#allocation102_spill] sm:$0xff]  ;;  %v14180_v34 = vld [vmem:[#allocation103_spill] sm:$0xff] }
 0x2f9   : > { %v2331_v39 = vadd.f32 %v2203_v63, %v14179_v6  ;;  %v2332_v14 = vadd.f32 %v2204_v5, %v14180_v34  ;;  %v14181_v56 = vld [vmem:[#allocation104_spill] sm:$0xff]  ;;  %v2462_v33 = vld [vmem:[%s10447_s26 + $0x10] sm:$0xff]  ;;  %2456 = vst [vmem:[#allocation3 + $0x3d0] sm:$0xff] %v2328_v29  ;;  %2457 = vst [vmem:[#allocation3 + $0x3d8] sm:$0xff] %v2329_v50 }
 0x2fa   : > { %v2333_v11 = vadd.f32 %v2205_v49, %v14181_v56  ;;  %v2590_v18 = vld [vmem:[#allocation2] sm:$0xff]  ;;  %v2463_v43 = vld [vmem:[%s10447_s26 + $0x28] sm:$0xff]  ;;  %2458 = vst [vmem:[#allocation3 + $0x3e0] sm:$0xff] %v2330_v36  ;;  %v2592_v8 = vld [vmem:[#allocation2 + $0x10] sm:$0xff] }
 0x2fb   : > { %v2718_v62 = vmax.f32 %v2590_v18, %v2462_v33  ;;  %v2591_v55 = vld [vmem:[#allocation2 + $0x8] sm:$0xff]  ;;  %v2464_v22 = vld [vmem:[%s10447_s26 + $0x40] sm:$0xff]  ;;  %2459 = vst [vmem:[#allocation3 + $0x3e8] sm:$0xff] %v2331_v39  ;;  %2460 = vst [vmem:[#allocation3 + $0x3f0] sm:$0xff] %v2332_v14 }
 0x2fc   : > { %2461 = vst [vmem:[#allocation3 + $0x3f8] sm:$0xff] %v2333_v11  ;;  %v2719_v51 = vmax.f32 %v2591_v55, %v2463_v43  ;;  %v2720_v0 = vmax.f32 %v2592_v8, %v2464_v22  ;;  %v11990_v23 = vld [vmem:[%s10447_s26 + $0x58] sm:$0xff]  ;;  %v11993_v59 = vld [vmem:[%s10447_s26 + $0x70] sm:$0xff]  ;;  %v2594_v40 = vld [vmem:[#allocation2 + $0x20] sm:$0xff] }
 0x2fd   : > { %v2593_v1 = vld [vmem:[#allocation2 + $0x18] sm:$0xff]  ;;  %2846 = vst [vmem:[#allocation2] sm:$0xff] %v2718_v62  ;;  %v2467_v52 = vld [vmem:[%s10447_s26 + $0x88] sm:$0xff]  ;;  %v2722_v35 = vmax.f32 %v2594_v40, %v11993_v59  ;;  %v11999_v4 = vld [vmem:[%s10447_s26 + $0xa0] sm:$0xff] }
 0x2fe   : > { %v2721_v21 = vmax.f32 %v2593_v1, %v11990_v23  ;;  %v2595_v30 = vld [vmem:[#allocation2 + $0x28] sm:$0xff]  ;;  %2847 = vst [vmem:[#allocation2 + $0x8] sm:$0xff] %v2719_v51  ;;  %2848 = vst [vmem:[#allocation2 + $0x10] sm:$0xff] %v2720_v0  ;;  %v2596_v58 = vld [vmem:[#allocation2 + $0x30] sm:$0xff] }
 0x2ff   : > { %v2723_v2 = vmax.f32 %v2595_v30, %v2467_v52  ;;  %v12002_v28 = vld [vmem:[%s10447_s26 + $0xb8] sm:$0xff]  ;;  %v2724_v57 = vmax.f32 %v2596_v58, %v11999_v4  ;;  %v12006_v3 = vld [vmem:[%s10447_s26 + $0xd0] sm:$0xff]  ;;  %v2598_v7 = vld [vmem:[#allocation2 + $0x40] sm:$0xff]  ;;  %2850 = vst [vmem:[#allocation2 + $0x20] sm:$0xff] %v2722_v35 }
 0x300   : > { %2849 = vst [vmem:[#allocation2 + $0x18] sm:$0xff] %v2721_v21  ;;  %v2597_v53 = vld [vmem:[#allocation2 + $0x38] sm:$0xff]  ;;  %v2726_v24 = vmax.f32 %v2598_v7, %v12006_v3  ;;  %v12011_v32 = vld [vmem:[%s10447_s26 + $0xe8] sm:$0xff]  ;;  %v12014_v12 = vld [vmem:[%s10447_s26 + $0x100] sm:$0xff] }
 0x301   : > { %2851 = vst [vmem:[#allocation2 + $0x28] sm:$0xff] %v2723_v2  ;;  %v2725_v13 = vmax.f32 %v2597_v53, %v12002_v28  ;;  %v2599_v15 = vld [vmem:[#allocation2 + $0x48] sm:$0xff]  ;;  %2852 = vst [vmem:[#allocation2 + $0x30] sm:$0xff] %v2724_v57  ;;  %v2600_v27 = vld [vmem:[#allocation2 + $0x50] sm:$0xff] }
 0x302   : > { %v2727_v25 = vmax.f32 %v2599_v15, %v12011_v32  ;;  %v12018_v26 = vld [vmem:[%s10447_s26 + $0x118] sm:$0xff]  ;;  %2854 = vst [vmem:[#allocation2 + $0x40] sm:$0xff] %v2726_v24  ;;  %v2728_v44 = vmax.f32 %v2600_v27, %v12014_v12  ;;  %v12023_v60 = vld [vmem:[%s10447_s26 + $0x130] sm:$0xff]  ;;  %v2602_v10 = vld [vmem:[#allocation2 + $0x60] sm:$0xff] }
 0x303   : > { %v2601_v20 = vld [vmem:[#allocation2 + $0x58] sm:$0xff]  ;;  %2853 = vst [vmem:[#allocation2 + $0x38] sm:$0xff] %v2725_v13  ;;  %v12026_v42 = vld [vmem:[%s10447_s26 + $0x148] sm:$0xff]  ;;  %v2730_v41 = vmax.f32 %v2602_v10, %v12023_v60  ;;  %v12030_v54 = vld [vmem:[%s10447_s26 + $0x160] sm:$0xff] }
 0x304   : > { %v2729_v16 = vmax.f32 %v2601_v20, %v12018_v26  ;;  %2855 = vst [vmem:[#allocation2 + $0x48] sm:$0xff] %v2727_v25  ;;  %v2603_v45 = vld [vmem:[#allocation2 + $0x68] sm:$0xff]  ;;  %v2604_v46 = vld [vmem:[#allocation2 + $0x70] sm:$0xff]  ;;  %2856 = vst [vmem:[#allocation2 + $0x50] sm:$0xff] %v2728_v44 }
 0x305   : > { %v2731_v9 = vmax.f32 %v2603_v45, %v12026_v42  ;;  %v2732_v48 = vmax.f32 %v2604_v46, %v12030_v54  ;;  %v12035_v31 = vld [vmem:[%s10447_s26 + $0x178] sm:$0xff]  ;;  %v12038_v17 = vld [vmem:[%s10447_s26 + $0x190] sm:$0xff]  ;;  %2858 = vst [vmem:[#allocation2 + $0x60] sm:$0xff] %v2730_v41  ;;  %v2606_v37 = vld [vmem:[#allocation2 + $0x80] sm:$0xff] }
 0x306   : > { %2857 = vst [vmem:[#allocation2 + $0x58] sm:$0xff] %v2729_v16  ;;  %v2605_v19 = vld [vmem:[#allocation2 + $0x78] sm:$0xff]  ;;  %v12042_v29 = vld [vmem:[%s10447_s26 + $0x1a8] sm:$0xff]  ;;  %v2734_v50 = vmax.f32 %v2606_v37, %v12038_v17  ;;  %v12047_v36 = vld [vmem:[%s10447_s26 + $0x1c0] sm:$0xff] }
 0x307   : > { %v2733_v61 = vmax.f32 %v2605_v19, %v12035_v31  ;;  %v2607_v38 = vld [vmem:[#allocation2 + $0x88] sm:$0xff]  ;;  %2859 = vst [vmem:[#allocation2 + $0x68] sm:$0xff] %v2731_v9  ;;  %2860 = vst [vmem:[#allocation2 + $0x70] sm:$0xff] %v2732_v48  ;;  %v2608_v63 = vld [vmem:[#allocation2 + $0x90] sm:$0xff] }
 0x308   : > { %v2735_v47 = vmax.f32 %v2607_v38, %v12042_v29  ;;  %v12050_v5 = vld [vmem:[%s10447_s26 + $0x1d8] sm:$0xff]  ;;  %v2736_v49 = vmax.f32 %v2608_v63, %v12047_v36  ;;  %v12054_v39 = vld [vmem:[%s10447_s26 + $0x1f0] sm:$0xff]  ;;  %v2610_v34 = vld [vmem:[#allocation2 + $0xa0] sm:$0xff]  ;;  %2862 = vst [vmem:[#allocation2 + $0x80] sm:$0xff] %v2734_v50 }
 0x309   : > { %2861 = vst [vmem:[#allocation2 + $0x78] sm:$0xff] %v2733_v61  ;;  %v2609_v6 = vld [vmem:[#allocation2 + $0x98] sm:$0xff]  ;;  %v2738_v56 = vmax.f32 %v2610_v34, %v12054_v39  ;;  %v12059_v11 = vld [vmem:[%s10447_s26 + $0x208] sm:$0xff]  ;;  %v12062_v18 = vld [vmem:[%s10447_s26 + $0x220] sm:$0xff] }
 0x30a   : > { %2863 = vst [vmem:[#allocation2 + $0x88] sm:$0xff] %v2735_v47  ;;  %v2737_v14 = vmax.f32 %v2609_v6, %v12050_v5  ;;  %v2611_v33 = vld [vmem:[#allocation2 + $0xa8] sm:$0xff]  ;;  %2864 = vst [vmem:[#allocation2 + $0x90] sm:$0xff] %v2736_v49  ;;  %v2612_v62 = vld [vmem:[#allocation2 + $0xb0] sm:$0xff] }
 0x30b   : > { %v2739_v43 = vmax.f32 %v2611_v33, %v12059_v11  ;;  %v12066_v55 = vld [vmem:[%s10447_s26 + $0x238] sm:$0xff]  ;;  %2866 = vst [vmem:[#allocation2 + $0xa0] sm:$0xff] %v2738_v56  ;;  %v2740_v8 = vmax.f32 %v2612_v62, %v12062_v18  ;;  %v12071_v0 = vld [vmem:[%s10447_s26 + $0x250] sm:$0xff]  ;;  %v2614_v1 = vld [vmem:[#allocation2 + $0xc0] sm:$0xff] }
 0x30c   : > { %v2613_v22 = vld [vmem:[#allocation2 + $0xb8] sm:$0xff]  ;;  %2865 = vst [vmem:[#allocation2 + $0x98] sm:$0xff] %v2737_v14  ;;  %v12074_v21 = vld [vmem:[%s10447_s26 + $0x268] sm:$0xff]  ;;  %v2742_v40 = vmax.f32 %v2614_v1, %v12071_v0  ;;  %v12078_v30 = vld [vmem:[%s10447_s26 + $0x280] sm:$0xff] }
 0x30d   : > { %v2741_v51 = vmax.f32 %v2613_v22, %v12066_v55  ;;  %2867 = vst [vmem:[#allocation2 + $0xa8] sm:$0xff] %v2739_v43  ;;  %v2615_v52 = vld [vmem:[#allocation2 + $0xc8] sm:$0xff]  ;;  %v2616_v35 = vld [vmem:[#allocation2 + $0xd0] sm:$0xff]  ;;  %2868 = vst [vmem:[#allocation2 + $0xb0] sm:$0xff] %v2740_v8 }
 0x30e   : > { %v2743_v2 = vmax.f32 %v2615_v52, %v12074_v21  ;;  %v2744_v58 = vmax.f32 %v2616_v35, %v12078_v30  ;;  %v12083_v57 = vld [vmem:[%s10447_s26 + $0x298] sm:$0xff]  ;;  %v12086_v7 = vld [vmem:[%s10447_s26 + $0x2b0] sm:$0xff]  ;;  %2870 = vst [vmem:[#allocation2 + $0xc0] sm:$0xff] %v2742_v40  ;;  %v2618_v24 = vld [vmem:[#allocation2 + $0xe0] sm:$0xff] }
 0x30f   : > { %2869 = vst [vmem:[#allocation2 + $0xb8] sm:$0xff] %v2741_v51  ;;  %v2617_v53 = vld [vmem:[#allocation2 + $0xd8] sm:$0xff]  ;;  %v12090_v15 = vld [vmem:[%s10447_s26 + $0x2c8] sm:$0xff]  ;;  %v2746_v27 = vmax.f32 %v2618_v24, %v12086_v7  ;;  %v12095_v44 = vld [vmem:[%s10447_s26 + $0x2e0] sm:$0xff] }
 0x310   : > { %v2745_v13 = vmax.f32 %v2617_v53, %v12083_v57  ;;  %v2619_v25 = vld [vmem:[#allocation2 + $0xe8] sm:$0xff]  ;;  %2871 = vst [vmem:[#allocation2 + $0xc8] sm:$0xff] %v2743_v2  ;;  %2872 = vst [vmem:[#allocation2 + $0xd0] sm:$0xff] %v2744_v58  ;;  %v2620_v16 = vld [vmem:[#allocation2 + $0xf0] sm:$0xff] }
 0x311   : > { %v2747_v20 = vmax.f32 %v2619_v25, %v12090_v15  ;;  %v12098_v10 = vld [vmem:[%s10447_s26 + $0x2f8] sm:$0xff]  ;;  %v2748_v41 = vmax.f32 %v2620_v16, %v12095_v44  ;;  %v12102_v46 = vld [vmem:[%s10447_s26 + $0x310] sm:$0xff]  ;;  %v2622_v9 = vld [vmem:[#allocation2 + $0x100] sm:$0xff]  ;;  %2874 = vst [vmem:[#allocation2 + $0xe0] sm:$0xff] %v2746_v27 }
 0x312   : > { %2873 = vst [vmem:[#allocation2 + $0xd8] sm:$0xff] %v2745_v13  ;;  %v2621_v45 = vld [vmem:[#allocation2 + $0xf8] sm:$0xff]  ;;  %v2750_v19 = vmax.f32 %v2622_v9, %v12102_v46  ;;  %v12107_v61 = vld [vmem:[%s10447_s26 + $0x328] sm:$0xff]  ;;  %v12110_v38 = vld [vmem:[%s10447_s26 + $0x340] sm:$0xff] }
 0x313   : > { %2875 = vst [vmem:[#allocation2 + $0xe8] sm:$0xff] %v2747_v20  ;;  %v2749_v48 = vmax.f32 %v2621_v45, %v12098_v10  ;;  %v2623_v37 = vld [vmem:[#allocation2 + $0x108] sm:$0xff]  ;;  %2876 = vst [vmem:[#allocation2 + $0xf0] sm:$0xff] %v2748_v41  ;;  %v2624_v47 = vld [vmem:[#allocation2 + $0x110] sm:$0xff] }
 0x314   : > { %v2751_v50 = vmax.f32 %v2623_v37, %v12107_v61  ;;  %v12114_v63 = vld [vmem:[%s10447_s26 + $0x358] sm:$0xff]  ;;  %2878 = vst [vmem:[#allocation2 + $0x100] sm:$0xff] %v2750_v19  ;;  %v2752_v6 = vmax.f32 %v2624_v47, %v12110_v38  ;;  %v12119_v14 = vld [vmem:[%s10447_s26 + $0x370] sm:$0xff]  ;;  %v2626_v56 = vld [vmem:[#allocation2 + $0x120] sm:$0xff] }
 0x315   : > { %v2625_v49 = vld [vmem:[#allocation2 + $0x118] sm:$0xff]  ;;  %2877 = vst [vmem:[#allocation2 + $0xf8] sm:$0xff] %v2749_v48  ;;  %v12122_v33 = vld [vmem:[%s10447_s26 + $0x388] sm:$0xff]  ;;  %v2754_v43 = vmax.f32 %v2626_v56, %v12119_v14  ;;  %v12126_v22 = vld [vmem:[%s10447_s26 + $0x3a0] sm:$0xff] }
 0x316   : > { %v2753_v34 = vmax.f32 %v2625_v49, %v12114_v63  ;;  %2879 = vst [vmem:[#allocation2 + $0x108] sm:$0xff] %v2751_v50  ;;  %v2627_v62 = vld [vmem:[#allocation2 + $0x128] sm:$0xff]  ;;  %v2628_v8 = vld [vmem:[#allocation2 + $0x130] sm:$0xff]  ;;  %2880 = vst [vmem:[#allocation2 + $0x110] sm:$0xff] %v2752_v6 }
 0x317   : > { %v2755_v51 = vmax.f32 %v2627_v62, %v12122_v33  ;;  %v2756_v1 = vmax.f32 %v2628_v8, %v12126_v22  ;;  %v12131_v40 = vld [vmem:[%s10447_s26 + $0x3b8] sm:$0xff]  ;;  %v12134_v35 = vld [vmem:[%s10447_s26 + $0x3d0] sm:$0xff]  ;;  %2882 = vst [vmem:[#allocation2 + $0x120] sm:$0xff] %v2754_v43  ;;  %v2630_v58 = vld [vmem:[#allocation2 + $0x140] sm:$0xff] }
 0x318   : > { %2881 = vst [vmem:[#allocation2 + $0x118] sm:$0xff] %v2753_v34  ;;  %v2629_v52 = vld [vmem:[#allocation2 + $0x138] sm:$0xff]  ;;  %v12138_v53 = vld [vmem:[%s10447_s26 + $0x3e8] sm:$0xff]  ;;  %v2758_v24 = vmax.f32 %v2630_v58, %v12134_v35  ;;  %v12143_v27 = vld [vmem:[%s10447_s26 + $0x400] sm:$0xff] }
 0x319   : > { %v2757_v2 = vmax.f32 %v2629_v52, %v12131_v40  ;;  %v2631_v13 = vld [vmem:[#allocation2 + $0x148] sm:$0xff]  ;;  %2883 = vst [vmem:[#allocation2 + $0x128] sm:$0xff] %v2755_v51  ;;  %2884 = vst [vmem:[#allocation2 + $0x130] sm:$0xff] %v2756_v1  ;;  %v2632_v20 = vld [vmem:[#allocation2 + $0x150] sm:$0xff] }
 0x31a   : > { %v2759_v25 = vmax.f32 %v2631_v13, %v12138_v53  ;;  %v12146_v16 = vld [vmem:[%s10447_s26 + $0x418] sm:$0xff]  ;;  %v2760_v41 = vmax.f32 %v2632_v20, %v12143_v27  ;;  %v12150_v9 = vld [vmem:[%s10447_s26 + $0x430] sm:$0xff]  ;;  %v2634_v48 = vld [vmem:[#allocation2 + $0x160] sm:$0xff]  ;;  %2886 = vst [vmem:[#allocation2 + $0x140] sm:$0xff] %v2758_v24 }
 0x31b   : > { %2885 = vst [vmem:[#allocation2 + $0x138] sm:$0xff] %v2757_v2  ;;  %v2633_v45 = vld [vmem:[#allocation2 + $0x158] sm:$0xff]  ;;  %v2762_v37 = vmax.f32 %v2634_v48, %v12150_v9  ;;  %v12155_v50 = vld [vmem:[%s10447_s26 + $0x448] sm:$0xff]  ;;  %v12158_v49 = vld [vmem:[%s10447_s26 + $0x460] sm:$0xff] }
 0x31c   : > { %2887 = vst [vmem:[#allocation2 + $0x148] sm:$0xff] %v2759_v25  ;;  %v2761_v19 = vmax.f32 %v2633_v45, %v12146_v16  ;;  %v2635_v47 = vld [vmem:[#allocation2 + $0x168] sm:$0xff]  ;;  %2888 = vst [vmem:[#allocation2 + $0x150] sm:$0xff] %v2760_v41  ;;  %v2636_v34 = vld [vmem:[#allocation2 + $0x170] sm:$0xff] }
 0x31d   : > { %v2763_v6 = vmax.f32 %v2635_v47, %v12155_v50  ;;  %v12162_v56 = vld [vmem:[%s10447_s26 + $0x478] sm:$0xff]  ;;  %2890 = vst [vmem:[#allocation2 + $0x160] sm:$0xff] %v2762_v37  ;;  %v2764_v62 = vmax.f32 %v2636_v34, %v12158_v49  ;;  %v12167_v51 = vld [vmem:[%s10447_s26 + $0x490] sm:$0xff]  ;;  %v2638_v1 = vld [vmem:[#allocation2 + $0x180] sm:$0xff] }
 0x31e   : > { %v2637_v43 = vld [vmem:[#allocation2 + $0x178] sm:$0xff]  ;;  %2889 = vst [vmem:[#allocation2 + $0x158] sm:$0xff] %v2761_v19  ;;  %14182 = vst [vmem:[#allocation25_spill] sm:$0xff] %v12167_v51  ;;  %v12170_v52 = vld [vmem:[%s10447_s26 + $0x4a8] sm:$0xff]  ;;  %v2766_v2 = vmax.f32 %v2638_v1, %v12167_v51 }
 0x31f   : > { %v2765_v8 = vmax.f32 %v2637_v43, %v12162_v56  ;;  %14183 = vst [vmem:[#allocation26_spill] sm:$0xff] %v12170_v52  ;;  %2891 = vst [vmem:[#allocation2 + $0x168] sm:$0xff] %v2763_v6  ;;  %v2639_v58 = vld [vmem:[#allocation2 + $0x188] sm:$0xff]  ;;  %v12174_v13 = vld [vmem:[%s10447_s26 + $0x4c0] sm:$0xff] }
 0x320   : > { %14184 = vst [vmem:[#allocation27_spill] sm:$0xff] %v12174_v13  ;;  %v2640_v24 = vld [vmem:[#allocation2 + $0x190] sm:$0xff]  ;;  %2892 = vst [vmem:[#allocation2 + $0x170] sm:$0xff] %v2764_v62  ;;  %v2767_v25 = vmax.f32 %v2639_v58, %v12170_v52  ;;  %v12179_v41 = vld [vmem:[%s10447_s26 + $0x4d8] sm:$0xff] }
 0x321   : > { %2893 = vst [vmem:[#allocation2 + $0x178] sm:$0xff] %v2765_v8  ;;  %v2768_v20 = vmax.f32 %v2640_v24, %v12174_v13  ;;  %14185 = vst [vmem:[#allocation28_spill] sm:$0xff] %v12179_v41  ;;  %v2641_v45 = vld [vmem:[#allocation2 + $0x198] sm:$0xff]  ;;  %v12182_v48 = vld [vmem:[%s10447_s26 + $0x4f0] sm:$0xff] }
 0x322   : > { %14186 = vst [vmem:[#allocation29_spill] sm:$0xff] %v12182_v48  ;;  %2894 = vst [vmem:[#allocation2 + $0x180] sm:$0xff] %v2766_v2  ;;  %v2769_v19 = vmax.f32 %v2641_v45, %v12179_v41  ;;  %v2642_v37 = vld [vmem:[#allocation2 + $0x1a0] sm:$0xff]  ;;  %v12186_v47 = vld [vmem:[%s10447_s26 + $0x508] sm:$0xff] }
 0x323   : > { %14187 = vst [vmem:[#allocation30_spill] sm:$0xff] %v12186_v47  ;;  %v2643_v6 = vld [vmem:[#allocation2 + $0x1a8] sm:$0xff]  ;;  %2895 = vst [vmem:[#allocation2 + $0x188] sm:$0xff] %v2767_v25  ;;  %v2770_v34 = vmax.f32 %v2642_v37, %v12182_v48  ;;  %v12191_v62 = vld [vmem:[%s10447_s26 + $0x520] sm:$0xff] }
 0x324   : > { %2896 = vst [vmem:[#allocation2 + $0x190] sm:$0xff] %v2768_v20  ;;  %v2771_v43 = vmax.f32 %v2643_v6, %v12186_v47  ;;  %14188 = vst [vmem:[#allocation31_spill] sm:$0xff] %v12191_v62  ;;  %v2644_v8 = vld [vmem:[#allocation2 + $0x1b0] sm:$0xff]  ;;  %v12194_v1 = vld [vmem:[%s10447_s26 + $0x538] sm:$0xff] }
 0x325   : > { %14189 = vst [vmem:[#allocation32_spill] sm:$0xff] %v12194_v1  ;;  %2897 = vst [vmem:[#allocation2 + $0x198] sm:$0xff] %v2769_v19  ;;  %v2772_v2 = vmax.f32 %v2644_v8, %v12191_v62  ;;  %v2645_v58 = vld [vmem:[#allocation2 + $0x1b8] sm:$0xff]  ;;  %v12198_v24 = vld [vmem:[%s10447_s26 + $0x550] sm:$0xff] }
 0x326   : > { %14190 = vst [vmem:[#allocation33_spill] sm:$0xff] %v12198_v24  ;;  %v2646_v25 = vld [vmem:[#allocation2 + $0x1c0] sm:$0xff]  ;;  %2898 = vst [vmem:[#allocation2 + $0x1a0] sm:$0xff] %v2770_v34  ;;  %v2773_v20 = vmax.f32 %v2645_v58, %v12194_v1  ;;  %v12203_v37 = vld [vmem:[%s10447_s26 + $0x568] sm:$0xff] }
 0x327   : > { %2899 = vst [vmem:[#allocation2 + $0x1a8] sm:$0xff] %v2771_v43  ;;  %v2774_v45 = vmax.f32 %v2646_v25, %v12198_v24  ;;  %14191 = vst [vmem:[#allocation34_spill] sm:$0xff] %v12203_v37  ;;  %v2647_v6 = vld [vmem:[#allocation2 + $0x1c8] sm:$0xff]  ;;  %v12206_v47 = vld [vmem:[%s10447_s26 + $0x580] sm:$0xff] }
 0x328   : > { %14192 = vst [vmem:[#allocation35_spill] sm:$0xff] %v12206_v47  ;;  %2900 = vst [vmem:[#allocation2 + $0x1b0] sm:$0xff] %v2772_v2  ;;  %v2775_v19 = vmax.f32 %v2647_v6, %v12203_v37  ;;  %v2648_v8 = vld [vmem:[#allocation2 + $0x1d0] sm:$0xff]  ;;  %v12210_v62 = vld [vmem:[%s10447_s26 + $0x598] sm:$0xff] }
 0x329   : > { %14193 = vst [vmem:[#allocation36_spill] sm:$0xff] %v12210_v62  ;;  %v2649_v34 = vld [vmem:[#allocation2 + $0x1d8] sm:$0xff]  ;;  %2901 = vst [vmem:[#allocation2 + $0x1b8] sm:$0xff] %v2773_v20  ;;  %v2776_v43 = vmax.f32 %v2648_v8, %v12206_v47  ;;  %v12215_v25 = vld [vmem:[%s10447_s26 + $0x5b0] sm:$0xff] }
 0x32a   : > { %2902 = vst [vmem:[#allocation2 + $0x1c0] sm:$0xff] %v2774_v45  ;;  %v2777_v58 = vmax.f32 %v2649_v34, %v12210_v62  ;;  %14194 = vst [vmem:[#allocation37_spill] sm:$0xff] %v12215_v25  ;;  %v2650_v24 = vld [vmem:[#allocation2 + $0x1e0] sm:$0xff]  ;;  %v12218_v1 = vld [vmem:[%s10447_s26 + $0x5c8] sm:$0xff] }
 0x32b   : > { %14195 = vst [vmem:[#allocation38_spill] sm:$0xff] %v12218_v1  ;;  %2903 = vst [vmem:[#allocation2 + $0x1c8] sm:$0xff] %v2775_v19  ;;  %v2778_v2 = vmax.f32 %v2650_v24, %v12215_v25  ;;  %v2651_v6 = vld [vmem:[#allocation2 + $0x1e8] sm:$0xff]  ;;  %v12222_v37 = vld [vmem:[%s10447_s26 + $0x5e0] sm:$0xff] }
 0x32c   : > { %14196 = vst [vmem:[#allocation39_spill] sm:$0xff] %v12222_v37  ;;  %v2652_v20 = vld [vmem:[#allocation2 + $0x1f0] sm:$0xff]  ;;  %2904 = vst [vmem:[#allocation2 + $0x1d0] sm:$0xff] %v2776_v43  ;;  %v2779_v45 = vmax.f32 %v2651_v6, %v12218_v1  ;;  %v12227_v34 = vld [vmem:[%s10447_s26 + $0x5f8] sm:$0xff] }
 0x32d   : > { %2905 = vst [vmem:[#allocation2 + $0x1d8] sm:$0xff] %v2777_v58  ;;  %v2780_v8 = vmax.f32 %v2652_v20, %v12222_v37  ;;  %14197 = vst [vmem:[#allocation40_spill] sm:$0xff] %v12227_v34  ;;  %v2653_v62 = vld [vmem:[#allocation2 + $0x1f8] sm:$0xff]  ;;  %v12230_v47 = vld [vmem:[%s10447_s26 + $0x610] sm:$0xff] }
 0x32e   : > { %14198 = vst [vmem:[#allocation41_spill] sm:$0xff] %v12230_v47  ;;  %2906 = vst [vmem:[#allocation2 + $0x1e0] sm:$0xff] %v2778_v2  ;;  %v2781_v24 = vmax.f32 %v2653_v62, %v12227_v34  ;;  %v2654_v19 = vld [vmem:[#allocation2 + $0x200] sm:$0xff]  ;;  %v12234_v25 = vld [vmem:[%s10447_s26 + $0x628] sm:$0xff] }
 0x32f   : > { %14199 = vst [vmem:[#allocation42_spill] sm:$0xff] %v12234_v25  ;;  %v2655_v43 = vld [vmem:[#allocation2 + $0x208] sm:$0xff]  ;;  %2907 = vst [vmem:[#allocation2 + $0x1e8] sm:$0xff] %v2779_v45  ;;  %v2782_v58 = vmax.f32 %v2654_v19, %v12230_v47  ;;  %v12239_v20 = vld [vmem:[%s10447_s26 + $0x640] sm:$0xff] }
 0x330   : > { %2908 = vst [vmem:[#allocation2 + $0x1f0] sm:$0xff] %v2780_v8  ;;  %v2783_v6 = vmax.f32 %v2655_v43, %v12234_v25  ;;  %14200 = vst [vmem:[#allocation43_spill] sm:$0xff] %v12239_v20  ;;  %v2656_v37 = vld [vmem:[#allocation2 + $0x210] sm:$0xff]  ;;  %v12242_v1 = vld [vmem:[%s10447_s26 + $0x658] sm:$0xff] }
 0x331   : > { %14201 = vst [vmem:[#allocation44_spill] sm:$0xff] %v12242_v1  ;;  %2909 = vst [vmem:[#allocation2 + $0x1f8] sm:$0xff] %v2781_v24  ;;  %v2784_v62 = vmax.f32 %v2656_v37, %v12239_v20  ;;  %v2657_v2 = vld [vmem:[#allocation2 + $0x218] sm:$0xff]  ;;  %v12246_v34 = vld [vmem:[%s10447_s26 + $0x670] sm:$0xff] }
 0x332   : > { %14202 = vst [vmem:[#allocation45_spill] sm:$0xff] %v12246_v34  ;;  %v2658_v45 = vld [vmem:[#allocation2 + $0x220] sm:$0xff]  ;;  %2910 = vst [vmem:[#allocation2 + $0x200] sm:$0xff] %v2782_v58  ;;  %v2785_v8 = vmax.f32 %v2657_v2, %v12242_v1  ;;  %v12251_v43 = vld [vmem:[%s10447_s26 + $0x688] sm:$0xff] }
 0x333   : > { %2911 = vst [vmem:[#allocation2 + $0x208] sm:$0xff] %v2783_v6  ;;  %v2786_v19 = vmax.f32 %v2658_v45, %v12246_v34  ;;  %14203 = vst [vmem:[#allocation46_spill] sm:$0xff] %v12251_v43  ;;  %v2659_v25 = vld [vmem:[#allocation2 + $0x228] sm:$0xff]  ;;  %v12254_v47 = vld [vmem:[%s10447_s26 + $0x6a0] sm:$0xff] }
 0x334   : > { %14204 = vst [vmem:[#allocation47_spill] sm:$0xff] %v12254_v47  ;;  %2912 = vst [vmem:[#allocation2 + $0x210] sm:$0xff] %v2784_v62  ;;  %v2787_v37 = vmax.f32 %v2659_v25, %v12251_v43  ;;  %v2660_v24 = vld [vmem:[#allocation2 + $0x230] sm:$0xff]  ;;  %v12258_v20 = vld [vmem:[%s10447_s26 + $0x6b8] sm:$0xff] }
 0x335   : > { %14205 = vst [vmem:[#allocation48_spill] sm:$0xff] %v12258_v20  ;;  %v2661_v58 = vld [vmem:[#allocation2 + $0x238] sm:$0xff]  ;;  %2913 = vst [vmem:[#allocation2 + $0x218] sm:$0xff] %v2785_v8  ;;  %v2788_v6 = vmax.f32 %v2660_v24, %v12254_v47  ;;  %v12263_v45 = vld [vmem:[%s10447_s26 + $0x6d0] sm:$0xff] }
 0x336   : > { %2914 = vst [vmem:[#allocation2 + $0x220] sm:$0xff] %v2786_v19  ;;  %v2789_v2 = vmax.f32 %v2661_v58, %v12258_v20  ;;  %14206 = vst [vmem:[#allocation49_spill] sm:$0xff] %v12263_v45  ;;  %v2662_v34 = vld [vmem:[#allocation2 + $0x240] sm:$0xff]  ;;  %v12266_v1 = vld [vmem:[%s10447_s26 + $0x6e8] sm:$0xff] }
 0x337   : > { %14207 = vst [vmem:[#allocation50_spill] sm:$0xff] %v12266_v1  ;;  %2915 = vst [vmem:[#allocation2 + $0x228] sm:$0xff] %v2787_v37  ;;  %v2790_v25 = vmax.f32 %v2662_v34, %v12263_v45  ;;  %v2663_v62 = vld [vmem:[#allocation2 + $0x248] sm:$0xff]  ;;  %v12270_v43 = vld [vmem:[%s10447_s26 + $0x700] sm:$0xff] }
 0x338   : > { %14208 = vst [vmem:[#allocation51_spill] sm:$0xff] %v12270_v43  ;;  %v2664_v8 = vld [vmem:[#allocation2 + $0x250] sm:$0xff]  ;;  %2916 = vst [vmem:[#allocation2 + $0x230] sm:$0xff] %v2788_v6  ;;  %v2791_v19 = vmax.f32 %v2663_v62, %v12266_v1  ;;  %v12275_v58 = vld [vmem:[%s10447_s26 + $0x718] sm:$0xff] }
 0x339   : > { %2917 = vst [vmem:[#allocation2 + $0x238] sm:$0xff] %v2789_v2  ;;  %v2792_v24 = vmax.f32 %v2664_v8, %v12270_v43  ;;  %14209 = vst [vmem:[#allocation52_spill] sm:$0xff] %v12275_v58  ;;  %v2665_v20 = vld [vmem:[#allocation2 + $0x258] sm:$0xff]  ;;  %v12278_v47 = vld [vmem:[%s10447_s26 + $0x730] sm:$0xff] }
 0x33a   : > { %14210 = vst [vmem:[#allocation53_spill] sm:$0xff] %v12278_v47  ;;  %2918 = vst [vmem:[#allocation2 + $0x240] sm:$0xff] %v2790_v25  ;;  %v2793_v34 = vmax.f32 %v2665_v20, %v12275_v58  ;;  %v2666_v37 = vld [vmem:[#allocation2 + $0x260] sm:$0xff]  ;;  %v12282_v45 = vld [vmem:[%s10447_s26 + $0x748] sm:$0xff] }
 0x33b   : > { %14211 = vst [vmem:[#allocation54_spill] sm:$0xff] %v12282_v45  ;;  %v2667_v6 = vld [vmem:[#allocation2 + $0x268] sm:$0xff]  ;;  %2919 = vst [vmem:[#allocation2 + $0x248] sm:$0xff] %v2791_v19  ;;  %v2794_v2 = vmax.f32 %v2666_v37, %v12278_v47  ;;  %v12287_v8 = vld [vmem:[%s10447_s26 + $0x760] sm:$0xff] }
 0x33c   : > { %2920 = vst [vmem:[#allocation2 + $0x250] sm:$0xff] %v2792_v24  ;;  %v2795_v62 = vmax.f32 %v2667_v6, %v12282_v45  ;;  %14212 = vst [vmem:[#allocation55_spill] sm:$0xff] %v12287_v8  ;;  %v2668_v43 = vld [vmem:[#allocation2 + $0x270] sm:$0xff]  ;;  %v12290_v1 = vld [vmem:[%s10447_s26 + $0x778] sm:$0xff] }
 0x33d   : > { %14213 = vst [vmem:[#allocation56_spill] sm:$0xff] %v12290_v1  ;;  %2921 = vst [vmem:[#allocation2 + $0x258] sm:$0xff] %v2793_v34  ;;  %v2796_v20 = vmax.f32 %v2668_v43, %v12287_v8  ;;  %v2669_v25 = vld [vmem:[#allocation2 + $0x278] sm:$0xff]  ;;  %v12294_v58 = vld [vmem:[%s10447_s26 + $0x790] sm:$0xff] }
 0x33e   : > { %14214 = vst [vmem:[#allocation57_spill] sm:$0xff] %v12294_v58  ;;  %v2670_v19 = vld [vmem:[#allocation2 + $0x280] sm:$0xff]  ;;  %2922 = vst [vmem:[#allocation2 + $0x260] sm:$0xff] %v2794_v2  ;;  %v2797_v24 = vmax.f32 %v2669_v25, %v12290_v1  ;;  %v12299_v6 = vld [vmem:[%s10447_s26 + $0x7a8] sm:$0xff] }
 0x33f   : > { %2923 = vst [vmem:[#allocation2 + $0x268] sm:$0xff] %v2795_v62  ;;  %v2798_v37 = vmax.f32 %v2670_v19, %v12294_v58  ;;  %14215 = vst [vmem:[#allocation58_spill] sm:$0xff] %v12299_v6  ;;  %v2671_v45 = vld [vmem:[#allocation2 + $0x288] sm:$0xff]  ;;  %v12302_v47 = vld [vmem:[%s10447_s26 + $0x7c0] sm:$0xff] }
 0x340   : > { %14216 = vst [vmem:[#allocation59_spill] sm:$0xff] %v12302_v47  ;;  %2924 = vst [vmem:[#allocation2 + $0x270] sm:$0xff] %v2796_v20  ;;  %v2799_v43 = vmax.f32 %v2671_v45, %v12299_v6  ;;  %v2672_v34 = vld [vmem:[#allocation2 + $0x290] sm:$0xff]  ;;  %v12306_v8 = vld [vmem:[%s10447_s26 + $0x7d8] sm:$0xff] }
 0x341   : > { %14217 = vst [vmem:[#allocation60_spill] sm:$0xff] %v12306_v8  ;;  %v2673_v2 = vld [vmem:[#allocation2 + $0x298] sm:$0xff]  ;;  %2925 = vst [vmem:[#allocation2 + $0x278] sm:$0xff] %v2797_v24  ;;  %v2800_v62 = vmax.f32 %v2672_v34, %v12302_v47  ;;  %v12311_v19 = vld [vmem:[%s10447_s26 + $0x7f0] sm:$0xff] }
 0x342   : > { %2926 = vst [vmem:[#allocation2 + $0x280] sm:$0xff] %v2798_v37  ;;  %v2801_v25 = vmax.f32 %v2673_v2, %v12306_v8  ;;  %14218 = vst [vmem:[#allocation61_spill] sm:$0xff] %v12311_v19  ;;  %v2674_v58 = vld [vmem:[#allocation2 + $0x2a0] sm:$0xff]  ;;  %v12314_v1 = vld [vmem:[%s10447_s26 + $0x808] sm:$0xff] }
 0x343   : > { %14219 = vst [vmem:[#allocation62_spill] sm:$0xff] %v12314_v1  ;;  %2927 = vst [vmem:[#allocation2 + $0x288] sm:$0xff] %v2799_v43  ;;  %v2802_v45 = vmax.f32 %v2674_v58, %v12311_v19  ;;  %v2675_v20 = vld [vmem:[#allocation2 + $0x2a8] sm:$0xff]  ;;  %v12318_v6 = vld [vmem:[%s10447_s26 + $0x820] sm:$0xff] }
 0x344   : > { %14220 = vst [vmem:[#allocation63_spill] sm:$0xff] %v12318_v6  ;;  %v2676_v24 = vld [vmem:[#allocation2 + $0x2b0] sm:$0xff]  ;;  %2928 = vst [vmem:[#allocation2 + $0x290] sm:$0xff] %v2800_v62  ;;  %v2803_v37 = vmax.f32 %v2675_v20, %v12314_v1  ;;  %v12323_v2 = vld [vmem:[%s10447_s26 + $0x838] sm:$0xff] }
 0x345   : > { %2929 = vst [vmem:[#allocation2 + $0x298] sm:$0xff] %v2801_v25  ;;  %v2804_v34 = vmax.f32 %v2676_v24, %v12318_v6  ;;  %14221 = vst [vmem:[#allocation64_spill] sm:$0xff] %v12323_v2  ;;  %v2677_v8 = vld [vmem:[#allocation2 + $0x2b8] sm:$0xff]  ;;  %v12326_v47 = vld [vmem:[%s10447_s26 + $0x850] sm:$0xff] }
 0x346   : > { %14222 = vst [vmem:[#allocation65_spill] sm:$0xff] %v12326_v47  ;;  %2930 = vst [vmem:[#allocation2 + $0x2a0] sm:$0xff] %v2802_v45  ;;  %v2805_v58 = vmax.f32 %v2677_v8, %v12323_v2  ;;  %v2678_v43 = vld [vmem:[#allocation2 + $0x2c0] sm:$0xff]  ;;  %v12330_v19 = vld [vmem:[%s10447_s26 + $0x868] sm:$0xff] }
 0x347   : > { %14223 = vst [vmem:[#allocation66_spill] sm:$0xff] %v12330_v19  ;;  %v2679_v62 = vld [vmem:[#allocation2 + $0x2c8] sm:$0xff]  ;;  %2931 = vst [vmem:[#allocation2 + $0x2a8] sm:$0xff] %v2803_v37  ;;  %v2806_v25 = vmax.f32 %v2678_v43, %v12326_v47  ;;  %v12335_v24 = vld [vmem:[%s10447_s26 + $0x880] sm:$0xff] }
 0x348   : > { %2932 = vst [vmem:[#allocation2 + $0x2b0] sm:$0xff] %v2804_v34  ;;  %v2807_v20 = vmax.f32 %v2679_v62, %v12330_v19  ;;  %14224 = vst [vmem:[#allocation67_spill] sm:$0xff] %v12335_v24  ;;  %v2680_v6 = vld [vmem:[#allocation2 + $0x2d0] sm:$0xff]  ;;  %v12338_v1 = vld [vmem:[%s10447_s26 + $0x898] sm:$0xff] }
 0x349   : > { %14225 = vst [vmem:[#allocation68_spill] sm:$0xff] %v12338_v1  ;;  %2933 = vst [vmem:[#allocation2 + $0x2b8] sm:$0xff] %v2805_v58  ;;  %v2808_v8 = vmax.f32 %v2680_v6, %v12335_v24  ;;  %v2681_v45 = vld [vmem:[#allocation2 + $0x2d8] sm:$0xff]  ;;  %v12342_v2 = vld [vmem:[%s10447_s26 + $0x8b0] sm:$0xff] }
 0x34a   : > { %14226 = vst [vmem:[#allocation69_spill] sm:$0xff] %v12342_v2  ;;  %v2682_v37 = vld [vmem:[#allocation2 + $0x2e0] sm:$0xff]  ;;  %2934 = vst [vmem:[#allocation2 + $0x2c0] sm:$0xff] %v2806_v25  ;;  %v2809_v34 = vmax.f32 %v2681_v45, %v12338_v1  ;;  %v12347_v62 = vld [vmem:[%s10447_s26 + $0x8c8] sm:$0xff] }
 0x34b   : > { %2935 = vst [vmem:[#allocation2 + $0x2c8] sm:$0xff] %v2807_v20  ;;  %v2810_v43 = vmax.f32 %v2682_v37, %v12342_v2  ;;  %14227 = vst [vmem:[#allocation70_spill] sm:$0xff] %v12347_v62  ;;  %v2683_v19 = vld [vmem:[#allocation2 + $0x2e8] sm:$0xff]  ;;  %v12350_v47 = vld [vmem:[%s10447_s26 + $0x8e0] sm:$0xff] }
 0x34c   : > { %14228 = vst [vmem:[#allocation71_spill] sm:$0xff] %v12350_v47  ;;  %2936 = vst [vmem:[#allocation2 + $0x2d0] sm:$0xff] %v2808_v8  ;;  %v2811_v6 = vmax.f32 %v2683_v19, %v12347_v62  ;;  %v2684_v58 = vld [vmem:[#allocation2 + $0x2f0] sm:$0xff]  ;;  %v12354_v24 = vld [vmem:[%s10447_s26 + $0x8f8] sm:$0xff] }
 0x34d   : > { %14229 = vst [vmem:[#allocation72_spill] sm:$0xff] %v12354_v24  ;;  %v2685_v25 = vld [vmem:[#allocation2 + $0x2f8] sm:$0xff]  ;;  %2937 = vst [vmem:[#allocation2 + $0x2d8] sm:$0xff] %v2809_v34  ;;  %v2812_v20 = vmax.f32 %v2684_v58, %v12350_v47  ;;  %v12359_v37 = vld [vmem:[%s10447_s26 + $0x910] sm:$0xff] }
 0x34e   : > { %2938 = vst [vmem:[#allocation2 + $0x2e0] sm:$0xff] %v2810_v43  ;;  %v2813_v45 = vmax.f32 %v2685_v25, %v12354_v24  ;;  %14230 = vst [vmem:[#allocation73_spill] sm:$0xff] %v12359_v37  ;;  %v2686_v2 = vld [vmem:[#allocation2 + $0x300] sm:$0xff]  ;;  %v12362_v1 = vld [vmem:[%s10447_s26 + $0x928] sm:$0xff] }
 0x34f   : > { %14231 = vst [vmem:[#allocation74_spill] sm:$0xff] %v12362_v1  ;;  %2939 = vst [vmem:[#allocation2 + $0x2e8] sm:$0xff] %v2811_v6  ;;  %v2814_v19 = vmax.f32 %v2686_v2, %v12359_v37  ;;  %v2687_v8 = vld [vmem:[#allocation2 + $0x308] sm:$0xff]  ;;  %v12366_v62 = vld [vmem:[%s10447_s26 + $0x940] sm:$0xff] }
 0x350   : > { %14232 = vst [vmem:[#allocation75_spill] sm:$0xff] %v12366_v62  ;;  %v2688_v34 = vld [vmem:[#allocation2 + $0x310] sm:$0xff]  ;;  %2940 = vst [vmem:[#allocation2 + $0x2f0] sm:$0xff] %v2812_v20  ;;  %v2815_v43 = vmax.f32 %v2687_v8, %v12362_v1  ;;  %v12371_v25 = vld [vmem:[%s10447_s26 + $0x958] sm:$0xff] }
 0x351   : > { %2941 = vst [vmem:[#allocation2 + $0x2f8] sm:$0xff] %v2813_v45  ;;  %v2816_v58 = vmax.f32 %v2688_v34, %v12366_v62  ;;  %14233 = vst [vmem:[#allocation76_spill] sm:$0xff] %v12371_v25  ;;  %v2689_v24 = vld [vmem:[#allocation2 + $0x318] sm:$0xff]  ;;  %v12374_v47 = vld [vmem:[%s10447_s26 + $0x970] sm:$0xff] }
 0x352   : > { %14234 = vst [vmem:[#allocation77_spill] sm:$0xff] %v12374_v47  ;;  %2942 = vst [vmem:[#allocation2 + $0x300] sm:$0xff] %v2814_v19  ;;  %v2817_v2 = vmax.f32 %v2689_v24, %v12371_v25  ;;  %v2690_v6 = vld [vmem:[#allocation2 + $0x320] sm:$0xff]  ;;  %v12378_v37 = vld [vmem:[%s10447_s26 + $0x988] sm:$0xff] }
 0x353   : > { %14235 = vst [vmem:[#allocation78_spill] sm:$0xff] %v12378_v37  ;;  %v2691_v20 = vld [vmem:[#allocation2 + $0x328] sm:$0xff]  ;;  %2943 = vst [vmem:[#allocation2 + $0x308] sm:$0xff] %v2815_v43  ;;  %v2818_v45 = vmax.f32 %v2690_v6, %v12374_v47  ;;  %v12383_v34 = vld [vmem:[%s10447_s26 + $0x9a0] sm:$0xff] }
 0x354   : > { %2944 = vst [vmem:[#allocation2 + $0x310] sm:$0xff] %v2816_v58  ;;  %v2819_v8 = vmax.f32 %v2691_v20, %v12378_v37  ;;  %14236 = vst [vmem:[#allocation79_spill] sm:$0xff] %v12383_v34  ;;  %v2692_v62 = vld [vmem:[#allocation2 + $0x330] sm:$0xff]  ;;  %v12386_v1 = vld [vmem:[%s10447_s26 + $0x9b8] sm:$0xff] }
 0x355   : > { %14237 = vst [vmem:[#allocation80_spill] sm:$0xff] %v12386_v1  ;;  %2945 = vst [vmem:[#allocation2 + $0x318] sm:$0xff] %v2817_v2  ;;  %v2820_v24 = vmax.f32 %v2692_v62, %v12383_v34  ;;  %v2693_v19 = vld [vmem:[#allocation2 + $0x338] sm:$0xff]  ;;  %v12390_v25 = vld [vmem:[%s10447_s26 + $0x9d0] sm:$0xff] }
 0x356   : > { %14238 = vst [vmem:[#allocation81_spill] sm:$0xff] %v12390_v25  ;;  %v2694_v43 = vld [vmem:[#allocation2 + $0x340] sm:$0xff]  ;;  %2946 = vst [vmem:[#allocation2 + $0x320] sm:$0xff] %v2818_v45  ;;  %v2821_v58 = vmax.f32 %v2693_v19, %v12386_v1  ;;  %v12395_v20 = vld [vmem:[%s10447_s26 + $0x9e8] sm:$0xff] }
 0x357   : > { %2947 = vst [vmem:[#allocation2 + $0x328] sm:$0xff] %v2819_v8  ;;  %v2822_v6 = vmax.f32 %v2694_v43, %v12390_v25  ;;  %14239 = vst [vmem:[#allocation82_spill] sm:$0xff] %v12395_v20  ;;  %v2695_v37 = vld [vmem:[#allocation2 + $0x348] sm:$0xff]  ;;  %v12398_v47 = vld [vmem:[%s10447_s26 + $0xa00] sm:$0xff] }
 0x358   : > { %14240 = vst [vmem:[#allocation83_spill] sm:$0xff] %v12398_v47  ;;  %2948 = vst [vmem:[#allocation2 + $0x330] sm:$0xff] %v2820_v24  ;;  %v2823_v62 = vmax.f32 %v2695_v37, %v12395_v20  ;;  %v2696_v2 = vld [vmem:[#allocation2 + $0x350] sm:$0xff]  ;;  %v12402_v34 = vld [vmem:[%s10447_s26 + $0xa18] sm:$0xff] }
 0x359   : > { %14241 = vst [vmem:[#allocation84_spill] sm:$0xff] %v12402_v34  ;;  %v2697_v45 = vld [vmem:[#allocation2 + $0x358] sm:$0xff]  ;;  %2949 = vst [vmem:[#allocation2 + $0x338] sm:$0xff] %v2821_v58  ;;  %v2824_v8 = vmax.f32 %v2696_v2, %v12398_v47  ;;  %v12407_v43 = vld [vmem:[%s10447_s26 + $0xa30] sm:$0xff] }
 0x35a   : > { %2950 = vst [vmem:[#allocation2 + $0x340] sm:$0xff] %v2822_v6  ;;  %v2825_v19 = vmax.f32 %v2697_v45, %v12402_v34  ;;  %14242 = vst [vmem:[#allocation85_spill] sm:$0xff] %v12407_v43  ;;  %v2698_v25 = vld [vmem:[#allocation2 + $0x360] sm:$0xff]  ;;  %v12410_v1 = vld [vmem:[%s10447_s26 + $0xa48] sm:$0xff] }
 0x35b   : > { %14243 = vst [vmem:[#allocation86_spill] sm:$0xff] %v12410_v1  ;;  %2951 = vst [vmem:[#allocation2 + $0x348] sm:$0xff] %v2823_v62  ;;  %v2826_v37 = vmax.f32 %v2698_v25, %v12407_v43  ;;  %v2699_v24 = vld [vmem:[#allocation2 + $0x368] sm:$0xff]  ;;  %v12414_v20 = vld [vmem:[%s10447_s26 + $0xa60] sm:$0xff] }
 0x35c   : > { %14244 = vst [vmem:[#allocation87_spill] sm:$0xff] %v12414_v20  ;;  %v2700_v58 = vld [vmem:[#allocation2 + $0x370] sm:$0xff]  ;;  %2952 = vst [vmem:[#allocation2 + $0x350] sm:$0xff] %v2824_v8  ;;  %v2827_v6 = vmax.f32 %v2699_v24, %v12410_v1  ;;  %v12419_v45 = vld [vmem:[%s10447_s26 + $0xa78] sm:$0xff] }
 0x35d   : > { %2953 = vst [vmem:[#allocation2 + $0x358] sm:$0xff] %v2825_v19  ;;  %v2828_v2 = vmax.f32 %v2700_v58, %v12414_v20  ;;  %14245 = vst [vmem:[#allocation88_spill] sm:$0xff] %v12419_v45  ;;  %v2701_v34 = vld [vmem:[#allocation2 + $0x378] sm:$0xff]  ;;  %v12422_v47 = vld [vmem:[%s10447_s26 + $0xa90] sm:$0xff] }
 0x35e   : > { %14246 = vst [vmem:[#allocation89_spill] sm:$0xff] %v12422_v47  ;;  %2954 = vst [vmem:[#allocation2 + $0x360] sm:$0xff] %v2826_v37  ;;  %v2829_v25 = vmax.f32 %v2701_v34, %v12419_v45  ;;  %v2702_v62 = vld [vmem:[#allocation2 + $0x380] sm:$0xff]  ;;  %v12426_v43 = vld [vmem:[%s10447_s26 + $0xaa8] sm:$0xff] }
 0x35f   : > { %14247 = vst [vmem:[#allocation90_spill] sm:$0xff] %v12426_v43  ;;  %v2703_v8 = vld [vmem:[#allocation2 + $0x388] sm:$0xff]  ;;  %2955 = vst [vmem:[#allocation2 + $0x368] sm:$0xff] %v2827_v6  ;;  %v2830_v19 = vmax.f32 %v2702_v62, %v12422_v47  ;;  %v12431_v58 = vld [vmem:[%s10447_s26 + $0xac0] sm:$0xff] }
 0x360   : > { %2956 = vst [vmem:[#allocation2 + $0x370] sm:$0xff] %v2828_v2  ;;  %v2831_v24 = vmax.f32 %v2703_v8, %v12426_v43  ;;  %14248 = vst [vmem:[#allocation91_spill] sm:$0xff] %v12431_v58  ;;  %v2704_v20 = vld [vmem:[#allocation2 + $0x390] sm:$0xff]  ;;  %v12434_v1 = vld [vmem:[%s10447_s26 + $0xad8] sm:$0xff] }
 0x361   : > { %14249 = vst [vmem:[#allocation92_spill] sm:$0xff] %v12434_v1  ;;  %2957 = vst [vmem:[#allocation2 + $0x378] sm:$0xff] %v2829_v25  ;;  %v2832_v34 = vmax.f32 %v2704_v20, %v12431_v58  ;;  %v2705_v37 = vld [vmem:[#allocation2 + $0x398] sm:$0xff]  ;;  %v12438_v45 = vld [vmem:[%s10447_s26 + $0xaf0] sm:$0xff] }
 0x362   : > { %14250 = vst [vmem:[#allocation93_spill] sm:$0xff] %v12438_v45  ;;  %v2706_v6 = vld [vmem:[#allocation2 + $0x3a0] sm:$0xff]  ;;  %2958 = vst [vmem:[#allocation2 + $0x380] sm:$0xff] %v2830_v19  ;;  %v2833_v2 = vmax.f32 %v2705_v37, %v12434_v1  ;;  %v12443_v8 = vld [vmem:[%s10447_s26 + $0xb08] sm:$0xff] }
 0x363   : > { %2959 = vst [vmem:[#allocation2 + $0x388] sm:$0xff] %v2831_v24  ;;  %v2834_v62 = vmax.f32 %v2706_v6, %v12438_v45  ;;  %14251 = vst [vmem:[#allocation94_spill] sm:$0xff] %v12443_v8  ;;  %v2707_v43 = vld [vmem:[#allocation2 + $0x3a8] sm:$0xff]  ;;  %v12446_v47 = vld [vmem:[%s10447_s26 + $0xb20] sm:$0xff] }
 0x364   : > { %14252 = vst [vmem:[#allocation95_spill] sm:$0xff] %v12446_v47  ;;  %2960 = vst [vmem:[#allocation2 + $0x390] sm:$0xff] %v2832_v34  ;;  %v2835_v20 = vmax.f32 %v2707_v43, %v12443_v8  ;;  %v2708_v25 = vld [vmem:[#allocation2 + $0x3b0] sm:$0xff]  ;;  %v12450_v58 = vld [vmem:[%s10447_s26 + $0xb38] sm:$0xff] }
 0x365   : > { %14253 = vst [vmem:[#allocation96_spill] sm:$0xff] %v12450_v58  ;;  %v2709_v19 = vld [vmem:[#allocation2 + $0x3b8] sm:$0xff]  ;;  %2961 = vst [vmem:[#allocation2 + $0x398] sm:$0xff] %v2833_v2  ;;  %v2836_v24 = vmax.f32 %v2708_v25, %v12446_v47  ;;  %v12455_v6 = vld [vmem:[%s10447_s26 + $0xb50] sm:$0xff] }
 0x366   : > { %2962 = vst [vmem:[#allocation2 + $0x3a0] sm:$0xff] %v2834_v62  ;;  %v2837_v37 = vmax.f32 %v2709_v19, %v12450_v58  ;;  %14254 = vst [vmem:[#allocation97_spill] sm:$0xff] %v12455_v6  ;;  %v2710_v45 = vld [vmem:[#allocation2 + $0x3c0] sm:$0xff]  ;;  %v12458_v1 = vld [vmem:[%s10447_s26 + $0xb68] sm:$0xff] }
 0x367   : > { %14255 = vst [vmem:[#allocation98_spill] sm:$0xff] %v12458_v1  ;;  %2963 = vst [vmem:[#allocation2 + $0x3a8] sm:$0xff] %v2835_v20  ;;  %v2838_v43 = vmax.f32 %v2710_v45, %v12455_v6  ;;  %v2711_v34 = vld [vmem:[#allocation2 + $0x3c8] sm:$0xff]  ;;  %v12462_v8 = vld [vmem:[%s10447_s26 + $0xb80] sm:$0xff] }
 0x368   : > { %14256 = vst [vmem:[#allocation99_spill] sm:$0xff] %v12462_v8  ;;  %v2712_v2 = vld [vmem:[#allocation2 + $0x3d0] sm:$0xff]  ;;  %2964 = vst [vmem:[#allocation2 + $0x3b0] sm:$0xff] %v2836_v24  ;;  %v2839_v62 = vmax.f32 %v2711_v34, %v12458_v1  ;;  %v12467_v19 = vld [vmem:[%s10447_s26 + $0xb98] sm:$0xff] }
 0x369   : > { %2965 = vst [vmem:[#allocation2 + $0x3b8] sm:$0xff] %v2837_v37  ;;  %v2840_v25 = vmax.f32 %v2712_v2, %v12462_v8  ;;  %14257 = vst [vmem:[#allocation100_spill] sm:$0xff] %v12467_v19  ;;  %v2713_v58 = vld [vmem:[#allocation2 + $0x3d8] sm:$0xff]  ;;  %v12470_v47 = vld [vmem:[%s10447_s26 + $0xbb0] sm:$0xff] }
 0x36a   : > { %14258 = vst [vmem:[#allocation101_spill] sm:$0xff] %v12470_v47  ;;  %2966 = vst [vmem:[#allocation2 + $0x3c0] sm:$0xff] %v2838_v43  ;;  %v2841_v45 = vmax.f32 %v2713_v58, %v12467_v19  ;;  %v2714_v20 = vld [vmem:[#allocation2 + $0x3e0] sm:$0xff]  ;;  %v12474_v6 = vld [vmem:[%s10447_s26 + $0xbc8] sm:$0xff] }
 0x36b   : > { %14259 = vst [vmem:[#allocation102_spill] sm:$0xff] %v12474_v6  ;;  %v2715_v48 = vld [vmem:[#allocation2 + $0x3e8] sm:$0xff]  ;;  %2967 = vst [vmem:[#allocation2 + $0x3c8] sm:$0xff] %v2839_v62  ;;  %v2842_v24 = vmax.f32 %v2714_v20, %v12470_v47  ;;  %v12479_v34 = vld [vmem:[%s10447_s26 + $0xbe0] sm:$0xff] }
 0x36c   : > { %2968 = vst [vmem:[#allocation2 + $0x3d0] sm:$0xff] %v2840_v25  ;;  %v2843_v37 = vmax.f32 %v2715_v48, %v12474_v6  ;;  %14260 = vst [vmem:[#allocation103_spill] sm:$0xff] %v12479_v34  ;;  %v2716_v2 = vld [vmem:[#allocation2 + $0x3f0] sm:$0xff]  ;;  %v12482_v8 = vld [vmem:[%s10447_s26 + $0xbf8] sm:$0xff] }
 0x36d   : > { %14261 = vst [vmem:[#allocation104_spill] sm:$0xff] %v12482_v8  ;;  %2969 = vst [vmem:[#allocation2 + $0x3d8] sm:$0xff] %v2841_v45  ;;  %v2844_v58 = vmax.f32 %v2716_v2, %v12479_v34  ;;  %v2717_v43 = vld [vmem:[#allocation2 + $0x3f8] sm:$0xff]  ;;  %v2974_v19 = vld [vmem:[#allocation3] sm:$0xff] }
 0x36e   : > { %v2975_v1 = vld [vmem:[#allocation3 + $0x8] sm:$0xff]  ;;  %2970 = vst [vmem:[#allocation2 + $0x3e0] sm:$0xff] %v2842_v24  ;;  %2971 = vst [vmem:[#allocation2 + $0x3e8] sm:$0xff] %v2843_v37  ;;  %v2845_v62 = vmax.f32 %v2717_v43, %v12482_v8  ;;  %v9311_v25 = vld [vmem:[%s10447_s26 + $0x10] sm:$0xff] }
 0x36f   : > { %v3102_v20 = vadd.f32 %v9311_v25, %v2974_v19  ;;  %v9312_v47 = vld [vmem:[%s10447_s26 + $0x28] sm:$0xff]  ;;  %v2976_v6 = vld [vmem:[#allocation3 + $0x10] sm:$0xff]  ;;  %v2977_v41 = vld [vmem:[#allocation3 + $0x18] sm:$0xff]  ;;  %2972 = vst [vmem:[#allocation2 + $0x3f0] sm:$0xff] %v2844_v58 }
 0x370   : > { %v3103_v48 = vadd.f32 %v9312_v47, %v2975_v1  ;;  %v2978_v13 = vld [vmem:[#allocation3 + $0x20] sm:$0xff]  ;;  %v3105_v2 = vadd.f32 %v2977_v41, %v11990_v23  ;;  %v2979_v51 = vld [vmem:[#allocation3 + $0x28] sm:$0xff]  ;;  %v2980_v24 = vld [vmem:[#allocation3 + $0x30] sm:$0xff]  ;;  %2973 = vst [vmem:[#allocation2 + $0x3f8] sm:$0xff] %v2845_v62 }
 0x371   : > { %v9313_v45 = vld [vmem:[%s10447_s26 + $0x40] sm:$0xff]  ;;  %v3106_v34 = vadd.f32 %v2978_v13, %v11993_v59  ;;  %v2981_v37 = vld [vmem:[#allocation3 + $0x38] sm:$0xff]  ;;  %3230 = vst [vmem:[#allocation3] sm:$0xff] %v3102_v20  ;;  %v9314_v19 = vld [vmem:[%s10447_s26 + $0x88] sm:$0xff]  ;;  %v3108_v47 = vadd.f32 %v2980_v24, %v11999_v4 }
 0x372   : > { %v3104_v52 = vadd.f32 %v9313_v45, %v2976_v6  ;;  %3231 = vst [vmem:[#allocation3 + $0x8] sm:$0xff] %v3103_v48  ;;  %v3107_v43 = vadd.f32 %v9314_v19, %v2979_v51  ;;  %v3109_v1 = vadd.f32 %v2981_v37, %v12002_v28  ;;  %v2982_v25 = vld [vmem:[#allocation3 + $0x40] sm:$0xff]  ;;  %v2983_v58 = vld [vmem:[#allocation3 + $0x48] sm:$0xff]  ;;  %v2984_v8 = vld [vmem:[#allocation3 + $0x50] sm:$0xff] }
 0x373   : > { %3233 = vst [vmem:[#allocation3 + $0x18] sm:$0xff] %v3105_v2  ;;  %3234 = vst [vmem:[#allocation3 + $0x20] sm:$0xff] %v3106_v34  ;;  %v3110_v23 = vadd.f32 %v2982_v25, %v12006_v3  ;;  %v3111_v59 = vadd.f32 %v2983_v58, %v12011_v32  ;;  %v3112_v13 = vadd.f32 %v2984_v8, %v12014_v12  ;;  %v2985_v41 = vld [vmem:[#allocation3 + $0x58] sm:$0xff]  ;;  %v2986_v6 = vld [vmem:[#allocation3 + $0x60] sm:$0xff] }
 0x374   : > { %3232 = vst [vmem:[#allocation3 + $0x10] sm:$0xff] %v3104_v52  ;;  %v2987_v62 = vld [vmem:[#allocation3 + $0x68] sm:$0xff]  ;;  %3235 = vst [vmem:[#allocation3 + $0x28] sm:$0xff] %v3107_v43  ;;  %v3113_v4 = vadd.f32 %v2985_v41, %v12018_v26  ;;  %v3114_v28 = vadd.f32 %v2986_v6, %v12023_v60  ;;  %v2988_v52 = vld [vmem:[#allocation3 + $0x70] sm:$0xff] }
 0x375   : > { %3236 = vst [vmem:[#allocation3 + $0x30] sm:$0xff] %v3108_v47  ;;  %3237 = vst [vmem:[#allocation3 + $0x38] sm:$0xff] %v3109_v1  ;;  %v3115_v51 = vadd.f32 %v2987_v62, %v12026_v42  ;;  %v2989_v34 = vld [vmem:[#allocation3 + $0x78] sm:$0xff]  ;;  %v2990_v20 = vld [vmem:[#allocation3 + $0x80] sm:$0xff]  ;;  %v3116_v3 = vadd.f32 %v2988_v52, %v12030_v54 }
 0x376   : > { %3238 = vst [vmem:[#allocation3 + $0x40] sm:$0xff] %v3110_v23  ;;  %3239 = vst [vmem:[#allocation3 + $0x48] sm:$0xff] %v3111_v59  ;;  %v3117_v32 = vadd.f32 %v2989_v34, %v12035_v31  ;;  %v3118_v12 = vadd.f32 %v2990_v20, %v12038_v17  ;;  %v2991_v8 = vld [vmem:[#allocation3 + $0x88] sm:$0xff]  ;;  %v2992_v48 = vld [vmem:[#allocation3 + $0x90] sm:$0xff] }
 0x377   : > { %3240 = vst [vmem:[#allocation3 + $0x50] sm:$0xff] %v3112_v13  ;;  %v2993_v45 = vld [vmem:[#allocation3 + $0x98] sm:$0xff]  ;;  %3241 = vst [vmem:[#allocation3 + $0x58] sm:$0xff] %v3113_v4  ;;  %v3119_v26 = vadd.f32 %v2991_v8, %v12042_v29  ;;  %v3120_v60 = vadd.f32 %v2992_v48, %v12047_v36  ;;  %v2994_v2 = vld [vmem:[#allocation3 + $0xa0] sm:$0xff] }
 0x378   : > { %3242 = vst [vmem:[#allocation3 + $0x60] sm:$0xff] %v3114_v28  ;;  %3243 = vst [vmem:[#allocation3 + $0x68] sm:$0xff] %v3115_v51  ;;  %v3121_v42 = vadd.f32 %v2993_v45, %v12050_v5  ;;  %v2995_v24 = vld [vmem:[#allocation3 + $0xa8] sm:$0xff]  ;;  %v2996_v37 = vld [vmem:[#allocation3 + $0xb0] sm:$0xff]  ;;  %v3122_v54 = vadd.f32 %v2994_v2, %v12054_v39 }
 0x379   : > { %3244 = vst [vmem:[#allocation3 + $0x70] sm:$0xff] %v3116_v3  ;;  %3245 = vst [vmem:[#allocation3 + $0x78] sm:$0xff] %v3117_v32  ;;  %v3123_v31 = vadd.f32 %v2995_v24, %v12059_v11  ;;  %v3124_v17 = vadd.f32 %v2996_v37, %v12062_v18  ;;  %v2997_v19 = vld [vmem:[#allocation3 + $0xb8] sm:$0xff]  ;;  %v2998_v43 = vld [vmem:[#allocation3 + $0xc0] sm:$0xff] }
 0x37a   : > { %3246 = vst [vmem:[#allocation3 + $0x80] sm:$0xff] %v3118_v12  ;;  %v2999_v47 = vld [vmem:[#allocation3 + $0xc8] sm:$0xff]  ;;  %3247 = vst [vmem:[#allocation3 + $0x88] sm:$0xff] %v3119_v26  ;;  %v3125_v29 = vadd.f32 %v2997_v19, %v12066_v55  ;;  %v3126_v36 = vadd.f32 %v2998_v43, %v12071_v0  ;;  %v3000_v1 = vld [vmem:[#allocation3 + $0xd0] sm:$0xff] }
 0x37b   : > { %3248 = vst [vmem:[#allocation3 + $0x90] sm:$0xff] %v3120_v60  ;;  %3249 = vst [vmem:[#allocation3 + $0x98] sm:$0xff] %v3121_v42  ;;  %v3127_v5 = vadd.f32 %v2999_v47, %v12074_v21  ;;  %v3001_v25 = vld [vmem:[#allocation3 + $0xd8] sm:$0xff]  ;;  %v3002_v58 = vld [vmem:[#allocation3 + $0xe0] sm:$0xff]  ;;  %v3128_v39 = vadd.f32 %v3000_v1, %v12078_v30 }
 0x37c   : > { %3250 = vst [vmem:[#allocation3 + $0xa0] sm:$0xff] %v3122_v54  ;;  %3251 = vst [vmem:[#allocation3 + $0xa8] sm:$0xff] %v3123_v31  ;;  %v3129_v11 = vadd.f32 %v3001_v25, %v12083_v57  ;;  %v3130_v18 = vadd.f32 %v3002_v58, %v12086_v7  ;;  %v3003_v23 = vld [vmem:[#allocation3 + $0xe8] sm:$0xff]  ;;  %v3004_v59 = vld [vmem:[#allocation3 + $0xf0] sm:$0xff] }
 0x37d   : > { %3252 = vst [vmem:[#allocation3 + $0xb0] sm:$0xff] %v3124_v17  ;;  %v3005_v13 = vld [vmem:[#allocation3 + $0xf8] sm:$0xff]  ;;  %3253 = vst [vmem:[#allocation3 + $0xb8] sm:$0xff] %v3125_v29  ;;  %v3131_v55 = vadd.f32 %v3003_v23, %v12090_v15  ;;  %v3132_v0 = vadd.f32 %v3004_v59, %v12095_v44  ;;  %v3006_v41 = vld [vmem:[#allocation3 + $0x100] sm:$0xff] }
 0x37e   : > { %3254 = vst [vmem:[#allocation3 + $0xc0] sm:$0xff] %v3126_v36  ;;  %3255 = vst [vmem:[#allocation3 + $0xc8] sm:$0xff] %v3127_v5  ;;  %v3133_v21 = vadd.f32 %v3005_v13, %v12098_v10  ;;  %v3007_v6 = vld [vmem:[#allocation3 + $0x108] sm:$0xff]  ;;  %v3008_v62 = vld [vmem:[#allocation3 + $0x110] sm:$0xff]  ;;  %v3134_v30 = vadd.f32 %v3006_v41, %v12102_v46 }
 0x37f   : > { %3256 = vst [vmem:[#allocation3 + $0xd0] sm:$0xff] %v3128_v39  ;;  %3257 = vst [vmem:[#allocation3 + $0xd8] sm:$0xff] %v3129_v11  ;;  %v3135_v57 = vadd.f32 %v3007_v6, %v12107_v61  ;;  %v3136_v7 = vadd.f32 %v3008_v62, %v12110_v38  ;;  %v3009_v4 = vld [vmem:[#allocation3 + $0x118] sm:$0xff]  ;;  %v3010_v28 = vld [vmem:[#allocation3 + $0x120] sm:$0xff] }
 0x380   : > { %3258 = vst [vmem:[#allocation3 + $0xe0] sm:$0xff] %v3130_v18  ;;  %v3011_v51 = vld [vmem:[#allocation3 + $0x128] sm:$0xff]  ;;  %3259 = vst [vmem:[#allocation3 + $0xe8] sm:$0xff] %v3131_v55  ;;  %v3137_v15 = vadd.f32 %v3009_v4, %v12114_v63  ;;  %v3138_v44 = vadd.f32 %v3010_v28, %v12119_v14  ;;  %v3012_v52 = vld [vmem:[#allocation3 + $0x130] sm:$0xff] }
 0x381   : > { %3260 = vst [vmem:[#allocation3 + $0xf0] sm:$0xff] %v3132_v0  ;;  %3261 = vst [vmem:[#allocation3 + $0xf8] sm:$0xff] %v3133_v21  ;;  %v3139_v10 = vadd.f32 %v3011_v51, %v12122_v33  ;;  %v3013_v34 = vld [vmem:[#allocation3 + $0x138] sm:$0xff]  ;;  %v3014_v20 = vld [vmem:[#allocation3 + $0x140] sm:$0xff]  ;;  %v3140_v46 = vadd.f32 %v3012_v52, %v12126_v22 }
 0x382   : > { %3262 = vst [vmem:[#allocation3 + $0x100] sm:$0xff] %v3134_v30  ;;  %3263 = vst [vmem:[#allocation3 + $0x108] sm:$0xff] %v3135_v57  ;;  %v3141_v61 = vadd.f32 %v3013_v34, %v12131_v40  ;;  %v3142_v38 = vadd.f32 %v3014_v20, %v12134_v35  ;;  %v3015_v3 = vld [vmem:[#allocation3 + $0x148] sm:$0xff]  ;;  %v3016_v32 = vld [vmem:[#allocation3 + $0x150] sm:$0xff] }
 0x383   : > { %3264 = vst [vmem:[#allocation3 + $0x110] sm:$0xff] %v3136_v7  ;;  %v3017_v12 = vld [vmem:[#allocation3 + $0x158] sm:$0xff]  ;;  %3265 = vst [vmem:[#allocation3 + $0x118] sm:$0xff] %v3137_v15  ;;  %v3143_v63 = vadd.f32 %v3015_v3, %v12138_v53  ;;  %v3144_v14 = vadd.f32 %v3016_v32, %v12143_v27  ;;  %v3018_v8 = vld [vmem:[#allocation3 + $0x160] sm:$0xff] }
 0x384   : > { %3266 = vst [vmem:[#allocation3 + $0x120] sm:$0xff] %v3138_v44  ;;  %3267 = vst [vmem:[#allocation3 + $0x128] sm:$0xff] %v3139_v10  ;;  %v3145_v33 = vadd.f32 %v3017_v12, %v12146_v16  ;;  %v3019_v48 = vld [vmem:[#allocation3 + $0x168] sm:$0xff]  ;;  %v3020_v45 = vld [vmem:[#allocation3 + $0x170] sm:$0xff]  ;;  %v3146_v22 = vadd.f32 %v3018_v8, %v12150_v9 }
 0x385   : > { %3268 = vst [vmem:[#allocation3 + $0x130] sm:$0xff] %v3140_v46  ;;  %3269 = vst [vmem:[#allocation3 + $0x138] sm:$0xff] %v3141_v61  ;;  %v3147_v40 = vadd.f32 %v3019_v48, %v12155_v50  ;;  %v3148_v35 = vadd.f32 %v3020_v45, %v12158_v49  ;;  %v3021_v26 = vld [vmem:[#allocation3 + $0x178] sm:$0xff]  ;;  %v3022_v60 = vld [vmem:[#allocation3 + $0x180] sm:$0xff] }
 0x386   : > { %3270 = vst [vmem:[#allocation3 + $0x140] sm:$0xff] %v3142_v38  ;;  %v3023_v42 = vld [vmem:[#allocation3 + $0x188] sm:$0xff]  ;;  %3271 = vst [vmem:[#allocation3 + $0x148] sm:$0xff] %v3143_v63  ;;  %v3149_v53 = vadd.f32 %v3021_v26, %v12162_v56  ;;  %v14263_v2 = vld [vmem:[#allocation26_spill] sm:$0xff] }
 0x387   : > { %3272 = vst [vmem:[#allocation3 + $0x150] sm:$0xff] %v3144_v14  ;;  %3273 = vst [vmem:[#allocation3 + $0x158] sm:$0xff] %v3145_v33  ;;  %v14262_v27 = vld [vmem:[#allocation25_spill] sm:$0xff]  ;;  %v3151_v24 = vadd.f32 %v3023_v42, %v14263_v2  ;;  %v3025_v54 = vld [vmem:[#allocation3 + $0x198] sm:$0xff] }
 0x388   : > { %v3150_v16 = vadd.f32 %v3022_v60, %v14262_v27  ;;  %v3024_v37 = vld [vmem:[#allocation3 + $0x190] sm:$0xff]  ;;  %v3026_v31 = vld [vmem:[#allocation3 + $0x1a0] sm:$0xff]  ;;  %3274 = vst [vmem:[#allocation3 + $0x160] sm:$0xff] %v3146_v22  ;;  %3275 = vst [vmem:[#allocation3 + $0x168] sm:$0xff] %v3147_v40 }
 0x389   : > { %3276 = vst [vmem:[#allocation3 + $0x170] sm:$0xff] %v3148_v35  ;;  %v14264_v9 = vld [vmem:[#allocation27_spill] sm:$0xff]  ;;  %v14265_v49 = vld [vmem:[#allocation28_spill] sm:$0xff]  ;;  %v14266_v19 = vld [vmem:[#allocation29_spill] sm:$0xff] }
 0x38a   : > { %v3152_v50 = vadd.f32 %v3024_v37, %v14264_v9  ;;  %v3153_v17 = vadd.f32 %v3025_v54, %v14265_v49  ;;  %v3154_v43 = vadd.f32 %v3026_v31, %v14266_v19  ;;  %v3027_v47 = vld [vmem:[#allocation3 + $0x1a8] sm:$0xff]  ;;  %v3028_v29 = vld [vmem:[#allocation3 + $0x1b0] sm:$0xff]  ;;  %v3029_v36 = vld [vmem:[#allocation3 + $0x1b8] sm:$0xff]  ;;  %3277 = vst [vmem:[#allocation3 + $0x178] sm:$0xff] %v3149_v53 }
 0x38b   : > { %3278 = vst [vmem:[#allocation3 + $0x180] sm:$0xff] %v3150_v16  ;;  %3279 = vst [vmem:[#allocation3 + $0x188] sm:$0xff] %v3151_v24  ;;  %v14267_v56 = vld [vmem:[#allocation30_spill] sm:$0xff]  ;;  %v14268_v1 = vld [vmem:[#allocation31_spill] sm:$0xff] }
 0x38c   : > { %v3155_v5 = vadd.f32 %v3027_v47, %v14267_v56  ;;  %v3156_v25 = vadd.f32 %v3028_v29, %v14268_v1  ;;  %v14269_v58 = vld [vmem:[#allocation32_spill] sm:$0xff]  ;;  %v3032_v23 = vld [vmem:[#allocation3 + $0x1d0] sm:$0xff]  ;;  %3280 = vst [vmem:[#allocation3 + $0x190] sm:$0xff] %v3152_v50  ;;  %3281 = vst [vmem:[#allocation3 + $0x198] sm:$0xff] %v3153_v17 }
 0x38d   : > { %v3157_v39 = vadd.f32 %v3029_v36, %v14269_v58  ;;  %v3030_v11 = vld [vmem:[#allocation3 + $0x1c0] sm:$0xff]  ;;  %v3031_v18 = vld [vmem:[#allocation3 + $0x1c8] sm:$0xff]  ;;  %3282 = vst [vmem:[#allocation3 + $0x1a0] sm:$0xff] %v3154_v43  ;;  %v14271_v55 = vld [vmem:[#allocation34_spill] sm:$0xff] }
 0x38e   : > { %v14270_v59 = vld [vmem:[#allocation33_spill] sm:$0xff]  ;;  %v3159_v0 = vadd.f32 %v3031_v18, %v14271_v55  ;;  %v14272_v21 = vld [vmem:[#allocation35_spill] sm:$0xff]  ;;  %3283 = vst [vmem:[#allocation3 + $0x1a8] sm:$0xff] %v3155_v5  ;;  %3284 = vst [vmem:[#allocation3 + $0x1b0] sm:$0xff] %v3156_v25 }
 0x38f   : > { %v3158_v13 = vadd.f32 %v3030_v11, %v14270_v59  ;;  %v3160_v41 = vadd.f32 %v3032_v23, %v14272_v21  ;;  %v3033_v6 = vld [vmem:[#allocation3 + $0x1d8] sm:$0xff]  ;;  %v3034_v62 = vld [vmem:[#allocation3 + $0x1e0] sm:$0xff]  ;;  %v3035_v30 = vld [vmem:[#allocation3 + $0x1e8] sm:$0xff]  ;;  %3285 = vst [vmem:[#allocation3 + $0x1b8] sm:$0xff] %v3157_v39 }
 0x390   : > { %v14273_v57 = vld [vmem:[#allocation36_spill] sm:$0xff]  ;;  %v14274_v4 = vld [vmem:[#allocation37_spill] sm:$0xff]  ;;  %v14275_v51 = vld [vmem:[#allocation38_spill] sm:$0xff]  ;;  %3287 = vst [vmem:[#allocation3 + $0x1c8] sm:$0xff] %v3159_v0 }
 0x391   : > { %v3161_v7 = vadd.f32 %v3033_v6, %v14273_v57  ;;  %v3162_v28 = vadd.f32 %v3034_v62, %v14274_v4  ;;  %v3163_v15 = vadd.f32 %v3035_v30, %v14275_v51  ;;  %v3036_v44 = vld [vmem:[#allocation3 + $0x1f0] sm:$0xff]  ;;  %v3037_v10 = vld [vmem:[#allocation3 + $0x1f8] sm:$0xff]  ;;  %v3038_v52 = vld [vmem:[#allocation3 + $0x200] sm:$0xff]  ;;  %3286 = vst [vmem:[#allocation3 + $0x1c0] sm:$0xff] %v3158_v13 }
 0x392   : > { %3288 = vst [vmem:[#allocation3 + $0x1d0] sm:$0xff] %v3160_v41  ;;  %v14276_v34 = vld [vmem:[#allocation39_spill] sm:$0xff]  ;;  %v14277_v46 = vld [vmem:[#allocation40_spill] sm:$0xff]  ;;  %v14278_v38 = vld [vmem:[#allocation41_spill] sm:$0xff] }
 0x393   : > { %v3164_v20 = vadd.f32 %v3036_v44, %v14276_v34  ;;  %v3165_v61 = vadd.f32 %v3037_v10, %v14277_v46  ;;  %v3166_v3 = vadd.f32 %v3038_v52, %v14278_v38  ;;  %v3039_v32 = vld [vmem:[#allocation3 + $0x208] sm:$0xff]  ;;  %v3040_v12 = vld [vmem:[#allocation3 + $0x210] sm:$0xff]  ;;  %v3041_v63 = vld [vmem:[#allocation3 + $0x218] sm:$0xff]  ;;  %3289 = vst [vmem:[#allocation3 + $0x1d8] sm:$0xff] %v3161_v7 }
 0x394   : > { %3290 = vst [vmem:[#allocation3 + $0x1e0] sm:$0xff] %v3162_v28  ;;  %3291 = vst [vmem:[#allocation3 + $0x1e8] sm:$0xff] %v3163_v15  ;;  %v14279_v14 = vld [vmem:[#allocation42_spill] sm:$0xff]  ;;  %v14280_v8 = vld [vmem:[#allocation43_spill] sm:$0xff] }
 0x395   : > { %v3167_v33 = vadd.f32 %v3039_v32, %v14279_v14  ;;  %v3168_v48 = vadd.f32 %v3040_v12, %v14280_v8  ;;  %v14281_v45 = vld [vmem:[#allocation44_spill] sm:$0xff]  ;;  %v3044_v26 = vld [vmem:[#allocation3 + $0x230] sm:$0xff]  ;;  %3292 = vst [vmem:[#allocation3 + $0x1f0] sm:$0xff] %v3164_v20  ;;  %3293 = vst [vmem:[#allocation3 + $0x1f8] sm:$0xff] %v3165_v61 }
 0x396   : > { %v3169_v22 = vadd.f32 %v3041_v63, %v14281_v45  ;;  %v3042_v40 = vld [vmem:[#allocation3 + $0x220] sm:$0xff]  ;;  %v3043_v35 = vld [vmem:[#allocation3 + $0x228] sm:$0xff]  ;;  %3294 = vst [vmem:[#allocation3 + $0x200] sm:$0xff] %v3166_v3  ;;  %v14283_v53 = vld [vmem:[#allocation46_spill] sm:$0xff] }
 0x397   : > { %v14282_v60 = vld [vmem:[#allocation45_spill] sm:$0xff]  ;;  %v3171_v27 = vadd.f32 %v3043_v35, %v14283_v53  ;;  %v14284_v16 = vld [vmem:[#allocation47_spill] sm:$0xff]  ;;  %3295 = vst [vmem:[#allocation3 + $0x208] sm:$0xff] %v3167_v33  ;;  %3296 = vst [vmem:[#allocation3 + $0x210] sm:$0xff] %v3168_v48 }
 0x398   : > { %v3170_v42 = vadd.f32 %v3042_v40, %v14282_v60  ;;  %v3172_v2 = vadd.f32 %v3044_v26, %v14284_v16  ;;  %v3045_v24 = vld [vmem:[#allocation3 + $0x238] sm:$0xff]  ;;  %v3046_v37 = vld [vmem:[#allocation3 + $0x240] sm:$0xff]  ;;  %v3047_v54 = vld [vmem:[#allocation3 + $0x248] sm:$0xff]  ;;  %3297 = vst [vmem:[#allocation3 + $0x218] sm:$0xff] %v3169_v22 }
 0x399   : > { %v14285_v31 = vld [vmem:[#allocation48_spill] sm:$0xff]  ;;  %v14286_v50 = vld [vmem:[#allocation49_spill] sm:$0xff]  ;;  %v14287_v17 = vld [vmem:[#allocation50_spill] sm:$0xff]  ;;  %3299 = vst [vmem:[#allocation3 + $0x228] sm:$0xff] %v3171_v27 }
 0x39a   : > { %v3173_v9 = vadd.f32 %v3045_v24, %v14285_v31  ;;  %v3174_v49 = vadd.f32 %v3046_v37, %v14286_v50  ;;  %v3175_v19 = vadd.f32 %v3047_v54, %v14287_v17  ;;  %v3048_v43 = vld [vmem:[#allocation3 + $0x250] sm:$0xff]  ;;  %v3049_v47 = vld [vmem:[#allocation3 + $0x258] sm:$0xff]  ;;  %v3050_v29 = vld [vmem:[#allocation3 + $0x260] sm:$0xff]  ;;  %3298 = vst [vmem:[#allocation3 + $0x220] sm:$0xff] %v3170_v42 }
 0x39b   : > { %3300 = vst [vmem:[#allocation3 + $0x230] sm:$0xff] %v3172_v2  ;;  %v14288_v36 = vld [vmem:[#allocation51_spill] sm:$0xff]  ;;  %v14289_v5 = vld [vmem:[#allocation52_spill] sm:$0xff]  ;;  %v14290_v25 = vld [vmem:[#allocation53_spill] sm:$0xff] }
 0x39c   : > { %v3176_v56 = vadd.f32 %v3048_v43, %v14288_v36  ;;  %v3177_v1 = vadd.f32 %v3049_v47, %v14289_v5  ;;  %v3178_v58 = vadd.f32 %v3050_v29, %v14290_v25  ;;  %v3051_v39 = vld [vmem:[#allocation3 + $0x268] sm:$0xff]  ;;  %v3052_v11 = vld [vmem:[#allocation3 + $0x270] sm:$0xff]  ;;  %v3053_v18 = vld [vmem:[#allocation3 + $0x278] sm:$0xff]  ;;  %3301 = vst [vmem:[#allocation3 + $0x238] sm:$0xff] %v3173_v9 }
 0x39d   : > { %3302 = vst [vmem:[#allocation3 + $0x240] sm:$0xff] %v3174_v49  ;;  %3303 = vst [vmem:[#allocation3 + $0x248] sm:$0xff] %v3175_v19  ;;  %v14291_v23 = vld [vmem:[#allocation54_spill] sm:$0xff]  ;;  %v14292_v13 = vld [vmem:[#allocation55_spill] sm:$0xff] }
 0x39e   : > { %v3179_v59 = vadd.f32 %v3051_v39, %v14291_v23  ;;  %v3180_v55 = vadd.f32 %v3052_v11, %v14292_v13  ;;  %v14293_v0 = vld [vmem:[#allocation56_spill] sm:$0xff]  ;;  %v3056_v62 = vld [vmem:[#allocation3 + $0x290] sm:$0xff]  ;;  %3304 = vst [vmem:[#allocation3 + $0x250] sm:$0xff] %v3176_v56  ;;  %3305 = vst [vmem:[#allocation3 + $0x258] sm:$0xff] %v3177_v1 }
 0x39f   : > { %v3181_v21 = vadd.f32 %v3053_v18, %v14293_v0  ;;  %v3054_v41 = vld [vmem:[#allocation3 + $0x280] sm:$0xff]  ;;  %v3055_v6 = vld [vmem:[#allocation3 + $0x288] sm:$0xff]  ;;  %3306 = vst [vmem:[#allocation3 + $0x260] sm:$0xff] %v3178_v58  ;;  %v14295_v7 = vld [vmem:[#allocation58_spill] sm:$0xff] }
 0x3a0   : > { %v14294_v30 = vld [vmem:[#allocation57_spill] sm:$0xff]  ;;  %v3183_v4 = vadd.f32 %v3055_v6, %v14295_v7  ;;  %v14296_v28 = vld [vmem:[#allocation59_spill] sm:$0xff]  ;;  %3307 = vst [vmem:[#allocation3 + $0x268] sm:$0xff] %v3179_v59  ;;  %3308 = vst [vmem:[#allocation3 + $0x270] sm:$0xff] %v3180_v55 }
 0x3a1   : > { %v3182_v57 = vadd.f32 %v3054_v41, %v14294_v30  ;;  %v3184_v51 = vadd.f32 %v3056_v62, %v14296_v28  ;;  %v3057_v15 = vld [vmem:[#allocation3 + $0x298] sm:$0xff]  ;;  %v3058_v44 = vld [vmem:[#allocation3 + $0x2a0] sm:$0xff]  ;;  %v3059_v10 = vld [vmem:[#allocation3 + $0x2a8] sm:$0xff]  ;;  %3309 = vst [vmem:[#allocation3 + $0x278] sm:$0xff] %v3181_v21 }
 0x3a2   : > { %v14297_v52 = vld [vmem:[#allocation60_spill] sm:$0xff]  ;;  %v14298_v20 = vld [vmem:[#allocation61_spill] sm:$0xff]  ;;  %v14299_v61 = vld [vmem:[#allocation62_spill] sm:$0xff]  ;;  %3311 = vst [vmem:[#allocation3 + $0x288] sm:$0xff] %v3183_v4 }
 0x3a3   : > { %v3185_v34 = vadd.f32 %v3057_v15, %v14297_v52  ;;  %v3186_v46 = vadd.f32 %v3058_v44, %v14298_v20  ;;  %v3187_v38 = vadd.f32 %v3059_v10, %v14299_v61  ;;  %v3060_v3 = vld [vmem:[#allocation3 + $0x2b0] sm:$0xff]  ;;  %v3061_v32 = vld [vmem:[#allocation3 + $0x2b8] sm:$0xff]  ;;  %v3062_v12 = vld [vmem:[#allocation3 + $0x2c0] sm:$0xff]  ;;  %3310 = vst [vmem:[#allocation3 + $0x280] sm:$0xff] %v3182_v57 }
 0x3a4   : > { %3312 = vst [vmem:[#allocation3 + $0x290] sm:$0xff] %v3184_v51  ;;  %v14300_v63 = vld [vmem:[#allocation63_spill] sm:$0xff]  ;;  %v14301_v33 = vld [vmem:[#allocation64_spill] sm:$0xff]  ;;  %v14302_v48 = vld [vmem:[#allocation65_spill] sm:$0xff] }
 0x3a5   : > { %v3188_v14 = vadd.f32 %v3060_v3, %v14300_v63  ;;  %v3189_v8 = vadd.f32 %v3061_v32, %v14301_v33  ;;  %v3190_v45 = vadd.f32 %v3062_v12, %v14302_v48  ;;  %v3063_v22 = vld [vmem:[#allocation3 + $0x2c8] sm:$0xff]  ;;  %v3064_v40 = vld [vmem:[#allocation3 + $0x2d0] sm:$0xff]  ;;  %v3065_v35 = vld [vmem:[#allocation3 + $0x2d8] sm:$0xff]  ;;  %3313 = vst [vmem:[#allocation3 + $0x298] sm:$0xff] %v3185_v34 }
 0x3a6   : > { %3314 = vst [vmem:[#allocation3 + $0x2a0] sm:$0xff] %v3186_v46  ;;  %3315 = vst [vmem:[#allocation3 + $0x2a8] sm:$0xff] %v3187_v38  ;;  %v14303_v26 = vld [vmem:[#allocation66_spill] sm:$0xff]  ;;  %v14304_v42 = vld [vmem:[#allocation67_spill] sm:$0xff] }
 0x3a7   : > { %v3191_v60 = vadd.f32 %v3063_v22, %v14303_v26  ;;  %v3192_v53 = vadd.f32 %v3064_v40, %v14304_v42  ;;  %v14305_v27 = vld [vmem:[#allocation68_spill] sm:$0xff]  ;;  %v3068_v37 = vld [vmem:[#allocation3 + $0x2f0] sm:$0xff]  ;;  %3316 = vst [vmem:[#allocation3 + $0x2b0] sm:$0xff] %v3188_v14  ;;  %3317 = vst [vmem:[#allocation3 + $0x2b8] sm:$0xff] %v3189_v8 }
 0x3a8   : > { %v3193_v16 = vadd.f32 %v3065_v35, %v14305_v27  ;;  %v3066_v2 = vld [vmem:[#allocation3 + $0x2e0] sm:$0xff]  ;;  %v3067_v24 = vld [vmem:[#allocation3 + $0x2e8] sm:$0xff]  ;;  %3318 = vst [vmem:[#allocation3 + $0x2c0] sm:$0xff] %v3190_v45  ;;  %v14307_v9 = vld [vmem:[#allocation70_spill] sm:$0xff] }
 0x3a9   : > { %v14306_v54 = vld [vmem:[#allocation69_spill] sm:$0xff]  ;;  %v3195_v50 = vadd.f32 %v3067_v24, %v14307_v9  ;;  %v14308_v49 = vld [vmem:[#allocation71_spill] sm:$0xff]  ;;  %3319 = vst [vmem:[#allocation3 + $0x2c8] sm:$0xff] %v3191_v60  ;;  %3320 = vst [vmem:[#allocation3 + $0x2d0] sm:$0xff] %v3192_v53 }
 0x3aa   : > { %v3194_v31 = vadd.f32 %v3066_v2, %v14306_v54  ;;  %v3196_v17 = vadd.f32 %v3068_v37, %v14308_v49  ;;  %v3069_v19 = vld [vmem:[#allocation3 + $0x2f8] sm:$0xff]  ;;  %v3070_v43 = vld [vmem:[#allocation3 + $0x300] sm:$0xff]  ;;  %v3071_v47 = vld [vmem:[#allocation3 + $0x308] sm:$0xff]  ;;  %3321 = vst [vmem:[#allocation3 + $0x2d8] sm:$0xff] %v3193_v16 }
 0x3ab   : > { %v14309_v29 = vld [vmem:[#allocation72_spill] sm:$0xff]  ;;  %v14310_v56 = vld [vmem:[#allocation73_spill] sm:$0xff]  ;;  %v14311_v1 = vld [vmem:[#allocation74_spill] sm:$0xff]  ;;  %3323 = vst [vmem:[#allocation3 + $0x2e8] sm:$0xff] %v3195_v50 }
 0x3ac   : > { %v3197_v36 = vadd.f32 %v3069_v19, %v14309_v29  ;;  %v3198_v5 = vadd.f32 %v3070_v43, %v14310_v56  ;;  %v3199_v25 = vadd.f32 %v3071_v47, %v14311_v1  ;;  %v3072_v58 = vld [vmem:[#allocation3 + $0x310] sm:$0xff]  ;;  %v3073_v39 = vld [vmem:[#allocation3 + $0x318] sm:$0xff]  ;;  %v3074_v11 = vld [vmem:[#allocation3 + $0x320] sm:$0xff]  ;;  %3322 = vst [vmem:[#allocation3 + $0x2e0] sm:$0xff] %v3194_v31 }
 0x3ad   : > { %3324 = vst [vmem:[#allocation3 + $0x2f0] sm:$0xff] %v3196_v17  ;;  %v14312_v18 = vld [vmem:[#allocation75_spill] sm:$0xff]  ;;  %v14313_v59 = vld [vmem:[#allocation76_spill] sm:$0xff]  ;;  %v14314_v55 = vld [vmem:[#allocation77_spill] sm:$0xff] }
 0x3ae   : > { %v3200_v23 = vadd.f32 %v3072_v58, %v14312_v18  ;;  %v3201_v13 = vadd.f32 %v3073_v39, %v14313_v59  ;;  %v3202_v0 = vadd.f32 %v3074_v11, %v14314_v55  ;;  %v3075_v21 = vld [vmem:[#allocation3 + $0x328] sm:$0xff]  ;;  %v3076_v41 = vld [vmem:[#allocation3 + $0x330] sm:$0xff]  ;;  %v3077_v6 = vld [vmem:[#allocation3 + $0x338] sm:$0xff]  ;;  %3325 = vst [vmem:[#allocation3 + $0x2f8] sm:$0xff] %v3197_v36 }
 0x3af   : > { %3326 = vst [vmem:[#allocation3 + $0x300] sm:$0xff] %v3198_v5  ;;  %3327 = vst [vmem:[#allocation3 + $0x308] sm:$0xff] %v3199_v25  ;;  %v14315_v62 = vld [vmem:[#allocation78_spill] sm:$0xff]  ;;  %v14316_v57 = vld [vmem:[#allocation79_spill] sm:$0xff] }
 0x3b0   : > { %v3203_v30 = vadd.f32 %v3075_v21, %v14315_v62  ;;  %v3204_v7 = vadd.f32 %v3076_v41, %v14316_v57  ;;  %v14317_v4 = vld [vmem:[#allocation80_spill] sm:$0xff]  ;;  %v3080_v44 = vld [vmem:[#allocation3 + $0x350] sm:$0xff]  ;;  %3328 = vst [vmem:[#allocation3 + $0x310] sm:$0xff] %v3200_v23  ;;  %3329 = vst [vmem:[#allocation3 + $0x318] sm:$0xff] %v3201_v13 }
 0x3b1   : > { %v3205_v28 = vadd.f32 %v3077_v6, %v14317_v4  ;;  %v3078_v51 = vld [vmem:[#allocation3 + $0x340] sm:$0xff]  ;;  %v3079_v15 = vld [vmem:[#allocation3 + $0x348] sm:$0xff]  ;;  %3330 = vst [vmem:[#allocation3 + $0x320] sm:$0xff] %v3202_v0  ;;  %v14319_v34 = vld [vmem:[#allocation82_spill] sm:$0xff] }
 0x3b2   : > { %v14318_v10 = vld [vmem:[#allocation81_spill] sm:$0xff]  ;;  %v3207_v20 = vadd.f32 %v3079_v15, %v14319_v34  ;;  %v14320_v46 = vld [vmem:[#allocation83_spill] sm:$0xff]  ;;  %3331 = vst [vmem:[#allocation3 + $0x328] sm:$0xff] %v3203_v30  ;;  %3332 = vst [vmem:[#allocation3 + $0x330] sm:$0xff] %v3204_v7 }
 0x3b3   : > { %v3206_v52 = vadd.f32 %v3078_v51, %v14318_v10  ;;  %v3208_v61 = vadd.f32 %v3080_v44, %v14320_v46  ;;  %v3081_v38 = vld [vmem:[#allocation3 + $0x358] sm:$0xff]  ;;  %v3082_v3 = vld [vmem:[#allocation3 + $0x360] sm:$0xff]  ;;  %v3083_v32 = vld [vmem:[#allocation3 + $0x368] sm:$0xff]  ;;  %3333 = vst [vmem:[#allocation3 + $0x338] sm:$0xff] %v3205_v28 }
 0x3b4   : > { %v14321_v12 = vld [vmem:[#allocation84_spill] sm:$0xff]  ;;  %v14322_v14 = vld [vmem:[#allocation85_spill] sm:$0xff]  ;;  %v14323_v8 = vld [vmem:[#allocation86_spill] sm:$0xff]  ;;  %3335 = vst [vmem:[#allocation3 + $0x348] sm:$0xff] %v3207_v20 }
 0x3b5   : > { %v3209_v63 = vadd.f32 %v3081_v38, %v14321_v12  ;;  %v3210_v33 = vadd.f32 %v3082_v3, %v14322_v14  ;;  %v3211_v48 = vadd.f32 %v3083_v32, %v14323_v8  ;;  %v3084_v45 = vld [vmem:[#allocation3 + $0x370] sm:$0xff]  ;;  %v3085_v22 = vld [vmem:[#allocation3 + $0x378] sm:$0xff]  ;;  %v3086_v40 = vld [vmem:[#allocation3 + $0x380] sm:$0xff]  ;;  %3334 = vst [vmem:[#allocation3 + $0x340] sm:$0xff] %v3206_v52 }
 0x3b6   : > { %3336 = vst [vmem:[#allocation3 + $0x350] sm:$0xff] %v3208_v61  ;;  %v14324_v35 = vld [vmem:[#allocation87_spill] sm:$0xff]  ;;  %v14325_v60 = vld [vmem:[#allocation88_spill] sm:$0xff]  ;;  %v14326_v53 = vld [vmem:[#allocation89_spill] sm:$0xff] }
 0x3b7   : > { %v3212_v26 = vadd.f32 %v3084_v45, %v14324_v35  ;;  %v3213_v42 = vadd.f32 %v3085_v22, %v14325_v60  ;;  %v3214_v27 = vadd.f32 %v3086_v40, %v14326_v53  ;;  %v3087_v16 = vld [vmem:[#allocation3 + $0x388] sm:$0xff]  ;;  %v3088_v2 = vld [vmem:[#allocation3 + $0x390] sm:$0xff]  ;;  %v3089_v24 = vld [vmem:[#allocation3 + $0x398] sm:$0xff]  ;;  %3337 = vst [vmem:[#allocation3 + $0x358] sm:$0xff] %v3209_v63 }
 0x3b8   : > { %3338 = vst [vmem:[#allocation3 + $0x360] sm:$0xff] %v3210_v33  ;;  %3339 = vst [vmem:[#allocation3 + $0x368] sm:$0xff] %v3211_v48  ;;  %v14327_v37 = vld [vmem:[#allocation90_spill] sm:$0xff]  ;;  %v14328_v31 = vld [vmem:[#allocation91_spill] sm:$0xff] }
 0x3b9   : > { %v3215_v54 = vadd.f32 %v3087_v16, %v14327_v37  ;;  %v3216_v9 = vadd.f32 %v3088_v2, %v14328_v31  ;;  %v14329_v50 = vld [vmem:[#allocation92_spill] sm:$0xff]  ;;  %v3092_v43 = vld [vmem:[#allocation3 + $0x3b0] sm:$0xff]  ;;  %3340 = vst [vmem:[#allocation3 + $0x370] sm:$0xff] %v3212_v26  ;;  %3341 = vst [vmem:[#allocation3 + $0x378] sm:$0xff] %v3213_v42 }
 0x3ba   : > { %v3217_v49 = vadd.f32 %v3089_v24, %v14329_v50  ;;  %v3090_v17 = vld [vmem:[#allocation3 + $0x3a0] sm:$0xff]  ;;  %v3091_v19 = vld [vmem:[#allocation3 + $0x3a8] sm:$0xff]  ;;  %3342 = vst [vmem:[#allocation3 + $0x380] sm:$0xff] %v3214_v27  ;;  %v14331_v36 = vld [vmem:[#allocation94_spill] sm:$0xff] }
 0x3bb   : > { %v14330_v47 = vld [vmem:[#allocation93_spill] sm:$0xff]  ;;  %v3219_v56 = vadd.f32 %v3091_v19, %v14331_v36  ;;  %v14332_v5 = vld [vmem:[#allocation95_spill] sm:$0xff]  ;;  %3343 = vst [vmem:[#allocation3 + $0x388] sm:$0xff] %v3215_v54  ;;  %3344 = vst [vmem:[#allocation3 + $0x390] sm:$0xff] %v3216_v9 }
 0x3bc   : > { %v3218_v29 = vadd.f32 %v3090_v17, %v14330_v47  ;;  %v3220_v1 = vadd.f32 %v3092_v43, %v14332_v5  ;;  %v3093_v25 = vld [vmem:[#allocation3 + $0x3b8] sm:$0xff]  ;;  %v3094_v58 = vld [vmem:[#allocation3 + $0x3c0] sm:$0xff]  ;;  %v3095_v39 = vld [vmem:[#allocation3 + $0x3c8] sm:$0xff]  ;;  %3345 = vst [vmem:[#allocation3 + $0x398] sm:$0xff] %v3217_v49 }
 0x3bd   : > { %v14333_v11 = vld [vmem:[#allocation96_spill] sm:$0xff]  ;;  %v14334_v23 = vld [vmem:[#allocation97_spill] sm:$0xff]  ;;  %v14335_v13 = vld [vmem:[#allocation98_spill] sm:$0xff]  ;;  %3347 = vst [vmem:[#allocation3 + $0x3a8] sm:$0xff] %v3219_v56 }
 0x3be   : > { %v3221_v18 = vadd.f32 %v3093_v25, %v14333_v11  ;;  %v3222_v59 = vadd.f32 %v3094_v58, %v14334_v23  ;;  %v3223_v55 = vadd.f32 %v3095_v39, %v14335_v13  ;;  %v3096_v0 = vld [vmem:[#allocation3 + $0x3d0] sm:$0xff]  ;;  %v3097_v21 = vld [vmem:[#allocation3 + $0x3d8] sm:$0xff]  ;;  %v3098_v41 = vld [vmem:[#allocation3 + $0x3e0] sm:$0xff]  ;;  %3346 = vst [vmem:[#allocation3 + $0x3a0] sm:$0xff] %v3218_v29 }
 0x3bf   : > { %3348 = vst [vmem:[#allocation3 + $0x3b0] sm:$0xff] %v3220_v1  ;;  %v14336_v6 = vld [vmem:[#allocation99_spill] sm:$0xff]  ;;  %v14337_v30 = vld [vmem:[#allocation100_spill] sm:$0xff]  ;;  %v14338_v7 = vld [vmem:[#allocation101_spill] sm:$0xff]  ;;  %3361 = sbr.rel (%p8803_p10) target bundleno = 2354 (0x932), region = 92 }
 0x3c0   : > { %v3224_v62 = vadd.f32 %v3096_v0, %v14336_v6  ;;  %v3225_v57 = vadd.f32 %v3097_v21, %v14337_v30  ;;  %v3226_v4 = vadd.f32 %v3098_v41, %v14338_v7  ;;  %v3099_v28 = vld [vmem:[#allocation3 + $0x3e8] sm:$0xff]  ;;  %v3100_v51 = vld [vmem:[#allocation3 + $0x3f0] sm:$0xff]  ;;  %v3101_v15 = vld [vmem:[#allocation3 + $0x3f8] sm:$0xff]  ;;  %3349 = vst [vmem:[#allocation3 + $0x3b8] sm:$0xff] %v3221_v18 }
 0x3c1   : > { %3350 = vst [vmem:[#allocation3 + $0x3c0] sm:$0xff] %v3222_v59  ;;  %3351 = vst [vmem:[#allocation3 + $0x3c8] sm:$0xff] %v3223_v55  ;;  %v14339_v44 = vld [vmem:[#allocation102_spill] sm:$0xff]  ;;  %v14340_v52 = vld [vmem:[#allocation103_spill] sm:$0xff] }
 0x3c2   : > { %v3227_v10 = vadd.f32 %v3099_v28, %v14339_v44  ;;  %v3228_v34 = vadd.f32 %v3100_v51, %v14340_v52  ;;  %v14341_v20 = vld [vmem:[#allocation104_spill] sm:$0xff]  ;;  %3352 = vst [vmem:[#allocation3 + $0x3d0] sm:$0xff] %v3224_v62  ;;  %3353 = vst [vmem:[#allocation3 + $0x3d8] sm:$0xff] %v3225_v57  ;;  %v3765_v14 = vld [vmem:[#allocation3 + $0x98] sm:$0xff] (!%p8803_p10) }
 0x3c3   : > { %v3229_v46 = vadd.f32 %v3101_v15, %v14341_v20  ;;  %3354 = vst [vmem:[#allocation3 + $0x3e0] sm:$0xff] %v3226_v4  ;;  %v3826_v61 = vld [vmem:[#allocation3 + $0x280] sm:$0xff] (!%p8803_p10)  ;;  %v3827_v3 = vld [vmem:[#allocation3 + $0x288] sm:$0xff] (!%p8803_p10)  ;;  %v3764_v33 = vld [vmem:[#allocation3 + $0x90] sm:$0xff] (!%p8803_p10) }
 0x3c4   : > { %3355 = vst [vmem:[#allocation3 + $0x3e8] sm:$0xff] %v3227_v10  ;;  %3356 = vst [vmem:[#allocation3 + $0x3f0] sm:$0xff] %v3228_v34  ;;  %v3762_v38 = vld [vmem:[#allocation3 + $0x80] sm:$0xff] (!%p8803_p10)  ;;  %4034 = vadd.xlane.f32.xlu1 (!%p8803_p10), %v3826_v61  ;;  %v3763_v32 = vld [vmem:[#allocation3 + $0x88] sm:$0xff] (!%p8803_p10) }
 0x3c5   : > { %3357 = vst [vmem:[#allocation3 + $0x3f8] sm:$0xff] %v3229_v46  ;;  %3906 = vadd.xlane.f32.xlu0 (!%p8803_p10), %v3762_v38  ;;  %v3747_v12 = vld [vmem:[#allocation3 + $0x8] sm:$0xff] (!%p8803_p10)  ;;  %v3746_v63 = vld [vmem:[#allocation3] sm:$0xff] (!%p8803_p10)  ;;  %v3829_v45 = vld [vmem:[#allocation3 + $0x298] sm:$0xff] (!%p8803_p10) }
 0x3c6   : > { %v3811_v8 = vld [vmem:[#allocation3 + $0x208] sm:$0xff]  ;;  %v3810_v48 = vld [vmem:[#allocation3 + $0x200] sm:$0xff]  ;;  %v3828_v22 = vld [vmem:[#allocation3 + $0x290] sm:$0xff] }
 0x3c7   : > { %v3749_v40 = vld [vmem:[#allocation3 + $0x18] sm:$0xff]  ;;  %v3748_v35 = vld [vmem:[#allocation3 + $0x10] sm:$0xff]  ;;  %v3767_v42 = vld [vmem:[#allocation3 + $0xa8] sm:$0xff] }
 0x3c8   : > { %4036 = vadd.xlane.f32.xlu1 %v3827_v3  ;;  %v3813_v26 = vld [vmem:[#allocation3 + $0x218] sm:$0xff]  ;;  %v3812_v60 = vld [vmem:[#allocation3 + $0x210] sm:$0xff]  ;;  %v3766_v53 = vld [vmem:[#allocation3 + $0xa0] sm:$0xff] }
 0x3c9   : > { %3908 = vadd.xlane.f32.xlu0 %v3763_v32  ;;  %v3831_v27 = vld [vmem:[#allocation3 + $0x2a8] sm:$0xff]  ;;  %v3830_v16 = vld [vmem:[#allocation3 + $0x2a0] sm:$0xff]  ;;  %v3769_v31 = vld [vmem:[#allocation3 + $0xb8] sm:$0xff] }
 0x3ca   : > { %v3751_v2 = vld [vmem:[#allocation3 + $0x28] sm:$0xff]  ;;  %v3750_v24 = vld [vmem:[#allocation3 + $0x20] sm:$0xff]  ;;  %v3768_v9 = vld [vmem:[#allocation3 + $0xb0] sm:$0xff] }
 0x3cb   : > { %v3815_v37 = vld [vmem:[#allocation3 + $0x228] sm:$0xff]  ;;  %v3814_v54 = vld [vmem:[#allocation3 + $0x220] sm:$0xff]  ;;  %v3833_v50 = vld [vmem:[#allocation3 + $0x2b8] sm:$0xff] }
 0x3cc   : > { %3876 = vadd.xlane.f32.xlu1 %v3747_v12  ;;  %v3832_v49 = vld [vmem:[#allocation3 + $0x2b0] sm:$0xff]  ;;  %v3753_v17 = vld [vmem:[#allocation3 + $0x38] sm:$0xff]  ;;  %v3771_v29 = vld [vmem:[#allocation3 + $0xc8] sm:$0xff] }
 0x3cd   : > { %3874 = vadd.xlane.f32.xlu0 %v3746_v63  ;;  %v3752_v19 = vld [vmem:[#allocation3 + $0x30] sm:$0xff]  ;;  %v3817_v43 = vld [vmem:[#allocation3 + $0x238] sm:$0xff]  ;;  %v3770_v36 = vld [vmem:[#allocation3 + $0xc0] sm:$0xff] }
 0x3ce   : > { %v3816_v47 = vld [vmem:[#allocation3 + $0x230] sm:$0xff]  ;;  %v3835_v56 = vld [vmem:[#allocation3 + $0x2c8] sm:$0xff]  ;;  %v3834_v5 = vld [vmem:[#allocation3 + $0x2c0] sm:$0xff] }
 0x3cf   : > { %v3755_v1 = vld [vmem:[#allocation3 + $0x48] sm:$0xff]  ;;  %v3754_v25 = vld [vmem:[#allocation3 + $0x40] sm:$0xff]  ;;  %v3773_v11 = vld [vmem:[#allocation3 + $0xd8] sm:$0xff] }
 0x3d0   : > { %3912 = vadd.xlane.f32.xlu1 %v3765_v14  ;;  %v3819_v58 = vld [vmem:[#allocation3 + $0x248] sm:$0xff]  ;;  %v3818_v39 = vld [vmem:[#allocation3 + $0x240] sm:$0xff]  ;;  %v3772_v18 = vld [vmem:[#allocation3 + $0xd0] sm:$0xff] }
 0x3d1   : > { %3910 = vadd.xlane.f32.xlu0 %v3764_v33  ;;  %v3837_v23 = vld [vmem:[#allocation3 + $0x2d8] sm:$0xff]  ;;  %v3836_v59 = vld [vmem:[#allocation3 + $0x2d0] sm:$0xff]  ;;  %v3775_v51 = vld [vmem:[#allocation3 + $0xe8] sm:$0xff] }
 0x3d2   : > { %v3757_v13 = vld [vmem:[#allocation3 + $0x58] sm:$0xff]  ;;  %v3756_v55 = vld [vmem:[#allocation3 + $0x50] sm:$0xff]  ;;  %v3774_v15 = vld [vmem:[#allocation3 + $0xe0] sm:$0xff] }
 0x3d3   : > { %v9315_v0 = vld [vmem:[#allocation9 + $0x4] ss:$16 sps:$4 sm:$0xff]   ;;  %v9317_v21 = vld [vmem:[#allocation9 + $0xc] ss:$16 sps:$4 sm:$0xff]   ;;  %v9319_v41 = vld [vmem:[#allocation9] ss:$16 sps:$4 sm:$0xff]  }
 0x3d4   : > { %4004 = vadd.xlane.f32.xlu1 %v3811_v8  ;;  %v9320_v6 = vld [vmem:[#allocation9 + $0x8] ss:$16 sps:$4 sm:$0xff]   ;;  %v3820_v30 = vld [vmem:[#allocation3 + $0x250] sm:$0xff]  ;;  %6151 = vmatprep.subr.bf16.mxu1 %v9315_v0  ;;  %v9323_v7 = vld [vmem:[#allocation9 + $0x2c] ss:$16 sps:$4 sm:$0xff]  }
 0x3d5   : > { %4002 = vadd.xlane.f32.xlu0 %v3810_v48  ;;  %v3821_v62 = vld [vmem:[#allocation3 + $0x258] sm:$0xff]  ;;  %6233 = vmatprep.subr.bf16.mxu0 %v9317_v21  ;;  %v9321_v57 = vld [vmem:[#allocation9 + $0x24] ss:$16 sps:$4 sm:$0xff]   ;;  %v9325_v4 = vld [vmem:[#allocation9 + $0x20] ss:$16 sps:$4 sm:$0xff]  }
 0x3d6   : > { %6152 = vmatpush1.bf16.msra.mxu1 %v9319_v41  ;;  %6234 = vmatpush1.bf16.msra.mxu0 %v9320_v6  ;;  %v9326_v28 = vld [vmem:[#allocation9 + $0x28] ss:$16 sps:$4 sm:$0xff]   ;;  %v9327_v44 = vld [vmem:[#allocation9 + $0x44] ss:$16 sps:$4 sm:$0xff]   ;;  %v9329_v10 = vld [vmem:[#allocation9 + $0x4c] ss:$16 sps:$4 sm:$0xff]  }
 0x3d7   : > { %6153 = vmatprep.subr.bf16.mxu1 %v9321_v57  ;;  %6235 = vmatprep.subr.bf16.mxu0 %v9323_v7  ;;  %v9331_v52 = vld [vmem:[#allocation9 + $0x40] ss:$16 sps:$4 sm:$0xff]   ;;  %v9332_v34 = vld [vmem:[#allocation9 + $0x48] ss:$16 sps:$4 sm:$0xff]   ;;  %v9333_v61 = vld [vmem:[#allocation9 + $0x64] ss:$16 sps:$4 sm:$0xff]  }
 0x3d8   : > { %4040 = vadd.xlane.f32.xlu1 %v3829_v45  ;;  %v3839_v20 = vld [vmem:[#allocation3 + $0x2e8] sm:$0xff]  ;;  %v3838_v46 = vld [vmem:[#allocation3 + $0x2e0] sm:$0xff] }
 0x3d9   : > { %4038 = vadd.xlane.f32.xlu0 %v3828_v22  ;;  %v9335_v38 = vld [vmem:[#allocation9 + $0x6c] ss:$16 sps:$4 sm:$0xff]   ;;  %v9337_v3 = vld [vmem:[#allocation9 + $0x60] ss:$16 sps:$4 sm:$0xff]   ;;  %v9338_v32 = vld [vmem:[#allocation9 + $0x68] ss:$16 sps:$4 sm:$0xff]  }
 0x3da   : > { %6154 = vmatpush1.bf16.msra.mxu1 %v9325_v4  ;;  %6236 = vmatpush1.bf16.msra.mxu0 %v9326_v28  ;;  %v3759_v12 = vld [vmem:[#allocation3 + $0x68] sm:$0xff]  ;;  %v3758_v63 = vld [vmem:[#allocation3 + $0x60] sm:$0xff] }
 0x3db   : > { %6155 = vmatprep.subr.bf16.mxu1 %v9327_v44  ;;  %6237 = vmatprep.subr.bf16.mxu0 %v9329_v10  ;;  %v9339_v14 = vld [vmem:[#allocation9 + $0x84] ss:$16 sps:$4 sm:$0xff]   ;;  %v9341_v33 = vld [vmem:[#allocation9 + $0x8c] ss:$16 sps:$4 sm:$0xff]   ;;  %v9343_v8 = vld [vmem:[#allocation9 + $0x80] ss:$16 sps:$4 sm:$0xff]  }
 0x3dc   : > { %3880 = vadd.xlane.f32.xlu1 %v3749_v40  ;;  %v9344_v48 = vld [vmem:[#allocation9 + $0x88] ss:$16 sps:$4 sm:$0xff]   ;;  %v3822_v22 = vld [vmem:[#allocation3 + $0x260] sm:$0xff]  ;;  %v9383_v6 = vld [vmem:[#allocation9 + $0x16c] ss:$16 sps:$4 sm:$0xff]  }
 0x3dd   : > { %3878 = vadd.xlane.f32.xlu0 %v3748_v35  ;;  %v3823_v45 = vld [vmem:[#allocation3 + $0x268] sm:$0xff]  ;;  %v9345_v40 = vld [vmem:[#allocation9 + $0xa4] ss:$16 sps:$4 sm:$0xff]   ;;  %v3797_v44 = vld [vmem:[#allocation3 + $0x198] sm:$0xff] }
 0x3de   : > { %6156 = vmatpush1.bf16.msra.mxu1 %v9331_v52  ;;  %6238 = vmatpush1.bf16.msra.mxu0 %v9332_v34  ;;  %v9347_v35 = vld [vmem:[#allocation9 + $0xac] ss:$16 sps:$4 sm:$0xff]   ;;  %v3858_v21 = vld [vmem:[#allocation3 + $0x380] sm:$0xff]  ;;  %v3796_v10 = vld [vmem:[#allocation3 + $0x190] sm:$0xff] }
 0x3df   : > { %6157 = vmatprep.subr.bf16.mxu1 %v9333_v61  ;;  %6239 = vmatprep.subr.bf16.mxu0 %v9335_v38  ;;  %v3859_v0 = vld [vmem:[#allocation3 + $0x388] sm:$0xff]  ;;  %v9381_v41 = vld [vmem:[#allocation9 + $0x164] ss:$16 sps:$4 sm:$0xff]  }
 0x3e0   : > { %4008 = vadd.xlane.f32.xlu1 %v3813_v26  ;;  %v9349_v26 = vld [vmem:[#allocation9 + $0xa0] ss:$16 sps:$4 sm:$0xff]   ;;  %v3779_v57 = vld [vmem:[#allocation3 + $0x108] sm:$0xff]  ;;  %v9387_v4 = vld [vmem:[#allocation9 + $0x184] ss:$16 sps:$4 sm:$0xff]  }
 0x3e1   : > { %4006 = vadd.xlane.f32.xlu0 %v3812_v60  ;;  %v9350_v60 = vld [vmem:[#allocation9 + $0xa8] ss:$16 sps:$4 sm:$0xff]   ;;  %v3778_v7 = vld [vmem:[#allocation3 + $0x100] sm:$0xff]  ;;  %v9389_v28 = vld [vmem:[#allocation9 + $0x18c] ss:$16 sps:$4 sm:$0xff]  }
 0x3e2   : > { %6158 = vmatpush1.bf16.msra.mxu1 %v9337_v3  ;;  %6240 = vmatpush1.bf16.msra.mxu0 %v9338_v32  ;;  %v9393_v52 = vld [vmem:[#allocation9 + $0x1a4] ss:$16 sps:$4 sm:$0xff]   ;;  %v9395_v34 = vld [vmem:[#allocation9 + $0x1ac] ss:$16 sps:$4 sm:$0xff]   ;;  %v4834_v3 = vlaneseq }
 0x3e3   : > { %6159 = vmatprep.subr.bf16.mxu1 %v9339_v14  ;;  %6241 = vmatprep.subr.bf16.mxu0 %v9341_v33  ;;  %v3843_v61 = vld [vmem:[#allocation3 + $0x308] sm:$0xff]  ;;  %v3842_v38 = vld [vmem:[#allocation3 + $0x300] sm:$0xff]  ;;  %v3861_v14 = vld [vmem:[#allocation3 + $0x398] sm:$0xff] }
 0x3e4   : > { %3916 = vadd.xlane.f32.xlu1 %v3767_v42  ;;  %v3777_v42 = vld [vmem:[#allocation3 + $0xf8] sm:$0xff] }
 0x3e5   : > { %3914 = vadd.xlane.f32.xlu0 %v3766_v53  ;;  %v3776_v53 = vld [vmem:[#allocation3 + $0xf0] sm:$0xff]  ;;  %v9401_v33 = vld [vmem:[#allocation9 + $0x1cc] ss:$16 sps:$4 sm:$0xff]  }
 0x3e6   : > { %6160 = vmatpush1.bf16.msra.mxu1 %v9343_v8  ;;  %6242 = vmatpush1.bf16.msra.mxu0 %v9344_v48  ;;  %v12615_v8 = vand.u32 127, %v4834_v3  ;;  %v9403_v48 = vld [vmem:[#allocation9 + $0x1c0] ss:$16 sps:$4 sm:$0xff]  }
 0x3e7   : > { %6161 = vmatprep.subr.bf16.mxu1 %v9345_v40  ;;  %6243 = vmatprep.subr.bf16.mxu0 %v9347_v35 }
 0x3e8   : > { %4044 = vadd.xlane.f32.xlu1 %v3831_v27  ;;  %v9351_v27 = vld [vmem:[#allocation9 + $0xc4] ss:$16 sps:$4 sm:$0xff]  }
 0x3e9   : > { %4042 = vadd.xlane.f32.xlu0 %v3830_v16  ;;  %v9353_v16 = vld [vmem:[#allocation9 + $0xcc] ss:$16 sps:$4 sm:$0xff]  }
 0x3ea   : > { %6162 = vmatpush1.bf16.msra.mxu1 %v9349_v26  ;;  %6244 = vmatpush1.bf16.msra.mxu0 %v9350_v60  ;;  %v3860_v60 = vld [vmem:[#allocation3 + $0x390] sm:$0xff] }
 0x3eb   : > { %6163 = vmatprep.subr.bf16.mxu1 %v9351_v27  ;;  %6245 = vmatprep.subr.bf16.mxu0 %v9353_v16  ;;  %v9405_v27 = vld [vmem:[#allocation9 + $0x1e4] ss:$16 sps:$4 sm:$0xff]   ;;  %v9407_v16 = vld [vmem:[#allocation9 + $0x1ec] ss:$16 sps:$4 sm:$0xff]  }
 0x3ec   : > { %3884 = vadd.xlane.f32.xlu1 %v3751_v2  ;;  %v9355_v2 = vld [vmem:[#allocation9 + $0xc0] ss:$16 sps:$4 sm:$0xff]  }
 0x3ed   : > { %3882 = vadd.xlane.f32.xlu0 %v3750_v24  ;;  %v9356_v24 = vld [vmem:[#allocation9 + $0xc8] ss:$16 sps:$4 sm:$0xff]  }
 0x3ee   : > { %6164 = vmatpush1.bf16.msra.mxu1 %v9355_v2  ;;  %6246 = vmatpush1.bf16.msra.mxu0 %v9356_v24  ;;  %v12617_v2 = vshrl.u32 %v4834_v3, 7  ;;  %v3863_v3 = vld [vmem:[#allocation3 + $0x3a8] sm:$0xff] }
 0x3f0   : > { %4012 = vadd.xlane.f32.xlu1 %v3815_v37  ;;  %v3841_v37 = vld [vmem:[#allocation3 + $0x2f8] sm:$0xff] }
 0x3f1   : > { %4010 = vadd.xlane.f32.xlu0 %v3814_v54  ;;  %v3840_v54 = vld [vmem:[#allocation3 + $0x2f0] sm:$0xff] }
 0x3f4   : > { %3920 = vadd.xlane.f32.xlu1 %v3769_v31  ;;  %v9357_v31 = vld [vmem:[#allocation9 + $0xe4] ss:$16 sps:$4 sm:$0xff]  }
 0x3f5   : > { %3918 = vadd.xlane.f32.xlu0 %v3768_v9  ;;  %v9359_v9 = vld [vmem:[#allocation9 + $0xec] ss:$16 sps:$4 sm:$0xff]   ;;  %6165 = vmatprep.subr.bf16.mxu1 %v9357_v31  ;;  %v9410_v31 = vld [vmem:[#allocation9 + $0x1e8] ss:$16 sps:$4 sm:$0xff]  }
 0x3f6   : > { %6247 = vmatprep.subr.bf16.mxu0 %v9359_v9  ;;  %v4840_v9 = vadd.s32 4294967288, %v12615_v8 }
 0x3f8   : > { %4048 = vadd.xlane.f32.xlu1 %v3833_v50  ;;  %v9361_v50 = vld [vmem:[#allocation9 + $0xe0] ss:$16 sps:$4 sm:$0xff]  }
 0x3f9   : > { %4046 = vadd.xlane.f32.xlu0 %v3832_v49  ;;  %v9362_v49 = vld [vmem:[#allocation9 + $0xe8] ss:$16 sps:$4 sm:$0xff]   ;;  %6166 = vmatpush1.bf16.msra.mxu1 %v9361_v50 }
 0x3fa   : > { %6248 = vmatpush1.bf16.msra.mxu0 %v9362_v49 }
 0x3fc   : > { %3888 = vadd.xlane.f32.xlu1 %v3753_v17  ;;  %v3761_v17 = vld [vmem:[#allocation3 + $0x78] sm:$0xff] }
 0x3fd   : > { %3886 = vadd.xlane.f32.xlu0 %v3752_v19  ;;  %v3760_v19 = vld [vmem:[#allocation3 + $0x70] sm:$0xff] }
 0x400   : > { %4016 = vadd.xlane.f32.xlu1 %v3817_v43  ;;  %v9363_v43 = vld [vmem:[#allocation9 + $0x104] ss:$16 sps:$4 sm:$0xff]  }
 0x401   : > { %4014 = vadd.xlane.f32.xlu0 %v3816_v47  ;;  %v9365_v47 = vld [vmem:[#allocation9 + $0x10c] ss:$16 sps:$4 sm:$0xff]   ;;  %6167 = vmatprep.subr.bf16.mxu1 %v9363_v43 }
 0x402   : > { %6249 = vmatprep.subr.bf16.mxu0 %v9365_v47 }
 0x404   : > { %3924 = vadd.xlane.f32.xlu1 %v3771_v29  ;;  %v9367_v29 = vld [vmem:[#allocation9 + $0x100] ss:$16 sps:$4 sm:$0xff]  }
 0x405   : > { %3922 = vadd.xlane.f32.xlu0 %v3770_v36  ;;  %v9368_v36 = vld [vmem:[#allocation9 + $0x108] ss:$16 sps:$4 sm:$0xff]   ;;  %6168 = vmatpush1.bf16.msra.mxu1 %v9367_v29  ;;  %v12624_v29 = vsub.s32 %v12615_v8, %v12617_v2 }
 0x406   : > { %6250 = vmatpush1.bf16.msra.mxu0 %v9368_v36  ;;  %v4847_v36 = vadd.s32 4294967280, %v12615_v8 }
 0x408   : > { %4052 = vadd.xlane.f32.xlu1 %v3835_v56  ;;  %v3825_v56 = vld [vmem:[#allocation3 + $0x278] sm:$0xff] }
 0x409   : > { %4050 = vadd.xlane.f32.xlu0 %v3834_v5  ;;  %v3824_v5 = vld [vmem:[#allocation3 + $0x270] sm:$0xff] }
 0x40c   : > { %3892 = vadd.xlane.f32.xlu1 %v3755_v1  ;;  %v9369_v1 = vld [vmem:[#allocation9 + $0x124] ss:$16 sps:$4 sm:$0xff]  }
 0x40d   : > { %3890 = vadd.xlane.f32.xlu0 %v3754_v25  ;;  %v9371_v25 = vld [vmem:[#allocation9 + $0x12c] ss:$16 sps:$4 sm:$0xff]   ;;  %6169 = vmatprep.subr.bf16.mxu1 %v9369_v1 }
 0x40e   : > { %6251 = vmatprep.subr.bf16.mxu0 %v9371_v25 }
 0x410   : > { %4020 = vadd.xlane.f32.xlu1 %v3819_v58  ;;  %v9373_v58 = vld [vmem:[#allocation9 + $0x120] ss:$16 sps:$4 sm:$0xff]  }
 0x411   : > { %4018 = vadd.xlane.f32.xlu0 %v3818_v39  ;;  %v9374_v39 = vld [vmem:[#allocation9 + $0x128] ss:$16 sps:$4 sm:$0xff]   ;;  %6170 = vmatpush1.bf16.msra.mxu1 %v9373_v58 }
 0x412   : > { %6252 = vmatpush1.bf16.msra.mxu0 %v9374_v39 }
 0x414   : > { %3928 = vadd.xlane.f32.xlu1 %v3773_v11  ;;  %v3795_v11 = vld [vmem:[#allocation3 + $0x188] sm:$0xff] }
 0x415   : > { %3926 = vadd.xlane.f32.xlu0 %v3772_v18  ;;  %v3794_v18 = vld [vmem:[#allocation3 + $0x180] sm:$0xff] }
 0x418   : > { %4056 = vadd.xlane.f32.xlu1 %v3837_v23  ;;  %v9375_v23 = vld [vmem:[#allocation9 + $0x144] ss:$16 sps:$4 sm:$0xff]  }
 0x419   : > { %4054 = vadd.xlane.f32.xlu0 %v3836_v59  ;;  %v9377_v59 = vld [vmem:[#allocation9 + $0x14c] ss:$16 sps:$4 sm:$0xff]   ;;  %6171 = vmatprep.subr.bf16.mxu1 %v9375_v23  ;;  %v3844_v23 = vld [vmem:[#allocation3 + $0x310] sm:$0xff] }
 0x41a   : > { %6253 = vmatprep.subr.bf16.mxu0 %v9377_v59 }
 0x41c   : > { %3896 = vadd.xlane.f32.xlu1 %v3757_v13  ;;  %v9379_v13 = vld [vmem:[#allocation9 + $0x140] ss:$16 sps:$4 sm:$0xff]  }
 0x41d   : > { %3894 = vadd.xlane.f32.xlu0 %v3756_v55  ;;  %v9380_v55 = vld [vmem:[#allocation9 + $0x148] ss:$16 sps:$4 sm:$0xff]   ;;  %6172 = vmatpush1.bf16.msra.mxu1 %v9379_v13 }
 0x41e   : > { %6254 = vmatpush1.bf16.msra.mxu0 %v9380_v55  ;;  %6173 = vmatprep.subr.bf16.mxu1 %v9381_v41  ;;  %v12632_v55 = vsub.s32 %v4847_v36, %v12617_v2 }
 0x41f   : > { %6255 = vmatprep.subr.bf16.mxu0 %v9383_v6 }
 0x420   : > { %4024 = vadd.xlane.f32.xlu1 %v3821_v62  ;;  %v9385_v62 = vld [vmem:[#allocation9 + $0x160] ss:$16 sps:$4 sm:$0xff]  }
 0x421   : > { %4022 = vadd.xlane.f32.xlu0 %v3820_v30  ;;  %v9386_v30 = vld [vmem:[#allocation9 + $0x168] ss:$16 sps:$4 sm:$0xff]   ;;  %6174 = vmatpush1.bf16.msra.mxu1 %v9385_v62 }
 0x422   : > { %6256 = vmatpush1.bf16.msra.mxu0 %v9386_v30  ;;  %6175 = vmatprep.subr.bf16.mxu1 %v9387_v4 }
 0x423   : > { %6257 = vmatprep.subr.bf16.mxu0 %v9389_v28 }
 0x424   : > { %3932 = vadd.xlane.f32.xlu1 %v3775_v51  ;;  %v9391_v51 = vld [vmem:[#allocation9 + $0x180] ss:$16 sps:$4 sm:$0xff]  }
 0x425   : > { %3930 = vadd.xlane.f32.xlu0 %v3774_v15  ;;  %v9392_v15 = vld [vmem:[#allocation9 + $0x188] ss:$16 sps:$4 sm:$0xff]   ;;  %6176 = vmatpush1.bf16.msra.mxu1 %v9391_v51 }
 0x426   : > { %6258 = vmatpush1.bf16.msra.mxu0 %v9392_v15  ;;  %6177 = vmatprep.subr.bf16.mxu1 %v9393_v52 }
 0x427   : > { %6259 = vmatprep.subr.bf16.mxu0 %v9395_v34 }
 0x428   : > { %4060 = vadd.xlane.f32.xlu1 %v3839_v20  ;;  %v9397_v20 = vld [vmem:[#allocation9 + $0x1a0] ss:$16 sps:$4 sm:$0xff]  }
 0x429   : > { %4058 = vadd.xlane.f32.xlu0 %v3838_v46  ;;  %v9398_v46 = vld [vmem:[#allocation9 + $0x1a8] ss:$16 sps:$4 sm:$0xff]   ;;  %6178 = vmatpush1.bf16.msra.mxu1 %v9397_v20 }
 0x42a   : > { %6260 = vmatpush1.bf16.msra.mxu0 %v9398_v46 }
 0x42b   : > { %6261 = vmatprep.subr.bf16.mxu0 %v9401_v33 }
 0x42c   : > { %3900 = vadd.xlane.f32.xlu1 %v3759_v12 }
 0x42d   : > { %3898 = vadd.xlane.f32.xlu0 %v3758_v63  ;;  %v9399_v63 = vld [vmem:[#allocation9 + $0x1c4] ss:$16 sps:$4 sm:$0xff]  }
 0x42e   : > { %6179 = vmatprep.subr.bf16.mxu1 %v9399_v63 }
 0x42f   : > { %6180 = vmatpush1.bf16.msra.mxu1 %v9403_v48 }
 0x430   : > { %4028 = vadd.xlane.f32.xlu1 %v3823_v45  ;;  %v9404_v45 = vld [vmem:[#allocation9 + $0x1c8] ss:$16 sps:$4 sm:$0xff]   ;;  %6181 = vmatprep.subr.bf16.mxu1 %v9405_v27 }
 0x431   : > { %4026 = vadd.xlane.f32.xlu0 %v3822_v22  ;;  %6262 = vmatpush1.bf16.msra.mxu0 %v9404_v45 }
 0x432   : > { %6263 = vmatprep.subr.bf16.mxu0 %v9407_v16 }
 0x434   : > { %3936 = vadd.xlane.f32.xlu1 %v3777_v42 }
 0x435   : > { %3934 = vadd.xlane.f32.xlu0 %v3776_v53  ;;  %6264 = vmatpush1.bf16.msra.mxu0 %v9410_v31 }
 0x438   : > { %4064 = vadd.xlane.f32.xlu1 %v3841_v37 }
 0x439   : > { %4062 = vadd.xlane.f32.xlu0 %v3840_v54  ;;  %v9409_v54 = vld [vmem:[#allocation9 + $0x1e0] ss:$16 sps:$4 sm:$0xff]  }
 0x43a   : > { %6182 = vmatpush1.bf16.msra.mxu1 %v9409_v54 }
 0x43c   : > { %3904 = vadd.xlane.f32.xlu1 %v3761_v17  ;;  %v3781_v17 = vld [vmem:[#allocation3 + $0x118] sm:$0xff] }
 0x43d   : > { %3902 = vadd.xlane.f32.xlu0 %v3760_v19  ;;  %v3780_v19 = vld [vmem:[#allocation3 + $0x110] sm:$0xff] }
 0x440   : > { %4032 = vadd.xlane.f32.xlu1 %v3825_v56  ;;  %v4854_v56 = vadd.s32 4294967272, %v12615_v8 }
 0x441   : > { %4030 = vadd.xlane.f32.xlu0 %v3824_v5  ;;  %v12629_v5 = vsub.s32 %v4840_v9, %v12617_v2 }
 0x444   : > { %3972 = vadd.xlane.f32.xlu1 %v3795_v11 }
 0x445   : > { %3970 = vadd.xlane.f32.xlu0 %v3794_v18  ;;  %v3845_v18 = vld [vmem:[#allocation3 + $0x318] sm:$0xff] }
 0x448   : > { %4100 = vadd.xlane.f32.xlu1 %v3859_v0  ;;  %v12635_v0 = vsub.s32 %v4854_v56, %v12617_v2  ;;  %v3847_v56 = vld [vmem:[#allocation3 + $0x328] sm:$0xff] }
 0x449   : > { %4098 = vadd.xlane.f32.xlu0 %v3858_v21 }
 0x44c   : > { %3940 = vadd.xlane.f32.xlu1 %v3779_v57  ;;  %v3799_v57 = vld [vmem:[#allocation3 + $0x1a8] sm:$0xff] }
 0x44d   : > { %3938 = vadd.xlane.f32.xlu0 %v3778_v7  ;;  %v3798_v7 = vld [vmem:[#allocation3 + $0x1a0] sm:$0xff] }
 0x450   : > { %3976 = vadd.xlane.f32.xlu1 %v3797_v44 }
 0x451   : > { %3974 = vadd.xlane.f32.xlu0 %v3796_v10  ;;  %v4035_v32 = vpop.xlane.xlu1 %4034 }
 0x452   : > { %v3907_v12 = vpop.xlane.xlu0 %3906  ;;  %v4210_v22 = vmul.f32 0.00086805556, %v4035_v32  ;;  %v3862_v32 = vld [vmem:[#allocation3 + $0x3a0] sm:$0xff] }
 0x453   : > { %v4146_v40 = vmul.f32 0.00086805556, %v3907_v12 }
 0x454   : > { %4068 = vadd.xlane.f32.xlu1 %v3843_v61 }
 0x455   : > { %4066 = vadd.xlane.f32.xlu0 %v3842_v38  ;;  %v4037_v35 = vpop.xlane.xlu1 %4036 }
 0x456   : > { %v3909_v26 = vpop.xlane.xlu0 %3908  ;;  %v4211_v42 = vmul.f32 0.00086805556, %v4037_v35 }
 0x457   : > { %v4147_v53 = vmul.f32 0.00086805556, %v3909_v26 }
 0x458   : > { %v12619_v24 = vpack.c.bf16 %v4211_v42, %v4210_v22  ;;  %4104 = vadd.xlane.f32.xlu1 %v3861_v14  ;;  %v3783_v42 = vld [vmem:[#allocation3 + $0x128] sm:$0xff] }
 0x459   : > { %v4458_v37 = vpack.c.bf16 %v4147_v53, %v4146_v40  ;;  %4102 = vadd.xlane.f32.xlu0 %v3860_v60  ;;  %v3877_v50 = vpop.xlane.xlu1 %3876  ;;  %v3782_v53 = vld [vmem:[#allocation3 + $0x120] sm:$0xff] }
 0x45a   : > { %v3875_v49 = vpop.xlane.xlu0 %3874  ;;  %v4131_v43 = vmul.f32 0.00086805556, %v3877_v50  ;;  %v4786_v44 = vunpack.c.l.b16 %v12619_v24  ;;  %v4787_v10 = vunpack.c.h.b16 %v12619_v24 }
 0x45b   : > { %v4130_v47 = vmul.f32 0.00086805556, %v3875_v49  ;;  %v4722_v1 = vunpack.c.l.b16 %v4458_v37  ;;  %v4723_v25 = vunpack.c.h.b16 %v4458_v37 }
 0x45c   : > { %3944 = vadd.xlane.f32.xlu1 %v3781_v17  ;;  %v5264_v48 = vrot.slane %v4786_v44, %v12624_v29  ;;  %v5268_v45 = vrot.slane %v4787_v10, %v12629_v5 }
 0x45d   : > { %v4450_v58 = vpack.c.bf16 %v4131_v43, %v4130_v47  ;;  %3942 = vadd.xlane.f32.xlu0 %v3780_v19  ;;  %v3913_v39 = vpop.xlane.xlu1 %3912  ;;  %v4948_v41 = vrot.slane %v4722_v1, %v12624_v29  ;;  %v4952_v6 = vrot.slane %v4723_v25, %v12629_v5  ;;  %v3846_v1 = vld [vmem:[#allocation3 + $0x320] sm:$0xff] }
 0x45e   : > { %v3911_v11 = vpop.xlane.xlu0 %3910  ;;  %v4149_v59 = vmul.f32 0.00086805556, %v3913_v39  ;;  %v5269_v54 = vsel %vm4845_vm0, %v5268_v45, %v5264_v48  ;;  %v3865_v48 = vld [vmem:[#allocation3 + $0x3b8] sm:$0xff]  ;;  %v3864_v45 = vld [vmem:[#allocation3 + $0x3b0] sm:$0xff] }
 0x45f   : > { %v4148_v13 = vmul.f32 0.00086805556, %v3911_v11  ;;  %v4953_v46 = vsel %vm4845_vm0, %v4952_v6, %v4948_v41  ;;  %v4706_v22 = vunpack.c.l.b16 %v4450_v58  ;;  %v4707_v40 = vunpack.c.h.b16 %v4450_v58 }
 0x460   : > { %4072 = vadd.xlane.f32.xlu1 %v3845_v18 }
 0x461   : > { %v4459_v21 = vpack.c.bf16 %v4149_v59, %v4148_v13  ;;  %4070 = vadd.xlane.f32.xlu0 %v3844_v23  ;;  %v4005_v62 = vpop.xlane.xlu1 %4004  ;;  %v4839_v31 = vrot.slane %v4706_v22, %v12624_v29  ;;  %v4844_v9 = vrot.slane %v4707_v40, %v12629_v5  ;;  %v4861_v23 = vadd.s32 4294967264, %v12615_v8 }
 0x462   : > { %v4003_v30 = vpop.xlane.xlu0 %4002  ;;  %v4195_v51 = vmul.f32 0.00086805556, %v4005_v62 }
 0x463   : > { %v4724_v4 = vunpack.c.l.b16 %v4459_v21  ;;  %v4725_v28 = vunpack.c.h.b16 %v4459_v21  ;;  %v4194_v15 = vmul.f32 0.00086805556, %v4003_v30  ;;  %v4846_v6 = vsel %vm4845_vm0, %v4844_v9, %v4839_v31 }
 0x464   : > { %3980 = vadd.xlane.f32.xlu1 %v3799_v57 }
 0x465   : > { %v4957_v52 = vrot.slane %v4724_v4, %v12632_v55  ;;  %v4962_v34 = vrot.slane %v4725_v28, %v12635_v0  ;;  %v4482_v20 = vpack.c.bf16 %v4195_v51, %v4194_v15  ;;  %3978 = vadd.xlane.f32.xlu0 %v3798_v7  ;;  %v4041_v61 = vpop.xlane.xlu1 %4040  ;;  %v4868_v7 = vadd.s32 4294967256, %v12615_v8  ;;  %v3801_v28 = vld [vmem:[#allocation3 + $0x1b8] sm:$0xff]  ;;  %v3800_v51 = vld [vmem:[#allocation3 + $0x1b0] sm:$0xff] }
 0x466   : > { %v4039_v38 = vpop.xlane.xlu0 %4038  ;;  %v4213_v63 = vmul.f32 0.00086805556, %v4041_v61 }
 0x467   : > { %v4958_v12 = vsel %vm4852_vm1, %v4957_v52, %v4953_v46  ;;  %v4212_v33 = vmul.f32 0.00086805556, %v4039_v38  ;;  %v4770_v49 = vunpack.c.l.b16 %v4482_v20  ;;  %v4771_v17 = vunpack.c.h.b16 %v4482_v20 }
 0x468   : > { %v12646_v14 = vsel %vm4859_vm2, %v4962_v34, %v4958_v12  ;;  %4108 = vadd.xlane.f32.xlu1 %v3863_v3  ;;  %v12672_v3 = vsub.s32 %v4861_v23, %v12617_v2 }
 0x469   : > { %v4491_v35 = vpack.c.bf16 %v4213_v63, %v4212_v33  ;;  %4106 = vadd.xlane.f32.xlu0 %v3862_v32  ;;  %v3881_v26 = vpop.xlane.xlu1 %3880  ;;  %v5185_v62 = vrot.slane %v4770_v49, %v12624_v29  ;;  %v5189_v30 = vrot.slane %v4771_v17, %v12629_v5  ;;  %v12675_v32 = vsub.s32 %v4868_v7, %v12617_v2  ;;  %v3784_v17 = vld [vmem:[#allocation3 + $0x130] sm:$0xff]  ;;  %v3803_v7 = vld [vmem:[#allocation3 + $0x1c8] sm:$0xff] }
 0x46a   : > { %v3879_v60 = vpop.xlane.xlu0 %3878  ;;  %v4133_v27 = vmul.f32 0.00086805556, %v3881_v26 }
 0x46b   : > { %v4132_v16 = vmul.f32 0.00086805556, %v3879_v60  ;;  %v4788_v24 = vunpack.c.l.b16 %v4491_v35  ;;  %v4789_v37 = vunpack.c.h.b16 %v4491_v35  ;;  %v5190_v38 = vsel %vm4845_vm0, %v5189_v30, %v5185_v62 }
 0x46c   : > { %3948 = vadd.xlane.f32.xlu1 %v3783_v42 }
 0x46d   : > { %v4451_v50 = vpack.c.bf16 %v4133_v27, %v4132_v16  ;;  %v5273_v19 = vrot.slane %v4788_v24, %v12632_v55  ;;  %v5278_v43 = vrot.slane %v4789_v37, %v12635_v0  ;;  %3946 = vadd.xlane.f32.xlu0 %v3782_v53  ;;  %v4009_v47 = vpop.xlane.xlu1 %4008 }
 0x46e   : > { %v4007_v36 = vpop.xlane.xlu0 %4006  ;;  %v4197_v39 = vmul.f32 0.00086805556, %v4009_v47 }
 0x46f   : > { %v4708_v25 = vunpack.c.l.b16 %v4451_v50  ;;  %v4709_v58 = vunpack.c.h.b16 %v4451_v50  ;;  %v4196_v11 = vmul.f32 0.00086805556, %v4007_v36  ;;  %v5274_v18 = vsel %vm4852_vm1, %v5273_v19, %v5269_v54  ;;  %v3785_v54 = vld [vmem:[#allocation3 + $0x138] sm:$0xff] }
 0x470   : > { %v12658_v59 = vsel %vm4859_vm2, %v5278_v43, %v5274_v18  ;;  %4076 = vadd.xlane.f32.xlu1 %v3847_v56 }
 0x471   : > { %v4851_v13 = vrot.slane %v4708_v25, %v12632_v55  ;;  %v4858_v21 = vrot.slane %v4709_v58, %v12635_v0  ;;  %v4483_v41 = vpack.c.bf16 %v4197_v39, %v4196_v11  ;;  %4074 = vadd.xlane.f32.xlu0 %v3846_v1  ;;  %v3917_v57 = vpop.xlane.xlu1 %3916  ;;  %v3849_v58 = vld [vmem:[#allocation3 + $0x338] sm:$0xff]  ;;  %v3848_v39 = vld [vmem:[#allocation3 + $0x330] sm:$0xff] }
 0x472   : > { %v3915_v4 = vpop.xlane.xlu0 %3914  ;;  %v4151_v52 = vmul.f32 0.00086805556, %v3917_v57 }
 0x473   : > { %v4853_v15 = vsel %vm4852_vm1, %v4851_v13, %v4846_v6  ;;  %v4772_v44 = vunpack.c.l.b16 %v4483_v41  ;;  %v4773_v10 = vunpack.c.h.b16 %v4483_v41  ;;  %v4150_v20 = vmul.f32 0.00086805556, %v3915_v4 }
 0x474   : > { %v4860_v34 = vsel %vm4859_vm2, %v4858_v21, %v4853_v15  ;;  %3984 = vadd.xlane.f32.xlu1 %v3801_v28 }
 0x475   : > { %v5194_v46 = vrot.slane %v4772_v44, %v12632_v55  ;;  %v5199_v61 = vrot.slane %v4773_v10, %v12635_v0  ;;  %v4460_v12 = vpack.c.bf16 %v4151_v52, %v4150_v20  ;;  %3982 = vadd.xlane.f32.xlu0 %v3800_v51  ;;  %v4045_v63 = vpop.xlane.xlu1 %4044 }
 0x476   : > { %v4043_v33 = vpop.xlane.xlu0 %4042  ;;  %v4215_v40 = vmul.f32 0.00086805556, %v4045_v63 }
 0x477   : > { %v5195_v22 = vsel %vm4852_vm1, %v5194_v46, %v5190_v38  ;;  %v4214_v35 = vmul.f32 0.00086805556, %v4043_v33  ;;  %v4726_v60 = vunpack.c.l.b16 %v4460_v12  ;;  %v4727_v42 = vunpack.c.h.b16 %v4460_v12  ;;  %v3867_v46 = vld [vmem:[#allocation3 + $0x3c8] sm:$0xff] }
 0x478   : > { %v5200_v26 = vsel %vm4859_vm2, %v5199_v61, %v5195_v22  ;;  %4112 = vadd.xlane.f32.xlu1 %v3865_v48  ;;  %v3866_v61 = vld [vmem:[#allocation3 + $0x3c0] sm:$0xff]  ;;  %v3787_v33 = vld [vmem:[#allocation3 + $0x148] sm:$0xff] }
 0x479   : > { %v4492_v53 = vpack.c.bf16 %v4215_v40, %v4214_v35  ;;  %v4967_v27 = vrot.slane %v4726_v60, %v12672_v3  ;;  %v4972_v16 = vrot.slane %v4727_v42, %v12675_v32  ;;  %4110 = vadd.xlane.f32.xlu0 %v3864_v45  ;;  %v3885_v24 = vpop.xlane.xlu1 %3884  ;;  %v3786_v48 = vld [vmem:[#allocation3 + $0x140] sm:$0xff]  ;;  %v3851_v40 = vld [vmem:[#allocation3 + $0x348] sm:$0xff] }
 0x47a   : > { %v3883_v37 = vpop.xlane.xlu0 %3882  ;;  %v4135_v50 = vmul.f32 0.00086805556, %v3885_v24  ;;  %v3850_v35 = vld [vmem:[#allocation3 + $0x340] sm:$0xff]  ;;  %v3869_v24 = vld [vmem:[#allocation3 + $0x3d8] sm:$0xff] }
 0x47b   : > { %v4790_v31 = vunpack.c.l.b16 %v4492_v53  ;;  %v4791_v9 = vunpack.c.h.b16 %v4492_v53  ;;  %v4134_v49 = vmul.f32 0.00086805556, %v3883_v37  ;;  %v4968_v19 = vsel %vm4866_vm3, %v4967_v27, %v12646_v14  ;;  %v3804_v53 = vld [vmem:[#allocation3 + $0x1d0] sm:$0xff] }
 0x47c   : > { %v12684_v43 = vsel %vm4873_vm4, %v4972_v16, %v4968_v19  ;;  %3952 = vadd.xlane.f32.xlu1 %v3785_v54  ;;  %v3868_v37 = vld [vmem:[#allocation3 + $0x3d0] sm:$0xff] }
 0x47d   : > { %v5283_v47 = vrot.slane %v4790_v31, %v12672_v3  ;;  %v5288_v36 = vrot.slane %v4791_v9, %v12675_v32  ;;  %v4452_v56 = vpack.c.bf16 %v4135_v50, %v4134_v49  ;;  %3950 = vadd.xlane.f32.xlu0 %v3784_v17  ;;  %v4013_v1 = vpop.xlane.xlu1 %4012  ;;  %v3789_v9 = vld [vmem:[#allocation3 + $0x158] sm:$0xff]  ;;  %v3788_v50 = vld [vmem:[#allocation3 + $0x150] sm:$0xff] }
 0x47e   : > { %v4011_v25 = vpop.xlane.xlu0 %4010  ;;  %v4199_v14 = vmul.f32 0.00086805556, %v4013_v1  ;;  %v9413_v49 = vld [vmem:[#allocation9 + $0x204] ss:$16 sps:$4 sm:$0xff]  }
 0x47f   : > { %v5284_v11 = vsel %vm4866_vm3, %v5283_v47, %v12658_v59  ;;  %v4710_v18 = vunpack.c.l.b16 %v4452_v56  ;;  %v4711_v23 = vunpack.c.h.b16 %v4452_v56  ;;  %v4198_v21 = vmul.f32 0.00086805556, %v4011_v25  ;;  %v3802_v59 = vld [vmem:[#allocation3 + $0x1c0] sm:$0xff]  ;;  %6192 = vmatprep.subr.bf16.mxu1 %v9413_v49  ;;  %v3853_v56 = vld [vmem:[#allocation3 + $0x358] sm:$0xff]  ;;  %v3852_v1 = vld [vmem:[#allocation3 + $0x350] sm:$0xff] }
 0x480   : > { %v12691_v13 = vsel %vm4873_vm4, %v5288_v36, %v5284_v11  ;;  %4080 = vadd.xlane.f32.xlu1 %v3849_v58  ;;  %v4875_v25 = vadd.s32 4294967248, %v12615_v8  ;;  %v4931_v49 = vadd.s32 4294967184, %v12615_v8 }
 0x481   : > { %v4865_v41 = vrot.slane %v4710_v18, %v12672_v3  ;;  %v4872_v6 = vrot.slane %v4711_v23, %v12675_v32  ;;  %v4484_v62 = vpack.c.bf16 %v4199_v14, %v4198_v21  ;;  %4078 = vadd.xlane.f32.xlu0 %v3848_v39  ;;  %v3921_v30 = vpop.xlane.xlu1 %3920  ;;  %v4882_v39 = vadd.s32 4294967240, %v12615_v8  ;;  %v3807_v23 = vld [vmem:[#allocation3 + $0x1e8] sm:$0xff] }
 0x482   : > { %v3919_v57 = vpop.xlane.xlu0 %3918  ;;  %v4153_v17 = vmul.f32 0.00086805556, %v3921_v30  ;;  %v4889_v30 = vadd.s32 4294967232, %v12615_v8 }
 0x483   : > { %v4867_v4 = vsel %vm4866_vm3, %v4865_v41, %v4860_v34  ;;  %v4774_v51 = vunpack.c.l.b16 %v4484_v62  ;;  %v4775_v15 = vunpack.c.h.b16 %v4484_v62  ;;  %v4152_v19 = vmul.f32 0.00086805556, %v3919_v57  ;;  %v3806_v41 = vld [vmem:[#allocation3 + $0x1e0] sm:$0xff] }
 0x484   : > { %v12697_v28 = vsel %vm4873_vm4, %v4872_v6, %v4867_v4  ;;  %3988 = vadd.xlane.f32.xlu1 %v3803_v7  ;;  %v12724_v6 = vsub.s32 %v4875_v25, %v12617_v2  ;;  %v4896_v57 = vadd.s32 4294967224, %v12615_v8  ;;  %v12729_v7 = vsub.s32 %v4882_v39, %v12617_v2 }
 0x485   : > { %v5204_v44 = vrot.slane %v4774_v51, %v12672_v3  ;;  %v5209_v10 = vrot.slane %v4775_v15, %v12675_v32  ;;  %3986 = vadd.xlane.f32.xlu0 %v3802_v59  ;;  %v4049_v52 = vpop.xlane.xlu1 %4048  ;;  %v4461_v58 = vpack.c.bf16 %v4153_v17, %v4152_v19  ;;  %v4903_v51 = vadd.s32 4294967216, %v12615_v8 }
 0x486   : > { %v4047_v20 = vpop.xlane.xlu0 %4046  ;;  %v4217_v14 = vmul.f32 0.00086805556, %v4049_v52  ;;  %v4938_v17 = vadd.s32 4294967176, %v12615_v8 }
 0x487   : > { %v5205_v38 = vsel %vm4866_vm3, %v5204_v44, %v5200_v26  ;;  %v3805_v26 = vld [vmem:[#allocation3 + $0x1d8] sm:$0xff]  ;;  %v4216_v21 = vmul.f32 0.00086805556, %v4047_v20  ;;  %v4728_v62 = vunpack.c.l.b16 %v4461_v58 }
 0x488   : > { %v12703_v34 = vsel %vm4873_vm4, %v5209_v10, %v5205_v38  ;;  %4116 = vadd.xlane.f32.xlu1 %v3867_v46  ;;  %v3871_v10 = vld [vmem:[#allocation3 + $0x3e8] sm:$0xff]  ;;  %v4729_v38 = vunpack.c.h.b16 %v4461_v58 }
 0x489   : > { %4114 = vadd.xlane.f32.xlu0 %v3866_v61  ;;  %v3889_v12 = vpop.xlane.xlu1 %3888  ;;  %v4493_v52 = vpack.c.bf16 %v4217_v14, %v4216_v21  ;;  %v3870_v61 = vld [vmem:[#allocation3 + $0x3e0] sm:$0xff] }
 0x48a   : > { %v3887_v63 = vpop.xlane.xlu0 %3886  ;;  %v4137_v4 = vmul.f32 0.00086805556, %v3889_v12  ;;  %v4977_v12 = vrot.slane %v4728_v62, %v12724_v6  ;;  %v4982_v19 = vrot.slane %v4729_v38, %v12729_v7 }
 0x48b   : > { %v4136_v59 = vmul.f32 0.00086805556, %v3887_v63  ;;  %v12738_v63 = vsub.s32 %v4889_v30, %v12617_v2  ;;  %v4793_v39 = vunpack.c.h.b16 %v4493_v52  ;;  %v3854_v30 = vld [vmem:[#allocation3 + $0x360] sm:$0xff] }
 0x48c   : > { %3956 = vadd.xlane.f32.xlu1 %v3787_v33  ;;  %v4978_v58 = vsel %vm4880_vm5, %v4977_v12, %v12684_v43 }
 0x48d   : > { %3954 = vadd.xlane.f32.xlu0 %v3786_v48  ;;  %v4017_v45 = vpop.xlane.xlu1 %4016 }
 0x48e   : > { %v4015_v22 = vpop.xlane.xlu0 %4014  ;;  %v4201_v20 = vmul.f32 0.00086805556, %v4017_v45  ;;  %v12745_v45 = vsub.s32 %v4903_v51, %v12617_v2 }
 0x48f   : > { %v4200_v46 = vmul.f32 0.00086805556, %v4015_v22 }
 0x490   : > { %4084 = vadd.xlane.f32.xlu1 %v3851_v40  ;;  %v12741_v40 = vsub.s32 %v4896_v57, %v12617_v2  ;;  %v12775_v57 = vsub.s32 %v4931_v49, %v12617_v2 }
 0x491   : > { %4082 = vadd.xlane.f32.xlu0 %v3850_v35  ;;  %v3925_v60 = vpop.xlane.xlu1 %3924  ;;  %v4910_v35 = vadd.s32 4294967208, %v12615_v8 }
 0x492   : > { %v3923_v42 = vpop.xlane.xlu0 %3922  ;;  %v4155_v33 = vmul.f32 0.00086805556, %v3925_v60  ;;  %v3791_v60 = vld [vmem:[#allocation3 + $0x168] sm:$0xff] }
 0x493   : > { %v4154_v48 = vmul.f32 0.00086805556, %v3923_v42  ;;  %v4917_v42 = vadd.s32 4294967200, %v12615_v8 }
 0x494   : > { %3992 = vadd.xlane.f32.xlu1 %v3805_v26  ;;  %v4453_v26 = vpack.c.bf16 %v4137_v4, %v4136_v59  ;;  %v12778_v4 = vsub.s32 %v4938_v17, %v12617_v2  ;;  %v4983_v59 = vsel %vm4887_vm6, %v4982_v19, %v4978_v58 }
 0x495   : > { %3990 = vadd.xlane.f32.xlu0 %v3804_v53  ;;  %v12705_v27 = vpop.xlane.xlu1 %4052  ;;  %v12768_v62 = vsub.s32 %v4917_v42, %v12617_v2  ;;  %v3809_v42 = vld [vmem:[#allocation3 + $0x1f8] sm:$0xff] }
 0x496   : > { %v12707_v16 = vpop.xlane.xlu0 %4050  ;;  %v4712_v21 = vunpack.c.l.b16 %v4453_v26  ;;  %v4713_v51 = vunpack.c.h.b16 %v4453_v26 }
 0x497   : > { %v4218_v25 = vmul.f32 0.00086805556, %v12707_v16  ;;  %v3855_v16 = vld [vmem:[#allocation3 + $0x368] sm:$0xff] }
 0x498   : > { %4120 = vadd.xlane.f32.xlu1 %v3869_v24  ;;  %v4924_v24 = vadd.s32 4294967192, %v12615_v8  ;;  %v12761_v8 = vsub.s32 %v4910_v35, %v12617_v2 }
 0x499   : > { %4118 = vadd.xlane.f32.xlu0 %v3868_v37  ;;  %v12709_v54 = vpop.xlane.xlu1 %3892  ;;  %v4792_v37 = vunpack.c.l.b16 %v4493_v52 }
 0x49a   : > { %v12711_v31 = vpop.xlane.xlu0 %3890  ;;  %v12771_v43 = vsub.s32 %v4924_v24, %v12617_v2 }
 0x49b   : > { %v4138_v14 = vmul.f32 0.00086805556, %v12711_v31 }
 0x49c   : > { %3960 = vadd.xlane.f32.xlu1 %v3789_v9  ;;  %v4485_v9 = vpack.c.bf16 %v4201_v20, %v4200_v46  ;;  %v5298_v20 = vrot.slane %v4793_v39, %v12729_v7 }
 0x49d   : > { %3958 = vadd.xlane.f32.xlu0 %v3788_v50  ;;  %v12713_v47 = vpop.xlane.xlu1 %4020  ;;  %v3790_v50 = vld [vmem:[#allocation3 + $0x160] sm:$0xff] }
 0x49e   : > { %v12715_v36 = vpop.xlane.xlu0 %4018  ;;  %v4776_v31 = vunpack.c.l.b16 %v4485_v9 }
 0x49f   : > { %v4202_v38 = vmul.f32 0.00086805556, %v12715_v36 }
 0x4a0   : > { %4088 = vadd.xlane.f32.xlu1 %v3853_v56  ;;  %v12752_v56 = vpack.c.bf16 %v4155_v33, %v4154_v48  ;;  %v4879_v33 = vrot.slane %v4712_v21, %v12724_v6  ;;  %v4777_v48 = vunpack.c.h.b16 %v4485_v9  ;;  %v4886_v9 = vrot.slane %v4713_v51, %v12729_v7 }
 0x4a1   : > { %4086 = vadd.xlane.f32.xlu0 %v3852_v1  ;;  %v12719_v11 = vpop.xlane.xlu1 %3928  ;;  %v4219_v1 = vmul.f32 0.00086805556, %v12705_v27 }
 0x4a2   : > { %v12721_v18 = vpop.xlane.xlu0 %3926  ;;  %v4157_v12 = vmul.f32 0.00086805556, %v12719_v11  ;;  %v4731_v11 = vunpack.c.h.b16 %v12752_v56 }
 0x4a3   : > { %v4494_v52 = vpack.c.bf16 %v4219_v1, %v4218_v25  ;;  %v4156_v35 = vmul.f32 0.00086805556, %v12721_v18 }
 0x4a4   : > { %3996 = vadd.xlane.f32.xlu1 %v3807_v23  ;;  %v4139_v23 = vmul.f32 0.00086805556, %v12709_v54  ;;  %v5293_v54 = vrot.slane %v4792_v37, %v12724_v6  ;;  %v5214_v37 = vrot.slane %v4776_v31, %v12724_v6 }
 0x4a5   : > { %3994 = vadd.xlane.f32.xlu0 %v3806_v41  ;;  %v12732_v15 = vpop.xlane.xlu1 %4056  ;;  %v4794_v49 = vunpack.c.l.b16 %v4494_v52  ;;  %v4795_v25 = vunpack.c.h.b16 %v4494_v52  ;;  %v12804_v58 = vpack.c.bf16 %v4157_v12, %v4156_v35 }
 0x4a6   : > { %v12734_v44 = vpop.xlane.xlu0 %4054  ;;  %v12783_v46 = vpack.c.bf16 %v4139_v23, %v4138_v14  ;;  %v5294_v24 = vsel %vm4880_vm5, %v5293_v54, %v12691_v13  ;;  %v3873_v23 = vld [vmem:[#allocation3 + $0x3f8] sm:$0xff]  ;;  %v5215_v14 = vsel %vm4880_vm5, %v5214_v37, %v12703_v34 }
 0x4a7   : > { %v4220_v36 = vmul.f32 0.00086805556, %v12734_v44  ;;  %v5219_v44 = vrot.slane %v4777_v48, %v12729_v7  ;;  %v5299_v54 = vsel %vm4887_vm6, %v5298_v20, %v5294_v24  ;;  %v5303_v31 = vrot.slane %v4794_v49, %v12738_v63 }
 0x4a8   : > { %4124 = vadd.xlane.f32.xlu1 %v3871_v10  ;;  %v4730_v10 = vunpack.c.l.b16 %v12752_v56  ;;  %v4714_v17 = vunpack.c.l.b16 %v12783_v46  ;;  %v5308_v20 = vrot.slane %v4795_v25, %v12741_v40 }
 0x4a9   : > { %4122 = vadd.xlane.f32.xlu0 %v3870_v61  ;;  %v3897_v22 = vpop.xlane.xlu1 %3896  ;;  %v4203_v61 = vmul.f32 0.00086805556, %v12713_v47  ;;  %v4221_v47 = vmul.f32 0.00086805556, %v12732_v15  ;;  %v4881_v15 = vsel %vm4880_vm5, %v4879_v33, %v12697_v28  ;;  %v4992_v28 = vrot.slane %v4731_v11, %v12741_v40 }
 0x4aa   : > { %v3895_v53 = vpop.xlane.xlu0 %3894  ;;  %v4987_v18 = vrot.slane %v4730_v10, %v12738_v63  ;;  %v4141_v1 = vmul.f32 0.00086805556, %v3897_v22  ;;  %v4893_v10 = vrot.slane %v4714_v17, %v12738_v63  ;;  %v4732_v33 = vunpack.c.l.b16 %v12804_v58 }
 0x4ab   : > { %v12799_v19 = vpack.c.bf16 %v4203_v61, %v4202_v38  ;;  %v4140_v13 = vmul.f32 0.00086805556, %v3895_v53  ;;  %v4495_v21 = vpack.c.bf16 %v4221_v47, %v4220_v36  ;;  %v4888_v61 = vsel %vm4887_vm6, %v4886_v9, %v4881_v15 }
 0x4ac   : > { %3964 = vadd.xlane.f32.xlu1 %v3791_v60  ;;  %v4988_v51 = vsel %vm4894_vm7, %v4987_v18, %v4983_v59  ;;  %v5220_v38 = vsel %vm4887_vm6, %v5219_v44, %v5215_v14  ;;  %v3793_v59 = vld [vmem:[#allocation3 + $0x178] sm:$0xff]  ;;  %v5304_v37 = vsel %vm4894_vm7, %v5303_v31, %v5299_v54  ;;  %v4733_v11 = vunpack.c.h.b16 %v12804_v58 }
 0x4ad   : > { %3962 = vadd.xlane.f32.xlu0 %v3790_v50  ;;  %v12763_v41 = vpop.xlane.xlu1 %4024  ;;  %v3808_v50 = vld [vmem:[#allocation3 + $0x1f0] sm:$0xff]  ;;  %v4778_v52 = vunpack.c.l.b16 %v12799_v19  ;;  %v12815_v34 = vpack.c.bf16 %v4141_v1, %v4140_v13  ;;  %v4796_v12 = vunpack.c.l.b16 %v4495_v21  ;;  %v4993_v24 = vsel %vm4901_vm8, %v4992_v28, %v4988_v51  ;;  %v3857_v44 = vld [vmem:[#allocation3 + $0x378] sm:$0xff] }
 0x4ae   : > { %v12765_v27 = vpop.xlane.xlu0 %4022  ;;  %v4779_v36 = vunpack.c.h.b16 %v12799_v19  ;;  %v4997_v49 = vrot.slane %v4732_v33, %v12745_v45  ;;  %v4797_v17 = vunpack.c.h.b16 %v4495_v21  ;;  %v4205_v1 = vmul.f32 0.00086805556, %v12763_v41 }
 0x4af   : > { %v5224_v9 = vrot.slane %v4778_v52, %v12738_v63  ;;  %v4716_v18 = vunpack.c.l.b16 %v12815_v34  ;;  %v4204_v13 = vmul.f32 0.00086805556, %v12765_v27  ;;  %v5309_v25 = vsel %vm4901_vm8, %v5308_v20, %v5304_v37 }
 0x4b0   : > { %4092 = vadd.xlane.f32.xlu1 %v3855_v16  ;;  %v3872_v16 = vld [vmem:[#allocation3 + $0x3f0] sm:$0xff]  ;;  %v5229_v21 = vrot.slane %v4779_v36, %v12741_v40  ;;  %v4998_v28 = vsel %vm4908_vm9, %v4997_v49, %v4993_v24  ;;  %v5318_v31 = vrot.slane %v4797_v17, %v12761_v8 }
 0x4b1   : > { %4090 = vadd.xlane.f32.xlu0 %v3854_v30  ;;  %v3933_v26 = vpop.xlane.xlu1 %3932  ;;  %v4715_v30 = vunpack.c.h.b16 %v12783_v46  ;;  %v5225_v27 = vsel %vm4894_vm7, %v5224_v9, %v5220_v38  ;;  %v4907_v54 = vrot.slane %v4716_v18, %v12745_v45  ;;  %v3443_v18 = vld [vmem:[#allocation2 + $0x288] sm:$0xff] }
 0x4b2   : > { %v3931_v60 = vpop.xlane.xlu0 %3930  ;;  %v4159_v22 = vmul.f32 0.00086805556, %v3933_v26 }
 0x4b3   : > { %v4158_v53 = vmul.f32 0.00086805556, %v3931_v60  ;;  %v4900_v47 = vrot.slane %v4715_v30, %v12741_v40  ;;  %v12842_v30 = vpack.c.bf16 %v4205_v1, %v4204_v13  ;;  %v3442_v13 = vld [vmem:[#allocation2 + $0x280] sm:$0xff] }
 0x4b4   : > { %4000 = vadd.xlane.f32.xlu1 %v3809_v42  ;;  %v3792_v42 = vld [vmem:[#allocation3 + $0x170] sm:$0xff] }
 0x4b5   : > { %3998 = vadd.xlane.f32.xlu0 %v3808_v50  ;;  %v4061_v56 = vpop.xlane.xlu1 %4060  ;;  %v4464_v35 = vpack.c.bf16 %v4159_v22, %v4158_v53  ;;  %v4895_v50 = vsel %vm4894_vm7, %v4893_v10, %v4888_v61  ;;  %v5002_v53 = vrot.slane %v4733_v11, %v12761_v8  ;;  %v3379_v61 = vld [vmem:[#allocation2 + $0x88] sm:$0xff]  ;;  %v4780_v37 = vunpack.c.l.b16 %v12842_v30 }
 0x4b6   : > { %v4059_v39 = vpop.xlane.xlu0 %4058  ;;  %v4223_v26 = vmul.f32 0.00086805556, %v4061_v56  ;;  %v5313_v56 = vrot.slane %v4796_v12, %v12745_v45  ;;  %v4902_v14 = vsel %vm4901_vm8, %v4900_v47, %v4895_v50 }
 0x4b7   : > { %v4222_v60 = vmul.f32 0.00086805556, %v4059_v39  ;;  %v4734_v39 = vunpack.c.l.b16 %v4464_v35  ;;  %v4735_v51 = vunpack.c.h.b16 %v4464_v35  ;;  %v5003_v35 = vsel %vm4915_vm10, %v5002_v53, %v4998_v28 }
 0x4b8   : > { %4128 = vadd.xlane.f32.xlu1 %v3873_v23  ;;  %v3856_v23 = vld [vmem:[#allocation3 + $0x370] sm:$0xff]  ;;  %v5314_v38 = vsel %vm4908_vm9, %v5313_v56, %v5309_v25 }
 0x4b9   : > { %4126 = vadd.xlane.f32.xlu0 %v3872_v16  ;;  %v3901_v46 = vpop.xlane.xlu1 %3900  ;;  %v4496_v58 = vpack.c.bf16 %v4223_v26, %v4222_v60  ;;  %v4717_v16 = vunpack.c.h.b16 %v12815_v34  ;;  %v5007_v20 = vrot.slane %v4734_v39, %v12768_v62  ;;  %v5230_v60 = vsel %vm4901_vm8, %v5229_v21, %v5225_v27 }
 0x4ba   : > { %v3899_v48 = vpop.xlane.xlu0 %3898  ;;  %v4143_v22 = vmul.f32 0.00086805556, %v3901_v46  ;;  %v3378_v46 = vld [vmem:[#allocation2 + $0x80] sm:$0xff]  ;;  %v5012_v47 = vrot.slane %v4735_v51, %v12771_v43  ;;  %v5319_v49 = vsel %vm4915_vm10, %v5318_v31, %v5314_v38  ;;  %v5234_v21 = vrot.slane %v4780_v37, %v12745_v45 }
 0x4bb   : > { %v4142_v41 = vmul.f32 0.00086805556, %v3899_v48  ;;  %v4798_v33 = vunpack.c.l.b16 %v4496_v58  ;;  %v4914_v24 = vrot.slane %v4717_v16, %v12761_v8  ;;  %v4799_v36 = vunpack.c.h.b16 %v4496_v58  ;;  %v3363_v16 = vld [vmem:[#allocation2 + $0x8] sm:$0xff] }
 0x4bc   : > { %3968 = vadd.xlane.f32.xlu1 %v3793_v59  ;;  %v4781_v58 = vunpack.c.h.b16 %v12842_v30  ;;  %v3362_v30 = vld [vmem:[#allocation2] sm:$0xff] }
 0x4bd   : > { %3966 = vadd.xlane.f32.xlu0 %v3792_v42  ;;  %v4029_v15 = vpop.xlane.xlu1 %4028  ;;  %v12846_v48 = vpack.c.bf16 %v4143_v22, %v4142_v41  ;;  %v4909_v42 = vsel %vm4908_vm9, %v4907_v54, %v4902_v14  ;;  %v5328_v22 = vrot.slane %v4799_v36, %v12771_v43 }
 0x4be   : > { %v4027_v19 = vpop.xlane.xlu0 %4026  ;;  %v4207_v59 = vmul.f32 0.00086805556, %v4029_v15  ;;  %v5008_v15 = vsel %vm4922_vm11, %v5007_v20, %v5003_v35  ;;  %v4916_v39 = vsel %vm4915_vm10, %v4914_v24, %v4909_v42  ;;  %v3381_v24 = vld [vmem:[#allocation2 + $0x98] sm:$0xff] }
 0x4bf   : > { %v4206_v12 = vmul.f32 0.00086805556, %v4027_v19  ;;  %v5323_v19 = vrot.slane %v4798_v33, %v12768_v62  ;;  %v5013_v54 = vsel %vm4929_vm12, %v5012_v47, %v5008_v15 }
 0x4c0   : > { %4096 = vadd.xlane.f32.xlu1 %v3857_v44  ;;  %v4718_v44 = vunpack.c.l.b16 %v12846_v48 }
 0x4c1   : > { %4094 = vadd.xlane.f32.xlu0 %v3856_v23  ;;  %v3937_v10 = vpop.xlane.xlu1 %3936  ;;  %v4488_v25 = vpack.c.bf16 %v4207_v59, %v4206_v12  ;;  %v5324_v20 = vsel %vm4922_vm11, %v5323_v19, %v5319_v49  ;;  %v5235_v12 = vsel %vm4908_vm9, %v5234_v21, %v5230_v60 }
 0x4c2   : > { %v3935_v52 = vpop.xlane.xlu0 %3934  ;;  %v4161_v34 = vmul.f32 0.00086805556, %v3937_v10 }
 0x4c3   : > { %v4160_v26 = vmul.f32 0.00086805556, %v3935_v52  ;;  %v4719_v52 = vunpack.c.h.b16 %v12846_v48  ;;  %v4782_v38 = vunpack.c.l.b16 %v4488_v25  ;;  %v4783_v35 = vunpack.c.h.b16 %v4488_v25 }
 0x4c4   : > { %3524 = vmax.xlane.f32.xlu1 %v3379_v61  ;;  %v4921_v61 = vrot.slane %v4718_v44, %v12768_v62 }
 0x4c5   : > { %v4465_v50 = vpack.c.bf16 %v4161_v34, %v4160_v26  ;;  %3522 = vmax.xlane.f32.xlu0 %v3378_v46  ;;  %v4065_v9 = vpop.xlane.xlu1 %4064  ;;  %v5239_v26 = vrot.slane %v4781_v58, %v12761_v8  ;;  %v4928_v49 = vrot.slane %v4719_v52, %v12771_v43  ;;  %v5244_v60 = vrot.slane %v4782_v38, %v12768_v62  ;;  %v3445_v38 = vld [vmem:[#allocation2 + $0x298] sm:$0xff] }
 0x4c6   : > { %v4063_v11 = vpop.xlane.xlu0 %4062  ;;  %v4225_v17 = vmul.f32 0.00086805556, %v4065_v9  ;;  %v3380_v9 = vld [vmem:[#allocation2 + $0x90] sm:$0xff]  ;;  %v5249_v25 = vrot.slane %v4783_v35, %v12771_v43 }
 0x4c7   : > { %v4224_v1 = vmul.f32 0.00086805556, %v4063_v11  ;;  %v4736_v56 = vunpack.c.l.b16 %v4465_v50  ;;  %v4737_v23 = vunpack.c.h.b16 %v4465_v50  ;;  %v5329_v11 = vsel %vm4929_vm12, %v5328_v22, %v5324_v20 }
 0x4c8   : > { %3652 = vmax.xlane.f32.xlu1 %v3443_v18  ;;  %v4923_v18 = vsel %vm4922_vm11, %v4921_v61, %v4916_v39  ;;  %v5240_v44 = vsel %vm4915_vm10, %v5239_v26, %v5235_v12 }
 0x4c9   : > { %v4497_v14 = vpack.c.bf16 %v4225_v17, %v4224_v1  ;;  %v5017_v41 = vrot.slane %v4736_v56, %v12775_v57  ;;  %3650 = vmax.xlane.f32.xlu0 %v3442_v13  ;;  %v3905_v27 = vpop.xlane.xlu1 %3904  ;;  %v5022_v33 = vrot.slane %v4737_v23, %v12778_v4 }
 0x4ca   : > { %v3903_v53 = vpop.xlane.xlu0 %3902  ;;  %v4145_v51 = vmul.f32 0.00086805556, %v3905_v27 }
 0x4cb   : > { %v4800_v28 = vunpack.c.l.b16 %v4497_v14  ;;  %v4801_v31 = vunpack.c.h.b16 %v4497_v14  ;;  %v4144_v10 = vmul.f32 0.00086805556, %v3903_v53  ;;  %v5018_v37 = vsel %vm4936_vm13, %v5017_v41, %v5013_v54  ;;  %v3427_v14 = vld [vmem:[#allocation2 + $0x208] sm:$0xff]  ;;  %v3426_v54 = vld [vmem:[#allocation2 + $0x200] sm:$0xff] }
 0x4cc   : > { %3492 = vmax.xlane.f32.xlu1 %v3363_v16  ;;  %v5023_v15 = vsel %vm4943_vm14, %v5022_v33, %v5018_v37  ;;  %v5245_v53 = vsel %vm4922_vm11, %v5244_v60, %v5240_v44 }
 0x4cd   : > { %v5333_v34 = vrot.slane %v4800_v28, %v12775_v57  ;;  %v5338_v46 = vrot.slane %v4801_v31, %v12778_v4  ;;  %v4457_v59 = vpack.c.bf16 %v4145_v51, %v4144_v10  ;;  %3490 = vmax.xlane.f32.xlu0 %v3362_v30  ;;  %v4033_v48 = vpop.xlane.xlu1 %4032  ;;  %v4930_v28 = vsel %vm4929_vm12, %v4928_v49, %v4923_v18  ;;  %v3364_v18 = vld [vmem:[#allocation2 + $0x10] sm:$0xff] }
 0x4ce   : > { %v4031_v42 = vpop.xlane.xlu0 %4030  ;;  %v4209_v36 = vmul.f32 0.00086805556, %v4033_v48  ;;  %v9416_v49 = vld [vmem:[#allocation9 + $0x224] ss:$16 sps:$4 sm:$0xff]  }
 0x4cf   : > { %v4720_v47 = vunpack.c.l.b16 %v4457_v59  ;;  %v4208_v50 = vmul.f32 0.00086805556, %v4031_v42  ;;  %v5334_v17 = vsel %vm4936_vm13, %v5333_v34, %v5329_v11  ;;  %v4721_v1 = vunpack.c.h.b16 %v4457_v59  ;;  %v3444_v59 = vld [vmem:[#allocation2 + $0x290] sm:$0xff] }
 0x4d0   : > { %3528 = vmax.xlane.f32.xlu1 %v3381_v24  ;;  %v5339_v19 = vsel %vm4943_vm14, %v5338_v46, %v5334_v17  ;;  %v5250_v46 = vsel %vm4929_vm12, %v5249_v25, %v5245_v53 }
 0x4d1   : > { %v4489_v13 = vpack.c.bf16 %v4209_v36, %v4208_v50  ;;  %v4935_v56 = vrot.slane %v4720_v47, %v12775_v57  ;;  %3526 = vmax.xlane.f32.xlu0 %v3380_v9  ;;  %v3973_v39 = vpop.xlane.xlu1 %3972  ;;  %v5500_v23 = vsel %vm5498_vm15, %v5339_v19, %v5023_v15  ;;  %v4942_v31 = vrot.slane %v4721_v1, %v12778_v4  ;;  %v3365_v47 = vld [vmem:[#allocation2 + $0x18] sm:$0xff]  ;;  %v9411_v50 = vld [vmem:[#allocation9 + $0x200] ss:$16 sps:$4 sm:$0xff]   ;;  %v3411_v19 = vld [vmem:[#allocation2 + $0x188] sm:$0xff] }
 0x4d2   : > { %v3971_v58 = vpop.xlane.xlu0 %3970  ;;  %v4179_v41 = vmul.f32 0.00086805556, %v3973_v39  ;;  %v5504_v16 = vpack.c.b16 %v5500_v23, %v5500_v23  ;;  %v3410_v39 = vld [vmem:[#allocation2 + $0x180] sm:$0xff] }
 0x4d3   : > { %v4784_v21 = vunpack.c.l.b16 %v4489_v13  ;;  %v4785_v22 = vunpack.c.h.b16 %v4489_v13  ;;  %v4178_v27 = vmul.f32 0.00086805556, %v3971_v58  ;;  %v4937_v20 = vsel %vm4936_vm13, %v4935_v56, %v4930_v28  ;;  %v9414_v56 = vld [vmem:[#allocation9 + $0x220] ss:$16 sps:$4 sm:$0xff]   ;;  %v9419_v58 = vld [vmem:[#allocation9 + $0x244] ss:$16 sps:$4 sm:$0xff]  }
 0x4d4   : > { %3620 = vmax.xlane.f32.xlu1 %v3427_v14  ;;  %6183 = vmatprep.mubr.bf16.mxu1 %v5504_v16  ;;  %v4944_v35 = vsel %vm4943_vm14, %v4942_v31, %v4937_v20  ;;  %v9417_v31 = vld [vmem:[#allocation9 + $0x240] ss:$16 sps:$4 sm:$0xff]  }
 0x4d5   : > { %v5254_v51 = vrot.slane %v4784_v21, %v12775_v57  ;;  %v5259_v10 = vrot.slane %v4785_v22, %v12778_v4  ;;  %v4474_v30 = vpack.c.bf16 %v4179_v41, %v4178_v27  ;;  %6265 = vmatprep.mubr.bf16.mxu0 %v5504_v16  ;;  %v4101_v52 = vpop.xlane.xlu1 %4100  ;;  %3618 = vmax.xlane.f32.xlu0 %v3426_v54  ;;  %v3429_v27 = vld [vmem:[#allocation2 + $0x218] sm:$0xff] }
 0x4d6   : > { %v4099_v61 = vpop.xlane.xlu0 %4098  ;;  %v4243_v33 = vmul.f32 0.00086805556, %v4101_v52 }
 0x4d7   : > { %v4242_v34 = vmul.f32 0.00086805556, %v4099_v61  ;;  %v5255_v12 = vsel %vm4936_vm13, %v5254_v51, %v5250_v46  ;;  %v4754_v60 = vunpack.c.l.b16 %v4474_v30  ;;  %v4755_v17 = vunpack.c.h.b16 %v4474_v30  ;;  %v9422_v30 = vld [vmem:[#allocation9 + $0x264] ss:$16 sps:$4 sm:$0xff]  }
 0x4d8   : > { %3656 = vmax.xlane.f32.xlu1 %v3445_v38  ;;  %v5260_v48 = vsel %vm4943_vm14, %v5259_v10, %v5255_v12  ;;  %v3428_v10 = vld [vmem:[#allocation2 + $0x210] sm:$0xff] }
 0x4d9   : > { %v12892_v26 = vpack.c.bf16 %v4243_v33, %v4242_v34  ;;  %v3941_v42 = vpop.xlane.xlu1 %3940  ;;  %v5499_v37 = vsel %vm5498_vm15, %v5260_v48, %v4944_v35  ;;  %3654 = vmax.xlane.f32.xlu0 %v3444_v59  ;;  %v5106_v14 = vrot.slane %v4754_v60, %v12624_v29  ;;  %v5110_v21 = vrot.slane %v4755_v17, %v12629_v5  ;;  %v3475_v59 = vld [vmem:[#allocation2 + $0x388] sm:$0xff]  ;;  %v9420_v48 = vld [vmem:[#allocation9 + $0x260] ss:$16 sps:$4 sm:$0xff]  }
 0x4da   : > { %v3939_v24 = vpop.xlane.xlu0 %3938  ;;  %v4163_v36 = vmul.f32 0.00086805556, %v3941_v42  ;;  %v5503_v11 = vpack.c.b16 %v5499_v37, %v5499_v37  ;;  %v9425_v37 = vld [vmem:[#allocation9 + $0x284] ss:$16 sps:$4 sm:$0xff]  }
 0x4db   : > { %v4162_v9 = vmul.f32 0.00086805556, %v3939_v24  ;;  %v4818_v51 = vunpack.c.l.b16 %v12892_v26  ;;  %v4819_v52 = vunpack.c.h.b16 %v12892_v26  ;;  %v5111_v33 = vsel %vm4845_vm0, %v5110_v21, %v5106_v14  ;;  %v3474_v24 = vld [vmem:[#allocation2 + $0x380] sm:$0xff] }
 0x4dc   : > { %3496 = vmax.xlane.f32.xlu1 %v3365_v47  ;;  %6184 = vmatmul.mubr.bf16.vlgmr.msra.gmra.mrb[0].mxu1 %v5503_v11 }
 0x4dd   : > { %v12897_v1 = vpack.c.bf16 %v4163_v36, %v4162_v9  ;;  %6266 = vmatmul.mubr.bf16.vlgmr.msra.gmra.mrb[0].mxu0 %v5503_v11  ;;  %v3977_v13 = vpop.xlane.xlu1 %3976  ;;  %3494 = vmax.xlane.f32.xlu0 %v3364_v18  ;;  %v5422_v47 = vrot.slane %v4818_v51, %v12624_v29  ;;  %v5426_v36 = vrot.slane %v4819_v52, %v12629_v5  ;;  %v3383_v18 = vld [vmem:[#allocation2 + $0xa8] sm:$0xff]  ;;  %v3394_v52 = vld [vmem:[#allocation2 + $0x100] sm:$0xff] }
 0x4de   : > { %v3975_v15 = vpop.xlane.xlu0 %3974  ;;  %v4181_v44 = vmul.f32 0.00086805556, %v3977_v13  ;;  %6193 = vmatpush1.bf16.msra.mxu1 %v9411_v50  ;;  %v9423_v13 = vld [vmem:[#allocation9 + $0x280] ss:$16 sps:$4 sm:$0xff]  }
 0x4df   : > { %v4180_v25 = vmul.f32 0.00086805556, %v3975_v15  ;;  %6194 = vmatprep.subr.bf16.mxu1 %v9416_v49  ;;  %v4738_v50 = vunpack.c.l.b16 %v12897_v1  ;;  %v4739_v49 = vunpack.c.h.b16 %v12897_v1 }
 0x4e0   : > { %3588 = vmax.xlane.f32.xlu1 %v3411_v19 }
 0x4e1   : > { %v4475_v23 = vpack.c.bf16 %v4181_v44, %v4180_v25  ;;  %v4069_v22 = vpop.xlane.xlu1 %4068  ;;  %3586 = vmax.xlane.f32.xlu0 %v3410_v39  ;;  %v3382_v25 = vld [vmem:[#allocation2 + $0xa0] sm:$0xff]  ;;  %v5427_v39 = vsel %vm4845_vm0, %v5426_v36, %v5422_v47 }
 0x4e2   : > { %v4067_v41 = vpop.xlane.xlu0 %4066  ;;  %v4227_v54 = vmul.f32 0.00086805556, %v4069_v22  ;;  %6195 = vmatpush1.bf16.msra.mxu1 %v9414_v56  ;;  %v9428_v56 = vld [vmem:[#allocation9 + $0x2a4] ss:$16 sps:$4 sm:$0xff]   ;;  %v3395_v22 = vld [vmem:[#allocation2 + $0x108] sm:$0xff] }
 0x4e3   : > { %v4756_v53 = vunpack.c.l.b16 %v4475_v23  ;;  %v4757_v16 = vunpack.c.h.b16 %v4475_v23  ;;  %v4226_v28 = vmul.f32 0.00086805556, %v4067_v41  ;;  %6196 = vmatprep.subr.bf16.mxu1 %v9419_v58  ;;  %v5027_v58 = vrot.slane %v4738_v50, %v12624_v29 }
 0x4e4   : > { %3624 = vmax.xlane.f32.xlu1 %v3429_v27  ;;  %v5031_v41 = vrot.slane %v4739_v49, %v12629_v5 }
 0x4e5   : > { %v5115_v61 = vrot.slane %v4756_v53, %v12632_v55  ;;  %v5120_v38 = vrot.slane %v4757_v16, %v12635_v0  ;;  %v12905_v20 = vpack.c.bf16 %v4227_v54, %v4226_v28  ;;  %v4105_v34 = vpop.xlane.xlu1 %4104  ;;  %3622 = vmax.xlane.f32.xlu0 %v3428_v10  ;;  %v9426_v28 = vld [vmem:[#allocation9 + $0x2a0] ss:$16 sps:$4 sm:$0xff]  }
 0x4e6   : > { %v4103_v46 = vpop.xlane.xlu0 %4102  ;;  %v4245_v35 = vmul.f32 0.00086805556, %v4105_v34  ;;  %6197 = vmatpush1.bf16.msra.mxu1 %v9417_v31 }
 0x4e7   : > { %v5116_v12 = vsel %vm4852_vm1, %v5115_v61, %v5111_v33  ;;  %v4244_v42 = vmul.f32 0.00086805556, %v4103_v46  ;;  %6198 = vmatprep.subr.bf16.mxu1 %v9422_v30  ;;  %v4802_v27 = vunpack.c.l.b16 %v12905_v20  ;;  %v4803_v53 = vunpack.c.h.b16 %v12905_v20  ;;  %v9431_v61 = vld [vmem:[#allocation9 + $0x2c4] ss:$16 sps:$4 sm:$0xff]  }
 0x4e8   : > { %v12910_v26 = vsel %vm4859_vm2, %v5120_v38, %v5116_v12  ;;  %3716 = vmax.xlane.f32.xlu1 %v3475_v59  ;;  %v3413_v59 = vld [vmem:[#allocation2 + $0x198] sm:$0xff]  ;;  %v5032_v12 = vsel %vm4845_vm0, %v5031_v41, %v5027_v58 }
 0x4e9   : > { %v4507_v9 = vpack.c.bf16 %v4245_v35, %v4244_v42  ;;  %v3945_v11 = vpop.xlane.xlu1 %3944  ;;  %3714 = vmax.xlane.f32.xlu0 %v3474_v24  ;;  %v5343_v35 = vrot.slane %v4802_v27, %v12624_v29 }
 0x4ea   : > { %v4165_v60 = vmul.f32 0.00086805556, %v3945_v11  ;;  %v3943_v17 = vpop.xlane.xlu0 %3942  ;;  %6199 = vmatpush1.bf16.msra.mxu1 %v9420_v48  ;;  %v5347_v48 = vrot.slane %v4803_v53, %v12629_v5  ;;  %v3412_v11 = vld [vmem:[#allocation2 + $0x190] sm:$0xff] }
 0x4eb   : > { %v4820_v15 = vunpack.c.l.b16 %v4507_v9  ;;  %v4821_v19 = vunpack.c.h.b16 %v4507_v9  ;;  %v4164_v44 = vmul.f32 0.00086805556, %v3943_v17  ;;  %6200 = vmatprep.subr.bf16.mxu1 %v9425_v37  ;;  %v9429_v37 = vld [vmem:[#allocation9 + $0x2c0] ss:$16 sps:$4 sm:$0xff]  }
 0x4ec   : > { %3532 = vmax.xlane.f32.xlu1 %v3383_v18  ;;  %v9434_v18 = vld [vmem:[#allocation9 + $0x2e4] ss:$16 sps:$4 sm:$0xff]  }
 0x4ed   : > { %v5431_v23 = vrot.slane %v4820_v15, %v12632_v55  ;;  %v5436_v1 = vrot.slane %v4821_v19, %v12635_v0  ;;  %v4467_v14 = vpack.c.bf16 %v4165_v60, %v4164_v44  ;;  %v4073_v21 = vpop.xlane.xlu1 %4072  ;;  %3530 = vmax.xlane.f32.xlu0 %v3382_v25  ;;  %v3447_v19 = vld [vmem:[#allocation2 + $0x2a8] sm:$0xff]  ;;  %v5348_v44 = vsel %vm4845_vm0, %v5347_v48, %v5343_v35 }
 0x4ee   : > { %v4229_v16 = vmul.f32 0.00086805556, %v4073_v21  ;;  %v4071_v54 = vpop.xlane.xlu0 %4070  ;;  %6201 = vmatpush1.bf16.msra.mxu1 %v9423_v13  ;;  %v3446_v21 = vld [vmem:[#allocation2 + $0x2a0] sm:$0xff] }
 0x4ef   : > { %v5432_v31 = vsel %vm4852_vm1, %v5431_v23, %v5427_v39  ;;  %v4740_v51 = vunpack.c.l.b16 %v4467_v14  ;;  %v4741_v10 = vunpack.c.h.b16 %v4467_v14  ;;  %v4228_v30 = vmul.f32 0.00086805556, %v4071_v54  ;;  %6202 = vmatprep.subr.bf16.mxu1 %v9428_v56  ;;  %v9432_v39 = vld [vmem:[#allocation9 + $0x2e0] ss:$16 sps:$4 sm:$0xff]  }
 0x4f0   : > { %v12925_v38 = vsel %vm4859_vm2, %v5436_v1, %v5432_v31  ;;  %3556 = vmax.xlane.f32.xlu1 %v3395_v22  ;;  %v9437_v22 = vld [vmem:[#allocation9 + $0x304] ss:$16 sps:$4 sm:$0xff]  }
 0x4f1   : > { %v5036_v33 = vrot.slane %v4740_v51, %v12632_v55  ;;  %v5041_v20 = vrot.slane %v4741_v10, %v12635_v0  ;;  %v4499_v34 = vpack.c.bf16 %v4229_v16, %v4228_v30  ;;  %v3981_v46 = vpop.xlane.xlu1 %3980  ;;  %3554 = vmax.xlane.f32.xlu0 %v3394_v52  ;;  %v9435_v10 = vld [vmem:[#allocation9 + $0x300] ss:$16 sps:$4 sm:$0xff]  }
 0x4f2   : > { %v4183_v42 = vmul.f32 0.00086805556, %v3981_v46  ;;  %v3979_v24 = vpop.xlane.xlu0 %3978  ;;  %6203 = vmatpush1.bf16.msra.mxu1 %v9426_v28  ;;  %v3459_v28 = vld [vmem:[#allocation2 + $0x308] sm:$0xff] }
 0x4f3   : > { %v5037_v47 = vsel %vm4852_vm1, %v5036_v33, %v5032_v12  ;;  %v4804_v36 = vunpack.c.l.b16 %v4499_v34  ;;  %v4805_v50 = vunpack.c.h.b16 %v4499_v34  ;;  %v4182_v9 = vmul.f32 0.00086805556, %v3979_v24  ;;  %6204 = vmatprep.subr.bf16.mxu1 %v9431_v61  ;;  %v9440_v34 = vld [vmem:[#allocation9 + $0x324] ss:$16 sps:$4 sm:$0xff]  }
 0x4f4   : > { %v12934_v49 = vsel %vm4859_vm2, %v5041_v20, %v5037_v47  ;;  %3592 = vmax.xlane.f32.xlu1 %v3413_v59  ;;  %v3458_v20 = vld [vmem:[#allocation2 + $0x300] sm:$0xff] }
 0x4f5   : > { %v5352_v60 = vrot.slane %v4804_v36, %v12632_v55  ;;  %v5357_v17 = vrot.slane %v4805_v50, %v12635_v0  ;;  %v4476_v13 = vpack.c.bf16 %v4183_v42, %v4182_v9  ;;  %v4109_v15 = vpop.xlane.xlu1 %4108  ;;  %3590 = vmax.xlane.f32.xlu0 %v3412_v11  ;;  %v3477_v42 = vld [vmem:[#allocation2 + $0x398] sm:$0xff]  ;;  %v3476_v11 = vld [vmem:[#allocation2 + $0x390] sm:$0xff] }
 0x4f6   : > { %v4247_v25 = vmul.f32 0.00086805556, %v4109_v15  ;;  %v4107_v56 = vpop.xlane.xlu0 %4106  ;;  %6205 = vmatpush1.bf16.msra.mxu1 %v9429_v37  ;;  %v9438_v37 = vld [vmem:[#allocation9 + $0x320] ss:$16 sps:$4 sm:$0xff]  }
 0x4f7   : > { %v5353_v58 = vsel %vm4852_vm1, %v5352_v60, %v5348_v44  ;;  %v4758_v23 = vunpack.c.l.b16 %v4476_v13  ;;  %v4759_v1 = vunpack.c.h.b16 %v4476_v13  ;;  %v4246_v14 = vmul.f32 0.00086805556, %v4107_v56  ;;  %6206 = vmatprep.subr.bf16.mxu1 %v9434_v18  ;;  %v9443_v18 = vld [vmem:[#allocation9 + $0x344] ss:$16 sps:$4 sm:$0xff]   ;;  %v3367_v44 = vld [vmem:[#allocation2 + $0x28] sm:$0xff] }
 0x4f8   : > { %v12941_v41 = vsel %vm4859_vm2, %v5357_v17, %v5353_v58  ;;  %3660 = vmax.xlane.f32.xlu1 %v3447_v19 }
 0x4f9   : > { %v5125_v27 = vrot.slane %v4758_v23, %v12672_v3  ;;  %v5130_v53 = vrot.slane %v4759_v1, %v12675_v32  ;;  %v4508_v16 = vpack.c.bf16 %v4247_v25, %v4246_v14  ;;  %v3949_v54 = vpop.xlane.xlu1 %3948  ;;  %3658 = vmax.xlane.f32.xlu0 %v3446_v21  ;;  %v9441_v25 = vld [vmem:[#allocation9 + $0x340] ss:$16 sps:$4 sm:$0xff]   ;;  %v9446_v1 = vld [vmem:[#allocation9 + $0x364] ss:$16 sps:$4 sm:$0xff]  }
 0x4fa   : > { %v4167_v31 = vmul.f32 0.00086805556, %v3949_v54  ;;  %v3947_v51 = vpop.xlane.xlu0 %3946  ;;  %6207 = vmatpush1.bf16.msra.mxu1 %v9432_v39  ;;  %v3366_v23 = vld [vmem:[#allocation2 + $0x20] sm:$0xff] }
 0x4fb   : > { %v5126_v30 = vsel %vm4866_vm3, %v5125_v27, %v12910_v26  ;;  %v4822_v52 = vunpack.c.l.b16 %v4508_v16  ;;  %v4823_v61 = vunpack.c.h.b16 %v4508_v16  ;;  %v4166_v33 = vmul.f32 0.00086805556, %v3947_v51  ;;  %6208 = vmatprep.subr.bf16.mxu1 %v9437_v22 }
 0x4fc   : > { %v12948_v46 = vsel %vm4873_vm4, %v5130_v53, %v5126_v30  ;;  %3684 = vmax.xlane.f32.xlu1 %v3459_v28  ;;  %v3397_v53 = vld [vmem:[#allocation2 + $0x118] sm:$0xff]  ;;  %v3396_v28 = vld [vmem:[#allocation2 + $0x110] sm:$0xff]  ;;  %v3431_v30 = vld [vmem:[#allocation2 + $0x228] sm:$0xff] }
 0x4fd   : > { %v5441_v59 = vrot.slane %v4822_v52, %v12672_v3  ;;  %v5446_v12 = vrot.slane %v4823_v61, %v12675_v32  ;;  %v4468_v35 = vpack.c.bf16 %v4167_v31, %v4166_v33  ;;  %v4077_v48 = vpop.xlane.xlu1 %4076  ;;  %3682 = vmax.xlane.f32.xlu0 %v3458_v20  ;;  %v9449_v31 = vld [vmem:[#allocation9 + $0x384] ss:$16 sps:$4 sm:$0xff]   ;;  %v9447_v61 = vld [vmem:[#allocation9 + $0x380] ss:$16 sps:$4 sm:$0xff]  }
 0x4fe   : > { %v4231_v24 = vmul.f32 0.00086805556, %v4077_v48  ;;  %v4075_v26 = vpop.xlane.xlu0 %4074  ;;  %6209 = vmatpush1.bf16.msra.mxu1 %v9435_v10  ;;  %v3430_v33 = vld [vmem:[#allocation2 + $0x220] sm:$0xff] }
 0x4ff   : > { %v5442_v47 = vsel %vm4866_vm3, %v5441_v59, %v12925_v38  ;;  %v4742_v36 = vunpack.c.l.b16 %v4468_v35  ;;  %v4743_v50 = vunpack.c.h.b16 %v4468_v35  ;;  %v4230_v9 = vmul.f32 0.00086805556, %v4075_v26  ;;  %6210 = vmatprep.subr.bf16.mxu1 %v9440_v34  ;;  %v9452_v20 = vld [vmem:[#allocation9 + $0x3a4] ss:$16 sps:$4 sm:$0xff]   ;;  %v3461_v59 = vld [vmem:[#allocation2 + $0x318] sm:$0xff] }
 0x500   : > { %v12955_v60 = vsel %vm4873_vm4, %v5446_v12, %v5442_v47  ;;  %3720 = vmax.xlane.f32.xlu1 %v3477_v42  ;;  %v9450_v12 = vld [vmem:[#allocation9 + $0x3a0] ss:$16 sps:$4 sm:$0xff]   ;;  %v9455_v48 = vld [vmem:[#allocation9 + $0x3c4] ss:$16 sps:$4 sm:$0xff]  }
 0x501   : > { %v5046_v17 = vrot.slane %v4742_v36, %v12672_v3  ;;  %v5051_v13 = vrot.slane %v4743_v50, %v12675_v32  ;;  %v4500_v15 = vpack.c.bf16 %v4231_v24, %v4230_v9  ;;  %v12959_v19 = vpop.xlane.xlu1 %3984  ;;  %3718 = vmax.xlane.f32.xlu0 %v3476_v11  ;;  %v3460_v35 = vld [vmem:[#allocation2 + $0x310] sm:$0xff]  ;;  %v3385_v24 = vld [vmem:[#allocation2 + $0xb8] sm:$0xff]  ;;  %v3415_v9 = vld [vmem:[#allocation2 + $0x1a8] sm:$0xff] }
 0x502   : > { %v12961_v38 = vpop.xlane.xlu0 %3982  ;;  %6211 = vmatpush1.bf16.msra.mxu1 %v9438_v37  ;;  %v9453_v37 = vld [vmem:[#allocation9 + $0x3c0] ss:$16 sps:$4 sm:$0xff]   ;;  %v9458_v36 = vld [vmem:[#allocation9 + $0x3e4] ss:$16 sps:$4 sm:$0xff]  }
 0x503   : > { %v5047_v56 = vsel %vm4866_vm3, %v5046_v17, %v12934_v49  ;;  %v4806_v39 = vunpack.c.l.b16 %v4500_v15  ;;  %v4807_v58 = vunpack.c.h.b16 %v4500_v15  ;;  %6212 = vmatprep.subr.bf16.mxu1 %v9443_v18  ;;  %v9444_v49 = vld [vmem:[#allocation9 + $0x360] ss:$16 sps:$4 sm:$0xff]  }
 0x504   : > { %v12966_v14 = vsel %vm4873_vm4, %v5051_v13, %v5047_v56  ;;  %3500 = vmax.xlane.f32.xlu1 %v3367_v44  ;;  %v3384_v47 = vld [vmem:[#allocation2 + $0xb0] sm:$0xff]  ;;  %v3414_v17 = vld [vmem:[#allocation2 + $0x1a0] sm:$0xff]  ;;  %v9461_v13 = vld [vmem:[#allocation9 + $0x20c] ss:$16 sps:$4 sm:$0xff]  }
 0x505   : > { %v5362_v21 = vrot.slane %v4806_v39, %v12672_v3  ;;  %v5367_v22 = vrot.slane %v4807_v58, %v12675_v32  ;;  %v12970_v27 = vpop.xlane.xlu1 %4112  ;;  %3498 = vmax.xlane.f32.xlu0 %v3366_v23  ;;  %v9456_v18 = vld [vmem:[#allocation9 + $0x3e0] ss:$16 sps:$4 sm:$0xff]   ;;  %v3449_v44 = vld [vmem:[#allocation2 + $0x2b8] sm:$0xff]  ;;  %v3479_v58 = vld [vmem:[#allocation2 + $0x3a8] sm:$0xff] }
 0x506   : > { %v12972_v16 = vpop.xlane.xlu0 %4110  ;;  %6213 = vmatpush1.bf16.msra.mxu1 %v9441_v25  ;;  %v3448_v56 = vld [vmem:[#allocation2 + $0x2b0] sm:$0xff] }
 0x507   : > { %v5363_v54 = vsel %vm4866_vm3, %v5362_v21, %v12941_v41  ;;  %6214 = vmatprep.subr.bf16.mxu1 %v9446_v1  ;;  %v3478_v1 = vld [vmem:[#allocation2 + $0x3a0] sm:$0xff]  ;;  %v4185_v21 = vmul.f32 0.00086805556, %v12959_v19 }
 0x508   : > { %v12977_v51 = vsel %vm4873_vm4, %v5367_v22, %v5363_v54  ;;  %3560 = vmax.xlane.f32.xlu1 %v3397_v53  ;;  %v4184_v22 = vmul.f32 0.00086805556, %v12961_v38  ;;  %v4249_v54 = vmul.f32 0.00086805556, %v12970_v27 }
 0x509   : > { %v3953_v10 = vpop.xlane.xlu1 %3952  ;;  %3558 = vmax.xlane.f32.xlu0 %v3396_v28  ;;  %v4248_v28 = vmul.f32 0.00086805556, %v12972_v16 }
 0x50a   : > { %v3951_v52 = vpop.xlane.xlu0 %3950  ;;  %6215 = vmatpush1.bf16.msra.mxu1 %v9444_v49  ;;  %v3369_v49 = vld [vmem:[#allocation2 + $0x38] sm:$0xff] }
 0x50b   : > { %6216 = vmatprep.subr.bf16.mxu1 %v9449_v31 }
 0x50c   : > { %3628 = vmax.xlane.f32.xlu1 %v3431_v30  ;;  %v4169_v30 = vmul.f32 0.00086805556, %v3953_v10  ;;  %v3433_v10 = vld [vmem:[#allocation2 + $0x238] sm:$0xff] }
 0x50d   : > { %v4081_v34 = vpop.xlane.xlu1 %4080  ;;  %3626 = vmax.xlane.f32.xlu0 %v3430_v33  ;;  %v3368_v33 = vld [vmem:[#allocation2 + $0x30] sm:$0xff] }
 0x50e   : > { %v4079_v41 = vpop.xlane.xlu0 %4078  ;;  %6217 = vmatpush1.bf16.msra.mxu1 %v9447_v61  ;;  %v4168_v61 = vmul.f32 0.00086805556, %v3951_v52  ;;  %v4233_v19 = vmul.f32 0.00086805556, %v4081_v34 }
 0x50f   : > { %6218 = vmatprep.subr.bf16.mxu1 %v9452_v20  ;;  %v4477_v20 = vpack.c.bf16 %v4185_v21, %v4184_v22  ;;  %v3463_v22 = vld [vmem:[#allocation2 + $0x328] sm:$0xff] }
 0x510   : > { %3688 = vmax.xlane.f32.xlu1 %v3461_v59 }
 0x511   : > { %v3989_v42 = vpop.xlane.xlu1 %3988  ;;  %3686 = vmax.xlane.f32.xlu0 %v3460_v35  ;;  %v4509_v35 = vpack.c.bf16 %v4249_v54, %v4248_v28  ;;  %v4760_v16 = vunpack.c.l.b16 %v4477_v20 }
 0x512   : > { %v3987_v26 = vpop.xlane.xlu0 %3986  ;;  %6219 = vmatpush1.bf16.msra.mxu1 %v9450_v12  ;;  %v3399_v12 = vld [vmem:[#allocation2 + $0x128] sm:$0xff]  ;;  %v4187_v27 = vmul.f32 0.00086805556, %v3989_v42 }
 0x513   : > { %6220 = vmatprep.subr.bf16.mxu1 %v9455_v48  ;;  %v4232_v48 = vmul.f32 0.00086805556, %v4079_v41  ;;  %v4824_v52 = vunpack.c.l.b16 %v4509_v35 }
 0x514   : > { %3536 = vmax.xlane.f32.xlu1 %v3385_v24  ;;  %v4469_v24 = vpack.c.bf16 %v4169_v30, %v4168_v61 }
 0x515   : > { %v4117_v50 = vpop.xlane.xlu1 %4116  ;;  %3534 = vmax.xlane.f32.xlu0 %v3384_v47  ;;  %v4186_v47 = vmul.f32 0.00086805556, %v3987_v26 }
 0x516   : > { %v4115_v11 = vpop.xlane.xlu0 %4114  ;;  %6221 = vmatpush1.bf16.msra.mxu1 %v9453_v37  ;;  %v3398_v37 = vld [vmem:[#allocation2 + $0x120] sm:$0xff]  ;;  %v4251_v34 = vmul.f32 0.00086805556, %v4117_v50  ;;  %v4745_v54 = vunpack.c.h.b16 %v4469_v24 }
 0x517   : > { %6222 = vmatprep.subr.bf16.mxu1 %v9458_v36  ;;  %v4250_v41 = vmul.f32 0.00086805556, %v4115_v11 }
 0x518   : > { %3596 = vmax.xlane.f32.xlu1 %v3415_v9  ;;  %v4501_v9 = vpack.c.bf16 %v4233_v19, %v4232_v48 }
 0x519   : > { %v3957_v15 = vpop.xlane.xlu1 %3956  ;;  %3594 = vmax.xlane.f32.xlu0 %v3414_v17  ;;  %v4744_v17 = vunpack.c.l.b16 %v4469_v24 }
 0x51a   : > { %v3955_v25 = vpop.xlane.xlu0 %3954  ;;  %6223 = vmatpush1.bf16.msra.mxu1 %v9456_v18  ;;  %v4171_v42 = vmul.f32 0.00086805556, %v3957_v15  ;;  %v4808_v28 = vunpack.c.l.b16 %v4501_v9  ;;  %v4510_v15 = vpack.c.bf16 %v4251_v34, %v4250_v41 }
 0x51b   : > { %6274 = vmatprep.subr.bf16.mxu1 %v9461_v13  ;;  %v3432_v13 = vld [vmem:[#allocation2 + $0x230] sm:$0xff]  ;;  %v4170_v26 = vmul.f32 0.00086805556, %v3955_v25  ;;  %v5056_v50 = vrot.slane %v4744_v17, %v12724_v6  ;;  %v3386_v17 = vld [vmem:[#allocation2 + $0xc0] sm:$0xff] }
 0x51c   : > { %3664 = vmax.xlane.f32.xlu1 %v3449_v44  ;;  %v4761_v44 = vunpack.c.h.b16 %v4477_v20 }
 0x51d   : > { %v4085_v39 = vpop.xlane.xlu1 %4084  ;;  %3662 = vmax.xlane.f32.xlu0 %v3448_v56  ;;  %v4478_v56 = vpack.c.bf16 %v4187_v27, %v4186_v47 }
 0x51e   : > { %v4083_v23 = vpop.xlane.xlu0 %4082  ;;  %v4235_v30 = vmul.f32 0.00086805556, %v4085_v39  ;;  %v5140_v19 = vrot.slane %v4761_v44, %v12729_v7  ;;  %v4470_v39 = vpack.c.bf16 %v4171_v42, %v4170_v26  ;;  %v4826_v44 = vunpack.c.l.b16 %v4510_v15  ;;  %v3417_v26 = vld [vmem:[#allocation2 + $0x1b8] sm:$0xff] }
 0x51f   : > { %v4234_v11 = vmul.f32 0.00086805556, %v4083_v23  ;;  %v5061_v23 = vrot.slane %v4745_v54, %v12729_v7  ;;  %v4827_v54 = vunpack.c.h.b16 %v4510_v15 }
 0x520   : > { %3724 = vmax.xlane.f32.xlu1 %v3479_v58  ;;  %v5135_v58 = vrot.slane %v4760_v16, %v12724_v6  ;;  %v4763_v16 = vunpack.c.h.b16 %v4478_v56  ;;  %v4746_v41 = vunpack.c.l.b16 %v4470_v39 }
 0x521   : > { %v3993_v53 = vpop.xlane.xlu1 %3992  ;;  %3722 = vmax.xlane.f32.xlu0 %v3478_v1  ;;  %v4825_v1 = vunpack.c.h.b16 %v4509_v35  ;;  %v4762_v35 = vunpack.c.l.b16 %v4478_v56 }
 0x522   : > { %v3991_v31 = vpop.xlane.xlu0 %3990  ;;  %v4189_v20 = vmul.f32 0.00086805556, %v3993_v53  ;;  %v5136_v25 = vsel %vm4880_vm5, %v5135_v58, %v12948_v46  ;;  %v4809_v53 = vunpack.c.h.b16 %v4501_v9  ;;  %v5057_v46 = vsel %vm4880_vm5, %v5056_v50, %v12966_v14 }
 0x523   : > { %v5456_v48 = vrot.slane %v4825_v1, %v12729_v7  ;;  %v5141_v9 = vsel %vm4887_vm6, %v5140_v19, %v5136_v25  ;;  %v5062_v56 = vsel %vm4887_vm6, %v5061_v23, %v5057_v46  ;;  %v4747_v50 = vunpack.c.h.b16 %v4470_v39  ;;  %v3451_v19 = vld [vmem:[#allocation2 + $0x2c8] sm:$0xff] }
 0x524   : > { %3504 = vmax.xlane.f32.xlu1 %v3369_v49  ;;  %v5451_v49 = vrot.slane %v4824_v52, %v12724_v6 }
 0x525   : > { %v12983_v59 = vpop.xlane.xlu1 %4120  ;;  %3502 = vmax.xlane.f32.xlu0 %v3368_v33  ;;  %v3462_v33 = vld [vmem:[#allocation2 + $0x320] sm:$0xff] }
 0x526   : > { %v4119_v38 = vpop.xlane.xlu0 %4118  ;;  %v5452_v27 = vsel %vm4880_vm5, %v5451_v49, %v12955_v60  ;;  %v4253_v34 = vmul.f32 0.00086805556, %v12983_v59  ;;  %v5377_v49 = vrot.slane %v4809_v53, %v12729_v7 }
 0x527   : > { %v4252_v60 = vmul.f32 0.00086805556, %v4119_v38  ;;  %v5457_v14 = vsel %vm4887_vm6, %v5456_v48, %v5452_v27  ;;  %v5150_v38 = vrot.slane %v4763_v16, %v12741_v40  ;;  %v3450_v16 = vld [vmem:[#allocation2 + $0x2c0] sm:$0xff] }
 0x528   : > { %3564 = vmax.xlane.f32.xlu1 %v3399_v12  ;;  %v4188_v12 = vmul.f32 0.00086805556, %v3991_v31  ;;  %v5372_v31 = vrot.slane %v4808_v28, %v12724_v6 }
 0x529   : > { %v3961_v36 = vpop.xlane.xlu1 %3960  ;;  %3562 = vmax.xlane.f32.xlu0 %v3398_v37  ;;  %v3387_v37 = vld [vmem:[#allocation2 + $0xc8] sm:$0xff] }
 0x52a   : > { %v3959_v18 = vpop.xlane.xlu0 %3958  ;;  %v4479_v52 = vpack.c.bf16 %v4189_v20, %v4188_v12  ;;  %v4173_v58 = vmul.f32 0.00086805556, %v3961_v36  ;;  %v3416_v36 = vld [vmem:[#allocation2 + $0x1b0] sm:$0xff]  ;;  %v5066_v20 = vrot.slane %v4746_v41, %v12738_v63 }
 0x52b   : > { %v4172_v1 = vmul.f32 0.00086805556, %v3959_v18 }
 0x52c   : > { %3632 = vmax.xlane.f32.xlu1 %v3433_v10  ;;  %v4502_v10 = vpack.c.bf16 %v4235_v30, %v4234_v11  ;;  %v4764_v30 = vunpack.c.l.b16 %v4479_v52  ;;  %v4511_v11 = vpack.c.bf16 %v4253_v34, %v4252_v60  ;;  %v5067_v41 = vsel %vm4894_vm7, %v5066_v20, %v5062_v56 }
 0x52d   : > { %v12986_v21 = vpop.xlane.xlu1 %4088  ;;  %3630 = vmax.xlane.f32.xlu0 %v3432_v13  ;;  %v5145_v13 = vrot.slane %v4762_v35, %v12738_v63 }
 0x52e   : > { %v12989_v61 = vpop.xlane.xlu0 %4086  ;;  %v4810_v28 = vunpack.c.l.b16 %v4502_v10  ;;  %v4811_v48 = vunpack.c.h.b16 %v4502_v10  ;;  %v5155_v46 = vrot.slane %v4764_v30, %v12745_v45  ;;  %v5071_v10 = vrot.slane %v4747_v50, %v12741_v40  ;;  %v3371_v50 = vld [vmem:[#allocation2 + $0x48] sm:$0xff] }
 0x52f   : > { %v5146_v18 = vsel %vm4894_vm7, %v5145_v13, %v5141_v9  ;;  %v4237_v13 = vmul.f32 0.00086805556, %v12986_v21  ;;  %v3481_v9 = vld [vmem:[#allocation2 + $0x3b8] sm:$0xff] }
 0x530   : > { %3692 = vmax.xlane.f32.xlu1 %v3463_v22  ;;  %v5373_v22 = vsel %vm4880_vm5, %v5372_v31, %v12977_v51  ;;  %v4471_v51 = vpack.c.bf16 %v4173_v58, %v4172_v1  ;;  %v5466_v31 = vrot.slane %v4827_v54, %v12741_v40  ;;  %v5382_v39 = vrot.slane %v4810_v28, %v12738_v63 }
 0x531   : > { %v3997_v24 = vpop.xlane.xlu1 %3996  ;;  %3690 = vmax.xlane.f32.xlu0 %v3462_v33  ;;  %v5461_v33 = vrot.slane %v4826_v44, %v12738_v63  ;;  %v5378_v53 = vsel %vm4887_vm6, %v5377_v49, %v5373_v22  ;;  %v4236_v44 = vmul.f32 0.00086805556, %v12989_v61  ;;  %v5387_v58 = vrot.slane %v4811_v48, %v12741_v40  ;;  %v3480_v49 = vld [vmem:[#allocation2 + $0x3b0] sm:$0xff] }
 0x532   : > { %v3995_v47 = vpop.xlane.xlu0 %3994  ;;  %v4191_v12 = vmul.f32 0.00086805556, %v3997_v24  ;;  %v5151_v24 = vsel %vm4901_vm8, %v5150_v38, %v5146_v18  ;;  %v5383_v22 = vsel %vm4894_vm7, %v5382_v39, %v5378_v53  ;;  %v4829_v61 = vunpack.c.h.b16 %v4511_v11 }
 0x533   : > { %v4190_v35 = vmul.f32 0.00086805556, %v3995_v47  ;;  %v5462_v47 = vsel %vm4894_vm7, %v5461_v33, %v5457_v14  ;;  %v5156_v21 = vsel %vm4908_vm9, %v5155_v46, %v5151_v24  ;;  %v4749_v38 = vunpack.c.h.b16 %v4471_v51 }
 0x534   : > { %3540 = vmax.xlane.f32.xlu1 %v3387_v37  ;;  %v4765_v37 = vunpack.c.h.b16 %v4479_v52  ;;  %v4828_v52 = vunpack.c.l.b16 %v4511_v11  ;;  %v5467_v14 = vsel %vm4901_vm8, %v5466_v31, %v5462_v47  ;;  %v5072_v28 = vsel %vm4901_vm8, %v5071_v10, %v5067_v41  ;;  %v3401_v10 = vld [vmem:[#allocation2 + $0x138] sm:$0xff] }
 0x535   : > { %v4125_v42 = vpop.xlane.xlu1 %4124  ;;  %3538 = vmax.xlane.f32.xlu0 %v3386_v17  ;;  %v4748_v17 = vunpack.c.l.b16 %v4471_v51  ;;  %v4480_v34 = vpack.c.bf16 %v4191_v12, %v4190_v35  ;;  %v13035_v20 = vsel %vm4901_vm8, %v5387_v58, %v5383_v22 }
 0x536   : > { %v4123_v59 = vpop.xlane.xlu0 %4122  ;;  %v4255_v15 = vmul.f32 0.00086805556, %v4125_v42  ;;  %v5160_v1 = vrot.slane %v4765_v37, %v12761_v8 }
 0x537   : > { %v4254_v27 = vmul.f32 0.00086805556, %v4123_v59  ;;  %v5471_v59 = vrot.slane %v4828_v52, %v12745_v45  ;;  %v5076_v30 = vrot.slane %v4748_v17, %v12745_v45  ;;  %v4766_v18 = vunpack.c.l.b16 %v4480_v34 }
 0x538   : > { %3600 = vmax.xlane.f32.xlu1 %v3417_v26  ;;  %v5161_v11 = vsel %vm4915_vm10, %v5160_v1, %v5156_v21  ;;  %v4767_v53 = vunpack.c.h.b16 %v4480_v34  ;;  %v3400_v1 = vld [vmem:[#allocation2 + $0x130] sm:$0xff] }
 0x539   : > { %v3965_v25 = vpop.xlane.xlu1 %3964  ;;  %3598 = vmax.xlane.f32.xlu0 %v3416_v36  ;;  %v13026_v42 = vpack.c.bf16 %v4255_v15, %v4254_v27  ;;  %v4503_v36 = vpack.c.bf16 %v4237_v13, %v4236_v44  ;;  %v5472_v27 = vsel %vm4908_vm9, %v5471_v59, %v5467_v14  ;;  %v5077_v39 = vsel %vm4908_vm9, %v5076_v30, %v5072_v28 }
 0x53a   : > { %v3963_v23 = vpop.xlane.xlu0 %3962  ;;  %v4175_v56 = vmul.f32 0.00086805556, %v3965_v25  ;;  %v3370_v25 = vld [vmem:[#allocation2 + $0x40] sm:$0xff]  ;;  %v5170_v14 = vrot.slane %v4767_v53, %v12771_v43  ;;  %v3465_v53 = vld [vmem:[#allocation2 + $0x338] sm:$0xff] }
 0x53b   : > { %v4174_v54 = vmul.f32 0.00086805556, %v3963_v23  ;;  %v4830_v12 = vunpack.c.l.b16 %v13026_v42  ;;  %v5081_v23 = vrot.slane %v4749_v38, %v12761_v8  ;;  %v4812_v46 = vunpack.c.l.b16 %v4503_v36 }
 0x53c   : > { %3668 = vmax.xlane.f32.xlu1 %v3451_v19  ;;  %v5476_v19 = vrot.slane %v4829_v61, %v12761_v8  ;;  %v4813_v52 = vunpack.c.h.b16 %v4503_v36  ;;  %v4831_v17 = vunpack.c.h.b16 %v13026_v42 }
 0x53d   : > { %v4093_v60 = vpop.xlane.xlu1 %4092  ;;  %3666 = vmax.xlane.f32.xlu0 %v3450_v16  ;;  %v13042_v31 = vpack.c.bf16 %v4175_v56, %v4174_v54  ;;  %v5165_v16 = vrot.slane %v4766_v18, %v12768_v62  ;;  %v5481_v13 = vrot.slane %v4830_v12, %v12768_v62  ;;  %v5392_v42 = vrot.slane %v4812_v46, %v12745_v45  ;;  %v3435_v56 = vld [vmem:[#allocation2 + $0x248] sm:$0xff] }
 0x53e   : > { %v4091_v26 = vpop.xlane.xlu0 %4090  ;;  %v4239_v48 = vmul.f32 0.00086805556, %v4093_v60  ;;  %v5477_v34 = vsel %vm4915_vm10, %v5476_v19, %v5472_v27  ;;  %v5397_v54 = vrot.slane %v4813_v52, %v12761_v8  ;;  %v5486_v30 = vrot.slane %v4831_v17, %v12771_v43 }
 0x53f   : > { %v4238_v37 = vmul.f32 0.00086805556, %v4091_v26  ;;  %v5082_v26 = vsel %vm4915_vm10, %v5081_v23, %v5077_v39  ;;  %v4750_v22 = vunpack.c.l.b16 %v13042_v31  ;;  %v5166_v61 = vsel %vm4922_vm11, %v5165_v16, %v5161_v11 }
 0x540   : > { %3728 = vmax.xlane.f32.xlu1 %v3481_v9  ;;  %v5482_v28 = vsel %vm4922_vm11, %v5481_v13, %v5477_v34  ;;  %v4751_v11 = vunpack.c.h.b16 %v13042_v31  ;;  %v5393_v46 = vsel %vm4908_vm9, %v5392_v42, %v13035_v20  ;;  %v3464_v13 = vld [vmem:[#allocation2 + $0x330] sm:$0xff] }
 0x541   : > { %v4001_v33 = vpop.xlane.xlu1 %4000  ;;  %3726 = vmax.xlane.f32.xlu0 %v3480_v49  ;;  %v4504_v9 = vpack.c.bf16 %v4239_v48, %v4238_v37  ;;  %v5171_v48 = vsel %vm4929_vm12, %v5170_v14, %v5166_v61  ;;  %v5398_v42 = vsel %vm4915_vm10, %v5397_v54, %v5393_v46 }
 0x542   : > { %v4193_v51 = vmul.f32 0.00086805556, %v4001_v33  ;;  %v3999_v35 = vpop.xlane.xlu0 %3998 }
 0x543   : > { %v4192_v15 = vmul.f32 0.00086805556, %v3999_v35  ;;  %v4814_v33 = vunpack.c.l.b16 %v4504_v9  ;;  %v3434_v35 = vld [vmem:[#allocation2 + $0x240] sm:$0xff]  ;;  %v4815_v31 = vunpack.c.h.b16 %v4504_v9 }
 0x544   : > { %3508 = vmax.xlane.f32.xlu1 %v3371_v50 }
 0x545   : > { %v4481_v24 = vpack.c.bf16 %v4193_v51, %v4192_v15  ;;  %v4129_v47 = vpop.xlane.xlu1 %4128  ;;  %3506 = vmax.xlane.f32.xlu0 %v3370_v25  ;;  %v5086_v25 = vrot.slane %v4750_v22, %v12768_v62  ;;  %v5407_v61 = vrot.slane %v4815_v31, %v12771_v43 }
 0x546   : > { %v4257_v44 = vmul.f32 0.00086805556, %v4129_v47  ;;  %v4127_v60 = vpop.xlane.xlu0 %4126  ;;  %v5487_v47 = vsel %vm4929_vm12, %v5486_v30, %v5482_v28 }
 0x547   : > { %v4768_v41 = vunpack.c.l.b16 %v4481_v24  ;;  %v4256_v58 = vmul.f32 0.00086805556, %v4127_v60  ;;  %v4769_v21 = vunpack.c.h.b16 %v4481_v24  ;;  %v5091_v60 = vrot.slane %v4751_v11, %v12771_v43 }
 0x548   : > { %3568 = vmax.xlane.f32.xlu1 %v3401_v10  ;;  %v5402_v10 = vrot.slane %v4814_v33, %v12768_v62  ;;  %v5087_v9 = vsel %vm4922_vm11, %v5086_v25, %v5082_v26  ;;  %v3388_v26 = vld [vmem:[#allocation2 + $0xd0] sm:$0xff] }
 0x549   : > { %v5175_v49 = vrot.slane %v4768_v41, %v12775_v57  ;;  %v4513_v59 = vpack.c.bf16 %v4257_v44, %v4256_v58  ;;  %v3969_v38 = vpop.xlane.xlu1 %3968  ;;  %3566 = vmax.xlane.f32.xlu0 %v3400_v1  ;;  %v5180_v19 = vrot.slane %v4769_v21, %v12778_v4  ;;  %v3389_v21 = vld [vmem:[#allocation2 + $0xd8] sm:$0xff] }
 0x54a   : > { %v4177_v36 = vmul.f32 0.00086805556, %v3969_v38  ;;  %v3967_v18 = vpop.xlane.xlu0 %3966  ;;  %v5403_v38 = vsel %vm4922_vm11, %v5402_v10, %v5398_v42  ;;  %v3373_v42 = vld [vmem:[#allocation2 + $0x58] sm:$0xff] }
 0x54b   : > { %v4832_v50 = vunpack.c.l.b16 %v4513_v59  ;;  %v4833_v12 = vunpack.c.h.b16 %v4513_v59  ;;  %v4176_v51 = vmul.f32 0.00086805556, %v3967_v18  ;;  %v5176_v39 = vsel %vm4936_vm13, %v5175_v49, %v5171_v48 }
 0x54c   : > { %3636 = vmax.xlane.f32.xlu1 %v3435_v56  ;;  %v5181_v41 = vsel %vm4943_vm14, %v5180_v19, %v5176_v39  ;;  %v3418_v19 = vld [vmem:[#allocation2 + $0x1c0] sm:$0xff]  ;;  %v3453_v39 = vld [vmem:[#allocation2 + $0x2d8] sm:$0xff] }
 0x54d   : > { %v5491_v37 = vrot.slane %v4832_v50, %v12775_v57  ;;  %v5496_v15 = vrot.slane %v4833_v12, %v12778_v4  ;;  %v4473_v27 = vpack.c.bf16 %v4177_v36, %v4176_v51  ;;  %v4097_v23 = vpop.xlane.xlu1 %4096  ;;  %3634 = vmax.xlane.f32.xlu0 %v3434_v35  ;;  %v5092_v36 = vsel %vm4929_vm12, %v5091_v60, %v5087_v9  ;;  %v3419_v12 = vld [vmem:[#allocation2 + $0x1c8] sm:$0xff] }
 0x54e   : > { %v4241_v16 = vmul.f32 0.00086805556, %v4097_v23  ;;  %v4095_v24 = vpop.xlane.xlu0 %4094  ;;  %v5408_v35 = vsel %vm4929_vm12, %v5407_v61, %v5403_v38  ;;  %v9459_v23 = vld [vmem:[#allocation9 + $0x208] ss:$16 sps:$4 sm:$0xff]   ;;  %v9470_v61 = vld [vmem:[#allocation9 + $0x26c] ss:$16 sps:$4 sm:$0xff]  }
 0x54f   : > { %v4752_v52 = vunpack.c.l.b16 %v4473_v27  ;;  %v4240_v17 = vmul.f32 0.00086805556, %v4095_v24  ;;  %v5492_v44 = vsel %vm4936_vm13, %v5491_v37, %v5487_v47  ;;  %v4753_v34 = vunpack.c.h.b16 %v4473_v27  ;;  %v3452_v47 = vld [vmem:[#allocation2 + $0x2d0] sm:$0xff] }
 0x550   : > { %3696 = vmax.xlane.f32.xlu1 %v3465_v53  ;;  %v5497_v20 = vsel %vm4943_vm14, %v5496_v15, %v5492_v44  ;;  %v3483_v44 = vld [vmem:[#allocation2 + $0x3c8] sm:$0xff] }
 0x551   : > { %v5096_v58 = vrot.slane %v4752_v52, %v12775_v57  ;;  %v4505_v1 = vpack.c.bf16 %v4241_v16, %v4240_v17  ;;  %v3525_v14 = vpop.xlane.xlu1 %3524  ;;  %v5502_v22 = vsel %vm5498_vm15, %v5497_v20, %v5181_v41  ;;  %3694 = vmax.xlane.f32.xlu0 %v3464_v13  ;;  %v5101_v18 = vrot.slane %v4753_v34, %v12778_v4  ;;  %v9464_v16 = vld [vmem:[#allocation9 + $0x22c] ss:$16 sps:$4 sm:$0xff]   ;;  %v9462_v13 = vld [vmem:[#allocation9 + $0x228] ss:$16 sps:$4 sm:$0xff]   ;;  %v3482_v20 = vld [vmem:[#allocation2 + $0x3c0] sm:$0xff] }
 0x552   : > { %v3523_v49 = vpop.xlane.xlu0 %3522  ;;  %v5506_v59 = vpack.c.b16 %v5502_v22, %v5502_v22  ;;  %v9467_v34 = vld [vmem:[#allocation9 + $0x24c] ss:$16 sps:$4 sm:$0xff]  }
 0x553   : > { %v4816_v56 = vunpack.c.l.b16 %v4505_v1  ;;  %v4817_v28 = vunpack.c.h.b16 %v4505_v1  ;;  %v4266_v30 = vpack.c.bf16 %v3525_v14, %v3523_v49  ;;  %v5097_v51 = vsel %vm4936_vm13, %v5096_v58, %v5092_v36 }
 0x554   : > { %6224 = vmatprep.mubr.bf16.mxu1 %v5506_v59  ;;  %3544 = vmax.xlane.f32.xlu1 %v3389_v21  ;;  %v5102_v37 = vsel %vm4943_vm14, %v5101_v18, %v5097_v51  ;;  %v9465_v21 = vld [vmem:[#allocation9 + $0x248] ss:$16 sps:$4 sm:$0xff]   ;;  %v9473_v51 = vld [vmem:[#allocation9 + $0x28c] ss:$16 sps:$4 sm:$0xff]  }
 0x555   : > { %v5412_v33 = vrot.slane %v4816_v56, %v12775_v57  ;;  %v5417_v54 = vrot.slane %v4817_v28, %v12778_v4  ;;  %v3653_v50 = vpop.xlane.xlu1 %3652  ;;  %3542 = vmax.xlane.f32.xlu0 %v3388_v26  ;;  %v6395_v10 = vunpack.c.l.b16 %v4266_v30  ;;  %v6396_v52 = vunpack.c.h.b16 %v4266_v30  ;;  %v3372_v56 = vld [vmem:[#allocation2 + $0x50] sm:$0xff] }
 0x556   : > { %v3651_v11 = vpop.xlane.xlu0 %3650 }
 0x557   : > { %v13085_v25 = vpack.c.bf16 %v3653_v50, %v3651_v11  ;;  %v5413_v48 = vsel %vm4936_vm13, %v5412_v33, %v5408_v35  ;;  %v6589_v9 = vrot.slane %v6395_v10, %v12624_v29  ;;  %v6593_v58 = vrot.slane %v6396_v52, %v12629_v5  ;;  %v3403_v50 = vld [vmem:[#allocation2 + $0x148] sm:$0xff]  ;;  %v3402_v11 = vld [vmem:[#allocation2 + $0x140] sm:$0xff]  ;;  %v3436_v10 = vld [vmem:[#allocation2 + $0x250] sm:$0xff] }
 0x558   : > { %3604 = vmax.xlane.f32.xlu1 %v3419_v12  ;;  %v5418_v15 = vsel %vm4943_vm14, %v5417_v54, %v5413_v48  ;;  %v9468_v54 = vld [vmem:[#allocation9 + $0x268] ss:$16 sps:$4 sm:$0xff]  }
 0x559   : > { %v3493_v27 = vpop.xlane.xlu1 %3492  ;;  %v5501_v53 = vsel %vm5498_vm15, %v5418_v15, %v5102_v37  ;;  %3602 = vmax.xlane.f32.xlu0 %v3418_v19  ;;  %v6594_v28 = vsel %vm4845_vm0, %v6593_v58, %v6589_v9  ;;  %v6459_v26 = vunpack.c.l.b16 %v13085_v25  ;;  %v6460_v36 = vunpack.c.h.b16 %v13085_v25 }
 0x55a   : > { %v3491_v46 = vpop.xlane.xlu0 %3490  ;;  %v13091_v31 = vpack.c.b16 %v5501_v53, %v5501_v53  ;;  %v3437_v53 = vld [vmem:[#allocation2 + $0x258] sm:$0xff] }
 0x55b   : > { %v13093_v24 = vpack.c.bf16 %v3493_v27, %v3491_v46  ;;  %v6905_v48 = vrot.slane %v6459_v26, %v12624_v29  ;;  %v6909_v25 = vrot.slane %v6460_v36, %v12629_v5  ;;  %v9477_v36 = vld [vmem:[#allocation9 + $0x2c8] ss:$16 sps:$4 sm:$0xff]  }
 0x55c   : > { %6225 = vmatmul.mubr.bf16.vlgmr.msra.gmra.mrb[4].mxu1 %v13091_v31  ;;  %3672 = vmax.xlane.f32.xlu1 %v3453_v39 }
 0x55d   : > { %6275 = vmatpush1.bf16.msra.mxu1 %v9459_v23  ;;  %6306 = vmatprep.mubr.bf16.mxu1 %v5506_v59  ;;  %v3529_v17 = vpop.xlane.xlu1 %3528  ;;  %v6379_v37 = vunpack.c.l.b16 %v13093_v24  ;;  %v6380_v15 = vunpack.c.h.b16 %v13093_v24  ;;  %v9471_v23 = vld [vmem:[#allocation9 + $0x288] ss:$16 sps:$4 sm:$0xff]  }
 0x55e   : > { %3670 = vmax.xlane.f32.xlu0 %v3452_v47  ;;  %v3527_v60 = vpop.xlane.xlu0 %3526  ;;  %6276 = vmatprep.subr.bf16.mxu1 %v9464_v16  ;;  %v9476_v16 = vld [vmem:[#allocation9 + $0x2ac] ss:$16 sps:$4 sm:$0xff]  }
 0x55f   : > { %v4267_v41 = vpack.c.bf16 %v3529_v17, %v3527_v60  ;;  %v6510_v24 = vrot.slane %v6379_v37, %v12624_v29  ;;  %v6514_v60 = vrot.slane %v6380_v15, %v12629_v5  ;;  %v3421_v37 = vld [vmem:[#allocation2 + $0x1d8] sm:$0xff] }
 0x560   : > { %3732 = vmax.xlane.f32.xlu1 %v3483_v44  ;;  %v6910_v44 = vsel %vm4845_vm0, %v6909_v25, %v6905_v48  ;;  %v9480_v25 = vld [vmem:[#allocation9 + $0x2e8] ss:$16 sps:$4 sm:$0xff]  }
 0x561   : > { %v6397_v1 = vunpack.c.l.b16 %v4267_v41  ;;  %v6398_v14 = vunpack.c.h.b16 %v4267_v41  ;;  %6277 = vmatpush1.bf16.msra.mxu1 %v9462_v13  ;;  %v3621_v22 = vpop.xlane.xlu1 %3620  ;;  %v9474_v41 = vld [vmem:[#allocation9 + $0x2a8] ss:$16 sps:$4 sm:$0xff]  }
 0x562   : > { %3730 = vmax.xlane.f32.xlu0 %v3482_v20  ;;  %6278 = vmatprep.subr.bf16.mxu1 %v9467_v34  ;;  %v3619_v38 = vpop.xlane.xlu0 %3618  ;;  %v3467_v20 = vld [vmem:[#allocation2 + $0x348] sm:$0xff] }
 0x563   : > { %v6598_v49 = vrot.slane %v6397_v1, %v12632_v55  ;;  %v6603_v59 = vrot.slane %v6398_v14, %v12635_v0  ;;  %v13101_v30 = vpack.c.bf16 %v3621_v22, %v3619_v38  ;;  %v9479_v14 = vld [vmem:[#allocation9 + $0x2cc] ss:$16 sps:$4 sm:$0xff]   ;;  %v6515_v38 = vsel %vm4845_vm0, %v6514_v60, %v6510_v24 }
 0x564   : > { %3512 = vmax.xlane.f32.xlu1 %v3373_v42  ;;  %v3466_v42 = vld [vmem:[#allocation2 + $0x340] sm:$0xff]  ;;  %v9488_v24 = vld [vmem:[#allocation9 + $0x32c] ss:$16 sps:$4 sm:$0xff]  }
 0x565   : > { %v6599_v18 = vsel %vm4852_vm1, %v6598_v49, %v6594_v28  ;;  %6279 = vmatpush1.bf16.msra.mxu1 %v9465_v21  ;;  %v3657_v33 = vpop.xlane.xlu1 %3656  ;;  %v6444_v28 = vunpack.c.h.b16 %v13101_v30 }
 0x566   : > { %v13107_v12 = vsel %vm4859_vm2, %v6603_v59, %v6599_v18  ;;  %3510 = vmax.xlane.f32.xlu0 %v3372_v56  ;;  %6280 = vmatprep.subr.bf16.mxu1 %v9470_v61  ;;  %v3655_v35 = vpop.xlane.xlu0 %3654  ;;  %v6443_v56 = vunpack.c.l.b16 %v13101_v30  ;;  %v3391_v18 = vld [vmem:[#allocation2 + $0xe8] sm:$0xff] }
 0x567   : > { %v4299_v19 = vpack.c.bf16 %v3657_v33, %v3655_v35  ;;  %v3390_v35 = vld [vmem:[#allocation2 + $0xe0] sm:$0xff]  ;;  %v6830_v30 = vrot.slane %v6444_v28, %v12629_v5 }
 0x568   : > { %3572 = vmax.xlane.f32.xlu1 %v3403_v50 }
 0x569   : > { %6281 = vmatpush1.bf16.msra.mxu1 %v9468_v54  ;;  %v3497_v27 = vpop.xlane.xlu1 %3496  ;;  %v6461_v39 = vunpack.c.l.b16 %v4299_v19  ;;  %v6462_v46 = vunpack.c.h.b16 %v4299_v19  ;;  %v9482_v54 = vld [vmem:[#allocation9 + $0x2ec] ss:$16 sps:$4 sm:$0xff]   ;;  %v6826_v19 = vrot.slane %v6443_v56, %v12624_v29 }
 0x56a   : > { %3570 = vmax.xlane.f32.xlu0 %v3402_v11  ;;  %6282 = vmatprep.subr.bf16.mxu1 %v9473_v51  ;;  %v3495_v47 = vpop.xlane.xlu0 %3494 }
 0x56b   : > { %v6914_v52 = vrot.slane %v6461_v39, %v12632_v55  ;;  %v6919_v17 = vrot.slane %v6462_v46, %v12635_v0  ;;  %v4259_v13 = vpack.c.bf16 %v3497_v27, %v3495_v47  ;;  %v3420_v39 = vld [vmem:[#allocation2 + $0x1d0] sm:$0xff] }
 0x56c   : > { %3640 = vmax.xlane.f32.xlu1 %v3437_v53 }
 0x56d   : > { %6283 = vmatpush1.bf16.msra.mxu1 %v9471_v23  ;;  %v3589_v34 = vpop.xlane.xlu1 %3588  ;;  %v6915_v9 = vsel %vm4852_vm1, %v6914_v52, %v6910_v44  ;;  %v6381_v58 = vunpack.c.l.b16 %v4259_v13  ;;  %v6382_v1 = vunpack.c.h.b16 %v4259_v13  ;;  %v9485_v23 = vld [vmem:[#allocation9 + $0x30c] ss:$16 sps:$4 sm:$0xff]  }
 0x56e   : > { %3638 = vmax.xlane.f32.xlu0 %v3436_v10  ;;  %6284 = vmatprep.subr.bf16.mxu1 %v9476_v16  ;;  %v13120_v22 = vsel %vm4859_vm2, %v6919_v17, %v6915_v9  ;;  %v3587_v21 = vpop.xlane.xlu0 %3586  ;;  %v6831_v10 = vsel %vm4845_vm0, %v6830_v30, %v6826_v19  ;;  %v9483_v17 = vld [vmem:[#allocation9 + $0x308] ss:$16 sps:$4 sm:$0xff]   ;;  %v3374_v30 = vld [vmem:[#allocation2 + $0x60] sm:$0xff] }
 0x56f   : > { %v6519_v61 = vrot.slane %v6381_v58, %v12632_v55  ;;  %v6524_v49 = vrot.slane %v6382_v1, %v12635_v0  ;;  %v13124_v59 = vpack.c.bf16 %v3589_v34, %v3587_v21  ;;  %v3455_v13 = vld [vmem:[#allocation2 + $0x2e8] sm:$0xff]  ;;  %v3485_v1 = vld [vmem:[#allocation2 + $0x3d8] sm:$0xff] }
 0x570   : > { %3700 = vmax.xlane.f32.xlu1 %v3467_v20  ;;  %v9486_v58 = vld [vmem:[#allocation9 + $0x328] ss:$16 sps:$4 sm:$0xff]  }
 0x571   : > { %6285 = vmatpush1.bf16.msra.mxu1 %v9474_v41  ;;  %v3625_v26 = vpop.xlane.xlu1 %3624  ;;  %v6520_v33 = vsel %vm4852_vm1, %v6519_v61, %v6515_v38  ;;  %v3454_v41 = vld [vmem:[#allocation2 + $0x2e0] sm:$0xff] }
 0x572   : > { %3698 = vmax.xlane.f32.xlu0 %v3466_v42  ;;  %6286 = vmatprep.subr.bf16.mxu1 %v9479_v14  ;;  %v13131_v50 = vsel %vm4859_vm2, %v6524_v49, %v6520_v33  ;;  %v3623_v51 = vpop.xlane.xlu0 %3622  ;;  %v9491_v42 = vld [vmem:[#allocation9 + $0x34c] ss:$16 sps:$4 sm:$0xff]   ;;  %v3484_v49 = vld [vmem:[#allocation2 + $0x3d0] sm:$0xff]  ;;  %v9489_v33 = vld [vmem:[#allocation9 + $0x348] ss:$16 sps:$4 sm:$0xff]  }
 0x573   : > { %v4291_v11 = vpack.c.bf16 %v3625_v26, %v3623_v51  ;;  %v6427_v26 = vunpack.c.l.b16 %v13124_v59 }
 0x574   : > { %3548 = vmax.xlane.f32.xlu1 %v3391_v18 }
 0x575   : > { %6287 = vmatpush1.bf16.msra.mxu1 %v9477_v36  ;;  %v3717_v48 = vpop.xlane.xlu1 %3716  ;;  %v6445_v15 = vunpack.c.l.b16 %v4291_v11  ;;  %v6446_v27 = vunpack.c.h.b16 %v4291_v11  ;;  %v6428_v36 = vunpack.c.h.b16 %v13124_v59 }
 0x576   : > { %3546 = vmax.xlane.f32.xlu0 %v3390_v35  ;;  %6288 = vmatprep.subr.bf16.mxu1 %v9482_v54  ;;  %v3715_v53 = vpop.xlane.xlu0 %3714  ;;  %v3375_v54 = vld [vmem:[#allocation2 + $0x68] sm:$0xff] }
 0x577   : > { %v6835_v46 = vrot.slane %v6445_v15, %v12632_v55  ;;  %v6840_v16 = vrot.slane %v6446_v27, %v12635_v0  ;;  %v13137_v47 = vpack.c.bf16 %v3717_v48, %v3715_v53  ;;  %v9494_v35 = vld [vmem:[#allocation9 + $0x36c] ss:$16 sps:$4 sm:$0xff]   ;;  %v6751_v59 = vrot.slane %v6428_v36, %v12629_v5  ;;  %v9492_v15 = vld [vmem:[#allocation9 + $0x368] ss:$16 sps:$4 sm:$0xff]  }
 0x578   : > { %3608 = vmax.xlane.f32.xlu1 %v3421_v37  ;;  %v3405_v27 = vld [vmem:[#allocation2 + $0x158] sm:$0xff] }
 0x579   : > { %6289 = vmatpush1.bf16.msra.mxu1 %v9480_v25  ;;  %v3533_v52 = vpop.xlane.xlu1 %3532  ;;  %v6836_v44 = vsel %vm4852_vm1, %v6835_v46, %v6831_v10  ;;  %v6747_v25 = vrot.slane %v6427_v26, %v12624_v29  ;;  %v9507_v46 = vld [vmem:[#allocation7] ss:$16 sps:$4 sm:$0xff]   ;;  %v6491_v36 = vunpack.c.l.b16 %v13137_v47 }
 0x57a   : > { %3606 = vmax.xlane.f32.xlu0 %v3420_v39  ;;  %6290 = vmatprep.subr.bf16.mxu1 %v9485_v23  ;;  %v13142_v60 = vsel %vm4859_vm2, %v6840_v16, %v6836_v44  ;;  %v3531_v34 = vpop.xlane.xlu0 %3530  ;;  %v9509_v23 = vld [vmem:[#allocation7 + $0x4] ss:$16 sps:$4 sm:$0xff]   ;;  %v9497_v39 = vld [vmem:[#allocation9 + $0x38c] ss:$16 sps:$4 sm:$0xff]  }
 0x57b   : > { %v4268_v20 = vpack.c.bf16 %v3533_v52, %v3531_v34  ;;  %v3404_v10 = vld [vmem:[#allocation2 + $0x150] sm:$0xff]  ;;  %7791 = vmatprep.subr.bf16.mxu0 %v9509_v23  ;;  %v6752_v44 = vsel %vm4845_vm0, %v6751_v59, %v6747_v25  ;;  %v9495_v34 = vld [vmem:[#allocation9 + $0x388] ss:$16 sps:$4 sm:$0xff]  }
 0x57c   : > { %3676 = vmax.xlane.f32.xlu1 %v3455_v13  ;;  %7792 = vmatpush1.bf16.msra.mxu0 %v9507_v46 }
 0x57d   : > { %6291 = vmatpush1.bf16.msra.mxu1 %v9483_v17  ;;  %v3557_v9 = vpop.xlane.xlu1 %3556  ;;  %v6399_v14 = vunpack.c.l.b16 %v4268_v20  ;;  %v6400_v21 = vunpack.c.h.b16 %v4268_v20  ;;  %v9512_v20 = vld [vmem:[#allocation7 + $0x24] ss:$16 sps:$4 sm:$0xff]  }
 0x57e   : > { %3674 = vmax.xlane.f32.xlu0 %v3454_v41  ;;  %6292 = vmatprep.subr.bf16.mxu1 %v9488_v24  ;;  %v3555_v61 = vpop.xlane.xlu0 %3554  ;;  %v3439_v41 = vld [vmem:[#allocation2 + $0x268] sm:$0xff] }
 0x57f   : > { %v6608_v38 = vrot.slane %v6399_v14, %v12672_v3  ;;  %v6613_v56 = vrot.slane %v6400_v21, %v12675_v32  ;;  %v13146_v28 = vpack.c.bf16 %v3557_v9, %v3555_v61  ;;  %v9500_v14 = vld [vmem:[#allocation9 + $0x3ac] ss:$16 sps:$4 sm:$0xff]   ;;  %v9510_v21 = vld [vmem:[#allocation7 + $0x20] ss:$16 sps:$4 sm:$0xff]   ;;  %7793 = vmatprep.subr.bf16.mxu0 %v9512_v20 }
 0x580   : > { %3736 = vmax.xlane.f32.xlu1 %v3485_v1  ;;  %7794 = vmatpush1.bf16.msra.mxu0 %v9510_v21 }
 0x581   : > { %6293 = vmatpush1.bf16.msra.mxu1 %v9486_v58  ;;  %v3593_v18 = vpop.xlane.xlu1 %3592  ;;  %v6609_v51 = vsel %vm4866_vm3, %v6608_v38, %v13107_v12  ;;  %v6412_v20 = vunpack.c.h.b16 %v13146_v28 }
 0x582   : > { %3734 = vmax.xlane.f32.xlu0 %v3484_v49  ;;  %6294 = vmatprep.subr.bf16.mxu1 %v9491_v42  ;;  %v13153_v11 = vsel %vm4873_vm4, %v6613_v56, %v6609_v51  ;;  %v3591_v19 = vpop.xlane.xlu0 %3590  ;;  %v3438_v49 = vld [vmem:[#allocation2 + $0x260] sm:$0xff]  ;;  %v3469_v51 = vld [vmem:[#allocation2 + $0x358] sm:$0xff] }
 0x583   : > { %v4283_v48 = vpack.c.bf16 %v3593_v18, %v3591_v19  ;;  %v6492_v18 = vunpack.c.h.b16 %v13137_v47  ;;  %v7063_v47 = vrot.slane %v6491_v36, %v12624_v29 }
 0x584   : > { %3516 = vmax.xlane.f32.xlu1 %v3375_v54  ;;  %v9498_v54 = vld [vmem:[#allocation9 + $0x3a8] ss:$16 sps:$4 sm:$0xff]  }
 0x585   : > { %6295 = vmatpush1.bf16.msra.mxu1 %v9489_v33  ;;  %v3661_v37 = vpop.xlane.xlu1 %3660  ;;  %v6429_v12 = vunpack.c.l.b16 %v4283_v48  ;;  %v6430_v53 = vunpack.c.h.b16 %v4283_v48  ;;  %v9513_v48 = vld [vmem:[#allocation7 + $0x40] ss:$16 sps:$4 sm:$0xff]  }
 0x586   : > { %3514 = vmax.xlane.f32.xlu0 %v3374_v30  ;;  %6296 = vmatprep.subr.bf16.mxu1 %v9494_v35  ;;  %v3659_v16 = vpop.xlane.xlu0 %3658  ;;  %v9515_v35 = vld [vmem:[#allocation7 + $0x44] ss:$16 sps:$4 sm:$0xff]   ;;  %v9503_v30 = vld [vmem:[#allocation9 + $0x3cc] ss:$16 sps:$4 sm:$0xff]  }
 0x587   : > { %v6756_v52 = vrot.slane %v6429_v12, %v12632_v55  ;;  %v6761_v17 = vrot.slane %v6430_v53, %v12635_v0  ;;  %v4300_v13 = vpack.c.bf16 %v3661_v37, %v3659_v16  ;;  %v3468_v37 = vld [vmem:[#allocation2 + $0x350] sm:$0xff]  ;;  %7795 = vmatprep.subr.bf16.mxu0 %v9515_v35  ;;  %v3393_v12 = vld [vmem:[#allocation2 + $0xf8] sm:$0xff]  ;;  %v6672_v35 = vrot.slane %v6412_v20, %v12629_v5 }
 0x588   : > { %3576 = vmax.xlane.f32.xlu1 %v3405_v27  ;;  %7796 = vmatpush1.bf16.msra.mxu0 %v9513_v48  ;;  %v7067_v27 = vrot.slane %v6492_v18, %v12629_v5  ;;  %v9518_v53 = vld [vmem:[#allocation7 + $0x64] ss:$16 sps:$4 sm:$0xff]   ;;  %v9506_v16 = vld [vmem:[#allocation9 + $0x3ec] ss:$16 sps:$4 sm:$0xff]  }
 0x589   : > { %6297 = vmatpush1.bf16.msra.mxu1 %v9492_v15  ;;  %v3685_v24 = vpop.xlane.xlu1 %3684  ;;  %v6757_v9 = vsel %vm4852_vm1, %v6756_v52, %v6752_v44  ;;  %v6463_v58 = vunpack.c.l.b16 %v4300_v13  ;;  %v6464_v1 = vunpack.c.h.b16 %v4300_v13  ;;  %7797 = vmatprep.subr.bf16.mxu0 %v9518_v53  ;;  %v3422_v18 = vld [vmem:[#allocation2 + $0x1e0] sm:$0xff]  ;;  %v3456_v53 = vld [vmem:[#allocation2 + $0x2f0] sm:$0xff] }
 0x58a   : > { %3574 = vmax.xlane.f32.xlu0 %v3404_v10  ;;  %6298 = vmatprep.subr.bf16.mxu1 %v9497_v39  ;;  %v13162_v42 = vsel %vm4859_vm2, %v6761_v17, %v6757_v9  ;;  %v3683_v61 = vpop.xlane.xlu0 %3682  ;;  %v9516_v10 = vld [vmem:[#allocation7 + $0x60] ss:$16 sps:$4 sm:$0xff]   ;;  %v9524_v48 = vld [vmem:[#allocation7 + $0xa4] ss:$16 sps:$4 sm:$0xff]  }
 0x58b   : > { %v6924_v38 = vrot.slane %v6463_v58, %v12672_v3  ;;  %v6929_v56 = vrot.slane %v6464_v1, %v12675_v32  ;;  %v13166_v26 = vpack.c.bf16 %v3685_v24, %v3683_v61  ;;  %v3392_v17 = vld [vmem:[#allocation2 + $0xf0] sm:$0xff]  ;;  %v9504_v58 = vld [vmem:[#allocation9 + $0x3e8] ss:$16 sps:$4 sm:$0xff]  }
 0x58c   : > { %3644 = vmax.xlane.f32.xlu1 %v3439_v41  ;;  %7798 = vmatpush1.bf16.msra.mxu0 %v9516_v10  ;;  %v6411_v41 = vunpack.c.l.b16 %v13146_v28  ;;  %v3423_v1 = vld [vmem:[#allocation2 + $0x1e8] sm:$0xff] }
 0x58d   : > { %6299 = vmatpush1.bf16.msra.mxu1 %v9495_v34  ;;  %v3721_v33 = vpop.xlane.xlu1 %3720  ;;  %v6925_v19 = vsel %vm4866_vm3, %v6924_v38, %v13120_v22  ;;  %v9501_v22 = vld [vmem:[#allocation9 + $0x3c8] ss:$16 sps:$4 sm:$0xff]   ;;  %v7068_v34 = vsel %vm4845_vm0, %v7067_v27, %v7063_v47  ;;  %v9519_v38 = vld [vmem:[#allocation7 + $0x80] ss:$16 sps:$4 sm:$0xff]   ;;  %v6475_v10 = vunpack.c.l.b16 %v13166_v26 }
 0x58e   : > { %3642 = vmax.xlane.f32.xlu0 %v3438_v49  ;;  %6300 = vmatprep.subr.bf16.mxu1 %v9500_v14  ;;  %v13173_v25 = vsel %vm4873_vm4, %v6929_v56, %v6925_v19  ;;  %v3719_v59 = vpop.xlane.xlu0 %3718  ;;  %v9521_v14 = vld [vmem:[#allocation7 + $0x84] ss:$16 sps:$4 sm:$0xff]   ;;  %v9522_v27 = vld [vmem:[#allocation7 + $0xa0] ss:$16 sps:$4 sm:$0xff]  }
 0x58f   : > { %v4315_v15 = vpack.c.bf16 %v3721_v33, %v3719_v59  ;;  %7799 = vmatprep.subr.bf16.mxu0 %v9521_v14  ;;  %v9527_v59 = vld [vmem:[#allocation7 + $0x204] ss:$16 sps:$4 sm:$0xff]  }
 0x590   : > { %3704 = vmax.xlane.f32.xlu1 %v3469_v51  ;;  %7800 = vmatpush1.bf16.msra.mxu0 %v9519_v38  ;;  %v6668_v51 = vrot.slane %v6411_v41, %v12624_v29  ;;  %v3486_v14 = vld [vmem:[#allocation2 + $0x3e0] sm:$0xff] }
 0x591   : > { %6301 = vmatpush1.bf16.msra.mxu1 %v9498_v54  ;;  %v3501_v23 = vpop.xlane.xlu1 %3500  ;;  %v6493_v39 = vunpack.c.l.b16 %v4315_v15  ;;  %v6494_v46 = vunpack.c.h.b16 %v4315_v15  ;;  %7801 = vmatprep.subr.bf16.mxu0 %v9524_v48 }
 0x592   : > { %3702 = vmax.xlane.f32.xlu0 %v3468_v37  ;;  %6302 = vmatprep.subr.bf16.mxu1 %v9503_v30  ;;  %v3499_v52 = vpop.xlane.xlu0 %3498  ;;  %v3457_v30 = vld [vmem:[#allocation2 + $0x2f8] sm:$0xff] }
 0x593   : > { %v7072_v13 = vrot.slane %v6493_v39, %v12632_v55  ;;  %v7077_v44 = vrot.slane %v6494_v46, %v12635_v0  ;;  %v4260_v24 = vpack.c.bf16 %v3501_v23, %v3499_v52  ;;  %v9525_v23 = vld [vmem:[#allocation7 + $0x200] ss:$16 sps:$4 sm:$0xff]   ;;  %v6476_v52 = vunpack.c.h.b16 %v13166_v26 }
 0x594   : > { %3552 = vmax.xlane.f32.xlu1 %v3393_v12  ;;  %7802 = vmatpush1.bf16.msra.mxu0 %v9522_v27  ;;  %v3407_v27 = vld [vmem:[#allocation2 + $0x168] sm:$0xff] }
 0x595   : > { %6303 = vmatpush1.bf16.msra.mxu1 %v9501_v22  ;;  %v3561_v9 = vpop.xlane.xlu1 %3560  ;;  %v7073_v21 = vsel %vm4852_vm1, %v7072_v13, %v7068_v34  ;;  %v6383_v61 = vunpack.c.l.b16 %v4260_v24  ;;  %v6384_v49 = vunpack.c.h.b16 %v4260_v24  ;;  %v3487_v13 = vld [vmem:[#allocation2 + $0x3e8] sm:$0xff]  ;;  %v9533_v24 = vld [vmem:[#allocation7 + $0x224] ss:$16 sps:$4 sm:$0xff]   ;;  %v6988_v38 = vrot.slane %v6476_v52, %v12629_v5 }
 0x596   : > { %3550 = vmax.xlane.f32.xlu0 %v3392_v17  ;;  %6304 = vmatprep.subr.bf16.mxu1 %v9506_v16  ;;  %v13184_v56 = vsel %vm4859_vm2, %v7077_v44, %v7073_v21  ;;  %v3559_v36 = vpop.xlane.xlu0 %3558  ;;  %v9530_v44 = vld [vmem:[#allocation7 + $0xc4] ss:$16 sps:$4 sm:$0xff]  }
 0x597   : > { %v6529_v28 = vrot.slane %v6383_v61, %v12672_v3  ;;  %v6534_v33 = vrot.slane %v6384_v49, %v12675_v32  ;;  %v4275_v54 = vpack.c.bf16 %v3561_v9, %v3559_v36  ;;  %v9528_v9 = vld [vmem:[#allocation7 + $0xc0] ss:$16 sps:$4 sm:$0xff]   ;;  %7803 = vmatprep.subr.bf16.mxu0 %v9530_v44  ;;  %v6984_v49 = vrot.slane %v6475_v10, %v12624_v29 }
 0x598   : > { %3612 = vmax.xlane.f32.xlu1 %v3423_v1  ;;  %7804 = vmatpush1.bf16.msra.mxu0 %v9528_v9  ;;  %v3406_v10 = vld [vmem:[#allocation2 + $0x160] sm:$0xff] }
 0x599   : > { %6305 = vmatpush1.bf16.msra.mxu1 %v9504_v58  ;;  %v3629_v19 = vpop.xlane.xlu1 %3628  ;;  %v6530_v37 = vsel %vm4866_vm3, %v6529_v28, %v13131_v50  ;;  %v6413_v15 = vunpack.c.l.b16 %v4275_v54  ;;  %v6414_v47 = vunpack.c.h.b16 %v4275_v54  ;;  %v6673_v50 = vsel %vm4845_vm0, %v6672_v35, %v6668_v51  ;;  %v9536_v28 = vld [vmem:[#allocation7 + $0xe4] ss:$16 sps:$4 sm:$0xff]  }
 0x59a   : > { %3610 = vmax.xlane.f32.xlu0 %v3422_v18  ;;  %v13193_v22 = vsel %vm4873_vm4, %v6534_v33, %v6530_v37  ;;  %v3627_v12 = vpop.xlane.xlu0 %3626  ;;  %7832 = vmatprep.subr.bf16.mxu1 %v9527_v59  ;;  %v3377_v18 = vld [vmem:[#allocation2 + $0x78] sm:$0xff]  ;;  %v9539_v33 = vld [vmem:[#allocation7 + $0x244] ss:$16 sps:$4 sm:$0xff]  }
 0x59b   : > { %v6677_v39 = vrot.slane %v6413_v15, %v12632_v55  ;;  %v6682_v46 = vrot.slane %v6414_v47, %v12635_v0  ;;  %v4292_v16 = vpack.c.bf16 %v3629_v19, %v3627_v12  ;;  %v9534_v19 = vld [vmem:[#allocation7 + $0xe0] ss:$16 sps:$4 sm:$0xff]   ;;  %7805 = vmatprep.subr.bf16.mxu0 %v9536_v28  ;;  %v9545_v12 = vld [vmem:[#allocation7 + $0x264] ss:$16 sps:$4 sm:$0xff]  }
 0x59c   : > { %6307 = vmatmul.mubr.bf16.vlgmr.msra.gmra.mrb[8].mxu1 %v13091_v31  ;;  %3680 = vmax.xlane.f32.xlu1 %v3457_v30  ;;  %v9531_v31 = vld [vmem:[#allocation7 + $0x220] ss:$16 sps:$4 sm:$0xff]   ;;  %v9554_v28 = vld [vmem:[#allocation7 + $0x144] ss:$16 sps:$4 sm:$0xff]  }
 0x59d   : > { %v3689_v17 = vpop.xlane.xlu1 %3688  ;;  %7833 = vmatpush1.bf16.msra.mxu1 %v9525_v23  ;;  %v6678_v34 = vsel %vm4852_vm1, %v6677_v39, %v6673_v50  ;;  %v6447_v41 = vunpack.c.l.b16 %v4292_v16  ;;  %v6448_v20 = vunpack.c.h.b16 %v4292_v16  ;;  %v9537_v30 = vld [vmem:[#allocation7 + $0x240] ss:$16 sps:$4 sm:$0xff]   ;;  %7806 = vmatpush1.bf16.msra.mxu0 %v9534_v19  ;;  %v9542_v23 = vld [vmem:[#allocation7 + $0x104] ss:$16 sps:$4 sm:$0xff]  }
 0x59e   : > { %3678 = vmax.xlane.f32.xlu0 %v3456_v53  ;;  %v13203_v58 = vsel %vm4859_vm2, %v6682_v46, %v6678_v34  ;;  %v3687_v1 = vpop.xlane.xlu0 %3686  ;;  %7834 = vmatprep.subr.bf16.mxu1 %v9533_v24  ;;  %v3376_v59 = vld [vmem:[#allocation2 + $0x70] sm:$0xff]  ;;  %v3441_v24 = vld [vmem:[#allocation2 + $0x278] sm:$0xff] }
 0x59f   : > { %v6845_v26 = vrot.slane %v6447_v41, %v12672_v3  ;;  %v6850_v21 = vrot.slane %v6448_v20, %v12675_v32  ;;  %v4307_v61 = vpack.c.bf16 %v3689_v17, %v3687_v1  ;;  %v9540_v16 = vld [vmem:[#allocation7 + $0x100] ss:$16 sps:$4 sm:$0xff]   ;;  %7807 = vmatprep.subr.bf16.mxu0 %v9542_v23  ;;  %v9548_v34 = vld [vmem:[#allocation7 + $0x124] ss:$16 sps:$4 sm:$0xff]  }
 0x5a0   : > { %3740 = vmax.xlane.f32.xlu1 %v3487_v13  ;;  %v9543_v50 = vld [vmem:[#allocation7 + $0x260] ss:$16 sps:$4 sm:$0xff]   ;;  %v9551_v41 = vld [vmem:[#allocation7 + $0x284] ss:$16 sps:$4 sm:$0xff]  }
 0x5a1   : > { %v3537_v36 = vpop.xlane.xlu1 %3536  ;;  %7835 = vmatpush1.bf16.msra.mxu1 %v9531_v31  ;;  %v6846_v54 = vsel %vm4866_vm3, %v6845_v26, %v13142_v60  ;;  %v6477_v51 = vunpack.c.l.b16 %v4307_v61  ;;  %v6478_v35 = vunpack.c.h.b16 %v4307_v61  ;;  %v6989_v60 = vsel %vm4845_vm0, %v6988_v38, %v6984_v49  ;;  %7808 = vmatpush1.bf16.msra.mxu0 %v9540_v16  ;;  %v9546_v1 = vld [vmem:[#allocation7 + $0x120] ss:$16 sps:$4 sm:$0xff]  }
 0x5a2   : > { %3738 = vmax.xlane.f32.xlu0 %v3486_v14  ;;  %v13212_v48 = vsel %vm4873_vm4, %v6850_v21, %v6846_v54  ;;  %v3535_v29 = vpop.xlane.xlu0 %3534  ;;  %7836 = vmatprep.subr.bf16.mxu1 %v9539_v33  ;;  %v9549_v14 = vld [vmem:[#allocation7 + $0x280] ss:$16 sps:$4 sm:$0xff]   ;;  %v9557_v33 = vld [vmem:[#allocation7 + $0x2a4] ss:$16 sps:$4 sm:$0xff]  }
 0x5a3   : > { %v6993_v5 = vrot.slane %v6477_v51, %v12632_v55  ;;  %v6998_v37 = vrot.slane %v6478_v35, %v12635_v0  ;;  %v4269_v15 = vpack.c.bf16 %v3537_v36, %v3535_v29  ;;  %v3440_v61 = vld [vmem:[#allocation2 + $0x270] sm:$0xff]  ;;  %7809 = vmatprep.subr.bf16.mxu0 %v9548_v34 }
 0x5a4   : > { %3520 = vmax.xlane.f32.xlu1 %v3377_v18  ;;  %v9552_v19 = vld [vmem:[#allocation7 + $0x140] ss:$16 sps:$4 sm:$0xff]  }
 0x5a5   : > { %v3597_v47 = vpop.xlane.xlu1 %3596  ;;  %7837 = vmatpush1.bf16.msra.mxu1 %v9537_v30  ;;  %v6994_v53 = vsel %vm4852_vm1, %v6993_v5, %v6989_v60  ;;  %v6401_v39 = vunpack.c.l.b16 %v4269_v15  ;;  %v6402_v46 = vunpack.c.h.b16 %v4269_v15  ;;  %7810 = vmatpush1.bf16.msra.mxu0 %v9546_v1  ;;  %v9555_v30 = vld [vmem:[#allocation7 + $0x2a0] ss:$16 sps:$4 sm:$0xff]   ;;  %v3489_v1 = vld [vmem:[#allocation2 + $0x3f8] sm:$0xff] }
 0x5a6   : > { %3518 = vmax.xlane.f32.xlu0 %v3376_v59  ;;  %v13219_v55 = vsel %vm4859_vm2, %v6998_v37, %v6994_v53  ;;  %v3595_v0 = vpop.xlane.xlu0 %3594  ;;  %7838 = vmatprep.subr.bf16.mxu1 %v9545_v12  ;;  %v3470_v5 = vld [vmem:[#allocation2 + $0x360] sm:$0xff]  ;;  %v3424_v34 = vld [vmem:[#allocation2 + $0x1f0] sm:$0xff] }
 0x5a7   : > { %v6618_v52 = vrot.slane %v6401_v39, %v12724_v6  ;;  %v6623_v17 = vrot.slane %v6402_v46, %v12729_v7  ;;  %v4284_v13 = vpack.c.bf16 %v3597_v47, %v3595_v0  ;;  %7811 = vmatprep.subr.bf16.mxu0 %v9554_v28  ;;  %v9560_v53 = vld [vmem:[#allocation7 + $0x164] ss:$16 sps:$4 sm:$0xff]  }
 0x5a8   : > { %3580 = vmax.xlane.f32.xlu1 %v3407_v27  ;;  %v3425_v27 = vld [vmem:[#allocation2 + $0x1f8] sm:$0xff]  ;;  %v9563_v39 = vld [vmem:[#allocation7 + $0x2c4] ss:$16 sps:$4 sm:$0xff]  }
 0x5a9   : > { %v3665_v44 = vpop.xlane.xlu1 %3664  ;;  %7839 = vmatpush1.bf16.msra.mxu1 %v9543_v50  ;;  %v6619_v20 = vsel %vm4880_vm5, %v6618_v52, %v13153_v11  ;;  %v6431_v9 = vunpack.c.l.b16 %v4284_v13  ;;  %v6432_v31 = vunpack.c.h.b16 %v4284_v13  ;;  %v3471_v11 = vld [vmem:[#allocation2 + $0x368] sm:$0xff]  ;;  %7812 = vmatpush1.bf16.msra.mxu0 %v9552_v19  ;;  %v9558_v52 = vld [vmem:[#allocation7 + $0x160] ss:$16 sps:$4 sm:$0xff]  }
 0x5aa   : > { %3578 = vmax.xlane.f32.xlu0 %v3406_v10  ;;  %v13226_v26 = vsel %vm4887_vm6, %v6623_v17, %v6619_v20  ;;  %v3663_v21 = vpop.xlane.xlu0 %3662  ;;  %7840 = vmatprep.subr.bf16.mxu1 %v9551_v41  ;;  %v9561_v17 = vld [vmem:[#allocation7 + $0x2c0] ss:$16 sps:$4 sm:$0xff]  }
 0x5ab   : > { %v6766_v49 = vrot.slane %v6431_v9, %v12672_v3  ;;  %v6771_v38 = vrot.slane %v6432_v31, %v12675_v32  ;;  %v4301_v36 = vpack.c.bf16 %v3665_v44, %v3663_v21  ;;  %7813 = vmatprep.subr.bf16.mxu0 %v9560_v53  ;;  %v9569_v21 = vld [vmem:[#allocation7 + $0x2e4] ss:$16 sps:$4 sm:$0xff]  }
 0x5ac   : > { %3648 = vmax.xlane.f32.xlu1 %v3441_v24  ;;  %v3488_v28 = vld [vmem:[#allocation2 + $0x3f0] sm:$0xff] }
 0x5ad   : > { %v3725_v18 = vpop.xlane.xlu1 %3724  ;;  %7841 = vmatpush1.bf16.msra.mxu1 %v9549_v14  ;;  %v6767_v54 = vsel %vm4866_vm3, %v6766_v49, %v13162_v42  ;;  %v6465_v51 = vunpack.c.l.b16 %v4301_v36  ;;  %v6466_v35 = vunpack.c.h.b16 %v4301_v36  ;;  %7814 = vmatpush1.bf16.msra.mxu0 %v9558_v52  ;;  %v9566_v14 = vld [vmem:[#allocation7 + $0x184] ss:$16 sps:$4 sm:$0xff]   ;;  %v9564_v49 = vld [vmem:[#allocation7 + $0x180] ss:$16 sps:$4 sm:$0xff]   ;;  %v3473_v52 = vld [vmem:[#allocation2 + $0x378] sm:$0xff] }
 0x5ae   : > { %3646 = vmax.xlane.f32.xlu0 %v3440_v61  ;;  %v13233_v29 = vsel %vm4873_vm4, %v6771_v38, %v6767_v54  ;;  %v3723_v59 = vpop.xlane.xlu0 %3722  ;;  %7842 = vmatprep.subr.bf16.mxu1 %v9557_v33  ;;  %v9567_v38 = vld [vmem:[#allocation7 + $0x2e0] ss:$16 sps:$4 sm:$0xff]  }
 0x5af   : > { %v6934_v37 = vrot.slane %v6465_v51, %v12724_v6  ;;  %v6939_v15 = vrot.slane %v6466_v35, %v12729_v7  ;;  %v4316_v60 = vpack.c.bf16 %v3725_v18, %v3723_v59  ;;  %v13237_v47 = vpop.f32.mrb[0].mxu1  ;;  %7815 = vmatprep.subr.bf16.mxu0 %v9566_v14  ;;  %v9575_v59 = vld [vmem:[#allocation7 + $0x304] ss:$16 sps:$4 sm:$0xff]  }
 0x5b0   : > { %v13239_v42 = vpop.f32.mrb[0].mxu0  ;;  %3708 = vmax.xlane.f32.xlu1 %v3471_v11  ;;  %v13241_v23 = vpop.f32.mrb[1].mxu1  ;;  %v3408_v53 = vld [vmem:[#allocation2 + $0x170] sm:$0xff] }
 0x5b1   : > { %v13243_v12 = vpop.f32.mrb[1].mxu0  ;;  %7843 = vmatpush1.bf16.msra.mxu1 %v9555_v30  ;;  %v6935_v46 = vsel %vm4880_vm5, %v6934_v37, %v13173_v25  ;;  %v6495_v16 = vunpack.c.l.b16 %v4316_v60  ;;  %v6496_v50 = vunpack.c.h.b16 %v4316_v60  ;;  %v6189_v0 = vpop.f32.mrb[2].mxu1  ;;  %7816 = vmatpush1.bf16.msra.mxu0 %v9564_v49  ;;  %v9572_v30 = vld [vmem:[#allocation7 + $0x1a4] ss:$16 sps:$4 sm:$0xff]   ;;  %v9573_v37 = vld [vmem:[#allocation7 + $0x300] ss:$16 sps:$4 sm:$0xff]  }
 0x5b2   : > { %v6271_v10 = vpop.f32.mrb[2].mxu0  ;;  %3706 = vmax.xlane.f32.xlu0 %v3470_v5  ;;  %v13248_v13 = vsel %vm4887_vm6, %v6939_v15, %v6935_v46  ;;  %v6190_v44 = vpop.f32.mrb[3].mxu1  ;;  %7844 = vmatprep.subr.bf16.mxu1 %v9563_v39  ;;  %v9570_v5 = vld [vmem:[#allocation7 + $0x1a0] ss:$16 sps:$4 sm:$0xff]   ;;  %v9584_v49 = vld [vmem:[#allocation7 + $0x1e4] ss:$16 sps:$4 sm:$0xff]  }
 0x5b3   : > { %v6272_v24 = vpop.f32.mrb[3].mxu0  ;;  %v7082_v41 = vrot.slane %v6495_v16, %v12672_v3  ;;  %v7087_v20 = vrot.slane %v6496_v50, %v12675_v32  ;;  %v3505_v25 = vpop.xlane.xlu1 %3504  ;;  %7817 = vmatprep.subr.bf16.mxu0 %v9572_v30  ;;  %v9576_v44 = vld [vmem:[#allocation7 + $0x1c0] ss:$16 sps:$4 sm:$0xff]  }
 0x5b4   : > { %v3503_v9 = vpop.xlane.xlu0 %3502  ;;  %3616 = vmax.xlane.f32.xlu1 %v3425_v27  ;;  %v9579_v24 = vld [vmem:[#allocation7 + $0x320] ss:$16 sps:$4 sm:$0xff]  }
 0x5b5   : > { %v4261_v31 = vpack.c.bf16 %v3505_v25, %v3503_v9  ;;  %7845 = vmatpush1.bf16.msra.mxu1 %v9561_v17  ;;  %v7083_v61 = vsel %vm4866_vm3, %v7082_v41, %v13184_v56  ;;  %v3409_v56 = vld [vmem:[#allocation2 + $0x178] sm:$0xff]  ;;  %7818 = vmatpush1.bf16.msra.mxu0 %v9570_v5  ;;  %v9581_v17 = vld [vmem:[#allocation7 + $0x324] ss:$16 sps:$4 sm:$0xff]  }
 0x5b6   : > { %3614 = vmax.xlane.f32.xlu0 %v3424_v34  ;;  %v13255_v36 = vsel %vm4873_vm4, %v7087_v20, %v7083_v61  ;;  %7846 = vmatprep.subr.bf16.mxu1 %v9569_v21  ;;  %v3472_v25 = vld [vmem:[#allocation2 + $0x370] sm:$0xff]  ;;  %v9593_v5 = vld [vmem:[#allocation7 + $0xc] ss:$16 sps:$4 sm:$0xff]  }
 0x5b7   : > { %v6385_v18 = vunpack.c.l.b16 %v4261_v31  ;;  %v6386_v11 = vunpack.c.h.b16 %v4261_v31  ;;  %v3565_v33 = vpop.xlane.xlu1 %3564 }
 0x5b8   : > { %v3563_v54 = vpop.xlane.xlu0 %3562  ;;  %3744 = vmax.xlane.f32.xlu1 %v3489_v1 }
 0x5b9   : > { %v6539_v51 = vrot.slane %v6385_v18, %v12724_v6  ;;  %v6544_v35 = vrot.slane %v6386_v11, %v12729_v7  ;;  %v4276_v19 = vpack.c.bf16 %v3565_v33, %v3563_v54  ;;  %7847 = vmatpush1.bf16.msra.mxu1 %v9567_v38  ;;  %v9582_v38 = vld [vmem:[#allocation7 + $0x1e0] ss:$16 sps:$4 sm:$0xff]  }
 0x5ba   : > { %3742 = vmax.xlane.f32.xlu0 %v3488_v28  ;;  %7848 = vmatprep.subr.bf16.mxu1 %v9575_v59  ;;  %v9585_v18 = vld [vmem:[#allocation7 + $0x340] ss:$16 sps:$4 sm:$0xff]   ;;  %v9590_v59 = vld [vmem:[#allocation7 + $0x364] ss:$16 sps:$4 sm:$0xff]  }
 0x5bb   : > { %v6540_v15 = vsel %vm4880_vm5, %v6539_v51, %v13193_v22  ;;  %v6415_v60 = vunpack.c.l.b16 %v4276_v19  ;;  %v6416_v27 = vunpack.c.h.b16 %v4276_v19  ;;  %v3633_v46 = vpop.xlane.xlu1 %3632  ;;  %v9578_v22 = vld [vmem:[#allocation7 + $0x1c4] ss:$16 sps:$4 sm:$0xff]  }
 0x5bc   : > { %v13262_v39 = vsel %vm4887_vm6, %v6544_v35, %v6540_v15  ;;  %v3631_v16 = vpop.xlane.xlu0 %3630  ;;  %3584 = vmax.xlane.f32.xlu1 %v3409_v56  ;;  %7819 = vmatprep.subr.bf16.mxu0 %v9578_v22 }
 0x5bd   : > { %v6687_v50 = vrot.slane %v6415_v60, %v12672_v3  ;;  %v6692_v0 = vrot.slane %v6416_v27, %v12675_v32  ;;  %v4293_v10 = vpack.c.bf16 %v3633_v46, %v3631_v16  ;;  %7849 = vmatpush1.bf16.msra.mxu1 %v9573_v37  ;;  %7820 = vmatpush1.bf16.msra.mxu0 %v9576_v44  ;;  %v9588_v37 = vld [vmem:[#allocation7 + $0x360] ss:$16 sps:$4 sm:$0xff]  }
 0x5be   : > { %3582 = vmax.xlane.f32.xlu0 %v3408_v53  ;;  %7850 = vmatprep.subr.bf16.mxu1 %v9581_v17 }
 0x5bf   : > { %v6688_v34 = vsel %vm4866_vm3, %v6687_v50, %v13203_v58  ;;  %v6449_v41 = vunpack.c.l.b16 %v4293_v10  ;;  %v6450_v20 = vunpack.c.h.b16 %v4293_v10  ;;  %v3693_v31 = vpop.xlane.xlu1 %3692  ;;  %v9587_v58 = vld [vmem:[#allocation7 + $0x344] ss:$16 sps:$4 sm:$0xff]   ;;  %7821 = vmatprep.subr.bf16.mxu0 %v9584_v49 }
 0x5c0   : > { %v13269_v9 = vsel %vm4873_vm4, %v6692_v0, %v6688_v34  ;;  %v3691_v1 = vpop.xlane.xlu0 %3690  ;;  %3712 = vmax.xlane.f32.xlu1 %v3473_v52  ;;  %v9596_v50 = vld [vmem:[#allocation7 + $0x384] ss:$16 sps:$4 sm:$0xff]   ;;  %v9594_v52 = vld [vmem:[#allocation7 + $0x380] ss:$16 sps:$4 sm:$0xff]  }
 0x5c1   : > { %v6855_v14 = vrot.slane %v6449_v41, %v12724_v6  ;;  %v6860_v21 = vrot.slane %v6450_v20, %v12729_v7  ;;  %v4308_v61 = vpack.c.bf16 %v3693_v31, %v3691_v1  ;;  %7851 = vmatpush1.bf16.msra.mxu1 %v9579_v24  ;;  %7822 = vmatpush1.bf16.msra.mxu0 %v9582_v38  ;;  %v9602_v20 = vld [vmem:[#allocation7 + $0x3a4] ss:$16 sps:$4 sm:$0xff]   ;;  %v9600_v1 = vld [vmem:[#allocation7 + $0x3a0] ss:$16 sps:$4 sm:$0xff]  }
 0x5c2   : > { %3710 = vmax.xlane.f32.xlu0 %v3472_v25  ;;  %7852 = vmatprep.subr.bf16.mxu1 %v9587_v58 }
 0x5c3   : > { %v6856_v11 = vsel %vm4880_vm5, %v6855_v14, %v13212_v48  ;;  %v6479_v28 = vunpack.c.l.b16 %v4308_v61  ;;  %v6480_v33 = vunpack.c.h.b16 %v4308_v61  ;;  %v3541_v51 = vpop.xlane.xlu1 %3540  ;;  %7873 = vmatprep.subr.bf16.mxu0 %v9593_v5  ;;  %v9614_v5 = vld [vmem:[#allocation7 + $0x3e4] ss:$16 sps:$4 sm:$0xff]  }
 0x5c4   : > { %v13276_v54 = vsel %vm4887_vm6, %v6860_v21, %v6856_v11  ;;  %v3539_v35 = vpop.xlane.xlu0 %3538 }
 0x5c5   : > { %v7003_v19 = vrot.slane %v6479_v28, %v12672_v3  ;;  %v7008_v56 = vrot.slane %v6480_v33, %v12675_v32  ;;  %v4270_v30 = vpack.c.bf16 %v3541_v51, %v3539_v35  ;;  %7853 = vmatpush1.bf16.msra.mxu1 %v9585_v18  ;;  %v9608_v18 = vld [vmem:[#allocation7 + $0x3c4] ss:$16 sps:$4 sm:$0xff]   ;;  %v9606_v33 = vld [vmem:[#allocation7 + $0x3c0] ss:$16 sps:$4 sm:$0xff]  }
 0x5c6   : > { %7854 = vmatprep.subr.bf16.mxu1 %v9590_v59 }
 0x5c7   : > { %v7004_v48 = vsel %vm4866_vm3, %v7003_v19, %v13219_v55  ;;  %v6403_v15 = vunpack.c.l.b16 %v4270_v30  ;;  %v6404_v60 = vunpack.c.h.b16 %v4270_v30  ;;  %v3601_v53 = vpop.xlane.xlu1 %3600 }
 0x5c8   : > { %v13283_v27 = vsel %vm4873_vm4, %v7008_v56, %v7004_v48  ;;  %v3599_v3 = vpop.xlane.xlu0 %3598 }
 0x5c9   : > { %v6628_v32 = vrot.slane %v6403_v15, %v12738_v63  ;;  %v6633_v46 = vrot.slane %v6404_v60, %v12741_v40  ;;  %v4285_v16 = vpack.c.bf16 %v3601_v53, %v3599_v3  ;;  %7855 = vmatpush1.bf16.msra.mxu1 %v9588_v37  ;;  %v9612_v15 = vld [vmem:[#allocation7 + $0x3e0] ss:$16 sps:$4 sm:$0xff]  }
 0x5ca   : > { %7856 = vmatprep.subr.bf16.mxu1 %v9596_v50  ;;  %v9623_v50 = vld [vmem:[#allocation7 + $0x20c] ss:$16 sps:$4 sm:$0xff]  }
 0x5cb   : > { %v6629_v0 = vsel %vm4894_vm7, %v6628_v32, %v13226_v26  ;;  %v6433_v55 = vunpack.c.l.b16 %v4285_v16  ;;  %v6434_v10 = vunpack.c.h.b16 %v4285_v16  ;;  %v3669_v17 = vpop.xlane.xlu1 %3668 }
 0x5cc   : > { %v13290_v22 = vsel %vm4901_vm8, %v6633_v46, %v6629_v0  ;;  %v3667_v44 = vpop.xlane.xlu0 %3666 }
 0x5cd   : > { %v6776_v24 = vrot.slane %v6433_v55, %v12724_v6  ;;  %v6781_v34 = vrot.slane %v6434_v10, %v12729_v7  ;;  %v4302_v41 = vpack.c.bf16 %v3669_v17, %v3667_v44  ;;  %7857 = vmatpush1.bf16.msra.mxu1 %v9594_v52 }
 0x5ce   : > { %7858 = vmatprep.subr.bf16.mxu1 %v9602_v20 }
 0x5cf   : > { %v6777_v25 = vsel %vm4880_vm5, %v6776_v24, %v13233_v29  ;;  %v6467_v26 = vunpack.c.l.b16 %v4302_v41  ;;  %v6468_v31 = vunpack.c.h.b16 %v4302_v41  ;;  %v3729_v21 = vpop.xlane.xlu1 %3728 }
 0x5d0   : > { %v13297_v14 = vsel %vm4887_vm6, %v6781_v34, %v6777_v25  ;;  %v3727_v61 = vpop.xlane.xlu0 %3726 }
 0x5d1   : > { %v6944_v49 = vrot.slane %v6467_v26, %v12738_v63  ;;  %v6949_v58 = vrot.slane %v6468_v31, %v12741_v40  ;;  %v4317_v38 = vpack.c.bf16 %v3729_v21, %v3727_v61  ;;  %7859 = vmatpush1.bf16.msra.mxu1 %v9600_v1 }
 0x5d2   : > { %7860 = vmatprep.subr.bf16.mxu1 %v9608_v18 }
 0x5d3   : > { %v6945_v11 = vsel %vm4894_vm7, %v6944_v49, %v13248_v13  ;;  %v6497_v29 = vunpack.c.l.b16 %v4317_v38  ;;  %v6498_v28 = vunpack.c.h.b16 %v4317_v38  ;;  %v3509_v35 = vpop.xlane.xlu1 %3508 }
 0x5d4   : > { %v13304_v51 = vsel %vm4901_vm8, %v6949_v58, %v6945_v11  ;;  %v3507_v19 = vpop.xlane.xlu0 %3506 }
 0x5d5   : > { %v7092_v56 = vrot.slane %v6497_v29, %v12724_v6  ;;  %v7097_v30 = vrot.slane %v6498_v28, %v12729_v7  ;;  %v4262_v59 = vpack.c.bf16 %v3509_v35, %v3507_v19  ;;  %7861 = vmatpush1.bf16.msra.mxu1 %v9606_v33 }
 0x5d6   : > { %7862 = vmatprep.subr.bf16.mxu1 %v9614_v5 }
 0x5d7   : > { %v7093_v37 = vsel %vm4880_vm5, %v7092_v56, %v13255_v36  ;;  %v6387_v13 = vunpack.c.l.b16 %v4262_v59  ;;  %v6388_v48 = vunpack.c.h.b16 %v4262_v59  ;;  %v3569_v53 = vpop.xlane.xlu1 %3568 }
 0x5d8   : > { %v13311_v60 = vsel %vm4887_vm6, %v7097_v30, %v7093_v37  ;;  %v3567_v3 = vpop.xlane.xlu0 %3566 }
 0x5d9   : > { %v6549_v32 = vrot.slane %v6387_v13, %v12738_v63  ;;  %v6554_v46 = vrot.slane %v6388_v48, %v12741_v40  ;;  %v4277_v16 = vpack.c.bf16 %v3569_v53, %v3567_v3  ;;  %7863 = vmatpush1.bf16.msra.mxu1 %v9612_v15 }
 0x5da   : > { %7914 = vmatprep.subr.bf16.mxu1 %v9623_v50 }
 0x5db   : > { %v6550_v0 = vsel %vm4894_vm7, %v6549_v32, %v13262_v39  ;;  %v6417_v36 = vunpack.c.l.b16 %v4277_v16  ;;  %v6418_v55 = vunpack.c.h.b16 %v4277_v16  ;;  %v3637_v52 = vpop.xlane.xlu1 %3636 }
 0x5dc   : > { %v13318_v10 = vsel %vm4901_vm8, %v6554_v46, %v6550_v0  ;;  %v3635_v17 = vpop.xlane.xlu0 %3634 }
 0x5dd   : > { %v6697_v44 = vrot.slane %v6417_v36, %v12724_v6  ;;  %v6702_v24 = vrot.slane %v6418_v55, %v12729_v7  ;;  %v4294_v34 = vpack.c.bf16 %v3637_v52, %v3635_v17 }
 0x5df   : > { %v6698_v41 = vsel %vm4880_vm5, %v6697_v44, %v13269_v9  ;;  %v6451_v20 = vunpack.c.l.b16 %v4294_v34  ;;  %v6452_v25 = vunpack.c.h.b16 %v4294_v34  ;;  %v3697_v26 = vpop.xlane.xlu1 %3696 }
 0x5e0   : > { %v6703_v39 = vsel %vm4887_vm6, %v6702_v24, %v6698_v41  ;;  %v3695_v31 = vpop.xlane.xlu0 %3694 }
 0x5e1   : > { %v6865_v1 = vrot.slane %v6451_v20, %v12738_v63  ;;  %v6870_v21 = vrot.slane %v6452_v25, %v12741_v40  ;;  %v4309_v61 = vpack.c.bf16 %v3697_v26, %v3695_v31 }
 0x5e3   : > { %v6866_v49 = vsel %vm4894_vm7, %v6865_v1, %v13276_v54  ;;  %v6481_v58 = vunpack.c.l.b16 %v4309_v61  ;;  %v6482_v38 = vunpack.c.h.b16 %v4309_v61  ;;  %v3545_v9 = vpop.xlane.xlu1 %3544 }
 0x5e4   : > { %v13330_v18 = vsel %vm4901_vm8, %v6870_v21, %v6866_v49  ;;  %v3543_v11 = vpop.xlane.xlu0 %3542 }
 0x5e5   : > { %v7013_v29 = vrot.slane %v6481_v58, %v12724_v6  ;;  %v7018_v28 = vrot.slane %v6482_v38, %v12729_v7  ;;  %v4271_v33 = vpack.c.bf16 %v3545_v9, %v3543_v11 }
 0x5e7   : > { %v7014_v35 = vsel %vm4880_vm5, %v7013_v29, %v13283_v27  ;;  %v6405_v19 = vunpack.c.l.b16 %v4271_v33  ;;  %v6406_v56 = vunpack.c.h.b16 %v4271_v33  ;;  %v3605_v54 = vpop.xlane.xlu1 %3604 }
 0x5e8   : > { %v7019_v30 = vsel %vm4887_vm6, %v7018_v28, %v7014_v35  ;;  %v3603_v59 = vpop.xlane.xlu0 %3602 }
 0x5e9   : > { %v6638_v5 = vrot.slane %v6405_v19, %v12745_v45  ;;  %v6643_v37 = vrot.slane %v6406_v56, %v12761_v8  ;;  %v4286_v13 = vpack.c.bf16 %v3605_v54, %v3603_v59 }
 0x5eb   : > { %v6639_v6 = vsel %vm4908_vm9, %v6638_v5, %v13290_v22  ;;  %v6435_v48 = vunpack.c.l.b16 %v4286_v13  ;;  %v6436_v7 = vunpack.c.h.b16 %v4286_v13  ;;  %v3673_v27 = vpop.xlane.xlu1 %3672 }
 0x5ec   : > { %v13342_v15 = vsel %vm4915_vm10, %v6643_v37, %v6639_v6  ;;  %v3671_v53 = vpop.xlane.xlu0 %3670 }
 0x5ed   : > { %v6786_v3 = vrot.slane %v6435_v48, %v12738_v63  ;;  %v6791_v32 = vrot.slane %v6436_v7, %v12741_v40 }
 0x5ef   : > { %v6787_v46 = vsel %vm4894_vm7, %v6786_v3, %v13297_v14  ;;  %v3733_v50 = vpop.xlane.xlu1 %3732 }
 0x5f0   : > { %v13349_v16 = vsel %vm4901_vm8, %v6791_v32, %v6787_v46  ;;  %v3731_v0 = vpop.xlane.xlu0 %3730 }
 0x5f1   : > { %v4318_v22 = vpack.c.bf16 %v3733_v50, %v3731_v0 }
 0x5f3   : > { %v6499_v36 = vunpack.c.l.b16 %v4318_v22  ;;  %v6500_v55 = vunpack.c.h.b16 %v4318_v22  ;;  %v3513_v52 = vpop.xlane.xlu1 %3512 }
 0x5f4   : > { %v3511_v17 = vpop.xlane.xlu0 %3510 }
 0x5f5   : > { %v7102_v44 = vrot.slane %v6499_v36, %v12738_v63  ;;  %v7107_v24 = vrot.slane %v6500_v55, %v12741_v40  ;;  %v4263_v34 = vpack.c.bf16 %v3513_v52, %v3511_v17  ;;  %v4303_v52 = vpack.c.bf16 %v3673_v27, %v3671_v53 }
 0x5f7   : > { %v7103_v41 = vsel %vm4894_vm7, %v7102_v44, %v13311_v60  ;;  %v6389_v20 = vunpack.c.l.b16 %v4263_v34  ;;  %v6390_v14 = vunpack.c.h.b16 %v4263_v34  ;;  %v3573_v26 = vpop.xlane.xlu1 %3572  ;;  %v6469_v34 = vunpack.c.l.b16 %v4303_v52 }
 0x5f8   : > { %v13356_v25 = vsel %vm4901_vm8, %v7107_v24, %v7103_v41  ;;  %v3571_v31 = vpop.xlane.xlu0 %3570 }
 0x5f9   : > { %v6559_v1 = vrot.slane %v6389_v20, %v12745_v45  ;;  %v6564_v21 = vrot.slane %v6390_v14, %v12761_v8  ;;  %v4278_v61 = vpack.c.bf16 %v3573_v26, %v3571_v31 }
 0x5fb   : > { %v6560_v49 = vsel %vm4908_vm9, %v6559_v1, %v13318_v10  ;;  %v6419_v58 = vunpack.c.l.b16 %v4278_v61  ;;  %v6420_v38 = vunpack.c.h.b16 %v4278_v61  ;;  %v3641_v60 = vpop.xlane.xlu1 %3640  ;;  %v6470_v1 = vunpack.c.h.b16 %v4303_v52 }
 0x5fc   : > { %v13363_v9 = vsel %vm4915_vm10, %v6564_v21, %v6560_v49  ;;  %v3639_v11 = vpop.xlane.xlu0 %3638  ;;  %v6954_v21 = vrot.slane %v6469_v34, %v12745_v45 }
 0x5fd   : > { %v6707_v29 = vrot.slane %v6419_v58, %v12738_v63  ;;  %v6712_v28 = vrot.slane %v6420_v38, %v12741_v40 }
 0x5ff   : > { %v6708_v33 = vsel %vm4894_vm7, %v6707_v29, %v6703_v39  ;;  %v3701_v19 = vpop.xlane.xlu1 %3700  ;;  %v6959_v29 = vrot.slane %v6470_v1, %v12761_v8 }
 0x600   : > { %v13369_v35 = vsel %vm4901_vm8, %v6712_v28, %v6708_v33  ;;  %v3699_v56 = vpop.xlane.xlu0 %3698  ;;  %v6955_v33 = vsel %vm4908_vm9, %v6954_v21, %v13304_v51 }
 0x601   : > { %v4310_v54 = vpack.c.bf16 %v3701_v19, %v3699_v56  ;;  %v4295_v56 = vpack.c.bf16 %v3641_v60, %v3639_v11 }
 0x603   : > { %v6483_v10 = vunpack.c.l.b16 %v4310_v54  ;;  %v6484_v59 = vunpack.c.h.b16 %v4310_v54  ;;  %v3549_v5 = vpop.xlane.xlu1 %3548  ;;  %v6453_v11 = vunpack.c.l.b16 %v4295_v56 }
 0x604   : > { %v3547_v37 = vpop.xlane.xlu0 %3546 }
 0x605   : > { %v7023_v13 = vrot.slane %v6483_v10, %v12738_v63  ;;  %v7028_v6 = vrot.slane %v6484_v59, %v12741_v40  ;;  %v4272_v24 = vpack.c.bf16 %v3549_v5, %v3547_v37 }
 0x607   : > { %v7024_v48 = vsel %vm4894_vm7, %v7023_v13, %v7019_v30  ;;  %v13377_v39 = vpop.xlane.xlu1 %3608  ;;  %v6407_v26 = vunpack.c.l.b16 %v4272_v24  ;;  %v6408_v49 = vunpack.c.h.b16 %v4272_v24 }
 0x608   : > { %v13375_v7 = vsel %vm4901_vm8, %v7028_v6, %v7024_v48  ;;  %v13379_v3 = vpop.xlane.xlu0 %3606  ;;  %v6960_v48 = vsel %vm4915_vm10, %v6959_v29, %v6955_v33 }
 0x609   : > { %v6648_v27 = vrot.slane %v6407_v26, %v12768_v62  ;;  %v6653_v54 = vrot.slane %v6408_v49, %v12771_v43 }
 0x60b   : > { %v3677_v32 = vpop.xlane.xlu1 %3676  ;;  %v6649_v37 = vsel %vm4922_vm11, %v6648_v27, %v13342_v15 }
 0x60c   : > { %v3675_v46 = vpop.xlane.xlu0 %3674  ;;  %v6654_v24 = vsel %vm4929_vm12, %v6653_v54, %v6649_v37 }
 0x60d   : > { %v4304_v41 = vpack.c.bf16 %v3677_v32, %v3675_v46 }
 0x60f   : > { %v13381_v50 = vpop.xlane.xlu1 %3736  ;;  %v6471_v61 = vunpack.c.l.b16 %v4304_v41  ;;  %v6472_v28 = vunpack.c.h.b16 %v4304_v41 }
 0x610   : > { %v13383_v0 = vpop.xlane.xlu0 %3734 }
 0x611   : > { %v6964_v19 = vrot.slane %v6471_v61, %v12768_v62  ;;  %v6969_v32 = vrot.slane %v6472_v28, %v12771_v43 }
 0x613   : > { %v3517_v22 = vpop.xlane.xlu1 %3516  ;;  %v6965_v51 = vsel %vm4922_vm11, %v6964_v19, %v6960_v48 }
 0x614   : > { %v3515_v36 = vpop.xlane.xlu0 %3514  ;;  %v6970_v61 = vsel %vm4929_vm12, %v6969_v32, %v6965_v51 }
 0x617   : > { %v13385_v63 = vpop.xlane.xlu1 %3576 }
 0x618   : > { %v13387_v40 = vpop.xlane.xlu0 %3574 }
 0x61b   : > { %v3645_v30 = vpop.xlane.xlu1 %3644 }
 0x61c   : > { %v3643_v55 = vpop.xlane.xlu0 %3642 }
 0x61d   : > { %v4296_v29 = vpack.c.bf16 %v3645_v30, %v3643_v55  ;;  %v4319_v30 = vpack.c.bf16 %v13381_v50, %v13383_v0 }
 0x61f   : > { %v13389_v17 = vpop.xlane.xlu1 %3704  ;;  %v6455_v37 = vunpack.c.l.b16 %v4296_v29 }
 0x620   : > { %v13391_v44 = vpop.xlane.xlu0 %3702 }
 0x621   : > { %v6885_v0 = vrot.slane %v6455_v37, %v12768_v62 }
 0x623   : > { %v3553_v20 = vpop.xlane.xlu1 %3552 }
 0x624   : > { %v3551_v14 = vpop.xlane.xlu0 %3550 }
 0x625   : > { %v4273_v31 = vpack.c.bf16 %v3553_v20, %v3551_v14  ;;  %v4264_v14 = vpack.c.bf16 %v3517_v22, %v3515_v36  ;;  %v6875_v22 = vrot.slane %v6453_v11, %v12745_v45  ;;  %v4287_v36 = vpack.c.bf16 %v13377_v39, %v13379_v3 }
 0x627   : > { %v13394_v58 = vpop.xlane.xlu1 %3612  ;;  %v6409_v53 = vunpack.c.l.b16 %v4273_v31  ;;  %v6410_v10 = vunpack.c.h.b16 %v4273_v31  ;;  %v6876_v39 = vsel %vm4908_vm9, %v6875_v22, %v13330_v18  ;;  %v6437_v3 = vunpack.c.l.b16 %v4287_v36 }
 0x628   : > { %v13396_v38 = vpop.xlane.xlu0 %3610 }
 0x629   : > { %v6658_v13 = vrot.slane %v6409_v53, %v12775_v57  ;;  %v6663_v34 = vrot.slane %v6410_v10, %v12778_v4  ;;  %v6454_v53 = vunpack.c.h.b16 %v4295_v56  ;;  %v6796_v11 = vrot.slane %v6437_v3, %v12745_v45 }
 0x62b   : > { %v3681_v59 = vpop.xlane.xlu1 %3680  ;;  %v6659_v21 = vsel %vm4936_vm13, %v6658_v13, %v6654_v24  ;;  %v6880_v56 = vrot.slane %v6454_v53, %v12761_v8  ;;  %v6392_v13 = vunpack.c.h.b16 %v4264_v14  ;;  %v4279_v53 = vpack.c.bf16 %v13385_v63, %v13387_v40 }
 0x62c   : > { %v3679_v5 = vpop.xlane.xlu0 %3678  ;;  %v6664_v54 = vsel %vm4943_vm14, %v6663_v34, %v6659_v21 }
 0x62d   : > { %v4305_v6 = vpack.c.bf16 %v3681_v59, %v3679_v5  ;;  %v6391_v59 = vunpack.c.l.b16 %v4264_v14  ;;  %v6881_v50 = vsel %vm4915_vm10, %v6880_v56, %v6876_v39  ;;  %v6574_v18 = vrot.slane %v6392_v13, %v12771_v43 }
 0x62f   : > { %v6473_v46 = vunpack.c.l.b16 %v4305_v6  ;;  %v6474_v52 = vunpack.c.h.b16 %v4305_v6  ;;  %v6226_v60 = vpop.f32.mrb[4].mxu1  ;;  %v3741_v41 = vpop.xlane.xlu1 %3740  ;;  %v6569_v32 = vrot.slane %v6391_v59, %v12768_v62  ;;  %v6421_v59 = vunpack.c.l.b16 %v4279_v53 }
 0x630   : > { %v3739_v20 = vpop.xlane.xlu0 %3738  ;;  %v13413_v15 = vadd.f32 %v6226_v60, %v13237_v47  ;;  %v6228_v1 = vpop.f32.mrb[5].mxu1  ;;  %v6438_v60 = vunpack.c.h.b16 %v4287_v36 }
 0x631   : > { %v6974_v26 = vrot.slane %v6473_v46, %v12775_v57  ;;  %v6979_v31 = vrot.slane %v6474_v52, %v12778_v4  ;;  %v13420_v49 = vadd.f32 %v6228_v1, %v13241_v23  ;;  %v6230_v27 = vpop.f32.mrb[6].mxu1  ;;  %v6501_v46 = vunpack.c.l.b16 %v4319_v30 }
 0x632   : > { %v6231_v28 = vpop.f32.mrb[7].mxu1  ;;  %v6456_v52 = vunpack.c.h.b16 %v4296_v29 }
 0x633   : > { %v6975_v47 = vsel %vm4936_vm13, %v6974_v26, %v6970_v61  ;;  %v3521_v33 = vpop.xlane.xlu1 %3520  ;;  %v6570_v26 = vsel %vm4922_vm11, %v6569_v32, %v13363_v9  ;;  %v6502_v61 = vunpack.c.h.b16 %v4319_v30  ;;  %v7112_v27 = vrot.slane %v6501_v46, %v12745_v45 }
 0x634   : > { %v3519_v19 = vpop.xlane.xlu0 %3518  ;;  %v6980_v10 = vsel %vm4943_vm14, %v6979_v31, %v6975_v47  ;;  %v4288_v31 = vpack.c.bf16 %v13394_v58, %v13396_v38  ;;  %v6890_v29 = vrot.slane %v6456_v52, %v12771_v43  ;;  %v6886_v28 = vsel %vm4922_vm11, %v6885_v0, %v6881_v50  ;;  %v9591_v50 = vld [vmem:[#allocation7 + $0x8] ss:$16 sps:$4 sm:$0xff]  }
 0x635   : > { %v4265_v23 = vpack.c.bf16 %v3521_v33, %v3519_v19  ;;  %v7140_v5 = vsel %vm5498_vm15, %v6980_v10, %v6664_v54  ;;  %v4320_v47 = vpack.c.bf16 %v3741_v41, %v3739_v20  ;;  %v6797_v9 = vsel %vm4908_vm9, %v6796_v11, %v13349_v16 }
 0x636   : > { %v13431_v55 = vpack.c.b16 %v7140_v5, %v7140_v5  ;;  %v6801_v58 = vrot.slane %v6438_v60, %v12761_v8  ;;  %v6575_v38 = vsel %vm4929_vm12, %v6574_v18, %v6570_v26  ;;  %v6439_v10 = vunpack.c.l.b16 %v4288_v31 }
 0x637   : > { %v3581_v6 = vpop.xlane.xlu1 %3580  ;;  %v6393_v51 = vunpack.c.l.b16 %v4265_v23  ;;  %v6394_v24 = vunpack.c.h.b16 %v4265_v23  ;;  %v7117_v20 = vrot.slane %v6502_v61, %v12761_v8  ;;  %v6891_v16 = vsel %vm4929_vm12, %v6890_v29, %v6886_v28 }
 0x638   : > { %7823 = vmatprep.mubr.bf16.mxu0 %v13431_v55  ;;  %v3579_v48 = vpop.xlane.xlu0 %3578  ;;  %v4311_v23 = vpack.c.bf16 %v13389_v17, %v13391_v44  ;;  %v7113_v5 = vsel %vm4908_vm9, %v7112_v27, %v13356_v25  ;;  %v6422_v30 = vunpack.c.h.b16 %v4279_v53  ;;  %v6503_v56 = vunpack.c.l.b16 %v4320_v47 }
 0x639   : > { %v6579_v1 = vrot.slane %v6393_v51, %v12775_v57  ;;  %v6584_v33 = vrot.slane %v6394_v24, %v12778_v4  ;;  %v6440_v39 = vunpack.c.h.b16 %v4288_v31  ;;  %v13468_v13 = vpack.c.bf16 %v3581_v6, %v3579_v48  ;;  %v9599_v6 = vld [vmem:[#allocation7 + $0x2c] ss:$16 sps:$4 sm:$0xff]  }
 0x63a   : > { %v6802_v52 = vsel %vm4915_vm10, %v6801_v58, %v6797_v9  ;;  %v6806_v17 = vrot.slane %v6439_v10, %v12768_v62  ;;  %v6717_v0 = vrot.slane %v6421_v59, %v12745_v45  ;;  %v6485_v60 = vunpack.c.l.b16 %v4311_v23 }
 0x63b   : > { %v3649_v34 = vpop.xlane.xlu1 %3648  ;;  %v6580_v63 = vsel %vm4936_vm13, %v6579_v1, %v6575_v38  ;;  %v6504_v11 = vunpack.c.h.b16 %v4320_v47  ;;  %v7118_v48 = vsel %vm4915_vm10, %v7117_v20, %v7113_v5  ;;  %v7122_v24 = vrot.slane %v6503_v56, %v12768_v62  ;;  %v9597_v47 = vld [vmem:[#allocation7 + $0x28] ss:$16 sps:$4 sm:$0xff]   ;;  %v9605_v38 = vld [vmem:[#allocation7 + $0x4c] ss:$16 sps:$4 sm:$0xff]  }
 0x63c   : > { %v3647_v14 = vpop.xlane.xlu0 %3646  ;;  %v6585_v3 = vsel %vm4943_vm14, %v6584_v33, %v6580_v63  ;;  %v6722_v26 = vrot.slane %v6422_v30, %v12761_v8  ;;  %v6811_v31 = vrot.slane %v6440_v39, %v12771_v43  ;;  %v6423_v1 = vunpack.c.l.b16 %v13468_v13 }
 0x63d   : > { %v4297_v21 = vpack.c.bf16 %v3649_v34, %v3647_v14  ;;  %v6807_v53 = vsel %vm4922_vm11, %v6806_v17, %v6802_v52  ;;  %v7033_v9 = vrot.slane %v6485_v60, %v12745_v45  ;;  %v7127_v58 = vrot.slane %v6504_v11, %v12771_v43  ;;  %v9609_v11 = vld [vmem:[#allocation7 + $0x68] ss:$16 sps:$4 sm:$0xff]  }
 0x63e   : > { %v7123_v33 = vsel %vm4922_vm11, %v7122_v24, %v7118_v48  ;;  %v6812_v63 = vsel %vm4929_vm12, %v6811_v31, %v6807_v53 }
 0x63f   : > { %v6457_v22 = vunpack.c.l.b16 %v4297_v21  ;;  %v6458_v36 = vunpack.c.h.b16 %v4297_v21  ;;  %v3709_v19 = vpop.xlane.xlu1 %3708 }
 0x640   : > { %v3707_v54 = vpop.xlane.xlu0 %3706 }
 0x641   : > { %v6895_v40 = vrot.slane %v6457_v22, %v12775_v57  ;;  %v6900_v41 = vrot.slane %v6458_v36, %v12778_v4  ;;  %v4312_v34 = vpack.c.bf16 %v3709_v19, %v3707_v54  ;;  %v6718_v22 = vsel %vm4908_vm9, %v6717_v0, %v13369_v35 }
 0x642   : > { %v6486_v36 = vunpack.c.h.b16 %v4311_v23  ;;  %v9603_v23 = vld [vmem:[#allocation7 + $0x48] ss:$16 sps:$4 sm:$0xff]   ;;  %v6723_v30 = vsel %vm4915_vm10, %v6722_v26, %v6718_v22 }
 0x643   : > { %v6896_v37 = vsel %vm4936_vm13, %v6895_v40, %v6891_v16  ;;  %v3617_v51 = vpop.xlane.xlu1 %3616  ;;  %v6487_v19 = vunpack.c.l.b16 %v4312_v34  ;;  %v6727_v40 = vrot.slane %v6423_v1, %v12768_v62  ;;  %v6488_v39 = vunpack.c.h.b16 %v4312_v34  ;;  %v9617_v34 = vld [vmem:[#allocation7 + $0x8c] ss:$16 sps:$4 sm:$0xff]  }
 0x644   : > { %v6901_v32 = vsel %vm4943_vm14, %v6900_v41, %v6896_v37  ;;  %v3615_v46 = vpop.xlane.xlu0 %3614  ;;  %v7038_v56 = vrot.slane %v6486_v36, %v12761_v8  ;;  %v7128_v37 = vsel %vm4929_vm12, %v7127_v58, %v7123_v33  ;;  %v9621_v58 = vld [vmem:[#allocation7 + $0x208] ss:$16 sps:$4 sm:$0xff]   ;;  %v9629_v33 = vld [vmem:[#allocation7 + $0x22c] ss:$16 sps:$4 sm:$0xff]  }
 0x645   : > { %v4289_v44 = vpack.c.bf16 %v3617_v51, %v3615_v46  ;;  %v7139_v25 = vsel %vm5498_vm15, %v6901_v32, %v6585_v3  ;;  %v9611_v3 = vld [vmem:[#allocation7 + $0x6c] ss:$16 sps:$4 sm:$0xff]   ;;  %v7043_v32 = vrot.slane %v6487_v19, %v12768_v62  ;;  %v6728_v0 = vsel %vm4922_vm11, %v6727_v40, %v6723_v30  ;;  %v9624_v19 = vld [vmem:[#allocation7 + $0xc8] ss:$16 sps:$4 sm:$0xff]  }
 0x646   : > { %v13475_v18 = vpack.c.b16 %v7139_v25, %v7139_v25  ;;  %v7048_v48 = vrot.slane %v6488_v39, %v12771_v43  ;;  %v9633_v40 = vld [vmem:[#allocation7 + $0x248] ss:$16 sps:$4 sm:$0xff]   ;;  %v9650_v30 = vld [vmem:[#allocation7 + $0x14c] ss:$16 sps:$4 sm:$0xff]  }
 0x647   : > { %v6441_v14 = vunpack.c.l.b16 %v4289_v44  ;;  %v6442_v21 = vunpack.c.h.b16 %v4289_v44  ;;  %v3745_v61 = vpop.xlane.xlu1 %3744  ;;  %v9651_v39 = vld [vmem:[#allocation7 + $0x2a8] ss:$16 sps:$4 sm:$0xff]  }
 0x648   : > { %7824 = vmatmul.mubr.bf16.vlgmr.msra.gmra.mrb[4].mxu0 %v13475_v18  ;;  %v3743_v27 = vpop.xlane.xlu0 %3742 }
 0x649   : > { %v6816_v29 = vrot.slane %v6441_v14, %v12775_v57  ;;  %7874 = vmatpush1.bf16.msra.mxu0 %v9591_v50  ;;  %v4321_v28 = vpack.c.bf16 %v3745_v61, %v3743_v27  ;;  %7905 = vmatprep.mubr.bf16.mxu0 %v13431_v55  ;;  %v6424_v55 = vunpack.c.h.b16 %v13468_v13  ;;  %v6821_v35 = vrot.slane %v6442_v21, %v12778_v4 }
 0x64a   : > { %7875 = vmatprep.subr.bf16.mxu0 %v9599_v6  ;;  %v7034_v13 = vsel %vm4908_vm9, %v7033_v9, %v13375_v7  ;;  %v9618_v9 = vld [vmem:[#allocation7 + $0xa8] ss:$16 sps:$4 sm:$0xff]  }
 0x64b   : > { %v6505_v54 = vunpack.c.l.b16 %v4321_v28  ;;  %v6506_v10 = vunpack.c.h.b16 %v4321_v28  ;;  %v3585_v41 = vpop.xlane.xlu1 %3584  ;;  %v6817_v5 = vsel %vm4936_vm13, %v6816_v29, %v6812_v63  ;;  %v6732_v52 = vrot.slane %v6424_v55, %v12771_v43  ;;  %v9615_v43 = vld [vmem:[#allocation7 + $0x88] ss:$16 sps:$4 sm:$0xff]   ;;  %v9620_v28 = vld [vmem:[#allocation7 + $0xac] ss:$16 sps:$4 sm:$0xff]  }
 0x64c   : > { %v3583_v20 = vpop.xlane.xlu0 %3582  ;;  %v6822_v8 = vsel %vm4943_vm14, %v6821_v35, %v6817_v5  ;;  %v7039_v6 = vsel %vm4915_vm10, %v7038_v56, %v7034_v13  ;;  %v9635_v63 = vld [vmem:[#allocation7 + $0x24c] ss:$16 sps:$4 sm:$0xff]   ;;  %v9630_v55 = vld [vmem:[#allocation7 + $0xe8] ss:$16 sps:$4 sm:$0xff]  }
 0x64d   : > { %v7132_v45 = vrot.slane %v6505_v54, %v12775_v57  ;;  %v7137_v59 = vrot.slane %v6506_v10, %v12778_v4  ;;  %7876 = vmatpush1.bf16.msra.mxu0 %v9597_v47  ;;  %v4281_v16 = vpack.c.bf16 %v3585_v41, %v3583_v20  ;;  %v7044_v14 = vsel %vm4922_vm11, %v7043_v32, %v7039_v6  ;;  %v9627_v54 = vld [vmem:[#allocation7 + $0x228] ss:$16 sps:$4 sm:$0xff]   ;;  %v9632_v10 = vld [vmem:[#allocation7 + $0xec] ss:$16 sps:$4 sm:$0xff]  }
 0x64e   : > { %7877 = vmatprep.subr.bf16.mxu0 %v9605_v38  ;;  %v6733_v1 = vsel %vm4929_vm12, %v6732_v52, %v6728_v0  ;;  %v7049_v29 = vsel %vm4929_vm12, %v7048_v48, %v7044_v14  ;;  %v9638_v35 = vld [vmem:[#allocation7 + $0x10c] ss:$16 sps:$4 sm:$0xff]   ;;  %v9636_v20 = vld [vmem:[#allocation7 + $0x108] ss:$16 sps:$4 sm:$0xff]  }
 0x64f   : > { %v6425_v51 = vunpack.c.l.b16 %v4281_v16  ;;  %v7133_v46 = vsel %vm4936_vm13, %v7132_v45, %v7128_v37  ;;  %v6426_v17 = vunpack.c.h.b16 %v4281_v16  ;;  %v3713_v44 = vpop.xlane.xlu1 %3712  ;;  %v9641_v41 = vld [vmem:[#allocation7 + $0x26c] ss:$16 sps:$4 sm:$0xff]   ;;  %v9639_v45 = vld [vmem:[#allocation7 + $0x268] ss:$16 sps:$4 sm:$0xff]  }
 0x650   : > { %v3711_v50 = vpop.xlane.xlu0 %3710  ;;  %v7138_v25 = vsel %vm4943_vm14, %v7137_v59, %v7133_v46  ;;  %v9644_v59 = vld [vmem:[#allocation7 + $0x12c] ss:$16 sps:$4 sm:$0xff]   ;;  %v9645_v5 = vld [vmem:[#allocation7 + $0x288] ss:$16 sps:$4 sm:$0xff]  }
 0x651   : > { %v6737_v60 = vrot.slane %v6425_v51, %v12775_v57  ;;  %7878 = vmatpush1.bf16.msra.mxu0 %v9603_v23  ;;  %v4313_v7 = vpack.c.bf16 %v3713_v44, %v3711_v50  ;;  %v7142_v62 = vsel %vm5498_vm15, %v7138_v25, %v6822_v8  ;;  %v6742_v21 = vrot.slane %v6426_v17, %v12778_v4  ;;  %v9647_v16 = vld [vmem:[#allocation7 + $0x28c] ss:$16 sps:$4 sm:$0xff]   ;;  %v9642_v23 = vld [vmem:[#allocation7 + $0x128] ss:$16 sps:$4 sm:$0xff]  }
 0x652   : > { %7879 = vmatprep.subr.bf16.mxu0 %v9611_v3  ;;  %v7146_v24 = vpack.c.b16 %v7142_v62, %v7142_v62  ;;  %v9653_v56 = vld [vmem:[#allocation7 + $0x2ac] ss:$16 sps:$4 sm:$0xff]   ;;  %v9648_v37 = vld [vmem:[#allocation7 + $0x148] ss:$16 sps:$4 sm:$0xff]  }
 0x653   : > { %v6489_v26 = vunpack.c.l.b16 %v4313_v7  ;;  %v6490_v31 = vunpack.c.h.b16 %v4313_v7  ;;  %v6738_v61 = vsel %vm4936_vm13, %v6737_v60, %v6733_v1  ;;  %v9656_v3 = vld [vmem:[#allocation7 + $0x16c] ss:$16 sps:$4 sm:$0xff]   ;;  %v9654_v44 = vld [vmem:[#allocation7 + $0x168] ss:$16 sps:$4 sm:$0xff]  }
 0x654   : > { %7864 = vmatprep.mubr.bf16.mxu1 %v7146_v24  ;;  %v6743_v22 = vsel %vm4943_vm14, %v6742_v21, %v6738_v61  ;;  %v9659_v13 = vld [vmem:[#allocation7 + $0x2cc] ss:$16 sps:$4 sm:$0xff]   ;;  %v9657_v50 = vld [vmem:[#allocation7 + $0x2c8] ss:$16 sps:$4 sm:$0xff]  }
 0x655   : > { %v7053_v27 = vrot.slane %v6489_v26, %v12775_v57  ;;  %v7058_v53 = vrot.slane %v6490_v31, %v12778_v4  ;;  %7880 = vmatpush1.bf16.msra.mxu0 %v9609_v11  ;;  %v9626_v4 = vld [vmem:[#allocation7 + $0xcc] ss:$16 sps:$4 sm:$0xff]   ;;  %v9660_v60 = vld [vmem:[#allocation7 + $0x188] ss:$16 sps:$4 sm:$0xff]  }
 0x656   : > { %7881 = vmatprep.subr.bf16.mxu0 %v9617_v34  ;;  %v9662_v25 = vld [vmem:[#allocation7 + $0x18c] ss:$16 sps:$4 sm:$0xff]   ;;  %v9663_v7 = vld [vmem:[#allocation7 + $0x2e8] ss:$16 sps:$4 sm:$0xff]  }
 0x657   : > { %v7054_v47 = vsel %vm4936_vm13, %v7053_v27, %v7049_v29  ;;  %v9665_v0 = vld [vmem:[#allocation7 + $0x2ec] ss:$16 sps:$4 sm:$0xff]   ;;  %v9669_v62 = vld [vmem:[#allocation7 + $0x308] ss:$16 sps:$4 sm:$0xff]  }
 0x658   : > { %v7059_v36 = vsel %vm4943_vm14, %v7058_v53, %v7054_v47  ;;  %v9671_v11 = vld [vmem:[#allocation7 + $0x30c] ss:$16 sps:$4 sm:$0xff]   ;;  %v9675_v34 = vld [vmem:[#allocation7 + $0x328] ss:$16 sps:$4 sm:$0xff]  }
 0x659   : > { %7882 = vmatpush1.bf16.msra.mxu0 %v9615_v43  ;;  %v7141_v38 = vsel %vm5498_vm15, %v7059_v36, %v6743_v22  ;;  %v9674_v6 = vld [vmem:[#allocation7 + $0x1cc] ss:$16 sps:$4 sm:$0xff]   ;;  %v9678_v31 = vld [vmem:[#allocation7 + $0x1e8] ss:$16 sps:$4 sm:$0xff]  }
 0x65a   : > { %7883 = vmatprep.subr.bf16.mxu0 %v9620_v28  ;;  %v13524_v57 = vpack.c.b16 %v7141_v38, %v7141_v38  ;;  %v9677_v48 = vld [vmem:[#allocation7 + $0x32c] ss:$16 sps:$4 sm:$0xff]   ;;  %v9681_v1 = vld [vmem:[#allocation7 + $0x348] ss:$16 sps:$4 sm:$0xff]  }
 0x65b   : > { %v9680_v14 = vld [vmem:[#allocation7 + $0x1ec] ss:$16 sps:$4 sm:$0xff]   ;;  %v9701_v61 = vld [vmem:[#allocation12 + $0x4] ss:$8 sps:$4 sm:$0xff]   ;;  %v9704_v29 = vld [vmem:[#allocation12 + $0x14] ss:$8 sps:$4 sm:$0xff]  }
 0x65c   : > { %7865 = vmatmul.mubr.bf16.vlgmr.msra.gmra.mrb[12].mxu1 %v13524_v57  ;;  %v9683_v26 = vld [vmem:[#allocation7 + $0x34c] ss:$16 sps:$4 sm:$0xff]   ;;  %v9684_v27 = vld [vmem:[#allocation7 + $0x368] ss:$16 sps:$4 sm:$0xff]  }
 0x65d   : > { %7884 = vmatpush1.bf16.msra.mxu0 %v9618_v9  ;;  %7915 = vmatpush1.bf16.msra.mxu1 %v9621_v58  ;;  %v9686_v21 = vld [vmem:[#allocation7 + $0x36c] ss:$16 sps:$4 sm:$0xff]   ;;  %v9687_v28 = vld [vmem:[#allocation7 + $0x388] ss:$16 sps:$4 sm:$0xff]  }
 0x65e   : > { %7946 = vmatprep.mubr.bf16.mxu1 %v7146_v24  ;;  %7885 = vmatprep.subr.bf16.mxu0 %v9626_v4  ;;  %v9672_v24 = vld [vmem:[#allocation7 + $0x1c8] ss:$16 sps:$4 sm:$0xff]   ;;  %v9699_v53 = vld [vmem:[#allocation12] ss:$8 sps:$4 sm:$0xff]   ;;  %v9702_v47 = vld [vmem:[#allocation12 + $0x10] ss:$8 sps:$4 sm:$0xff]  }
 0x65f   : > { %7916 = vmatprep.subr.bf16.mxu1 %v9629_v33  ;;  %v9689_v43 = vld [vmem:[#allocation7 + $0x38c] ss:$16 sps:$4 sm:$0xff]   ;;  %v9707_v36 = vld [vmem:[#allocation12 + $0x24] ss:$8 sps:$4 sm:$0xff]   ;;  %v9710_v4 = vld [vmem:[#allocation12 + $0x34] ss:$8 sps:$4 sm:$0xff]  }
 0x660   : > { %v9692_v22 = vld [vmem:[#allocation7 + $0x3ac] ss:$16 sps:$4 sm:$0xff]   ;;  %v9690_v9 = vld [vmem:[#allocation7 + $0x3a8] ss:$16 sps:$4 sm:$0xff]  }
 0x661   : > { %7886 = vmatpush1.bf16.msra.mxu0 %v9624_v19  ;;  %7917 = vmatpush1.bf16.msra.mxu1 %v9627_v54  ;;  %v9705_v58 = vld [vmem:[#allocation12 + $0x20] ss:$8 sps:$4 sm:$0xff]   ;;  %v9693_v33 = vld [vmem:[#allocation7 + $0x3c8] ss:$16 sps:$4 sm:$0xff]  }
 0x662   : > { %7887 = vmatprep.subr.bf16.mxu0 %v9632_v10  ;;  %7918 = vmatprep.subr.bf16.mxu1 %v9635_v63  ;;  %v9695_v38 = vld [vmem:[#allocation7 + $0x3cc] ss:$16 sps:$4 sm:$0xff]   ;;  %v9713_v54 = vld [vmem:[#allocation12 + $0x44] ss:$8 sps:$4 sm:$0xff]  }
 0x663   : > { %v9698_v19 = vld [vmem:[#allocation7 + $0x3ec] ss:$16 sps:$4 sm:$0xff]   ;;  %v9696_v10 = vld [vmem:[#allocation7 + $0x3e8] ss:$16 sps:$4 sm:$0xff]  }
 0x664   : > { %v9711_v63 = vld [vmem:[#allocation12 + $0x40] ss:$8 sps:$4 sm:$0xff]  }
 0x665   : > { %7888 = vmatpush1.bf16.msra.mxu0 %v9630_v55  ;;  %7919 = vmatpush1.bf16.msra.mxu1 %v9633_v40  ;;  %v9716_v55 = vld [vmem:[#allocation12 + $0x54] ss:$8 sps:$4 sm:$0xff]   ;;  %v9714_v40 = vld [vmem:[#allocation12 + $0x50] ss:$8 sps:$4 sm:$0xff]  }
 0x666   : > { %7889 = vmatprep.subr.bf16.mxu0 %v9638_v35  ;;  %7920 = vmatprep.subr.bf16.mxu1 %v9641_v41  ;;  %v9719_v35 = vld [vmem:[#allocation12 + $0x64] ss:$8 sps:$4 sm:$0xff]   ;;  %v9717_v41 = vld [vmem:[#allocation12 + $0x60] ss:$8 sps:$4 sm:$0xff]  }
 0x669   : > { %7890 = vmatpush1.bf16.msra.mxu0 %v9636_v20  ;;  %7921 = vmatpush1.bf16.msra.mxu1 %v9639_v45  ;;  %v9722_v20 = vld [vmem:[#allocation12 + $0x74] ss:$8 sps:$4 sm:$0xff]   ;;  %v9720_v45 = vld [vmem:[#allocation12 + $0x70] ss:$8 sps:$4 sm:$0xff]  }
 0x66a   : > { %7891 = vmatprep.subr.bf16.mxu0 %v9644_v59  ;;  %7922 = vmatprep.subr.bf16.mxu1 %v9647_v16  ;;  %v9725_v59 = vld [vmem:[#allocation12 + $0x84] ss:$8 sps:$4 sm:$0xff]   ;;  %v9723_v16 = vld [vmem:[#allocation12 + $0x80] ss:$8 sps:$4 sm:$0xff]  }
 0x66d   : > { %7892 = vmatpush1.bf16.msra.mxu0 %v9642_v23  ;;  %7923 = vmatpush1.bf16.msra.mxu1 %v9645_v5  ;;  %v9728_v23 = vld [vmem:[#allocation12 + $0x94] ss:$8 sps:$4 sm:$0xff]   ;;  %v9726_v5 = vld [vmem:[#allocation12 + $0x90] ss:$8 sps:$4 sm:$0xff]  }
 0x66e   : > { %7893 = vmatprep.subr.bf16.mxu0 %v9650_v30  ;;  %7924 = vmatprep.subr.bf16.mxu1 %v9653_v56  ;;  %v9731_v30 = vld [vmem:[#allocation12 + $0xa4] ss:$8 sps:$4 sm:$0xff]   ;;  %v9729_v56 = vld [vmem:[#allocation12 + $0xa0] ss:$8 sps:$4 sm:$0xff]  }
 0x66f   : > { %v6308_v32 = vpop.f32.mrb[8].mxu1 }
 0x670   : > { %v13528_v51 = vadd.f32 %v6308_v32, %v13239_v42  ;;  %v6310_v46 = vpop.f32.mrb[9].mxu1  ;;  %v9668_v42 = vld [vmem:[#allocation7 + $0x1ac] ss:$16 sps:$4 sm:$0xff]  }
 0x671   : > { %7894 = vmatpush1.bf16.msra.mxu0 %v9648_v37  ;;  %7925 = vmatpush1.bf16.msra.mxu1 %v9651_v39  ;;  %v13531_v52 = vadd.f32 %v6310_v46, %v13243_v12  ;;  %v6312_v17 = vpop.f32.mrb[10].mxu1  ;;  %v9666_v12 = vld [vmem:[#allocation7 + $0x1a8] ss:$16 sps:$4 sm:$0xff]   ;;  %v9732_v37 = vld [vmem:[#allocation12 + $0xb0] ss:$8 sps:$4 sm:$0xff]  }
 0x672   : > { %v6313_v8 = vpop.f32.mrb[11].mxu1  ;;  %7895 = vmatprep.subr.bf16.mxu0 %v9656_v3  ;;  %7926 = vmatprep.subr.bf16.mxu1 %v9659_v13  ;;  %v9737_v39 = vld [vmem:[#allocation12 + $0xc4] ss:$8 sps:$4 sm:$0xff]   ;;  %v9735_v3 = vld [vmem:[#allocation12 + $0xc0] ss:$8 sps:$4 sm:$0xff]  }
 0x673   : > { %v9740_v13 = vld [vmem:[#allocation12 + $0xd4] ss:$8 sps:$4 sm:$0xff]   ;;  %v9738_v32 = vld [vmem:[#allocation12 + $0xd0] ss:$8 sps:$4 sm:$0xff]   ;;  %v9743_v46 = vld [vmem:[#allocation12 + $0xe4] ss:$8 sps:$4 sm:$0xff]  }
 0x674   : > { %v9741_v17 = vld [vmem:[#allocation12 + $0xe0] ss:$8 sps:$4 sm:$0xff]   ;;  %v9749_v8 = vld [vmem:[#allocation12 + $0x104] ss:$8 sps:$4 sm:$0xff]  }
 0x675   : > { %7896 = vmatpush1.bf16.msra.mxu0 %v9654_v44  ;;  %7927 = vmatpush1.bf16.msra.mxu1 %v9657_v50  ;;  %v9746_v44 = vld [vmem:[#allocation12 + $0xf4] ss:$8 sps:$4 sm:$0xff]   ;;  %v9744_v50 = vld [vmem:[#allocation12 + $0xf0] ss:$8 sps:$4 sm:$0xff]  }
 0x676   : > { %7897 = vmatprep.subr.bf16.mxu0 %v9662_v25  ;;  %7928 = vmatprep.subr.bf16.mxu1 %v9665_v0  ;;  %v9795_v25 = vld [vmem:[#allocation15 + $0x40] sm:$0xff]  }
 0x677   : > { %v9796_v0 = vld [vmem:[#allocation15] sm:$0xff]  }
 0x679   : > { %7898 = vmatpush1.bf16.msra.mxu0 %v9660_v60  ;;  %7929 = vmatpush1.bf16.msra.mxu1 %v9663_v7  ;;  %v9797_v60 = vld [vmem:[#allocation15 + $0x48] sm:$0xff]  }
 0x67a   : > { %7899 = vmatprep.subr.bf16.mxu0 %v9668_v42  ;;  %7930 = vmatprep.subr.bf16.mxu1 %v9671_v11  ;;  %v9798_v7 = vld [vmem:[#allocation15 + $0x8] sm:$0xff]   ;;  %v9799_v42 = vld [vmem:[#allocation15 + $0x50] sm:$0xff]  }
 0x67b   : > { %v9800_v11 = vld [vmem:[#allocation15 + $0x10] sm:$0xff]  }
 0x67d   : > { %7900 = vmatpush1.bf16.msra.mxu0 %v9666_v12  ;;  %7931 = vmatpush1.bf16.msra.mxu1 %v9669_v62  ;;  %v9801_v12 = vld [vmem:[#allocation15 + $0x58] sm:$0xff]  }
 0x67e   : > { %7901 = vmatprep.subr.bf16.mxu0 %v9674_v6  ;;  %7932 = vmatprep.subr.bf16.mxu1 %v9677_v48  ;;  %v9802_v62 = vld [vmem:[#allocation15 + $0x18] sm:$0xff]   ;;  %v9803_v6 = vld [vmem:[#allocation15 + $0x60] sm:$0xff]  }
 0x67f   : > { %v9804_v48 = vld [vmem:[#allocation15 + $0x20] sm:$0xff]  }
 0x681   : > { %7902 = vmatpush1.bf16.msra.mxu0 %v9672_v24  ;;  %7933 = vmatpush1.bf16.msra.mxu1 %v9675_v34  ;;  %v9805_v24 = vld [vmem:[#allocation15 + $0x68] sm:$0xff]  }
 0x682   : > { %7903 = vmatprep.subr.bf16.mxu0 %v9680_v14  ;;  %7934 = vmatprep.subr.bf16.mxu1 %v9683_v26  ;;  %v9806_v34 = vld [vmem:[#allocation15 + $0x28] sm:$0xff]  }
 0x685   : > { %7904 = vmatpush1.bf16.msra.mxu0 %v9678_v31  ;;  %7935 = vmatpush1.bf16.msra.mxu1 %v9681_v1 }
 0x686   : > { %7936 = vmatprep.subr.bf16.mxu1 %v9686_v21  ;;  %8393 = vmatprep.subr.bf16.mxu0 %v9701_v61 }
 0x688   : > { %7906 = vmatmul.mubr.bf16.vlgmr.msra.gmra.mrb[8].mxu0 %v13475_v18  ;;  %v9708_v18 = vld [vmem:[#allocation12 + $0x30] ss:$8 sps:$4 sm:$0xff]  }
 0x689   : > { %7937 = vmatpush1.bf16.msra.mxu1 %v9684_v27  ;;  %8394 = vmatpush1.bf16.msra.mxu0 %v9699_v53  ;;  %v7959_v27 = vsub.s32 0, %v12617_v2  ;;  %v13538_v53 = vld [vmem:[#allocation10] sm:$0xf] }
 0x68a   : > { %7938 = vmatprep.subr.bf16.mxu1 %v9689_v43  ;;  %8395 = vmatprep.subr.bf16.mxu0 %v9704_v29  ;;  %v7963_v43 = vsub.s32 1, %v12617_v2 }
 0x68b   : > { %v7960_v29 = vrot.slane %v13538_v53, %v7959_v27 }
 0x68d   : > { %7939 = vmatpush1.bf16.msra.mxu1 %v9687_v28  ;;  %8396 = vmatpush1.bf16.msra.mxu0 %v9702_v47 }
 0x68e   : > { %7940 = vmatprep.subr.bf16.mxu1 %v9692_v22  ;;  %8397 = vmatprep.subr.bf16.mxu0 %v9707_v36 }
 0x691   : > { %7941 = vmatpush1.bf16.msra.mxu1 %v9690_v9  ;;  %8398 = vmatpush1.bf16.msra.mxu0 %v9705_v58 }
 0x692   : > { %7942 = vmatprep.subr.bf16.mxu1 %v9695_v38  ;;  %8399 = vmatprep.subr.bf16.mxu0 %v9710_v4 }
 0x695   : > { %7943 = vmatpush1.bf16.msra.mxu1 %v9693_v33  ;;  %8400 = vmatpush1.bf16.msra.mxu0 %v9708_v18 }
 0x696   : > { %7944 = vmatprep.subr.bf16.mxu1 %v9698_v19  ;;  %8401 = vmatprep.subr.bf16.mxu0 %v9713_v54 }
 0x699   : > { %7945 = vmatpush1.bf16.msra.mxu1 %v9696_v10  ;;  %8402 = vmatpush1.bf16.msra.mxu0 %v9711_v63  ;;  %v9747_v10 = vld [vmem:[#allocation12 + $0x100] ss:$8 sps:$4 sm:$0xff]  }
 0x69a   : > { %8403 = vmatprep.subr.bf16.mxu0 %v9716_v55  ;;  %9146 = vmatprep.subr.bf16.mxu1 %v9795_v25  ;;  %v9752_v55 = vld [vmem:[#allocation12 + $0x114] ss:$8 sps:$4 sm:$0xff]   ;;  %v9779_v25 = vld [vmem:[#allocation12 + $0x1a4] ss:$8 sps:$4 sm:$0xff]  }
 0x69c   : > { %7947 = vmatmul.mubr.bf16.vlgmr.msra.gmra.mrb[16].mxu1 %v13524_v57  ;;  %v9734_v57 = vld [vmem:[#allocation12 + $0xb4] ss:$8 sps:$4 sm:$0xff]  }
 0x69d   : > { %8404 = vmatpush1.bf16.msra.mxu0 %v9714_v40  ;;  %9147 = vmatpush3.bf16.msra.mxu1 %v9796_v0  ;;  %v9750_v40 = vld [vmem:[#allocation12 + $0x110] ss:$8 sps:$4 sm:$0xff]  }
 0x69e   : > { %8405 = vmatprep.subr.bf16.mxu0 %v9719_v35  ;;  %9148 = vmatprep.subr.bf16.mxu1 %v9797_v60  ;;  %v9755_v35 = vld [vmem:[#allocation12 + $0x124] ss:$8 sps:$4 sm:$0xff]   ;;  %v9777_v60 = vld [vmem:[#allocation12 + $0x1a0] ss:$8 sps:$4 sm:$0xff]  }
 0x6a1   : > { %8406 = vmatpush1.bf16.msra.mxu0 %v9717_v41  ;;  %9149 = vmatpush3.bf16.msra.mxu1 %v9798_v7  ;;  %v9753_v41 = vld [vmem:[#allocation12 + $0x120] ss:$8 sps:$4 sm:$0xff]   ;;  %v9782_v7 = vld [vmem:[#allocation12 + $0x1b4] ss:$8 sps:$4 sm:$0xff]  }
 0x6a2   : > { %8407 = vmatprep.subr.bf16.mxu0 %v9722_v20  ;;  %9150 = vmatprep.subr.bf16.mxu1 %v9799_v42  ;;  %v9758_v20 = vld [vmem:[#allocation12 + $0x134] ss:$8 sps:$4 sm:$0xff]   ;;  %v9780_v42 = vld [vmem:[#allocation12 + $0x1b0] ss:$8 sps:$4 sm:$0xff]  }
 0x6a5   : > { %8408 = vmatpush1.bf16.msra.mxu0 %v9720_v45  ;;  %9151 = vmatpush3.bf16.msra.mxu1 %v9800_v11  ;;  %v9756_v45 = vld [vmem:[#allocation12 + $0x130] ss:$8 sps:$4 sm:$0xff]   ;;  %v9785_v11 = vld [vmem:[#allocation12 + $0x1c4] ss:$8 sps:$4 sm:$0xff]  }
 0x6a6   : > { %8409 = vmatprep.subr.bf16.mxu0 %v9725_v59  ;;  %9152 = vmatprep.subr.bf16.mxu1 %v9801_v12  ;;  %v9761_v59 = vld [vmem:[#allocation12 + $0x144] ss:$8 sps:$4 sm:$0xff]   ;;  %v9783_v12 = vld [vmem:[#allocation12 + $0x1c0] ss:$8 sps:$4 sm:$0xff]  }
 0x6a9   : > { %8410 = vmatpush1.bf16.msra.mxu0 %v9723_v16  ;;  %9153 = vmatpush3.bf16.msra.mxu1 %v9802_v62  ;;  %v9759_v16 = vld [vmem:[#allocation12 + $0x140] ss:$8 sps:$4 sm:$0xff]   ;;  %v7967_v62 = vsub.s32 2, %v12617_v2 }
 0x6aa   : > { %8411 = vmatprep.subr.bf16.mxu0 %v9728_v23  ;;  %9154 = vmatprep.subr.bf16.mxu1 %v9803_v6  ;;  %v9764_v23 = vld [vmem:[#allocation12 + $0x154] ss:$8 sps:$4 sm:$0xff]   ;;  %v9786_v6 = vld [vmem:[#allocation12 + $0x1d0] ss:$8 sps:$4 sm:$0xff]  }
 0x6ad   : > { %8412 = vmatpush1.bf16.msra.mxu0 %v9726_v5  ;;  %9155 = vmatpush3.bf16.msra.mxu1 %v9804_v48  ;;  %v9762_v5 = vld [vmem:[#allocation12 + $0x150] ss:$8 sps:$4 sm:$0xff]   ;;  %v9791_v48 = vld [vmem:[#allocation12 + $0x1e4] ss:$8 sps:$4 sm:$0xff]  }
 0x6ae   : > { %8413 = vmatprep.subr.bf16.mxu0 %v9731_v30  ;;  %9156 = vmatprep.subr.bf16.mxu1 %v9805_v24  ;;  %v9767_v30 = vld [vmem:[#allocation12 + $0x164] ss:$8 sps:$4 sm:$0xff]   ;;  %v7968_v24 = vrot.slane %v13538_v53, %v7967_v62 }
 0x6b1   : > { %8414 = vmatpush1.bf16.msra.mxu0 %v9729_v56  ;;  %9157 = vmatpush3.bf16.msra.mxu1 %v9806_v34  ;;  %v9765_v56 = vld [vmem:[#allocation12 + $0x160] ss:$8 sps:$4 sm:$0xff]  }
 0x6b2   : > { %8415 = vmatprep.subr.bf16.mxu0 %v9734_v57  ;;  %v9770_v57 = vld [vmem:[#allocation12 + $0x174] ss:$8 sps:$4 sm:$0xff]  }
 0x6b5   : > { %8416 = vmatpush1.bf16.msra.mxu0 %v9732_v37  ;;  %v9768_v37 = vld [vmem:[#allocation12 + $0x170] ss:$8 sps:$4 sm:$0xff]  }
 0x6b6   : > { %8417 = vmatprep.subr.bf16.mxu0 %v9737_v39  ;;  %v9773_v39 = vld [vmem:[#allocation12 + $0x184] ss:$8 sps:$4 sm:$0xff]  }
 0x6b9   : > { %8418 = vmatpush1.bf16.msra.mxu0 %v9735_v3  ;;  %v9771_v3 = vld [vmem:[#allocation12 + $0x180] ss:$8 sps:$4 sm:$0xff]  }
 0x6ba   : > { %8419 = vmatprep.subr.bf16.mxu0 %v9740_v13  ;;  %v9776_v13 = vld [vmem:[#allocation12 + $0x194] ss:$8 sps:$4 sm:$0xff]  }
 0x6bd   : > { %8420 = vmatpush1.bf16.msra.mxu0 %v9738_v32 }
 0x6be   : > { %8421 = vmatprep.subr.bf16.mxu0 %v9743_v46 }
 0x6c1   : > { %8422 = vmatpush1.bf16.msra.mxu0 %v9741_v17 }
 0x6c2   : > { %8423 = vmatprep.subr.bf16.mxu0 %v9746_v44  ;;  %v9774_v44 = vld [vmem:[#allocation12 + $0x190] ss:$8 sps:$4 sm:$0xff]  }
 0x6c5   : > { %8424 = vmatpush1.bf16.msra.mxu0 %v9744_v50 }
 0x6c6   : > { %8434 = vmatprep.subr.bf16.mxu0 %v9749_v8 }
 0x71b   : > { %v7825_v14 = vpop.f32.mrb[4].mxu0 }
 0x71c   : > { %v7826_v26 = vadd.f32 %v7825_v14, %v13413_v15  ;;  %v7827_v31 = vpop.f32.mrb[5].mxu0  ;;  %v7964_v15 = vrot.slane %v13538_v53, %v7963_v43 }
 0x71d   : > { %v7828_v1 = vadd.f32 %v7827_v31, %v13420_v49  ;;  %v7829_v21 = vpop.f32.mrb[6].mxu0 }
 0x71e   : > { %v7830_v61 = vpop.f32.mrb[7].mxu0 }
 0x72f   : > { %v7866_v28 = vpop.f32.mrb[12].mxu1 }
 0x730   : > { %v7867_v47 = vadd.f32 %v7866_v28, %v7826_v26  ;;  %v7868_v22 = vpop.f32.mrb[13].mxu1 }
 0x731   : > { %v7869_v49 = vadd.f32 %v7868_v22, %v7828_v1  ;;  %v7870_v36 = vpop.f32.mrb[14].mxu1  ;;  %v9789_v1 = vld [vmem:[#allocation12 + $0x1e0] ss:$8 sps:$4 sm:$0xff]  }
 0x732   : > { %v7977_v9 = vadd.f32 %v7960_v29, %v7867_v47  ;;  %v7871_v58 = vpop.f32.mrb[15].mxu1  ;;  %v9794_v29 = vld [vmem:[#allocation12 + $0x1f4] ss:$8 sps:$4 sm:$0xff]  }
 0x733   : > { %v7978_v38 = vadd.f32 %v7964_v15, %v7869_v49  ;;  %v9792_v49 = vld [vmem:[#allocation12 + $0x1f0] ss:$8 sps:$4 sm:$0xff]  }
 0x734   : > { %vm7981_vm0 = vcmp.gt.f32.partialorder %v7977_v9, 0.0  ;;  %v7985_v4 = vmul.f32 0.2, %v7977_v9 }
 0x735   : > { %v7986_v33 = vmul.f32 0.2, %v7978_v38  ;;  %vm7982_vm1 = vcmp.gt.f32.partialorder %v7978_v38, 0.0 }
 0x736   : > { %v7989_v18 = vsel %vm7981_vm0, %v7977_v9, %v7985_v4  ;;  %v9807_v4 = vld [vmem:[#allocation15 + $0x70] sm:$0xff]  }
 0x737   : > { %v7990_v19 = vsel %vm7982_vm1, %v7978_v38, %v7986_v33  ;;  %v7993_v63 = vpack.c.bf16 %v7989_v18, %v7989_v18  ;;  %v9808_v33 = vld [vmem:[#allocation15 + $0x30] sm:$0xff]   ;;  %9158 = vmatprep.subr.bf16.mxu1 %v9807_v4  ;;  %v9809_v18 = vld [vmem:[#allocation15 + $0x78] sm:$0xff]  }
 0x738   : > { %v7994_v54 = vpack.c.bf16 %v7990_v19, %v7990_v19  ;;  %9159 = vmatpush3.bf16.msra.mxu1 %v9808_v33  ;;  %v9810_v19 = vld [vmem:[#allocation15 + $0x38] sm:$0xff]  }
 0x739   : > { %9160 = vmatprep.subr.bf16.mxu1 %v9809_v18 }
 0x73a   : > { %8425 = vmatprep.mubr.bf16.mxu0 %v7994_v54  ;;  %v8061_v54 = vld [vmem:[#allocation13] sm:$0x3] }
 0x73b   : > { %8426 = vmatmul.mubr.bf16.vlgmr.msra.gmra.mrb[12].mxu0 %v7993_v63  ;;  %v8070_v63 = vrot.slane %v8061_v54, %v7963_v43 }
 0x73c   : > { %8435 = vmatpush1.bf16.msra.mxu0 %v9747_v10  ;;  %9161 = vmatpush3.bf16.msra.mxu1 %v9810_v19  ;;  %v8066_v10 = vrot.slane %v8061_v54, %v7959_v27 }
 0x73d   : > { %8436 = vmatprep.subr.bf16.mxu0 %v9752_v55 }
 0x740   : > { %8437 = vmatpush1.bf16.msra.mxu0 %v9750_v40 }
 0x741   : > { %8438 = vmatprep.subr.bf16.mxu0 %v9755_v35 }
 0x744   : > { %8439 = vmatpush1.bf16.msra.mxu0 %v9753_v41 }
 0x745   : > { %8440 = vmatprep.subr.bf16.mxu0 %v9758_v20 }
 0x748   : > { %8441 = vmatpush1.bf16.msra.mxu0 %v9756_v45 }
 0x749   : > { %8442 = vmatprep.subr.bf16.mxu0 %v9761_v59 }
 0x74c   : > { %8443 = vmatpush1.bf16.msra.mxu0 %v9759_v16 }
 0x74d   : > { %8444 = vmatprep.subr.bf16.mxu0 %v9764_v23 }
 0x750   : > { %8445 = vmatpush1.bf16.msra.mxu0 %v9762_v5 }
 0x751   : > { %8446 = vmatprep.subr.bf16.mxu0 %v9767_v30 }
 0x754   : > { %8447 = vmatpush1.bf16.msra.mxu0 %v9765_v56 }
 0x755   : > { %8448 = vmatprep.subr.bf16.mxu0 %v9770_v57  ;;  %v9124_v57 = vld [vmem:[#allocation16] ss:$0 sm:$0xff] }
 0x758   : > { %8449 = vmatpush1.bf16.msra.mxu0 %v9768_v37 }
 0x759   : > { %8450 = vmatprep.subr.bf16.mxu0 %v9773_v39 }
 0x75b   : > { %v7907_v32 = vpop.f32.mrb[8].mxu0 }
 0x75c   : > { %v7908_v46 = vadd.f32 %v7907_v32, %v13528_v51  ;;  %v7909_v17 = vpop.f32.mrb[9].mxu0  ;;  %8451 = vmatpush1.bf16.msra.mxu0 %v9771_v3  ;;  %v9788_v51 = vld [vmem:[#allocation12 + $0x1d4] ss:$8 sps:$4 sm:$0xff]  }
 0x75d   : > { %v7910_v50 = vadd.f32 %v7909_v17, %v13531_v52  ;;  %v7911_v8 = vpop.f32.mrb[10].mxu0  ;;  %8452 = vmatprep.subr.bf16.mxu0 %v9776_v13  ;;  %v7971_v52 = vsub.s32 3, %v12617_v2 }
 0x75e   : > { %v7912_v0 = vpop.f32.mrb[11].mxu0 }
 0x75f   : > { %v7972_v14 = vrot.slane %v13538_v53, %v7971_v52 }
 0x760   : > { %8453 = vmatpush1.bf16.msra.mxu0 %v9774_v44 }
 0x761   : > { %8454 = vmatprep.subr.bf16.mxu0 %v9779_v25 }
 0x764   : > { %8455 = vmatpush1.bf16.msra.mxu0 %v9777_v60 }
 0x765   : > { %8456 = vmatprep.subr.bf16.mxu0 %v9782_v7 }
 0x768   : > { %8457 = vmatpush1.bf16.msra.mxu0 %v9780_v42 }
 0x769   : > { %8458 = vmatprep.subr.bf16.mxu0 %v9785_v11 }
 0x76c   : > { %8459 = vmatpush1.bf16.msra.mxu0 %v9783_v12 }
 0x76d   : > { %8460 = vmatprep.subr.bf16.mxu0 %v9788_v51 }
 0x76f   : > { %v7948_v34 = vpop.f32.mrb[16].mxu1 }
 0x770   : > { %v7949_v26 = vadd.f32 %v7948_v34, %v7908_v46  ;;  %v7950_v31 = vpop.f32.mrb[17].mxu1  ;;  %8461 = vmatpush1.bf16.msra.mxu0 %v9786_v6 }
 0x771   : > { %v7951_v21 = vadd.f32 %v7950_v31, %v7910_v50  ;;  %v7952_v61 = vpop.f32.mrb[18].mxu1  ;;  %8462 = vmatprep.subr.bf16.mxu0 %v9791_v48 }
 0x772   : > { %v7979_v28 = vadd.f32 %v7968_v24, %v7949_v26  ;;  %v7953_v15 = vpop.f32.mrb[19].mxu1 }
 0x773   : > { %v7980_v47 = vadd.f32 %v7972_v14, %v7951_v21 }
 0x774   : > { %vm7983_vm2 = vcmp.gt.f32.partialorder %v7979_v28, 0.0  ;;  %v7987_v22 = vmul.f32 0.2, %v7979_v28  ;;  %8463 = vmatpush1.bf16.msra.mxu0 %v9789_v1 }
 0x775   : > { %v7988_v36 = vmul.f32 0.2, %v7980_v47  ;;  %8464 = vmatprep.subr.bf16.mxu0 %v9794_v29  ;;  %vm7984_vm3 = vcmp.gt.f32.partialorder %v7980_v47, 0.0 }
 0x776   : > { %v7991_v9 = vsel %vm7983_vm2, %v7979_v28, %v7987_v22 }
 0x777   : > { %v7992_v53 = vsel %vm7984_vm3, %v7980_v47, %v7988_v36  ;;  %v7995_v38 = vpack.c.bf16 %v7991_v9, %v7991_v9 }
 0x778   : > { %8465 = vmatpush1.bf16.msra.mxu0 %v9792_v49  ;;  %v7996_v58 = vpack.c.bf16 %v7992_v53, %v7992_v53 }
 0x77a   : > { %8466 = vmatprep.mubr.bf16.mxu0 %v7996_v58 }
 0x77b   : > { %8467 = vmatmul.mubr.bf16.vlgmr.msra.gmra.mrb[12].mxu0 %v7995_v38 }
 0x84e   : > { %v8468_v55 = vpop.f32.mrb[12].mxu0 }
 0x84f   : > { %v9168_v40 = vadd.f32 %v8468_v55, %v8066_v10  ;;  %v8470_v35 = vpop.f32.mrb[13].mxu0 }
 0x850   : > { %v9169_v41 = vadd.f32 %v8470_v35, %v8070_v63  ;;  %v8472_v20 = vpop.f32.mrb[14].mxu0 }
 0x851   : > { %vm8475_vm4 = vcmp.gt.f32.partialorder %v9168_v40, 0.0  ;;  %v8477_v45 = vmul.f32 0.2, %v9168_v40  ;;  %v8473_v59 = vpop.f32.mrb[15].mxu0 }
 0x852   : > { %vm8476_vm5 = vcmp.gt.f32.partialorder %v9169_v41, 0.0  ;;  %v8478_v16 = vmul.f32 0.2, %v9169_v41 }
 0x853   : > { %v8479_v23 = vsel %vm8475_vm4, %v9168_v40, %v8477_v45 }
 0x854   : > { %v8480_v5 = vsel %vm8476_vm5, %v9169_v41, %v8478_v16  ;;  %v8481_v56 = vpack.c.bf16 %v8479_v23, %v8479_v23 }
 0x855   : > { %v8482_v30 = vpack.c.bf16 %v8480_v5, %v8480_v5 }
 0x857   : > { %8650 = vmatprep.mubr.bf16.mxu1 %v8482_v30 }
 0x858   : > { %8651 = vmatmul.mubr.bf16.vlgmr.msra.gmra.mrb[20].mxu1 %v8481_v56 }
 0x92b   : > { %v9162_v27 = vpop.f32.mrb[20].mxu1 }
 0x92c   : > { %v9163_v2 = vpop.f32.mrb[21].mxu1 }
 0x92d   : > { %v9164_v43 = vadd.f32 %v9163_v2, %v9162_v27  ;;  %v9165_v37 = vpop.f32.mrb[22].mxu1 }
 0x92e   : > { %v9166_v39 = vpop.f32.mrb[23].mxu1 }
 0x92f   : > { %v8653_v3 = vadd.f32 %v9164_v43, %v9124_v57 }
 0x931   : > { %8658 = vst [vmem:[#allocation18] sm:$0x3] %v8653_v3 }
 0x932 PF: > { %p9251_p12 = scmp.eq.s32.totalorder %s10205_s11, 2  ;;  %s10138_s12 = smov [#allocation18]  }
 0x933   : > { %s8666_s24 = sshll.u32 %s10138_s12, 4  ;;  %s8667_s24 = int_to_ptr.vmem [resolvable:$true] %s8666_s24 }
 0x934   : > { %s10037_s14 = scalar_lea.vmem %s8667_s24, 32  ;;  %p10044_p11 = scmp.lt.s32.totalorder %s8667_s24, %s8667_s24 }
 0x935   : > { %p10038_p8 = scmp.ne.s32.totalorder %s8667_s24, %s10037_s14  ;;  %p10045_p6 = scmp.lt.s32.totalorder %s10037_s14, %s10037_s14 }
 0x937   : > { %p10039_p1 = pnand %p10038_p8, %p9251_p12  ;;  %p10046_p4 = por %p10045_p6, %p10044_p11 }
 0x939   : > { %p10040_p3 = pneg %p10039_p1 }
 0x93b   : > { %p10047_p13 = pnand %p10046_p4, %p10040_p3 }
 0x93d   : > { %10050 = shalt.err (!%p10047_p13)
}
 0x93e   : > { %s10051_s30 = scalar_lea.hbm %s13601_s8, 32 }
 0x93f   : > { %p10052_p0 = scmp.ne.s32.totalorder %s13601_s8, %s10051_s30  ;;  %p10057_p7 = scmp.lt.u32.totalorder %s10051_s30, %s13601_s8 }
 0x941   : > { %p10053_p2 = pnand %p10052_p0, %p9251_p12 }
 0x943   : > { %p10054_p5 = pneg %p10053_p2 }
 0x945   : > { %p10059_p9 = pnand %p10057_p7, %p10054_p5 }
 0x947   : > { %10062 = shalt.err (!%p10059_p9)
}
 0x948   : > { %9207 = dma.vmem_to_hbm [thread:$0]  (%p9251_p12), %s8667_s24, 32, %s13601_s8, [#allocation6]  }
 0x949   : > { %10100 = dma.done.wait (%p9251_p12), [#allocation6], 32  }
 0x94a   : > { %10102 = vsyncadd (%p9251_p12), [#allocation6], 4294967264 }
 0x94b PF: > { %p23_p10 = scmp.ge.s32.totalorder %s10383_s23, 5   ;;  %s14342_s27 = smov %s10109_s28 }
 0x94c   : > { %s14343_s28 = smov %s10113_s29  ;;  %s14344_s29 = smov %s10394_s18 }
 0x94d   : > { %s14345_s30 = smov %s10383_s23  ;;  %25 = sbr.rel (!%p23_p10) target bundleno = 8 (0x8), region = 125 }
 0x954   :  { %8679 = vsyncpa [#allocation5], 1 }
 0x955   :  { %8681 = vsyncpa [#allocation5 + $0x1], 1 }
 0x956   :  { %8682 = vsyncpa [#allocation8], 1 }
 0x957   :  { %8683 = vsyncpa [#allocation11], 1 }
 0x958   :  { %8684 = vsyncpa [#allocation14], 1 }
 0x959   :  { %8685 = vsyncpa [#allocation17], 1 }
 0x95a   :  { %8686 = vsyncpa [#allocation6], 1 }
 0x95b   :  { %8688 = vsyncpa [#allocation6 + $0x1], 1 }

</bundles_post_ra>
